<compile_context>
chip_gen: v6e
topology: v6e:2x2x1
jax: 0.10.0
libtpu: 0.0.40
codegen_flags: <defaults>
</compile_context>

<pallas_src>
import math
from functools import partial

import jax
import jax.numpy as jnp
from jax.experimental import pallas as pl
from jax.experimental.pallas import tpu as pltpu

BN_EPS = 1e-5
KERNEL_SIZES = (1, 2, 4, 8)
# Each branch's tap group is padded to max(k, 2) taps -> column offsets below and
# a lane-aligned total of 512 columns for the single FastCNN matmul.
BRANCH_COLS = (0, 64, 128, 256)
CNN_CHANNEL = 32
TEXT_DIM = 768
FASTCNN_COLS = 512


def _softplus(x):
    # matches torch.nn.functional.softplus (beta=1, threshold=20)
    return jnp.where(x > 20.0, x, jnp.log1p(jnp.exp(jnp.minimum(x, 20.0))))


# ----------------------------------------------------------------------------
# Single fused kernel (one batch tile per grid step)
# ----------------------------------------------------------------------------
def _multimodal_kernel(
    tr_ref, ir_ref, t_ref, i_ref, e1_ref, e2_ref,          # data (batch-tiled)
    wcat_ref, bcat_ref,                                     # FastCNN (all taps, BN folded)
    stl1_w, stl1_b, stl2_w, stl2_b,                         # shared_text_linear
    si1_w, si1_b, si2_w, si2_b,                             # shared_image
    uni1_w, uni1_b, uni2_w, uni2_b,                         # UnimodalDetection (block-diag fused)
    cross_w, cross_b,                                       # CrossModule4Batch.c_specific_2
    cls1_w, cls1_b, cls2_w, cls2_b, cls3_w, cls3_b,         # classifier_corre
    amb1_w, amb1_b, amb2_w, amb2_b,                         # Ambiguity encoders (block-diag fused)
    o_ref,
):
    bt, seq, _ = tr_ref.shape

    def lin(x, w_ref, b_ref, relu=True):
        y = jnp.dot(x.astype(jnp.bfloat16), w_ref[...],
                    preferred_element_type=jnp.float32) + b_ref[...]
        return jnp.maximum(y, 0.0) if relu else y

    # ------------------------------------------------------------------ Ambiguity
    # Both encoders in one block-diagonal pair of matmuls; output columns are
    # [mu_t(2) | sig_t(2) | mu_i(2) | sig_i(2)].
    t64 = t_ref[...]
    i64 = i_ref[...]
    ti = jnp.concatenate([t64, i64], axis=1)                 # (bt, 128)
    h = lin(ti, amb1_w, amb1_b, relu=True)                   # (bt, 128)
    p = lin(h, amb2_w, amb2_b, relu=False)                   # (bt, 8)
    mu1 = p[:, 0:2]
    s1 = _softplus(p[:, 2:4]) + 1e-7
    mu2 = p[:, 4:6]
    s2 = _softplus(p[:, 6:8]) + 1e-7
    z1 = mu1 + s1 * e1_ref[...]                              # rsample() with external N(0,1) noise
    z2 = mu2 + s2 * e2_ref[...]

    log2pi = math.log(2.0 * math.pi)

    def log_prob(z, mu, s):
        return jnp.sum(-0.5 * ((z - mu) / s) ** 2 - jnp.log(s) - 0.5 * log2pi,
                       axis=-1, keepdims=True)

    skl = 0.5 * ((log_prob(z1, mu1, s1) - log_prob(z1, mu2, s2))
                 + (log_prob(z2, mu2, s2) - log_prob(z2, mu1, s1)))
    skl = 1.0 / (1.0 + jnp.exp(-skl))                        # sigmoid, (bt, 1)

    # -------------------------------------------------------------------- FastCNN
    # One bf16 MXU matmul over text_raw for ALL conv taps of ALL kernel sizes
    # (512 lane-aligned columns), then per-branch shifted-slice accumulation and a
    # vectorized max-pool.  Bias is time-invariant and ReLU monotonic, so pool
    # first, bias/ReLU after (requires positive folded BN scale).
    x2 = tr_ref[...].reshape(bt * seq, TEXT_DIM)                               # bf16
    taps = jnp.dot(x2, wcat_ref[...], preferred_element_type=jnp.float32)      # (bt*seq, 512)
    taps = taps.reshape(bt, seq, FASTCNN_COLS)

    feats = []
    for k, col in zip(KERNEL_SIZES, BRANCH_COLS):
        l_out = seq - k + 1
        acc = taps[:, 0:l_out, col:col + CNN_CHANNEL]
        for j in range(1, k):
            c0 = col + j * CNN_CHANNEL
            acc = acc + taps[:, j:j + l_out, c0:c0 + CNN_CHANNEL]
        feats.append(jnp.max(acc, axis=1))                                     # (bt, 32)

    text_enc = jnp.maximum(jnp.concatenate(feats, axis=1) + bcat_ref[...], 0.0)  # (bt, 128)

    # ------------------------------------------------------ EncodingPart linears
    # TODO(synk): nn.Dropout is identity (eval mode); BatchNorm uses running stats
    # and is folded into the weights on the host.
    text_shared = lin(lin(text_enc, stl1_w, stl1_b), stl2_w, stl2_b)       # (bt, 128)
    image_shared = lin(lin(ir_ref[...], si1_w, si1_b), si2_w, si2_b)       # (bt, 128)

    # --------------------------------------------------------- UnimodalDetection
    # text_uni / image_uni fused block-diagonally: (bt,256)@(256,256) -> (256,32)
    shared = jnp.concatenate([text_shared, image_shared], axis=1)          # (bt, 256)
    primes = lin(lin(shared, uni1_w, uni1_b), uni2_w, uni2_b)              # (bt, 32)

    # -------------------------------------------------------- CrossModule4Batch
    # sim[b,i,j] = t[b,i]*image[b,j]/sqrt(d): the per-row max is analytic
    # (sign of t picks max_j or min_j of image), and
    # max(softmax(sim), -1) == 1 / sum(exp(sim - rowmax))  (exact identity).
    inv_sqrt_d = 1.0 / math.sqrt(t64.shape[-1])
    ts = t64 * inv_sqrt_d                                                   # (bt, 64)
    i_max = jnp.max(i64, axis=-1, keepdims=True)                            # (bt, 1)
    i_min = jnp.min(i64, axis=-1, keepdims=True)
    row_max = ts * jnp.where(ts >= 0.0, i_max, i_min)                       # (bt, 64)
    sim = ts[:, :, None] * i64[:, None, :]                                  # (bt, 64, 64)
    denom = jnp.sum(jnp.exp(sim - row_max[:, :, None]), axis=-1)            # (bt, 64)
    pooled = 1.0 / denom                                                    # exact reciprocal
    correlation = lin(pooled, cross_w, cross_b)                             # (bt, 64)

    # ------------------------------------ ambiguity-weighted fusion + classifier
    w_uni = 1.0 - skl
    final = jnp.concatenate([w_uni * primes, skl * correlation], axis=1)    # (bt, 96)
    out = lin(lin(lin(final, cls1_w, cls1_b), cls2_w, cls2_b),
              cls3_w, cls3_b, relu=False)                                   # (bt, 2)
    o_ref[...] = out


# ----------------------------------------------------------------------------
# BlockSpecs: data tiled on the batch grid axis, weights resident across steps
# ----------------------------------------------------------------------------
def _data_spec(b_tile, tail):
    tail = tuple(int(d) for d in tail)
    zeros = (0,) * len(tail)
    return pl.BlockSpec((b_tile,) + tail, lambda b: (b,) + zeros)


def _weight_spec(shape):
    shape = tuple(int(d) for d in shape)
    zeros = (0,) * len(shape)
    return pl.BlockSpec(shape, lambda b: zeros)


def multimodal_forward(params, text_raw, image_raw, text, image, eps1, eps2,
                       *, b_tile=128):
    B, seq, _ = text_raw.shape
    bt = min(b_tile, B)
    pad = (-B) % bt
    if pad:
        def padb(a):
            return jnp.concatenate([a, jnp.zeros((pad,) + a.shape[1:], a.dtype)], 0)
        text_raw, image_raw, text, image, eps1, eps2 = map(
            padb, (text_raw, image_raw, text, image, eps1, eps2))
    bp = B + pad

    # Dominant inputs go over the wire / into VMEM as bf16 (the kernel is bf16 on
    # the MXU path anyway).
    text_raw = text_raw.astype(jnp.bfloat16)
    image_raw = image_raw.astype(jnp.bfloat16)

    data = (text_raw, image_raw, text, image, eps1, eps2)
    weights = (
        params["fastcnn_w"], params["fastcnn_b"],
        *params["stl1"], *params["stl2"],
        *params["si1"], *params["si2"],
        *params["uni1"], *params["uni2"],
        *params["cross"],
        *params["cls1"], *params["cls2"], *params["cls3"],
        *params["amb1"], *params["amb2"],
    )

    in_specs = ([_data_spec(bt, a.shape[1:]) for a in data]
                + [_weight_spec(w.shape) for w in weights])
    out_spec = _data_spec(bt, (2,))

    flops_per_row = 2 * (seq * TEXT_DIM * FASTCNN_COLS      # FastCNN taps matmul
                         + 2048 * 256 + 256 * 128           # shared_image
                         + 128 * 64 + 64 * 128               # shared_text_linear
                         + 256 * 256 + 256 * 32              # unimodal (block-diag)
                         + 128 * 128 + 128 * 8               # ambiguity (block-diag)
                         + 64 * 64                           # cross linear
                         + 96 * 64 + 64 * 64 + 64 * 2        # classifier
                         ) + 5 * 64 * 64                     # sim elementwise/reduce
    bytes_accessed = (sum(int(a.size) * a.dtype.itemsize for a in data)
                      + sum(int(w.size) * w.dtype.itemsize for w in weights)
                      + bp * 2 * 4)

    out = pl.pallas_call(
        _multimodal_kernel,
        out_shape=jax.ShapeDtypeStruct((bp, 2), jnp.float32),
        grid_spec=pltpu.PrefetchScalarGridSpec(
            num_scalar_prefetch=0,
            grid=(bp // bt,),
            in_specs=in_specs,
            out_specs=out_spec),
        compiler_params=pltpu.CompilerParams(
            dimension_semantics=("parallel",)),
        cost_estimate=pl.CostEstimate(
            flops=bp * flops_per_row,
            transcendentals=bp * (64 * 64 + 16),
            bytes_accessed=bytes_accessed),
    )(*data, *weights)
    return out[:B]


# ----------------------------------------------------------------------------
# Parameter construction: PyTorch-default-like init with eval-BatchNorm folded in
# ----------------------------------------------------------------------------
def _init_linear(key, fan_in, fan_out):
    k1, k2 = jax.random.split(key)
    bound = 1.0 / math.sqrt(fan_in)
    w = jax.random.uniform(k1, (fan_in, fan_out), jnp.float32, -bound, bound)
    b = jax.random.uniform(k2, (fan_out,), jnp.float32, -bound, bound)
    return w, b


def _bn_fold(w, b):
    # eval-mode BatchNorm1d with default params/stats: gamma=1, beta=0, mean=0, var=1
    # TODO(synk): with real trained BN stats use gamma/sqrt(var+eps) and
    # beta - mean*scale; a negative folded scale would also break the FastCNN
    # pool-before-bias/ReLU commutation.
    dim = w.shape[1]
    scale = jnp.ones((dim,), jnp.float32) / jnp.sqrt(1.0 + BN_EPS)
    shift = jnp.zeros((dim,), jnp.float32)
    return w * scale[None, :], b * scale + shift


def _block_diag(a, b):
    r1, c1 = a.shape
    r2, c2 = b.shape
    out = jnp.zeros((r1 + r2, c1 + c2), a.dtype)
    out = out.at[:r1, :c1].set(a)
    out = out.at[r1:, c1:].set(b)
    return out


def init_params(key):
    keys = iter(jax.random.split(key, 64))
    p = {}

    # FastCNN: Conv1d(768, 32, k) per branch with BN folded; every kernel tap is a
    # (768, 32) column block of one (768, 512) bf16 matmul weight.  Branch groups
    # are padded to max(k, 2) taps so branch starts are (0, 64, 128, 256) and the
    # matmul N is lane-aligned (512).
    # TODO(synk): if real PyTorch Conv1d weights (C_out, C_in, k) are loaded, tap j
    # must be permuted as weight[:, :, j].T -> (768, 32) to match this layout.
    tap_blocks, biases = [], []
    for k in KERNEL_SIZES:
        w, b = _bn_fold(*_init_linear(next(keys), TEXT_DIM * k, CNN_CHANNEL))
        w = w.reshape(k, TEXT_DIM, CNN_CHANNEL)
        group = max(k, 2)
        for j in range(group):
            tap_blocks.append(w[j] if j < k
                              else jnp.zeros((TEXT_DIM, CNN_CHANNEL), jnp.float32))
        biases.append(b)
    p["fastcnn_w"] = jnp.concatenate(tap_blocks, axis=1).astype(jnp.bfloat16)  # (768, 512)
    p["fastcnn_b"] = jnp.concatenate(biases).reshape(1, -1)                    # (1, 128) f32

    def lin_bn(fan_in, fan_out):           # Linear + folded eval-BatchNorm (f32)
        return _bn_fold(*_init_linear(next(keys), fan_in, fan_out))

    def pack(w, b):                        # bf16 weight, f32 (1, N) bias
        return w.astype(jnp.bfloat16), b.reshape(1, -1)

    p["stl1"] = pack(*lin_bn(128, 64))     # shared_text_linear
    p["stl2"] = pack(*lin_bn(64, 128))
    p["si1"] = pack(*lin_bn(2048, 256))    # shared_image
    p["si2"] = pack(*lin_bn(256, 128))

    # UnimodalDetection: text_uni / image_uni fused block-diagonally
    tu1_w, tu1_b = lin_bn(128, 128)
    tu2_w, tu2_b = lin_bn(128, 16)
    iu1_w, iu1_b = lin_bn(128, 128)
    iu2_w, iu2_b = lin_bn(128, 16)
    p["uni1"] = pack(_block_diag(tu1_w, iu1_w), jnp.concatenate([tu1_b, iu1_b]))
    p["uni2"] = pack(_block_diag(tu2_w, iu2_w), jnp.concatenate([tu2_b, iu2_b]))

    p["cross"] = pack(*lin_bn(64, 64))     # CrossModule4Batch.c_specific_2
    p["cls1"] = pack(*lin_bn(96, 64))      # classifier_corre
    p["cls2"] = pack(*lin_bn(64, 64))
    p["cls3"] = pack(*_init_linear(next(keys), 64, 2))

    # Ambiguity encoders (Linear(64,64)->ReLU->Linear(64,4)) fused block-diagonally;
    # output columns = [mu_t(2) | sig_t(2) | mu_i(2) | sig_i(2)].
    at_w1, at_b1 = _init_linear(next(keys), 64, 64)
    at_w2, at_b2 = _init_linear(next(keys), 64, 4)
    ai_w1, ai_b1 = _init_linear(next(keys), 64, 64)
    ai_w2, ai_b2 = _init_linear(next(keys), 64, 4)
    p["amb1"] = pack(_block_diag(at_w1, ai_w1), jnp.concatenate([at_b1, ai_b1]))
    p["amb2"] = pack(_block_diag(at_w2, ai_w2), jnp.concatenate([at_b2, ai_b2]))
    return p


if __name__ == "__main__":
    key = jax.random.PRNGKey(0)
    k_param, k_tr, k_ir, k_t, k_i, k_e1, k_e2 = jax.random.split(key, 7)

    B, SEQ = 16, 8
    text_raw = jax.random.normal(k_tr, (B, SEQ, 768), jnp.float32)
    image_raw = jax.random.normal(k_ir, (B, 2048), jnp.float32)
    text = jax.random.normal(k_t, (B, 64), jnp.float32)
    image = jax.random.normal(k_i, (B, 64), jnp.float32)
    # deterministic N(0,1) noise standing in for Normal.rsample()
    eps1 = jax.random.normal(k_e1, (B, 2), jnp.float32)
    eps2 = jax.random.normal(k_e2, (B, 2), jnp.float32)

    params = init_params(k_param)

    # b_tile=8 -> grid=(2,), exercising the batch pipeline + "parallel" semantics.
    fwd = jax.jit(partial(multimodal_forward, b_tile=8))
    out = fwd(params, text_raw, image_raw, text, image, eps1, eps2)
    jax.block_until_ready(out)
    assert out.shape == (B, 2) and out.dtype == jnp.float32
    print("KERNEL_OK")
</pallas_src>

<mosaic_0001>
module attributes {stable_mosaic.version = 11 : i64} {
  func.func @_multimodal_kernel(%arg0: i32, %arg1: memref<8x8x768xbf16, #tpu.memory_space<vmem>>, %arg2: memref<8x2048xbf16, #tpu.memory_space<vmem>>, %arg3: memref<8x64xf32, #tpu.memory_space<vmem>>, %arg4: memref<8x64xf32, #tpu.memory_space<vmem>>, %arg5: memref<8x2xf32, #tpu.memory_space<vmem>>, %arg6: memref<8x2xf32, #tpu.memory_space<vmem>>, %arg7: memref<768x512xbf16, #tpu.memory_space<vmem>>, %arg8: memref<1x128xf32, #tpu.memory_space<vmem>>, %arg9: memref<128x64xbf16, #tpu.memory_space<vmem>>, %arg10: memref<1x64xf32, #tpu.memory_space<vmem>>, %arg11: memref<64x128xbf16, #tpu.memory_space<vmem>>, %arg12: memref<1x128xf32, #tpu.memory_space<vmem>>, %arg13: memref<2048x256xbf16, #tpu.memory_space<vmem>>, %arg14: memref<1x256xf32, #tpu.memory_space<vmem>>, %arg15: memref<256x128xbf16, #tpu.memory_space<vmem>>, %arg16: memref<1x128xf32, #tpu.memory_space<vmem>>, %arg17: memref<256x256xbf16, #tpu.memory_space<vmem>>, %arg18: memref<1x256xf32, #tpu.memory_space<vmem>>, %arg19: memref<256x32xbf16, #tpu.memory_space<vmem>>, %arg20: memref<1x32xf32, #tpu.memory_space<vmem>>, %arg21: memref<64x64xbf16, #tpu.memory_space<vmem>>, %arg22: memref<1x64xf32, #tpu.memory_space<vmem>>, %arg23: memref<96x64xbf16, #tpu.memory_space<vmem>>, %arg24: memref<1x64xf32, #tpu.memory_space<vmem>>, %arg25: memref<64x64xbf16, #tpu.memory_space<vmem>>, %arg26: memref<1x64xf32, #tpu.memory_space<vmem>>, %arg27: memref<64x2xbf16, #tpu.memory_space<vmem>>, %arg28: memref<1x2xf32, #tpu.memory_space<vmem>>, %arg29: memref<128x128xbf16, #tpu.memory_space<vmem>>, %arg30: memref<1x128xf32, #tpu.memory_space<vmem>>, %arg31: memref<128x8xbf16, #tpu.memory_space<vmem>>, %arg32: memref<1x8xf32, #tpu.memory_space<vmem>>, %arg33: memref<8x2xf32, #tpu.memory_space<vmem>>) attributes {dimension_semantics = [#tpu.dimension_semantics<parallel>], iteration_bounds = array<i64: 2>, scalar_prefetch = 0 : i64, scratch_operands = 0 : i64, tpu.core_type = #tpu.core_type<tc>, window_params = [{transform_indices = @transform_0, window_bounds = array<i64: 8, 8, 768>}, {transform_indices = @transform_1, window_bounds = array<i64: 8, 2048>}, {transform_indices = @transform_2, window_bounds = array<i64: 8, 64>}, {transform_indices = @transform_3, window_bounds = array<i64: 8, 64>}, {transform_indices = @transform_4, window_bounds = array<i64: 8, 2>}, {transform_indices = @transform_5, window_bounds = array<i64: 8, 2>}, {pipeline_mode = #tpu.pipeline_mode<synchronous>, transform_indices = @transform_6, window_bounds = array<i64: 768, 512>}, {pipeline_mode = #tpu.pipeline_mode<synchronous>, transform_indices = @transform_7, window_bounds = array<i64: 1, 128>}, {pipeline_mode = #tpu.pipeline_mode<synchronous>, transform_indices = @transform_8, window_bounds = array<i64: 128, 64>}, {pipeline_mode = #tpu.pipeline_mode<synchronous>, transform_indices = @transform_9, window_bounds = array<i64: 1, 64>}, {pipeline_mode = #tpu.pipeline_mode<synchronous>, transform_indices = @transform_10, window_bounds = array<i64: 64, 128>}, {pipeline_mode = #tpu.pipeline_mode<synchronous>, transform_indices = @transform_11, window_bounds = array<i64: 1, 128>}, {pipeline_mode = #tpu.pipeline_mode<synchronous>, transform_indices = @transform_12, window_bounds = array<i64: 2048, 256>}, {pipeline_mode = #tpu.pipeline_mode<synchronous>, transform_indices = @transform_13, window_bounds = array<i64: 1, 256>}, {pipeline_mode = #tpu.pipeline_mode<synchronous>, transform_indices = @transform_14, window_bounds = array<i64: 256, 128>}, {pipeline_mode = #tpu.pipeline_mode<synchronous>, transform_indices = @transform_15, window_bounds = array<i64: 1, 128>}, {pipeline_mode = #tpu.pipeline_mode<synchronous>, transform_indices = @transform_16, window_bounds = array<i64: 256, 256>}, {pipeline_mode = #tpu.pipeline_mode<synchronous>, transform_indices = @transform_17, window_bounds = array<i64: 1, 256>}, {pipeline_mode = #tpu.pipeline_mode<synchronous>, transform_indices = @transform_18, window_bounds = array<i64: 256, 32>}, {pipeline_mode = #tpu.pipeline_mode<synchronous>, transform_indices = @transform_19, window_bounds = array<i64: 1, 32>}, {pipeline_mode = #tpu.pipeline_mode<synchronous>, transform_indices = @transform_20, window_bounds = array<i64: 64, 64>}, {pipeline_mode = #tpu.pipeline_mode<synchronous>, transform_indices = @transform_21, window_bounds = array<i64: 1, 64>}, {pipeline_mode = #tpu.pipeline_mode<synchronous>, transform_indices = @transform_22, window_bounds = array<i64: 96, 64>}, {pipeline_mode = #tpu.pipeline_mode<synchronous>, transform_indices = @transform_23, window_bounds = array<i64: 1, 64>}, {pipeline_mode = #tpu.pipeline_mode<synchronous>, transform_indices = @transform_24, window_bounds = array<i64: 64, 64>}, {pipeline_mode = #tpu.pipeline_mode<synchronous>, transform_indices = @transform_25, window_bounds = array<i64: 1, 64>}, {pipeline_mode = #tpu.pipeline_mode<synchronous>, transform_indices = @transform_26, window_bounds = array<i64: 64, 2>}, {pipeline_mode = #tpu.pipeline_mode<synchronous>, transform_indices = @transform_27, window_bounds = array<i64: 1, 2>}, {pipeline_mode = #tpu.pipeline_mode<synchronous>, transform_indices = @transform_28, window_bounds = array<i64: 128, 128>}, {pipeline_mode = #tpu.pipeline_mode<synchronous>, transform_indices = @transform_29, window_bounds = array<i64: 1, 128>}, {pipeline_mode = #tpu.pipeline_mode<synchronous>, transform_indices = @transform_30, window_bounds = array<i64: 128, 8>}, {pipeline_mode = #tpu.pipeline_mode<synchronous>, transform_indices = @transform_31, window_bounds = array<i64: 1, 8>}, {transform_indices = @transform_32, window_bounds = array<i64: 8, 2>}]} {
    %c0 = arith.constant 0 : index
    %c0_0 = arith.constant 0 : index
    %0 = vector.load %arg3[%c0, %c0_0] : memref<8x64xf32, #tpu.memory_space<vmem>>, vector<8x64xf32>
    %c0_1 = arith.constant 0 : index
    %c0_2 = arith.constant 0 : index
    %1 = vector.load %arg4[%c0_1, %c0_2] : memref<8x64xf32, #tpu.memory_space<vmem>>, vector<8x64xf32>
    %2 = tpu.concatenate %0, %1 in 1 : vector<8x64xf32>, vector<8x64xf32> -> vector<8x128xf32>
    %3 = arith.truncf %2 : vector<8x128xf32> to vector<8x128xbf16>
    %c0_3 = arith.constant 0 : index
    %c0_4 = arith.constant 0 : index
    %4 = vector.load %arg29[%c0_3, %c0_4] : memref<128x128xbf16, #tpu.memory_space<vmem>>, vector<128x128xbf16>
    %cst = arith.constant dense<0.000000e+00> : vector<8x128xf32>
    %5 = tpu.matmul %3, %4, %cst {dimension_numbers = #tpu.dot_dimension_numbers<[1], [0], [0], [1], [0, 0, 1, 1], [], []>} : vector<8x128xbf16>, vector<128x128xbf16>, vector<8x128xf32> -> vector<8x128xf32>
    %c0_5 = arith.constant 0 : index
    %c0_6 = arith.constant 0 : index
    %6 = vector.load %arg30[%c0_5, %c0_6] : memref<1x128xf32, #tpu.memory_space<vmem>>, vector<1x128xf32>
    %7 = vector.broadcast %6 : vector<1x128xf32> to vector<8x128xf32>
    %8 = arith.addf %5, %7 : vector<8x128xf32>
    %cst_7 = arith.constant 0.000000e+00 : f32
    %9 = vector.broadcast %cst_7 : f32 to vector<8x128xf32>
    %10 = arith.maximumf %8, %9 : vector<8x128xf32>
    %11 = arith.truncf %10 : vector<8x128xf32> to vector<8x128xbf16>
    %c0_8 = arith.constant 0 : index
    %c0_9 = arith.constant 0 : index
    %12 = vector.load %arg31[%c0_8, %c0_9] : memref<128x8xbf16, #tpu.memory_space<vmem>>, vector<128x8xbf16>
    %cst_10 = arith.constant dense<0.000000e+00> : vector<8x8xf32>
    %13 = tpu.matmul %11, %12, %cst_10 {dimension_numbers = #tpu.dot_dimension_numbers<[1], [0], [0], [1], [0, 0, 1, 1], [], []>} : vector<8x128xbf16>, vector<128x8xbf16>, vector<8x8xf32> -> vector<8x8xf32>
    %c0_11 = arith.constant 0 : index
    %c0_12 = arith.constant 0 : index
    %14 = vector.load %arg32[%c0_11, %c0_12] : memref<1x8xf32, #tpu.memory_space<vmem>>, vector<1x8xf32>
    %15 = vector.broadcast %14 : vector<1x8xf32> to vector<8x8xf32>
    %16 = arith.addf %13, %15 : vector<8x8xf32>
    %17 = vector.extract_strided_slice %16 {offsets = [0, 0], sizes = [8, 2], strides = [1, 1]} : vector<8x8xf32> to vector<8x2xf32>
    %18 = vector.extract_strided_slice %16 {offsets = [0, 2], sizes = [8, 2], strides = [1, 1]} : vector<8x8xf32> to vector<8x2xf32>
    %cst_13 = arith.constant 2.000000e+01 : f32
    %19 = vector.broadcast %cst_13 : f32 to vector<8x2xf32>
    %20 = arith.cmpf ogt, %18, %19 : vector<8x2xf32>
    %cst_14 = arith.constant 2.000000e+01 : f32
    %21 = vector.broadcast %cst_14 : f32 to vector<8x2xf32>
    %22 = arith.minimumf %18, %21 : vector<8x2xf32>
    %23 = math.exp %22 : vector<8x2xf32>
    %24 = math.log1p %23 : vector<8x2xf32>
    %25 = arith.select %20, %18, %24 : vector<8x2xi1>, vector<8x2xf32>
    %cst_15 = arith.constant 1.000000e-07 : f32
    %26 = vector.broadcast %cst_15 : f32 to vector<8x2xf32>
    %27 = arith.addf %25, %26 : vector<8x2xf32>
    %28 = vector.extract_strided_slice %16 {offsets = [0, 4], sizes = [8, 2], strides = [1, 1]} : vector<8x8xf32> to vector<8x2xf32>
    %29 = vector.extract_strided_slice %16 {offsets = [0, 6], sizes = [8, 2], strides = [1, 1]} : vector<8x8xf32> to vector<8x2xf32>
    %cst_16 = arith.constant 2.000000e+01 : f32
    %30 = vector.broadcast %cst_16 : f32 to vector<8x2xf32>
    %31 = arith.cmpf ogt, %29, %30 : vector<8x2xf32>
    %cst_17 = arith.constant 2.000000e+01 : f32
    %32 = vector.broadcast %cst_17 : f32 to vector<8x2xf32>
    %33 = arith.minimumf %29, %32 : vector<8x2xf32>
    %34 = math.exp %33 : vector<8x2xf32>
    %35 = math.log1p %34 : vector<8x2xf32>
    %36 = arith.select %31, %29, %35 : vector<8x2xi1>, vector<8x2xf32>
    %cst_18 = arith.constant 1.000000e-07 : f32
    %37 = vector.broadcast %cst_18 : f32 to vector<8x2xf32>
    %38 = arith.addf %36, %37 : vector<8x2xf32>
    %c0_19 = arith.constant 0 : index
    %c0_20 = arith.constant 0 : index
    %39 = vector.load %arg5[%c0_19, %c0_20] : memref<8x2xf32, #tpu.memory_space<vmem>>, vector<8x2xf32>
    %40 = arith.mulf %27, %39 : vector<8x2xf32>
    %41 = arith.addf %17, %40 : vector<8x2xf32>
    %c0_21 = arith.constant 0 : index
    %c0_22 = arith.constant 0 : index
    %42 = vector.load %arg6[%c0_21, %c0_22] : memref<8x2xf32, #tpu.memory_space<vmem>>, vector<8x2xf32>
    %43 = arith.mulf %38, %42 : vector<8x2xf32>
    %44 = arith.addf %28, %43 : vector<8x2xf32>
    %45 = arith.subf %41, %17 : vector<8x2xf32>
    %46 = arith.divf %45, %27 : vector<8x2xf32>
    %47 = arith.mulf %46, %46 : vector<8x2xf32>
    %cst_23 = arith.constant -5.000000e-01 : f32
    %48 = vector.broadcast %cst_23 : f32 to vector<8x2xf32>
    %49 = arith.mulf %48, %47 : vector<8x2xf32>
    %50 = math.log %27 : vector<8x2xf32>
    %51 = arith.subf %49, %50 : vector<8x2xf32>
    %cst_24 = arith.constant 0.918938517 : f32
    %52 = vector.broadcast %cst_24 : f32 to vector<8x2xf32>
    %53 = arith.subf %51, %52 : vector<8x2xf32>
    %cst_25 = arith.constant dense<0.000000e+00> : vector<8xf32>
    %54 = vector.multi_reduction <add>, %53, %cst_25 [1] : vector<8x2xf32> to vector<8xf32>
    %55 = vector.shape_cast %54 : vector<8xf32> to vector<8x1xf32>
    %56 = arith.subf %41, %28 : vector<8x2xf32>
    %57 = arith.divf %56, %38 : vector<8x2xf32>
    %58 = arith.mulf %57, %57 : vector<8x2xf32>
    %cst_26 = arith.constant -5.000000e-01 : f32
    %59 = vector.broadcast %cst_26 : f32 to vector<8x2xf32>
    %60 = arith.mulf %59, %58 : vector<8x2xf32>
    %61 = math.log %38 : vector<8x2xf32>
    %62 = arith.subf %60, %61 : vector<8x2xf32>
    %cst_27 = arith.constant 0.918938517 : f32
    %63 = vector.broadcast %cst_27 : f32 to vector<8x2xf32>
    %64 = arith.subf %62, %63 : vector<8x2xf32>
    %cst_28 = arith.constant dense<0.000000e+00> : vector<8xf32>
    %65 = vector.multi_reduction <add>, %64, %cst_28 [1] : vector<8x2xf32> to vector<8xf32>
    %66 = vector.shape_cast %65 : vector<8xf32> to vector<8x1xf32>
    %67 = arith.subf %55, %66 : vector<8x1xf32>
    %68 = arith.subf %44, %28 : vector<8x2xf32>
    %69 = arith.divf %68, %38 : vector<8x2xf32>
    %70 = arith.mulf %69, %69 : vector<8x2xf32>
    %cst_29 = arith.constant -5.000000e-01 : f32
    %71 = vector.broadcast %cst_29 : f32 to vector<8x2xf32>
    %72 = arith.mulf %71, %70 : vector<8x2xf32>
    %73 = math.log %38 : vector<8x2xf32>
    %74 = arith.subf %72, %73 : vector<8x2xf32>
    %cst_30 = arith.constant 0.918938517 : f32
    %75 = vector.broadcast %cst_30 : f32 to vector<8x2xf32>
    %76 = arith.subf %74, %75 : vector<8x2xf32>
    %cst_31 = arith.constant dense<0.000000e+00> : vector<8xf32>
    %77 = vector.multi_reduction <add>, %76, %cst_31 [1] : vector<8x2xf32> to vector<8xf32>
    %78 = vector.shape_cast %77 : vector<8xf32> to vector<8x1xf32>
    %79 = arith.subf %44, %17 : vector<8x2xf32>
    %80 = arith.divf %79, %27 : vector<8x2xf32>
    %81 = arith.mulf %80, %80 : vector<8x2xf32>
    %cst_32 = arith.constant -5.000000e-01 : f32
    %82 = vector.broadcast %cst_32 : f32 to vector<8x2xf32>
    %83 = arith.mulf %82, %81 : vector<8x2xf32>
    %84 = math.log %27 : vector<8x2xf32>
    %85 = arith.subf %83, %84 : vector<8x2xf32>
    %cst_33 = arith.constant 0.918938517 : f32
    %86 = vector.broadcast %cst_33 : f32 to vector<8x2xf32>
    %87 = arith.subf %85, %86 : vector<8x2xf32>
    %cst_34 = arith.constant dense<0.000000e+00> : vector<8xf32>
    %88 = vector.multi_reduction <add>, %87, %cst_34 [1] : vector<8x2xf32> to vector<8xf32>
    %89 = vector.shape_cast %88 : vector<8xf32> to vector<8x1xf32>
    %90 = arith.subf %78, %89 : vector<8x1xf32>
    %91 = arith.addf %67, %90 : vector<8x1xf32>
    %cst_35 = arith.constant 5.000000e-01 : f32
    %92 = vector.broadcast %cst_35 : f32 to vector<8x1xf32>
    %93 = arith.mulf %92, %91 : vector<8x1xf32>
    %cst_36 = arith.constant 0.000000e+00 : f32
    %94 = vector.broadcast %cst_36 : f32 to vector<8x1xf32>
    %95 = arith.subf %94, %93 : vector<8x1xf32>
    %96 = math.exp %95 : vector<8x1xf32>
    %cst_37 = arith.constant 1.000000e+00 : f32
    %97 = vector.broadcast %cst_37 : f32 to vector<8x1xf32>
    %98 = arith.addf %97, %96 : vector<8x1xf32>
    %cst_38 = arith.constant 1.000000e+00 : f32
    %99 = vector.broadcast %cst_38 : f32 to vector<8x1xf32>
    %100 = arith.divf %99, %98 : vector<8x1xf32>
    %c0_39 = arith.constant 0 : index
    %c0_40 = arith.constant 0 : index
    %c0_41 = arith.constant 0 : index
    %101 = vector.load %arg1[%c0_39, %c0_40, %c0_41] : memref<8x8x768xbf16, #tpu.memory_space<vmem>>, vector<8x8x768xbf16>
    %102 = vector.shape_cast %101 : vector<8x8x768xbf16> to vector<64x768xbf16>
    %c0_42 = arith.constant 0 : index
    %c0_43 = arith.constant 0 : index
    %103 = vector.load %arg7[%c0_42, %c0_43] : memref<768x512xbf16, #tpu.memory_space<vmem>>, vector<768x512xbf16>
    %cst_44 = arith.constant dense<0.000000e+00> : vector<64x512xf32>
    %104 = tpu.matmul %102, %103, %cst_44 {dimension_numbers = #tpu.dot_dimension_numbers<[1], [0], [0], [1], [0, 0, 1, 1], [], []>} : vector<64x768xbf16>, vector<768x512xbf16>, vector<64x512xf32> -> vector<64x512xf32>
    %105 = vector.shape_cast %104 : vector<64x512xf32> to vector<8x8x512xf32>
    %106 = vector.extract_strided_slice %105 {offsets = [0, 0, 0], sizes = [8, 8, 32], strides = [1, 1, 1]} : vector<8x8x512xf32> to vector<8x8x32xf32>
    %cst_45 = arith.constant dense<0xFF800000> : vector<8x32xf32>
    %107 = vector.multi_reduction <maximumf>, %106, %cst_45 [1] : vector<8x8x32xf32> to vector<8x32xf32>
    %108 = vector.extract_strided_slice %105 {offsets = [0, 0, 64], sizes = [8, 7, 32], strides = [1, 1, 1]} : vector<8x8x512xf32> to vector<8x7x32xf32>
    %109 = vector.extract_strided_slice %105 {offsets = [0, 1, 96], sizes = [8, 7, 32], strides = [1, 1, 1]} : vector<8x8x512xf32> to vector<8x7x32xf32>
    %110 = arith.addf %108, %109 : vector<8x7x32xf32>
    %cst_46 = arith.constant dense<0xFF800000> : vector<8x32xf32>
    %111 = vector.multi_reduction <maximumf>, %110, %cst_46 [1] : vector<8x7x32xf32> to vector<8x32xf32>
    %112 = vector.extract_strided_slice %105 {offsets = [0, 0, 128], sizes = [8, 5, 32], strides = [1, 1, 1]} : vector<8x8x512xf32> to vector<8x5x32xf32>
    %113 = vector.extract_strided_slice %105 {offsets = [0, 1, 160], sizes = [8, 5, 32], strides = [1, 1, 1]} : vector<8x8x512xf32> to vector<8x5x32xf32>
    %114 = arith.addf %112, %113 : vector<8x5x32xf32>
    %115 = vector.extract_strided_slice %105 {offsets = [0, 2, 192], sizes = [8, 5, 32], strides = [1, 1, 1]} : vector<8x8x512xf32> to vector<8x5x32xf32>
    %116 = arith.addf %114, %115 : vector<8x5x32xf32>
    %117 = vector.extract_strided_slice %105 {offsets = [0, 3, 224], sizes = [8, 5, 32], strides = [1, 1, 1]} : vector<8x8x512xf32> to vector<8x5x32xf32>
    %118 = arith.addf %116, %117 : vector<8x5x32xf32>
    %cst_47 = arith.constant dense<0xFF800000> : vector<8x32xf32>
    %119 = vector.multi_reduction <maximumf>, %118, %cst_47 [1] : vector<8x5x32xf32> to vector<8x32xf32>
    %120 = vector.extract_strided_slice %105 {offsets = [0, 0, 256], sizes = [8, 1, 32], strides = [1, 1, 1]} : vector<8x8x512xf32> to vector<8x1x32xf32>
    %121 = vector.extract_strided_slice %105 {offsets = [0, 1, 288], sizes = [8, 1, 32], strides = [1, 1, 1]} : vector<8x8x512xf32> to vector<8x1x32xf32>
    %122 = arith.addf %120, %121 : vector<8x1x32xf32>
    %123 = vector.extract_strided_slice %105 {offsets = [0, 2, 320], sizes = [8, 1, 32], strides = [1, 1, 1]} : vector<8x8x512xf32> to vector<8x1x32xf32>
    %124 = arith.addf %122, %123 : vector<8x1x32xf32>
    %125 = vector.extract_strided_slice %105 {offsets = [0, 3, 352], sizes = [8, 1, 32], strides = [1, 1, 1]} : vector<8x8x512xf32> to vector<8x1x32xf32>
    %126 = arith.addf %124, %125 : vector<8x1x32xf32>
    %127 = vector.extract_strided_slice %105 {offsets = [0, 4, 384], sizes = [8, 1, 32], strides = [1, 1, 1]} : vector<8x8x512xf32> to vector<8x1x32xf32>
    %128 = arith.addf %126, %127 : vector<8x1x32xf32>
    %129 = vector.extract_strided_slice %105 {offsets = [0, 5, 416], sizes = [8, 1, 32], strides = [1, 1, 1]} : vector<8x8x512xf32> to vector<8x1x32xf32>
    %130 = arith.addf %128, %129 : vector<8x1x32xf32>
    %131 = vector.extract_strided_slice %105 {offsets = [0, 6, 448], sizes = [8, 1, 32], strides = [1, 1, 1]} : vector<8x8x512xf32> to vector<8x1x32xf32>
    %132 = arith.addf %130, %131 : vector<8x1x32xf32>
    %133 = vector.extract_strided_slice %105 {offsets = [0, 7, 480], sizes = [8, 1, 32], strides = [1, 1, 1]} : vector<8x8x512xf32> to vector<8x1x32xf32>
    %134 = arith.addf %132, %133 : vector<8x1x32xf32>
    %cst_48 = arith.constant dense<0xFF800000> : vector<8x32xf32>
    %135 = vector.multi_reduction <maximumf>, %134, %cst_48 [1] : vector<8x1x32xf32> to vector<8x32xf32>
    %136 = tpu.concatenate %107, %111, %119, %135 in 1 : vector<8x32xf32>, vector<8x32xf32>, vector<8x32xf32>, vector<8x32xf32> -> vector<8x128xf32>
    %c0_49 = arith.constant 0 : index
    %c0_50 = arith.constant 0 : index
    %137 = vector.load %arg8[%c0_49, %c0_50] : memref<1x128xf32, #tpu.memory_space<vmem>>, vector<1x128xf32>
    %138 = vector.broadcast %137 : vector<1x128xf32> to vector<8x128xf32>
    %139 = arith.addf %136, %138 : vector<8x128xf32>
    %cst_51 = arith.constant 0.000000e+00 : f32
    %140 = vector.broadcast %cst_51 : f32 to vector<8x128xf32>
    %141 = arith.maximumf %139, %140 : vector<8x128xf32>
    %142 = arith.truncf %141 : vector<8x128xf32> to vector<8x128xbf16>
    %c0_52 = arith.constant 0 : index
    %c0_53 = arith.constant 0 : index
    %143 = vector.load %arg9[%c0_52, %c0_53] : memref<128x64xbf16, #tpu.memory_space<vmem>>, vector<128x64xbf16>
    %cst_54 = arith.constant dense<0.000000e+00> : vector<8x64xf32>
    %144 = tpu.matmul %142, %143, %cst_54 {dimension_numbers = #tpu.dot_dimension_numbers<[1], [0], [0], [1], [0, 0, 1, 1], [], []>} : vector<8x128xbf16>, vector<128x64xbf16>, vector<8x64xf32> -> vector<8x64xf32>
    %c0_55 = arith.constant 0 : index
    %c0_56 = arith.constant 0 : index
    %145 = vector.load %arg10[%c0_55, %c0_56] : memref<1x64xf32, #tpu.memory_space<vmem>>, vector<1x64xf32>
    %146 = vector.broadcast %145 : vector<1x64xf32> to vector<8x64xf32>
    %147 = arith.addf %144, %146 : vector<8x64xf32>
    %cst_57 = arith.constant 0.000000e+00 : f32
    %148 = vector.broadcast %cst_57 : f32 to vector<8x64xf32>
    %149 = arith.maximumf %147, %148 : vector<8x64xf32>
    %150 = arith.truncf %149 : vector<8x64xf32> to vector<8x64xbf16>
    %c0_58 = arith.constant 0 : index
    %c0_59 = arith.constant 0 : index
    %151 = vector.load %arg11[%c0_58, %c0_59] : memref<64x128xbf16, #tpu.memory_space<vmem>>, vector<64x128xbf16>
    %cst_60 = arith.constant dense<0.000000e+00> : vector<8x128xf32>
    %152 = tpu.matmul %150, %151, %cst_60 {dimension_numbers = #tpu.dot_dimension_numbers<[1], [0], [0], [1], [0, 0, 1, 1], [], []>} : vector<8x64xbf16>, vector<64x128xbf16>, vector<8x128xf32> -> vector<8x128xf32>
    %c0_61 = arith.constant 0 : index
    %c0_62 = arith.constant 0 : index
    %153 = vector.load %arg12[%c0_61, %c0_62] : memref<1x128xf32, #tpu.memory_space<vmem>>, vector<1x128xf32>
    %154 = vector.broadcast %153 : vector<1x128xf32> to vector<8x128xf32>
    %155 = arith.addf %152, %154 : vector<8x128xf32>
    %cst_63 = arith.constant 0.000000e+00 : f32
    %156 = vector.broadcast %cst_63 : f32 to vector<8x128xf32>
    %157 = arith.maximumf %155, %156 : vector<8x128xf32>
    %c0_64 = arith.constant 0 : index
    %c0_65 = arith.constant 0 : index
    %158 = vector.load %arg2[%c0_64, %c0_65] : memref<8x2048xbf16, #tpu.memory_space<vmem>>, vector<8x2048xbf16>
    %c0_66 = arith.constant 0 : index
    %c0_67 = arith.constant 0 : index
    %159 = vector.load %arg13[%c0_66, %c0_67] : memref<2048x256xbf16, #tpu.memory_space<vmem>>, vector<2048x256xbf16>
    %cst_68 = arith.constant dense<0.000000e+00> : vector<8x256xf32>
    %160 = tpu.matmul %158, %159, %cst_68 {dimension_numbers = #tpu.dot_dimension_numbers<[1], [0], [0], [1], [0, 0, 1, 1], [], []>} : vector<8x2048xbf16>, vector<2048x256xbf16>, vector<8x256xf32> -> vector<8x256xf32>
    %c0_69 = arith.constant 0 : index
    %c0_70 = arith.constant 0 : index
    %161 = vector.load %arg14[%c0_69, %c0_70] : memref<1x256xf32, #tpu.memory_space<vmem>>, vector<1x256xf32>
    %162 = vector.broadcast %161 : vector<1x256xf32> to vector<8x256xf32>
    %163 = arith.addf %160, %162 : vector<8x256xf32>
    %cst_71 = arith.constant 0.000000e+00 : f32
    %164 = vector.broadcast %cst_71 : f32 to vector<8x256xf32>
    %165 = arith.maximumf %163, %164 : vector<8x256xf32>
    %166 = arith.truncf %165 : vector<8x256xf32> to vector<8x256xbf16>
    %c0_72 = arith.constant 0 : index
    %c0_73 = arith.constant 0 : index
    %167 = vector.load %arg15[%c0_72, %c0_73] : memref<256x128xbf16, #tpu.memory_space<vmem>>, vector<256x128xbf16>
    %cst_74 = arith.constant dense<0.000000e+00> : vector<8x128xf32>
    %168 = tpu.matmul %166, %167, %cst_74 {dimension_numbers = #tpu.dot_dimension_numbers<[1], [0], [0], [1], [0, 0, 1, 1], [], []>} : vector<8x256xbf16>, vector<256x128xbf16>, vector<8x128xf32> -> vector<8x128xf32>
    %c0_75 = arith.constant 0 : index
    %c0_76 = arith.constant 0 : index
    %169 = vector.load %arg16[%c0_75, %c0_76] : memref<1x128xf32, #tpu.memory_space<vmem>>, vector<1x128xf32>
    %170 = vector.broadcast %169 : vector<1x128xf32> to vector<8x128xf32>
    %171 = arith.addf %168, %170 : vector<8x128xf32>
    %cst_77 = arith.constant 0.000000e+00 : f32
    %172 = vector.broadcast %cst_77 : f32 to vector<8x128xf32>
    %173 = arith.maximumf %171, %172 : vector<8x128xf32>
    %174 = tpu.concatenate %157, %173 in 1 : vector<8x128xf32>, vector<8x128xf32> -> vector<8x256xf32>
    %175 = arith.truncf %174 : vector<8x256xf32> to vector<8x256xbf16>
    %c0_78 = arith.constant 0 : index
    %c0_79 = arith.constant 0 : index
    %176 = vector.load %arg17[%c0_78, %c0_79] : memref<256x256xbf16, #tpu.memory_space<vmem>>, vector<256x256xbf16>
    %cst_80 = arith.constant dense<0.000000e+00> : vector<8x256xf32>
    %177 = tpu.matmul %175, %176, %cst_80 {dimension_numbers = #tpu.dot_dimension_numbers<[1], [0], [0], [1], [0, 0, 1, 1], [], []>} : vector<8x256xbf16>, vector<256x256xbf16>, vector<8x256xf32> -> vector<8x256xf32>
    %c0_81 = arith.constant 0 : index
    %c0_82 = arith.constant 0 : index
    %178 = vector.load %arg18[%c0_81, %c0_82] : memref<1x256xf32, #tpu.memory_space<vmem>>, vector<1x256xf32>
    %179 = vector.broadcast %178 : vector<1x256xf32> to vector<8x256xf32>
    %180 = arith.addf %177, %179 : vector<8x256xf32>
    %cst_83 = arith.constant 0.000000e+00 : f32
    %181 = vector.broadcast %cst_83 : f32 to vector<8x256xf32>
    %182 = arith.maximumf %180, %181 : vector<8x256xf32>
    %183 = arith.truncf %182 : vector<8x256xf32> to vector<8x256xbf16>
    %c0_84 = arith.constant 0 : index
    %c0_85 = arith.constant 0 : index
    %184 = vector.load %arg19[%c0_84, %c0_85] : memref<256x32xbf16, #tpu.memory_space<vmem>>, vector<256x32xbf16>
    %cst_86 = arith.constant dense<0.000000e+00> : vector<8x32xf32>
    %185 = tpu.matmul %183, %184, %cst_86 {dimension_numbers = #tpu.dot_dimension_numbers<[1], [0], [0], [1], [0, 0, 1, 1], [], []>} : vector<8x256xbf16>, vector<256x32xbf16>, vector<8x32xf32> -> vector<8x32xf32>
    %c0_87 = arith.constant 0 : index
    %c0_88 = arith.constant 0 : index
    %186 = vector.load %arg20[%c0_87, %c0_88] : memref<1x32xf32, #tpu.memory_space<vmem>>, vector<1x32xf32>
    %187 = vector.broadcast %186 : vector<1x32xf32> to vector<8x32xf32>
    %188 = arith.addf %185, %187 : vector<8x32xf32>
    %cst_89 = arith.constant 0.000000e+00 : f32
    %189 = vector.broadcast %cst_89 : f32 to vector<8x32xf32>
    %190 = arith.maximumf %188, %189 : vector<8x32xf32>
    %cst_90 = arith.constant 1.250000e-01 : f32
    %191 = vector.broadcast %cst_90 : f32 to vector<8x64xf32>
    %192 = arith.mulf %0, %191 : vector<8x64xf32>
    %cst_91 = arith.constant dense<0xFF800000> : vector<8xf32>
    %193 = vector.multi_reduction <maximumf>, %1, %cst_91 [1] : vector<8x64xf32> to vector<8xf32>
    %194 = vector.shape_cast %193 : vector<8xf32> to vector<8x1xf32>
    %cst_92 = arith.constant dense<0x7F800000> : vector<8xf32>
    %195 = vector.multi_reduction <minimumf>, %1, %cst_92 [1] : vector<8x64xf32> to vector<8xf32>
    %196 = vector.shape_cast %195 : vector<8xf32> to vector<8x1xf32>
    %cst_93 = arith.constant 0.000000e+00 : f32
    %197 = vector.broadcast %cst_93 : f32 to vector<8x64xf32>
    %198 = arith.cmpf oge, %192, %197 : vector<8x64xf32>
    %199 = vector.shape_cast %194 : vector<8x1xf32> to vector<8x1xf32>
    %200 = vector.broadcast %199 : vector<8x1xf32> to vector<8x64xf32>
    %201 = vector.shape_cast %196 : vector<8x1xf32> to vector<8x1xf32>
    %202 = vector.broadcast %201 : vector<8x1xf32> to vector<8x64xf32>
    %203 = arith.select %198, %200, %202 : vector<8x64xi1>, vector<8x64xf32>
    %204 = arith.mulf %192, %203 : vector<8x64xf32>
    %205 = vector.shape_cast %192 : vector<8x64xf32> to vector<8x64x1xf32>
    %206 = vector.shape_cast %1 : vector<8x64xf32> to vector<8x1x64xf32>
    %207 = vector.broadcast %205 : vector<8x64x1xf32> to vector<8x64x64xf32>
    %208 = vector.broadcast %206 : vector<8x1x64xf32> to vector<8x64x64xf32>
    %209 = arith.mulf %207, %208 : vector<8x64x64xf32>
    %210 = vector.shape_cast %204 : vector<8x64xf32> to vector<8x64x1xf32>
    %211 = vector.broadcast %210 : vector<8x64x1xf32> to vector<8x64x64xf32>
    %212 = arith.subf %209, %211 : vector<8x64x64xf32>
    %213 = math.exp %212 : vector<8x64x64xf32>
    %cst_94 = arith.constant dense<0.000000e+00> : vector<8x64xf32>
    %214 = vector.multi_reduction <add>, %213, %cst_94 [2] : vector<8x64x64xf32> to vector<8x64xf32>
    %cst_95 = arith.constant 1.000000e+00 : f32
    %215 = vector.broadcast %cst_95 : f32 to vector<8x64xf32>
    %216 = arith.divf %215, %214 : vector<8x64xf32>
    %217 = arith.truncf %216 : vector<8x64xf32> to vector<8x64xbf16>
    %c0_96 = arith.constant 0 : index
    %c0_97 = arith.constant 0 : index
    %218 = vector.load %arg21[%c0_96, %c0_97] : memref<64x64xbf16, #tpu.memory_space<vmem>>, vector<64x64xbf16>
    %cst_98 = arith.constant dense<0.000000e+00> : vector<8x64xf32>
    %219 = tpu.matmul %217, %218, %cst_98 {dimension_numbers = #tpu.dot_dimension_numbers<[1], [0], [0], [1], [0, 0, 1, 1], [], []>} : vector<8x64xbf16>, vector<64x64xbf16>, vector<8x64xf32> -> vector<8x64xf32>
    %c0_99 = arith.constant 0 : index
    %c0_100 = arith.constant 0 : index
    %220 = vector.load %arg22[%c0_99, %c0_100] : memref<1x64xf32, #tpu.memory_space<vmem>>, vector<1x64xf32>
    %221 = vector.broadcast %220 : vector<1x64xf32> to vector<8x64xf32>
    %222 = arith.addf %219, %221 : vector<8x64xf32>
    %cst_101 = arith.constant 0.000000e+00 : f32
    %223 = vector.broadcast %cst_101 : f32 to vector<8x64xf32>
    %224 = arith.maximumf %222, %223 : vector<8x64xf32>
    %cst_102 = arith.constant 1.000000e+00 : f32
    %225 = vector.broadcast %cst_102 : f32 to vector<8x1xf32>
    %226 = arith.subf %225, %100 : vector<8x1xf32>
    %227 = vector.broadcast %226 : vector<8x1xf32> to vector<8x32xf32>
    %228 = arith.mulf %227, %190 : vector<8x32xf32>
    %229 = vector.broadcast %100 : vector<8x1xf32> to vector<8x64xf32>
    %230 = arith.mulf %229, %224 : vector<8x64xf32>
    %231 = tpu.concatenate %228, %230 in 1 : vector<8x32xf32>, vector<8x64xf32> -> vector<8x96xf32>
    %232 = arith.truncf %231 : vector<8x96xf32> to vector<8x96xbf16>
    %c0_103 = arith.constant 0 : index
    %c0_104 = arith.constant 0 : index
    %233 = vector.load %arg23[%c0_103, %c0_104] : memref<96x64xbf16, #tpu.memory_space<vmem>>, vector<96x64xbf16>
    %cst_105 = arith.constant dense<0.000000e+00> : vector<8x64xf32>
    %234 = tpu.matmul %232, %233, %cst_105 {dimension_numbers = #tpu.dot_dimension_numbers<[1], [0], [0], [1], [0, 0, 1, 1], [], []>} : vector<8x96xbf16>, vector<96x64xbf16>, vector<8x64xf32> -> vector<8x64xf32>
    %c0_106 = arith.constant 0 : index
    %c0_107 = arith.constant 0 : index
    %235 = vector.load %arg24[%c0_106, %c0_107] : memref<1x64xf32, #tpu.memory_space<vmem>>, vector<1x64xf32>
    %236 = vector.broadcast %235 : vector<1x64xf32> to vector<8x64xf32>
    %237 = arith.addf %234, %236 : vector<8x64xf32>
    %cst_108 = arith.constant 0.000000e+00 : f32
    %238 = vector.broadcast %cst_108 : f32 to vector<8x64xf32>
    %239 = arith.maximumf %237, %238 : vector<8x64xf32>
    %240 = arith.truncf %239 : vector<8x64xf32> to vector<8x64xbf16>
    %c0_109 = arith.constant 0 : index
    %c0_110 = arith.constant 0 : index
    %241 = vector.load %arg25[%c0_109, %c0_110] : memref<64x64xbf16, #tpu.memory_space<vmem>>, vector<64x64xbf16>
    %cst_111 = arith.constant dense<0.000000e+00> : vector<8x64xf32>
    %242 = tpu.matmul %240, %241, %cst_111 {dimension_numbers = #tpu.dot_dimension_numbers<[1], [0], [0], [1], [0, 0, 1, 1], [], []>} : vector<8x64xbf16>, vector<64x64xbf16>, vector<8x64xf32> -> vector<8x64xf32>
    %c0_112 = arith.constant 0 : index
    %c0_113 = arith.constant 0 : index
    %243 = vector.load %arg26[%c0_112, %c0_113] : memref<1x64xf32, #tpu.memory_space<vmem>>, vector<1x64xf32>
    %244 = vector.broadcast %243 : vector<1x64xf32> to vector<8x64xf32>
    %245 = arith.addf %242, %244 : vector<8x64xf32>
    %cst_114 = arith.constant 0.000000e+00 : f32
    %246 = vector.broadcast %cst_114 : f32 to vector<8x64xf32>
    %247 = arith.maximumf %245, %246 : vector<8x64xf32>
    %248 = arith.truncf %247 : vector<8x64xf32> to vector<8x64xbf16>
    %c0_115 = arith.constant 0 : index
    %c0_116 = arith.constant 0 : index
    %249 = vector.load %arg27[%c0_115, %c0_116] : memref<64x2xbf16, #tpu.memory_space<vmem>>, vector<64x2xbf16>
    %cst_117 = arith.constant dense<0.000000e+00> : vector<8x2xf32>
    %250 = tpu.matmul %248, %249, %cst_117 {dimension_numbers = #tpu.dot_dimension_numbers<[1], [0], [0], [1], [0, 0, 1, 1], [], []>} : vector<8x64xbf16>, vector<64x2xbf16>, vector<8x2xf32> -> vector<8x2xf32>
    %c0_118 = arith.constant 0 : index
    %c0_119 = arith.constant 0 : index
    %251 = vector.load %arg28[%c0_118, %c0_119] : memref<1x2xf32, #tpu.memory_space<vmem>>, vector<1x2xf32>
    %252 = vector.broadcast %251 : vector<1x2xf32> to vector<8x2xf32>
    %253 = arith.addf %250, %252 : vector<8x2xf32>
    %c0_120 = arith.constant 0 : index
    %c0_121 = arith.constant 0 : index
    %254 = vector.load %arg33[%c0_120, %c0_121] : memref<8x2xf32, #tpu.memory_space<vmem>>, vector<8x2xf32>
    tpu.vector_store %arg33[%c0_120, %c0_121], %253 {strides = array<i32>} : memref<8x2xf32, #tpu.memory_space<vmem>>, vector<8x2xf32>,
    return
  }
  func.func @transform_0(%arg0: i32) -> (i32, i32, i32) {
    %c0_i32 = arith.constant 0 : i32
    %c0_i32_0 = arith.constant 0 : i32
    %c0_i32_1 = arith.constant 0 : i32
    return %arg0, %c0_i32, %c0_i32_0 : i32, i32, i32
  }
  func.func @transform_1(%arg0: i32) -> (i32, i32) {
    %c0_i32 = arith.constant 0 : i32
    %c0_i32_0 = arith.constant 0 : i32
    return %arg0, %c0_i32 : i32, i32
  }
  func.func @transform_2(%arg0: i32) -> (i32, i32) {
    %c0_i32 = arith.constant 0 : i32
    %c0_i32_0 = arith.constant 0 : i32
    return %arg0, %c0_i32 : i32, i32
  }
  func.func @transform_3(%arg0: i32) -> (i32, i32) {
    %c0_i32 = arith.constant 0 : i32
    %c0_i32_0 = arith.constant 0 : i32
    return %arg0, %c0_i32 : i32, i32
  }
  func.func @transform_4(%arg0: i32) -> (i32, i32) {
    %c0_i32 = arith.constant 0 : i32
    %c0_i32_0 = arith.constant 0 : i32
    return %arg0, %c0_i32 : i32, i32
  }
  func.func @transform_5(%arg0: i32) -> (i32, i32) {
    %c0_i32 = arith.constant 0 : i32
    %c0_i32_0 = arith.constant 0 : i32
    return %arg0, %c0_i32 : i32, i32
  }
  func.func @transform_6(%arg0: i32) -> (i32, i32) {
    %c0_i32 = arith.constant 0 : i32
    %c0_i32_0 = arith.constant 0 : i32
    %c0_i32_1 = arith.constant 0 : i32
    return %c0_i32, %c0_i32_0 : i32, i32
  }
  func.func @transform_7(%arg0: i32) -> (i32, i32) {
    %c0_i32 = arith.constant 0 : i32
    %c0_i32_0 = arith.constant 0 : i32
    %c0_i32_1 = arith.constant 0 : i32
    return %c0_i32, %c0_i32_0 : i32, i32
  }
  func.func @transform_8(%arg0: i32) -> (i32, i32) {
    %c0_i32 = arith.constant 0 : i32
    %c0_i32_0 = arith.constant 0 : i32
    %c0_i32_1 = arith.constant 0 : i32
    return %c0_i32, %c0_i32_0 : i32, i32
  }
  func.func @transform_9(%arg0: i32) -> (i32, i32) {
    %c0_i32 = arith.constant 0 : i32
    %c0_i32_0 = arith.constant 0 : i32
    %c0_i32_1 = arith.constant 0 : i32
    return %c0_i32, %c0_i32_0 : i32, i32
  }
  func.func @transform_10(%arg0: i32) -> (i32, i32) {
    %c0_i32 = arith.constant 0 : i32
    %c0_i32_0 = arith.constant 0 : i32
    %c0_i32_1 = arith.constant 0 : i32
    return %c0_i32, %c0_i32_0 : i32, i32
  }
  func.func @transform_11(%arg0: i32) -> (i32, i32) {
    %c0_i32 = arith.constant 0 : i32
    %c0_i32_0 = arith.constant 0 : i32
    %c0_i32_1 = arith.constant 0 : i32
    return %c0_i32, %c0_i32_0 : i32, i32
  }
  func.func @transform_12(%arg0: i32) -> (i32, i32) {
    %c0_i32 = arith.constant 0 : i32
    %c0_i32_0 = arith.constant 0 : i32
    %c0_i32_1 = arith.constant 0 : i32
    return %c0_i32, %c0_i32_0 : i32, i32
  }
  func.func @transform_13(%arg0: i32) -> (i32, i32) {
    %c0_i32 = arith.constant 0 : i32
    %c0_i32_0 = arith.constant 0 : i32
    %c0_i32_1 = arith.constant 0 : i32
    return %c0_i32, %c0_i32_0 : i32, i32
  }
  func.func @transform_14(%arg0: i32) -> (i32, i32) {
    %c0_i32 = arith.constant 0 : i32
    %c0_i32_0 = arith.constant 0 : i32
    %c0_i32_1 = arith.constant 0 : i32
    return %c0_i32, %c0_i32_0 : i32, i32
  }
  func.func @transform_15(%arg0: i32) -> (i32, i32) {
    %c0_i32 = arith.constant 0 : i32
    %c0_i32_0 = arith.constant 0 : i32
    %c0_i32_1 = arith.constant 0 : i32
    return %c0_i32, %c0_i32_0 : i32, i32
  }
  func.func @transform_16(%arg0: i32) -> (i32, i32) {
    %c0_i32 = arith.constant 0 : i32
    %c0_i32_0 = arith.constant 0 : i32
    %c0_i32_1 = arith.constant 0 : i32
    return %c0_i32, %c0_i32_0 : i32, i32
  }
  func.func @transform_17(%arg0: i32) -> (i32, i32) {
    %c0_i32 = arith.constant 0 : i32
    %c0_i32_0 = arith.constant 0 : i32
    %c0_i32_1 = arith.constant 0 : i32
    return %c0_i32, %c0_i32_0 : i32, i32
  }
  func.func @transform_18(%arg0: i32) -> (i32, i32) {
    %c0_i32 = arith.constant 0 : i32
    %c0_i32_0 = arith.constant 0 : i32
    %c0_i32_1 = arith.constant 0 : i32
    return %c0_i32, %c0_i32_0 : i32, i32
  }
  func.func @transform_19(%arg0: i32) -> (i32, i32) {
    %c0_i32 = arith.constant 0 : i32
    %c0_i32_0 = arith.constant 0 : i32
    %c0_i32_1 = arith.constant 0 : i32
    return %c0_i32, %c0_i32_0 : i32, i32
  }
  func.func @transform_20(%arg0: i32) -> (i32, i32) {
    %c0_i32 = arith.constant 0 : i32
    %c0_i32_0 = arith.constant 0 : i32
    %c0_i32_1 = arith.constant 0 : i32
    return %c0_i32, %c0_i32_0 : i32, i32
  }
  func.func @transform_21(%arg0: i32) -> (i32, i32) {
    %c0_i32 = arith.constant 0 : i32
    %c0_i32_0 = arith.constant 0 : i32
    %c0_i32_1 = arith.constant 0 : i32
    return %c0_i32, %c0_i32_0 : i32, i32
  }
  func.func @transform_22(%arg0: i32) -> (i32, i32) {
    %c0_i32 = arith.constant 0 : i32
    %c0_i32_0 = arith.constant 0 : i32
    %c0_i32_1 = arith.constant 0 : i32
    return %c0_i32, %c0_i32_0 : i32, i32
  }
  func.func @transform_23(%arg0: i32) -> (i32, i32) {
    %c0_i32 = arith.constant 0 : i32
    %c0_i32_0 = arith.constant 0 : i32
    %c0_i32_1 = arith.constant 0 : i32
    return %c0_i32, %c0_i32_0 : i32, i32
  }
  func.func @transform_24(%arg0: i32) -> (i32, i32) {
    %c0_i32 = arith.constant 0 : i32
    %c0_i32_0 = arith.constant 0 : i32
    %c0_i32_1 = arith.constant 0 : i32
    return %c0_i32, %c0_i32_0 : i32, i32
  }
  func.func @transform_25(%arg0: i32) -> (i32, i32) {
    %c0_i32 = arith.constant 0 : i32
    %c0_i32_0 = arith.constant 0 : i32
    %c0_i32_1 = arith.constant 0 : i32
    return %c0_i32, %c0_i32_0 : i32, i32
  }
  func.func @transform_26(%arg0: i32) -> (i32, i32) {
    %c0_i32 = arith.constant 0 : i32
    %c0_i32_0 = arith.constant 0 : i32
    %c0_i32_1 = arith.constant 0 : i32
    return %c0_i32, %c0_i32_0 : i32, i32
  }
  func.func @transform_27(%arg0: i32) -> (i32, i32) {
    %c0_i32 = arith.constant 0 : i32
    %c0_i32_0 = arith.constant 0 : i32
    %c0_i32_1 = arith.constant 0 : i32
    return %c0_i32, %c0_i32_0 : i32, i32
  }
  func.func @transform_28(%arg0: i32) -> (i32, i32) {
    %c0_i32 = arith.constant 0 : i32
    %c0_i32_0 = arith.constant 0 : i32
    %c0_i32_1 = arith.constant 0 : i32
    return %c0_i32, %c0_i32_0 : i32, i32
  }
  func.func @transform_29(%arg0: i32) -> (i32, i32) {
    %c0_i32 = arith.constant 0 : i32
    %c0_i32_0 = arith.constant 0 : i32
    %c0_i32_1 = arith.constant 0 : i32
    return %c0_i32, %c0_i32_0 : i32, i32
  }
  func.func @transform_30(%arg0: i32) -> (i32, i32) {
    %c0_i32 = arith.constant 0 : i32
    %c0_i32_0 = arith.constant 0 : i32
    %c0_i32_1 = arith.constant 0 : i32
    return %c0_i32, %c0_i32_0 : i32, i32
  }
  func.func @transform_31(%arg0: i32) -> (i32, i32) {
    %c0_i32 = arith.constant 0 : i32
    %c0_i32_0 = arith.constant 0 : i32
    %c0_i32_1 = arith.constant 0 : i32
    return %c0_i32, %c0_i32_0 : i32, i32
  }
  func.func @transform_32(%arg0: i32) -> (i32, i32) {
    %c0_i32 = arith.constant 0 : i32
    %c0_i32_0 = arith.constant 0 : i32
    return %arg0, %c0_i32 : i32, i32
  }
}

</mosaic_0001>

<bundles_post_ra>
// kernel: multimodal_forward.1
= control target key start
LH: loop header
LB: loop body
LE: loop exit
PB: predicated region body
PF: predicated region fallthrough
CT: control target
= control target key end

     0   :  { %s12271_s6 = smov 1   ;;  %s12272_s10 = smov 2   ;;  %s14919_s0 = inlined_call_operand.smem [shape: u32[33], index: -1, kind: input, shape index: {}] }
   0x1   :  { %s12348_s5 = sld [smem:[%s14919_s0]]   ;;  %s12273_s14 = smov 3  }
   0x2   :  { %s12353_s9 = sld [smem:[%s14919_s0 + %s12271_s6]]   ;;  %s12274_s18 = smov 4  }
   0x3   :  { %s12358_s13 = sld [smem:[%s14919_s0 + %s12272_s10]]   ;;  %s12275_s22 = smov 5  }
   0x4   :  { %s12363_s17 = sld [smem:[%s14919_s0 + %s12273_s14]]   ;;  %s12276_s26 = smov 6  }
   0x5   :  { %s12368_s21 = sld [smem:[%s14919_s0 + %s12274_s18]]   ;;  %s12277_s30 = smov 7  }
   0x6   :  { %s12373_s25 = sld [smem:[%s14919_s0 + %s12275_s22]]   ;;  %s12278_s4 = smov 8  }
   0x7   :  { %14958 = sst [smem:[#allocation46_spill]] %s12348_s5  ;;  %s12279_s10 = smov 9  }
   0x8   :  { %14959 = sst [smem:[#allocation47_spill]] %s12353_s9  ;;  %s12280_s15 = smov 10  }
   0x9   :  { %14960 = sst [smem:[#allocation48_spill]] %s12358_s13  ;;  %s12281_s20 = smov 11  }
   0xa   :  { %14961 = sst [smem:[#allocation49_spill]] %s12363_s17  ;;  %s12283_s1 = smov 13  }
   0xb   :  { %14962 = sst [smem:[#allocation50_spill]] %s12368_s21  ;;  %s12284_s7 = smov 14  }
   0xc   :  { %14963 = sst [smem:[#allocation51_spill]] %s12373_s25  ;;  %s12286_s22 = smov 16  }
   0xd   :  { %s12378_s29 = sld [smem:[%s14919_s0 + %s12276_s26]]   ;;  %s12282_s26 = smov 12  }
   0xe   :  { %s12383_s3 = sld [smem:[%s14919_s0 + %s12277_s30]]   ;;  %s12287_s28 = smov 17  }
   0xf   :  { %s12388_s8 = sld [smem:[%s14919_s0 + %s12278_s4]]  }
  0x10   :  { %s12393_s14 = sld [smem:[%s14919_s0 + %s12279_s10]]  }
  0x11   :  { %s12398_s19 = sld [smem:[%s14919_s0 + %s12280_s15]]   ;;  %s12285_s15 = smov 15  }
  0x12   :  { %s12403_s24 = sld [smem:[%s14919_s0 + %s12281_s20]]  }
  0x13   :  { %14964 = sst [smem:[#allocation52_spill]] %s12378_s29 }
  0x14   :  { %14965 = sst [smem:[#allocation53_spill]] %s12383_s3 }
  0x15   :  { %14966 = sst [smem:[#allocation54_spill]] %s12388_s8 }
  0x16   :  { %s12408_s30 = sld [smem:[%s14919_s0 + %s12282_s26]]  }
  0x17   :  { %s12413_s6 = sld [smem:[%s14919_s0 + %s12283_s1]]  }
  0x18   :  { %s12418_s12 = sld [smem:[%s14919_s0 + %s12284_s7]]   ;;  %s12288_s7 = smov 18  }
  0x19   :  { %s12423_s20 = sld [smem:[%s14919_s0 + %s12285_s15]]   ;;  %s12289_s15 = smov 19  }
  0x1a   :  { %s12428_s27 = sld [smem:[%s14919_s0 + %s12286_s22]]   ;;  %s12290_s22 = smov 20  }
  0x1b   :  { %s12433_s4 = sld [smem:[%s14919_s0 + %s12287_s28]]   ;;  %s12291_s28 = smov 21  }
  0x1c   :  { %s12438_s21 = sld [smem:[%s14919_s0 + %s12288_s7]]   ;;  %s12292_s7 = smov 22  }
  0x1d   :  { %14967 = sst [smem:[#allocation55_spill]] %s12413_s6 }
  0x1e   :  { %14968 = sst [smem:[#allocation56_spill]] %s12418_s12 }
  0x1f   :  { %s12443_s25 = sld [smem:[%s14919_s0 + %s12289_s15]]   ;;  %s12293_s15 = smov 23  }
  0x20   :  { %14969 = sst [smem:[#allocation57_spill]] %s12428_s27 }
  0x21   :  { %14970 = sst [smem:[#allocation58_spill]] %s12433_s4 }
  0x22   :  { %14971 = sst [smem:[#allocation59_spill]] %s12438_s21 }
  0x23   :  { %s12448_s27 = sld [smem:[%s14919_s0 + %s12290_s22]]   ;;  %s12294_s22 = smov 24  }
  0x24   :  { %s12453_s9 = sld [smem:[%s14919_s0 + %s12291_s28]]   ;;  %s12295_s28 = smov 25  }
  0x25   :  { %s12458_s21 = sld [smem:[%s14919_s0 + %s12292_s7]]   ;;  %s12296_s7 = smov 26  }
  0x26   :  { %s12463_s8 = sld [smem:[%s14919_s0 + %s12293_s15]]   ;;  %s12297_s15 = smov 27  }
  0x27   :  { %s12468_s5 = sld [smem:[%s14919_s0 + %s12294_s22]]   ;;  %s12298_s22 = smov 28  }
  0x28   :  { %s12473_s29 = sld [smem:[%s14919_s0 + %s12295_s28]]   ;;  %s12299_s28 = smov 29  }
  0x29   :  { %s12483_s17 = sld [smem:[%s14919_s0 + %s12297_s15]]   ;;  %s12301_s15 = smov 31  }
  0x2a   :  { %14972 = sst [smem:[#allocation60_spill]] %s12453_s9 }
  0x2b   :  { %14973 = sst [smem:[#allocation61_spill]] %s12458_s21 }
  0x2c   :  { %14974 = sst [smem:[#allocation62_spill]] %s12463_s8 }
  0x2d   :  { %14975 = sst [smem:[#allocation63_spill]] %s12468_s5 }
  0x2e   :  { %14976 = sst [smem:[#allocation64_spill]] %s12473_s29 }
  0x2f   :  { %s12478_s21 = sld [smem:[%s14919_s0 + %s12296_s7]]   ;;  %s12300_s7 = smov 30  }
  0x30   :  { %s12488_s13 = sld [smem:[%s14919_s0 + %s12298_s22]]   ;;  %s12302_s22 = smov 32  }
  0x31   :  { %s12493_s29 = sld [smem:[%s14919_s0 + %s12299_s28]]  }
  0x32   :  { %s12503_s8 = sld [smem:[%s14919_s0 + %s12301_s15]]  }
  0x35   :  { %14977 = sst [smem:[#allocation65_spill]] %s12478_s21 }
  0x36   :  { %14978 = sst [smem:[#allocation66_spill]] %s12488_s13 }
  0x37   :  { %s12498_s21 = sld [smem:[%s14919_s0 + %s12300_s7]]  }
  0x38   :  { %14980 = sst [smem:[#allocation68_spill]] %s12503_s8 }
  0x39   :  { %s12508_s13 = sld [smem:[%s14919_s0 + %s12302_s22]]  }
  0x3d   :  { %14979 = sst [smem:[#allocation67_spill]] %s12498_s21 }
  0x3f   :  { %14981 = sst [smem:[#allocation69_spill]] %s12508_s13 }
  0x40   :  { %70 = vsyncpa [#allocation3], 0 }
  0x41   :  { %72 = vsyncpa [#allocation3 + $0x1], 0 }
  0x42   :  { %73 = vsyncpa [#allocation5], 0 }
  0x43   :  { %75 = vsyncpa [#allocation5 + $0x1], 0 }
  0x44   :  { %76 = vsyncpa [#allocation8], 0 }
  0x45   :  { %77 = vsyncpa [#allocation11], 0 }
  0x46   :  { %78 = vsyncpa [#allocation14], 0 }
  0x47   :  { %79 = vsyncpa [#allocation17], 0 }
  0x48   :  { %80 = vsyncpa [#allocation20], 0 }
  0x49   :  { %81 = vsyncpa [#allocation23], 0 }
  0x4a   :  { %82 = vsyncpa [#allocation26], 0 }
  0x4b   :  { %83 = vsyncpa [#allocation29], 0 }
  0x4c   :  { %84 = vsyncpa [#allocation32], 0  ;;  %s12510_s28 = smov 0   ;;  %s12512_s1 = smov 0  }
  0x4d   :  { %s12514_s2 = smov 0   ;;  %s12516_s0 = smov 0  }
  0x4e LB: > { %s12303_s7 = smov [#allocation6]   ;;  %s12531_s11 = sadd.s32 4294967295, %s12269_s0   ;;  %s12269_s0 = sphi %s12516_s0, %s15143_s0   ;;  %s12265_s2 = sphi %s12514_s2, %s15142_s2   ;;  %s12261_s1 = sphi %s12512_s1, %s15141_s1   ;;  %s12257_s28 = sphi %s12510_s28, %s15140_s28  }
  0x4f   : > { %s839_s10 = sshll.u32 %s12303_s7, 4  ;;  %p9334_p0 = scmp.ge.s32.totalorder %s12269_s0, 1  ;;  %s840_s10 = int_to_ptr.vmem [resolvable:$true] %s839_s10 }
  0x50   : > { %p14930_p1 = scmp.eq.s32.totalorder %s12531_s11, 0  ;;  %p823_p2 = scmp.lt.s32.totalorder %s12269_s0, 3 }
  0x51   : > { %s12304_s16 = smov [#allocation7]   ;;  %s12305_s22 = smov [#allocation10]  }
  0x52   : > { %p12536_p3 = pnand %p9334_p0, %p823_p2  ;;  %s853_s18 = sshll.u32 %s12304_s16, 4  ;;  %s12542_s18 = int_to_ptr.vmem [resolvable:$true] %s853_s18 }
  0x53   : > { %s877_s23 = sshll.u32 %s12305_s22, 4  ;;  %s12306_s7 = smov [#allocation13]   ;;  %s12550_s23 = int_to_ptr.vmem [resolvable:$true] %s877_s23 }
  0x54   : > { %s14982_s15 = scalar_select %p12536_p3, 1, 0 }
  0x55   : > { %p10312_p4 = pneg %p12536_p3  ;;  %s12552_s13 = sshll.u32 %s12306_s7, 4  ;;  %s902_s13 = int_to_ptr.vmem [resolvable:$true] %s12552_s13 }
  0x56   : > { %14983 = sst [smem:[#allocation70_spill]] %s14982_s15  ;;  %s11652_s16 = scalar_lea.vmem %s840_s10, 16 }
  0x57   : > { %p12546_p5 = pnand %p10312_p4, %p14930_p1  ;;  %p11653_p7 = scmp.ne.s32.totalorder %s840_s10, %s11652_s16 }
  0x58   : > { %s11659_s22 = scalar_lea.vmem %s840_s10, 32  ;;  %p11660_p10 = scmp.lt.s32.totalorder %s840_s10, %s840_s10 }
  0x59   : > { %p12556_p6 = pneg %p12546_p5  ;;  %p11661_p11 = scmp.lt.s32.totalorder %s11659_s22, %s11652_s16 }
  0x5b   : > { %p11655_p8 = pnand %p11653_p7, %p12556_p6  ;;  %p11662_p12 = por %p11661_p11, %p11660_p10 }
  0x5d   : > { %p11656_p9 = pneg %p11655_p8 }
  0x5f   : > { %p11663_p13 = pnand %p11662_p12, %p11656_p9 }
  0x61   : > { %11666 = shalt.err (!%p11663_p13)
}
  0x62   : > { %s14986_s3 = sld [smem:[#allocation53_spill]]  ;;  %s11678_s7 = scalar_lea.vmem %s12542_s18, 16 }
  0x63   : > { %p11679_p0 = scmp.ne.s32.totalorder %s12542_s18, %s11678_s7  ;;  %s11685_s15 = scalar_lea.vmem %s12542_s18, 32 }
  0x64   : > { %p11686_p7 = scmp.lt.s32.totalorder %s12542_s18, %s12542_s18  ;;  %p11687_p8 = scmp.lt.s32.totalorder %s11685_s15, %s11678_s7 }
  0x65   : > { %p11681_p2 = pnand %p11679_p0, %p12556_p6 }
  0x66   : > { %p11688_p9 = por %p11687_p8, %p11686_p7 }
  0x67   : > { %p11682_p4 = pneg %p11681_p2 }
  0x68   : > { %10315 = dma.hbm_to_vmem [thread:$0]  (!%p12546_p5), %s14986_s3, 16, %s840_s10, [#allocation5]  }
  0x69   : > { %p11689_p10 = pnand %p11688_p9, %p11682_p4 }
  0x6b   : > { %11692 = shalt.err (!%p11689_p10)
}
  0x6c   : > { %10318 = dma.hbm_to_vmem [thread:$0]  (!%p12546_p5), %s12393_s14, 16, %s12542_s18, [#allocation8]  }
  0x6d   : > { %s11704_s10 = scalar_lea.vmem %s12550_s23, 16  ;;  %s11711_s16 = scalar_lea.vmem %s12550_s23, 32 }
  0x6e   : > { %p11705_p11 = scmp.ne.s32.totalorder %s12550_s23, %s11704_s10  ;;  %p11712_p0 = scmp.lt.s32.totalorder %s12550_s23, %s12550_s23 }
  0x6f   : > { %p11713_p2 = scmp.lt.s32.totalorder %s11711_s16, %s11704_s10 }
  0x70   : > { %p11707_p12 = pnand %p11705_p11, %p12556_p6 }
  0x71   : > { %p11714_p4 = por %p11713_p2, %p11712_p0 }
  0x72   : > { %p11708_p13 = pneg %p11707_p12 }
  0x74   : > { %p11715_p7 = pnand %p11714_p4, %p11708_p13 }
  0x76   : > { %11718 = shalt.err (!%p11715_p7)
}
  0x77   : > { %10324 = dma.hbm_to_vmem [thread:$0]  (!%p12546_p5), %s12403_s24, 16, %s12550_s23, [#allocation11]  }
  0x78   : > { %s12307_s15 = smov [#allocation16]   ;;  %s11730_s22 = scalar_lea.vmem %s902_s13, 32 }
  0x79   : > { %s925_s18 = sshll.u32 %s12307_s15, 4  ;;  %p11731_p8 = scmp.ne.s32.totalorder %s902_s13, %s11730_s22  ;;  %s926_s18 = int_to_ptr.vmem [resolvable:$true] %s925_s18 }
  0x7a   : > { %p11738_p11 = scmp.lt.s32.totalorder %s902_s13, %s902_s13  ;;  %p11739_p12 = scmp.lt.s32.totalorder %s11730_s22, %s11730_s22 }
  0x7b   : > { %p11733_p9 = pnand %p11731_p8, %p12556_p6 }
  0x7c   : > { %p11740_p0 = por %p11739_p12, %p11738_p11 }
  0x7d   : > { %p11734_p10 = pneg %p11733_p9 }
  0x7f   : > { %p11741_p13 = pnand %p11740_p0, %p11734_p10 }
  0x81   : > { %11744 = shalt.err (!%p11741_p13)
}
  0x82   : > { %s14987_s6 = sld [smem:[#allocation55_spill]]  ;;  %s11756_s23 = scalar_lea.vmem %s926_s18, 16 }
  0x83   : > { %p11757_p2 = scmp.ne.s32.totalorder %s926_s18, %s11756_s23  ;;  %s11763_s7 = scalar_lea.vmem %s926_s18, 32 }
  0x84   : > { %p11764_p1 = scmp.lt.s32.totalorder %s926_s18, %s926_s18  ;;  %p11765_p8 = scmp.lt.s32.totalorder %s11763_s7, %s11756_s23 }
  0x85   : > { %p11759_p4 = pnand %p11757_p2, %p12556_p6 }
  0x86   : > { %p11766_p9 = por %p11765_p8, %p11764_p1 }
  0x87   : > { %p11760_p7 = pneg %p11759_p4 }
  0x88   : > { %10330 = dma.hbm_to_vmem [thread:$0]  (!%p12546_p5), %s14987_s6, 32, %s902_s13, [#allocation14]  }
  0x89   : > { %p11767_p3 = pnand %p11766_p9, %p11760_p7 }
  0x8b   : > { %11770 = shalt.err (!%p11767_p3)
}
  0x8c   : > { %10336 = dma.hbm_to_vmem [thread:$0]  (!%p12546_p5), %s12423_s20, 16, %s926_s18, [#allocation17]  }
  0x8d   : > { %s12308_s10 = smov [#allocation19]   ;;  %s12309_s13 = smov [#allocation22]  }
  0x8e   : > { %s953_s16 = sshll.u32 %s12308_s10, 4  ;;  %s977_s15 = sshll.u32 %s12309_s13, 4  ;;  %s954_s16 = int_to_ptr.vmem [resolvable:$true] %s953_s16  ;;  %s978_s15 = int_to_ptr.vmem [resolvable:$true] %s977_s15 }
  0x8f   : > { %s11782_s22 = scalar_lea.vmem %s954_s16, 16  ;;  %s11789_s3 = scalar_lea.vmem %s954_s16, 32 }
  0x90   : > { %p11783_p10 = scmp.ne.s32.totalorder %s954_s16, %s11782_s22  ;;  %p11790_p0 = scmp.lt.s32.totalorder %s954_s16, %s954_s16 }
  0x91   : > { %p11791_p1 = scmp.lt.s32.totalorder %s11789_s3, %s11782_s22 }
  0x92   : > { %p11785_p11 = pnand %p11783_p10, %p12556_p6 }
  0x93   : > { %p11792_p13 = por %p11791_p1, %p11790_p0 }
  0x94   : > { %p11786_p12 = pneg %p11785_p11 }
  0x96   : > { %p11793_p3 = pnand %p11792_p13, %p11786_p12 }
  0x98   : > { %11796 = shalt.err (!%p11793_p3)
}
  0x99   : > { %10342 = dma.hbm_to_vmem [thread:$0]  (!%p12546_p5), %s12443_s25, 16, %s954_s16, [#allocation20]  }
  0x9a   : > { %s11808_s18 = scalar_lea.vmem %s978_s15, 16  ;;  %s11815_s23 = scalar_lea.vmem %s978_s15, 32 }
  0x9b   : > { %p11809_p2 = scmp.ne.s32.totalorder %s978_s15, %s11808_s18  ;;  %p11816_p8 = scmp.lt.s32.totalorder %s978_s15, %s978_s15 }
  0x9c   : > { %p11817_p9 = scmp.lt.s32.totalorder %s11815_s23, %s11808_s18 }
  0x9d   : > { %p11811_p4 = pnand %p11809_p2, %p12556_p6 }
  0x9e   : > { %p11818_p10 = por %p11817_p9, %p11816_p8 }
  0x9f   : > { %p11812_p7 = pneg %p11811_p4 }
  0xa1   : > { %p11819_p11 = pnand %p11818_p10, %p11812_p7 }
  0xa3   : > { %11822 = shalt.err (!%p11819_p11)
}
  0xa4   : > { %s14988_s9 = sld [smem:[#allocation60_spill]]  ;;  %s12310_s3 = smov [#allocation25]  }
  0xa5   : > { %s1001_s7 = sshll.u32 %s12310_s3, 4  ;;  %s12311_s10 = smov [#allocation28]   ;;  %s1002_s7 = int_to_ptr.vmem [resolvable:$true] %s1001_s7 }
  0xa6   : > { %s1029_s16 = sshll.u32 %s12311_s10, 4  ;;  %s11834_s13 = scalar_lea.vmem %s1002_s7, 512  ;;  %s1030_s16 = int_to_ptr.vmem [resolvable:$true] %s1029_s16 }
  0xa7   : > { %p11835_p12 = scmp.ne.s32.totalorder %s1002_s7, %s11834_s13  ;;  %p11842_p13 = scmp.lt.s32.totalorder %s1002_s7, %s1002_s7 }
  0xa8   : > { %p11843_p3 = scmp.lt.s32.totalorder %s11834_s13, %s11834_s13 }
  0xa9   : > { %p11837_p0 = pnand %p11835_p12, %p12556_p6 }
  0xaa   : > { %10348 = dma.hbm_to_vmem [thread:$0]  (!%p12546_p5), %s14988_s9, 16, %s978_s15, [#allocation23]  }
  0xab   : > { %p11838_p1 = pneg %p11837_p0  ;;  %p11844_p2 = por %p11843_p3, %p11842_p13 }
  0xad   : > { %p11845_p4 = pnand %p11844_p2, %p11838_p1 }
  0xaf   : > { %11848 = shalt.err (!%p11845_p4)
}
  0xb0   : > { %s14932_s22 = smov 64   ;;  %s14989_s5 = sld [smem:[#allocation63_spill]] }
  0xb1   : > { %s14934_s15 = smov 4   ;;  %s11860_s18 = scalar_lea.vmem %s1030_s16, 16 }
  0xb2   : > { %p11861_p7 = scmp.ne.s32.totalorder %s1030_s16, %s11860_s18  ;;  %s11867_s23 = scalar_lea.vmem %s1030_s16, 32 }
  0xb3   : > { %p11868_p10 = scmp.lt.s32.totalorder %s1030_s16, %s1030_s16  ;;  %p11869_p11 = scmp.lt.s32.totalorder %s11867_s23, %s11860_s18 }
  0xb4   : > { %p11863_p8 = pnand %p11861_p7, %p12556_p6 }
  0xb5   : > { %p11870_p12 = por %p11869_p11, %p11868_p10 }
  0xb6   : > { %10354 = dma.hbm_to_vmem [thread:$0]  (!%p12546_p5), %s14989_s5, 512, %s1002_s7, [#allocation26], %s14932_s22, %s14932_s22, %s14934_s15  }
  0xb7   : > { %p11864_p9 = pneg %p11863_p8 }
  0xb9   : > { %p11871_p0 = pnand %p11870_p12, %p11864_p9 }
  0xbb   : > { %11874 = shalt.err (!%p11871_p0)
}
  0xbc   : > { %10360 = dma.hbm_to_vmem [thread:$0]  (!%p12546_p5), %s12483_s17, 16, %s1030_s16, [#allocation29]  }
  0xbd   : > { %s12314_s3 = smov [#allocation31]   ;;  %s12315_s7 = smov [#allocation9]  }
  0xbe   : > { %s1053_s10 = sshll.u32 %s12314_s3, 4  ;;  %s863_s13 = sshll.u32 %s12315_s7, 4  ;;  %s1054_s10 = int_to_ptr.vmem [resolvable:$true] %s1053_s10  ;;  %s864_s13 = int_to_ptr.vmem [resolvable:$true] %s863_s13 }
  0xbf   : > { %s11886_s22 = scalar_lea.vmem %s1054_s10, 16  ;;  %s11893_s15 = scalar_lea.vmem %s1054_s10, 32 }
  0xc0   : > { %p11887_p1 = scmp.ne.s32.totalorder %s1054_s10, %s11886_s22  ;;  %p11894_p2 = scmp.lt.s32.totalorder %s1054_s10, %s1054_s10 }
  0xc1   : > { %p11895_p4 = scmp.lt.s32.totalorder %s11893_s15, %s11886_s22 }
  0xc2   : > { %p11889_p13 = pnand %p11887_p1, %p12556_p6 }
  0xc3   : > { %p11896_p7 = por %p11895_p4, %p11894_p2 }
  0xc4   : > { %p11890_p3 = pneg %p11889_p13 }
  0xc6   : > { %p11897_p8 = pnand %p11896_p7, %p11890_p3 }
  0xc8   : > { %11900 = shalt.err (!%p11897_p8)
}
  0xc9   : > { %10366 = dma.hbm_to_vmem [thread:$0]  (!%p12546_p5), %s12493_s29, 16, %s1054_s10, [#allocation32]  }
  0xca   : > { %s11912_s16 = scalar_lea.vmem %s864_s13, 512  ;;  %p11920_p12 = scmp.lt.s32.totalorder %s864_s13, %s864_s13 }
  0xcb   : > { %p11913_p9 = scmp.ne.s32.totalorder %s864_s13, %s11912_s16  ;;  %p11921_p0 = scmp.lt.s32.totalorder %s11912_s16, %s11912_s16 }
  0xcd   : > { %p11915_p10 = pnand %p11913_p9, %p12556_p6  ;;  %p11922_p1 = por %p11921_p0, %p11920_p12 }
  0xcf   : > { %p11916_p11 = pneg %p11915_p10 }
  0xd1   : > { %p11923_p13 = pnand %p11922_p1, %p11916_p11 }
  0xd3   : > { %11926 = shalt.err (!%p11923_p13)
}
  0xd4   : > { %s14990_s22 = smov 4   ;;  %s14991_s15 = smov 64  }
  0xd5   : > { %10321 = dma.hbm_to_vmem [thread:$0]  (!%p12546_p5), %s12398_s19, 512, %s864_s13, [#allocation8], %s14991_s15, %s14991_s15, %s14990_s22  }
  0xd6   : > { %s12316_s18 = smov [#allocation12]  }
  0xd7   : > { %s887_s23 = sshll.u32 %s12316_s18, 4  ;;  %s888_s23 = int_to_ptr.vmem [resolvable:$true] %s887_s23 }
  0xd8   : > { %s11938_s3 = scalar_lea.vmem %s888_s23, 32768  ;;  %p11946_p7 = scmp.lt.s32.totalorder %s888_s23, %s888_s23 }
  0xd9   : > { %p11939_p3 = scmp.ne.s32.totalorder %s888_s23, %s11938_s3  ;;  %p11947_p8 = scmp.lt.s32.totalorder %s11938_s3, %s11938_s3 }
  0xdb   : > { %p11941_p2 = pnand %p11939_p3, %p12556_p6  ;;  %p11948_p9 = por %p11947_p8, %p11946_p7 }
  0xdd   : > { %p11942_p4 = pneg %p11941_p2 }
  0xdf   : > { %p11949_p10 = pnand %p11948_p9, %p11942_p4 }
  0xe1   : > { %11952 = shalt.err (!%p11949_p10)
}
  0xe2   : > { %s12317_s10 = smov 128   ;;  %s12318_s7 = smov 8  }
  0xe3   : > { %10327 = dma.hbm_to_vmem [thread:$0]  (!%p12546_p5), %s12408_s30, 32768, %s888_s23, [#allocation11], %s12317_s10, %s12317_s10, %s12318_s7  }
  0xe4   : > { %s12319_s13 = smov [#allocation15]   ;;  %s12320_s18 = smov [#allocation18]  }
  0xe5   : > { %s911_s16 = sshll.u32 %s12319_s13, 4  ;;  %s939_s5 = sshll.u32 %s12320_s18, 4  ;;  %s912_s16 = int_to_ptr.vmem [resolvable:$true] %s911_s16  ;;  %s940_s5 = int_to_ptr.vmem [resolvable:$true] %s939_s5 }
  0xe6   : > { %s11964_s6 = scalar_lea.vmem %s912_s16, 2048  ;;  %p11972_p1 = scmp.lt.s32.totalorder %s912_s16, %s912_s16 }
  0xe7   : > { %p11965_p11 = scmp.ne.s32.totalorder %s912_s16, %s11964_s6  ;;  %p11973_p13 = scmp.lt.s32.totalorder %s11964_s6, %s11964_s6 }
  0xe9   : > { %p11967_p12 = pnand %p11965_p11, %p12556_p6  ;;  %p11974_p3 = por %p11973_p13, %p11972_p1 }
  0xeb   : > { %p11968_p0 = pneg %p11967_p12 }
  0xed   : > { %p11975_p2 = pnand %p11974_p3, %p11968_p0 }
  0xef   : > { %11978 = shalt.err (!%p11975_p2)
}
  0xf0   : > { %s14992_s12 = sld [smem:[#allocation56_spill]]  ;;  %s11990_s23 = scalar_lea.vmem %s940_s5, 32 }
  0xf1   : > { %p11991_p4 = scmp.ne.s32.totalorder %s940_s5, %s11990_s23  ;;  %p11998_p9 = scmp.lt.s32.totalorder %s940_s5, %s940_s5 }
  0xf2   : > { %p11999_p10 = scmp.lt.s32.totalorder %s11990_s23, %s11990_s23 }
  0xf3   : > { %p11993_p7 = pnand %p11991_p4, %p12556_p6 }
  0xf4   : > { %p12000_p11 = por %p11999_p10, %p11998_p9 }
  0xf5   : > { %p11994_p8 = pneg %p11993_p7 }
  0xf6   : > { %10333 = dma.hbm_to_vmem [thread:$0]  (!%p12546_p5), %s14992_s12, 2048, %s912_s16, [#allocation14], %s14991_s15, %s14991_s15, %s14990_s22  }
  0xf7   : > { %p12001_p12 = pnand %p12000_p11, %p11994_p8 }
  0xf9   : > { %12004 = shalt.err (!%p12001_p12)
}
  0xfa   : > { %s14993_s4 = sld [smem:[#allocation58_spill]]  ;;  %s12321_s6 = smov [#allocation21]  }
  0xfb   : > { %s963_s3 = sshll.u32 %s12321_s6, 4  ;;  %s12322_s10 = smov [#allocation24]   ;;  %s964_s3 = int_to_ptr.vmem [resolvable:$true] %s963_s3 }
  0xfc   : > { %s991_s7 = sshll.u32 %s12322_s10, 4  ;;  %s12016_s13 = scalar_lea.vmem %s964_s3, 512  ;;  %s992_s7 = int_to_ptr.vmem [resolvable:$true] %s991_s7 }
  0xfd   : > { %p12017_p0 = scmp.ne.s32.totalorder %s964_s3, %s12016_s13  ;;  %p12024_p3 = scmp.lt.s32.totalorder %s964_s3, %s964_s3 }
  0xfe   : > { %p12025_p2 = scmp.lt.s32.totalorder %s12016_s13, %s12016_s13 }
  0xff   : > { %p12019_p1 = pnand %p12017_p0, %p12556_p6 }
 0x100   : > { %10339 = dma.hbm_to_vmem [thread:$0]  (!%p12546_p5), %s14993_s4, 32, %s940_s5, [#allocation17]  }
 0x101   : > { %p12020_p13 = pneg %p12019_p1  ;;  %p12026_p4 = por %p12025_p2, %p12024_p3 }
 0x103   : > { %p12027_p7 = pnand %p12026_p4, %p12020_p13 }
 0x105   : > { %12030 = shalt.err (!%p12027_p7)
}
 0x106   : > { %10345 = dma.hbm_to_vmem [thread:$0]  (!%p12546_p5), %s12448_s27, 512, %s964_s3, [#allocation20], %s14991_s15, %s14991_s15, %s14990_s22  }
 0x107   : > { %s12042_s5 = scalar_lea.vmem %s992_s7, 16  ;;  %s12049_s16 = scalar_lea.vmem %s992_s7, 32 }
 0x108   : > { %p12043_p8 = scmp.ne.s32.totalorder %s992_s7, %s12042_s5  ;;  %p12050_p11 = scmp.lt.s32.totalorder %s992_s7, %s992_s7 }
 0x109   : > { %p12051_p12 = scmp.lt.s32.totalorder %s12049_s16, %s12042_s5 }
 0x10a   : > { %p12045_p9 = pnand %p12043_p8, %p12556_p6 }
 0x10b   : > { %p12052_p0 = por %p12051_p12, %p12050_p11 }
 0x10c   : > { %p12046_p10 = pneg %p12045_p9 }
 0x10e   : > { %p12053_p1 = pnand %p12052_p0, %p12046_p10 }
 0x110   : > { %12056 = shalt.err (!%p12053_p1)
}
 0x111   : > { %s14994_s18 = sld [smem:[#allocation62_spill]]  ;;  %s12323_s23 = smov [#allocation27]  }
 0x112   : > { %s1015_s6 = sshll.u32 %s12323_s23, 4  ;;  %s12324_s10 = smov [#allocation30]   ;;  %s1016_s6 = int_to_ptr.vmem [resolvable:$true] %s1015_s6 }
 0x113   : > { %s1039_s3 = sshll.u32 %s12324_s10, 4  ;;  %s12068_s13 = scalar_lea.vmem %s1016_s6, 16  ;;  %s1040_s3 = int_to_ptr.vmem [resolvable:$true] %s1039_s3 }
 0x114   : > { %p12069_p13 = scmp.ne.s32.totalorder %s1016_s6, %s12068_s13  ;;  %s12075_s5 = scalar_lea.vmem %s1016_s6, 32 }
 0x115   : > { %p12076_p4 = scmp.lt.s32.totalorder %s1016_s6, %s1016_s6  ;;  %p12077_p7 = scmp.lt.s32.totalorder %s12075_s5, %s12068_s13 }
 0x116   : > { %p12071_p3 = pnand %p12069_p13, %p12556_p6 }
 0x117   : > { %10351 = dma.hbm_to_vmem [thread:$0]  (!%p12546_p5), %s14994_s18, 16, %s992_s7, [#allocation23]  }
 0x118   : > { %p12072_p2 = pneg %p12071_p3  ;;  %p12078_p8 = por %p12077_p7, %p12076_p4 }
 0x11a   : > { %p12079_p9 = pnand %p12078_p8, %p12072_p2 }
 0x11c   : > { %12082 = shalt.err (!%p12079_p9)
}
 0x11d   : > { %s14995_s7 = sld [smem:[#allocation64_spill]]  ;;  %s12094_s16 = scalar_lea.vmem %s1040_s3, 1024 }
 0x11e   : > { %p12095_p10 = scmp.ne.s32.totalorder %s1040_s3, %s12094_s16  ;;  %p12102_p0 = scmp.lt.s32.totalorder %s1040_s3, %s1040_s3 }
 0x11f   : > { %p12103_p1 = scmp.lt.s32.totalorder %s12094_s16, %s12094_s16 }
 0x120   : > { %p12097_p11 = pnand %p12095_p10, %p12556_p6 }
 0x121   : > { %p12104_p13 = por %p12103_p1, %p12102_p0 }
 0x122   : > { %p12098_p12 = pneg %p12097_p11 }
 0x123   : > { %10357 = dma.hbm_to_vmem [thread:$0]  (!%p12546_p5), %s14995_s7, 16, %s1016_s6, [#allocation26]  }
 0x124   : > { %p12105_p3 = pnand %p12104_p13, %p12098_p12 }
 0x126   : > { %12108 = shalt.err (!%p12105_p3)
}
 0x127   : > { %s14996_s18 = sld [smem:[#allocation66_spill]]  ;;  %s12325_s23 = smov [#allocation33]  }
 0x128   : > { %s1067_s6 = sshll.u32 %s12325_s23, 4  ;;  %s1068_s6 = int_to_ptr.vmem [resolvable:$true] %s1067_s6 }
 0x129   : > { %s12120_s10 = scalar_lea.vmem %s1068_s6, 16  ;;  %s12127_s13 = scalar_lea.vmem %s1068_s6, 32 }
 0x12a   : > { %p12121_p2 = scmp.ne.s32.totalorder %s1068_s6, %s12120_s10  ;;  %p12128_p8 = scmp.lt.s32.totalorder %s1068_s6, %s1068_s6 }
 0x12b   : > { %p12129_p9 = scmp.lt.s32.totalorder %s12127_s13, %s12120_s10 }
 0x12c   : > { %p12123_p4 = pnand %p12121_p2, %p12556_p6 }
 0x12d   : > { %10363 = dma.hbm_to_vmem [thread:$0]  (!%p12546_p5), %s14996_s18, 1024, %s1040_s3, [#allocation29], %s14991_s15, %s14991_s15, %s14990_s22  }
 0x12e   : > { %p12124_p7 = pneg %p12123_p4  ;;  %p12130_p10 = por %p12129_p9, %p12128_p8 }
 0x130   : > { %p12131_p11 = pnand %p12130_p10, %p12124_p7 }
 0x132   : > { %12134 = shalt.err (!%p12131_p11)
}
 0x133   : > { %s14997_s8 = sld [smem:[#allocation68_spill]]  ;;  %s12684_s22 = sadd.s32 1, %s12269_s0  }
 0x134   : > { %s14998_s21 = sld [smem:[#allocation48_spill]]  ;;  %s146_s26 = ssub.s32 %s12269_s0, %s12684_s22 }
 0x135   : > { %s149_s15 = sadd.s32 1, %s12265_s2  ;;  %p147_p6 = scmp.eq.s32.totalorder %s146_s26, 0 }
 0x136   : > { %s14999_s3 = sld [smem:[#allocation49_spill]]  ;;  %p156_p12 = scmp.ne.s32.totalorder %s12265_s2, %s12261_s1 }
 0x137   : > { %p157_p0 = scmp.eq.s32.totalorder %s12269_s0, 0  ;;  %p162_p1 = scmp.ne.s32.totalorder %s12261_s1, %s12257_s28 }
 0x138   : > { %s12695_s5 = scalar_select %p147_p6, %s12265_s2, %s149_s15  }
 0x139   : > { %10369 = dma.hbm_to_vmem [thread:$0]  (!%p12546_p5), %s14997_s8, 16, %s1068_s6, [#allocation32]  }
 0x13a   : > { %p158_p13 = por %p157_p0, %p156_p12  ;;  %p15000_p3 = scmp.eq.s32.totalorder %s12531_s11, 0 }
 0x13b   : > { %p10396_p5 = scmp.lt.s32.totalorder %s12269_s0, 2  ;;  %s1096_s16 = sand.u32 1, %s12265_s2  }
 0x13c   : > { %p12699_p2 = por %p15000_p3, %p162_p1  ;;  %s12705_s18 = sshll.u32 %s1096_s16, 3 }
 0x13d   : > { %s9356_s23 = sshll.u32 %s12269_s0, 7  ;;  %s1100_s28 = scalar_lea.vmem [#allocation2], %s12705_s18 }
 0x13e   : > { %s15001_s7 = scalar_select %p12699_p2, 1, 0 }
 0x13f   : > { %s12709_s6 = scalar_lea.hbm %s14998_s21, %s9356_s23  ;;  %s1107_s10 = sshll.u32 %s1100_s28, 4  ;;  %s12712_s10 = int_to_ptr.vmem [resolvable:$true] %s1107_s10 }
 0x140   : > { %p12714_p4 = pnand %p10396_p5, %p158_p13  ;;  %s12719_s26 = scalar_lea.hbm %s14999_s3, %s9356_s23 }
 0x141   : > { %s1097_s4 = scalar_lea.sflag [#allocation3], %s1096_s16  ;;  %s12135_s8 = scalar_lea.hbm %s12709_s6, 128 }
 0x142   : > { %p12136_p7 = scmp.ne.s32.totalorder %s12709_s6, %s12135_s8  ;;  %p12137_p8 = pneg %p12714_p4 }
 0x143   : > { %s12140_s28 = scalar_lea.hbm %s14998_s21, 256  ;;  %p12141_p11 = scmp.lt.s32.totalorder %s12709_s6, %s14998_s21 }
 0x144   : > { %p12138_p9 = pnand %p12137_p8, %p12136_p7  ;;  %p12142_p6 = scmp.lt.s32.totalorder %s12140_s28, %s12135_s8 }
 0x146   : > { %p12139_p10 = pneg %p12138_p9  ;;  %p12143_p12 = por %p12142_p6, %p12141_p11 }
 0x148   : > { %p12144_p0 = pnand %p12143_p12, %p12139_p10 }
 0x14a   : > { %12147 = shalt.err (!%p12144_p0)
}
 0x14b   : > { %s12148_s23 = scalar_lea.vmem %s12712_s10, 128  ;;  %s12326_s16 = smov [#allocation2]  }
 0x14c   : > { %p12149_p1 = scmp.ne.s32.totalorder %s12712_s10, %s12148_s23  ;;  %s12153_s15 = sshll.u32 %s12326_s16, 4  ;;  %s12154_s15 = int_to_ptr.vmem [resolvable:$false] %s12153_s15 }
 0x14d   : > { %s12155_s9 = scalar_lea.vmem %s12154_s15, 256  ;;  %p12156_p5 = scmp.lt.s32.totalorder %s12712_s10, %s12154_s15 }
 0x14e   : > { %p12151_p13 = pnand %p12149_p1, %p12137_p8  ;;  %p12157_p7 = scmp.lt.s32.totalorder %s12155_s9, %s12148_s23 }
 0x150   : > { %p12152_p3 = pneg %p12151_p13  ;;  %p12158_p9 = por %p12157_p7, %p12156_p5 }
 0x152   : > { %p12159_p11 = pnand %p12158_p9, %p12152_p3 }
 0x154   : > { %12162 = shalt.err (!%p12159_p11)
}
 0x155   : > { %10373 = dma.hbm_to_vmem [thread:$0]  (!%p12714_p4), %s12709_s6, 128, %s12712_s10, %s1097_s4  }
 0x156   : > { %s1118_s8 = scalar_lea.vmem [#allocation4], %s12705_s18  ;;  %s15003_s9 = sand.u32 1, %s12269_s0  }
 0x157   : > { %s1125_s28 = sshll.u32 %s1118_s8, 4  ;;  %s1115_s15 = scalar_lea.sflag [#allocation5], %s15003_s9  ;;  %s1126_s28 = int_to_ptr.vmem [resolvable:$true] %s1125_s28 }
 0x158   : > { %s12163_s23 = scalar_lea.hbm %s12719_s26, 128  ;;  %s12168_s16 = scalar_lea.hbm %s14999_s3, 256 }
 0x159   : > { %p12164_p10 = scmp.ne.s32.totalorder %s12719_s26, %s12163_s23  ;;  %p12169_p0 = scmp.lt.s32.totalorder %s12719_s26, %s14999_s3 }
 0x15a   : > { %p12170_p1 = scmp.lt.s32.totalorder %s12168_s16, %s12163_s23 }
 0x15b   : > { %p12166_p6 = pnand %p12164_p10, %p12137_p8 }
 0x15c   : > { %p12171_p13 = por %p12170_p1, %p12169_p0 }
 0x15d   : > { %p12167_p12 = pneg %p12166_p6 }
 0x15f   : > { %p12172_p3 = pnand %p12171_p13, %p12167_p12 }
 0x161   : > { %12175 = shalt.err (!%p12172_p3)
}
 0x162   : > { %s12176_s12 = scalar_lea.vmem %s1126_s28, 128  ;;  %s12327_s4 = smov [#allocation4]  }
 0x163   : > { %p12177_p5 = scmp.ne.s32.totalorder %s1126_s28, %s12176_s12  ;;  %s12181_s0 = sshll.u32 %s12327_s4, 4  ;;  %s12182_s0 = int_to_ptr.vmem [resolvable:$false] %s12181_s0 }
 0x164   : > { %s12183_s18 = scalar_lea.vmem %s12182_s0, 256  ;;  %p12184_p11 = scmp.lt.s32.totalorder %s1126_s28, %s12182_s0 }
 0x165   : > { %p12179_p7 = pnand %p12177_p5, %p12137_p8  ;;  %p12185_p10 = scmp.lt.s32.totalorder %s12183_s18, %s12176_s12 }
 0x167   : > { %p12180_p9 = pneg %p12179_p7  ;;  %p12186_p6 = por %p12185_p10, %p12184_p11 }
 0x169   : > { %p12187_p2 = pnand %p12186_p6, %p12180_p9 }
 0x16b   : > { %12190 = shalt.err (!%p12187_p2)
}
 0x16c   : > { %10376 = dma.hbm_to_vmem [thread:$0]  (!%p12714_p4), %s12719_s26, 128, %s1126_s28, %s1115_s15  }
 0x16d   : > { %s15004_s6 = sld [smem:[#allocation70_spill]] }
 0x173   : > { %p15005_p12 = scmp.ne.s32.totalorder %s15004_s6, 0 }
 0x175   : > { %1148 = sbr.rel (%p15005_p12) target bundleno = 3452 (0xd7c), region = 148 }
 0x17a   : > { %s1150_s10 = sand.u32 1, %s12261_s1   ;;  %p15006_p8 = scmp.ne.s32.totalorder %s15001_s7, 0 }
 0x17b   : > { %s12762_s8 = sshll.u32 %s1150_s10, 3  ;;  %s1151_s9 = scalar_lea.sflag [#allocation3], %s1150_s10 }
 0x17c   : > { %s1154_s23 = scalar_lea.vmem [#allocation2], %s12762_s8 }
 0x17d   : > { %12208 = dma.done.wait (%p15006_p8), %s1151_s9, 128  }
 0x17e   : > { %12210 = vsyncadd (%p15006_p8), %s1151_s9, 4294967168  ;;  %s1159_s12 = sand.u32 1, %s12531_s11   ;;  %s12771_s26 = scalar_lea.vmem [#allocation4], %s12762_s8 }
 0x17f   : > { %s1160_s13 = scalar_lea.sflag [#allocation5], %s1159_s12 }
 0x180   : > { %12212 = dma.done.wait (%p15006_p8), %s1160_s13, 128  }
 0x181   : > { %12214 = vsyncadd (%p15006_p8), %s1160_s13, 4294967168  ;;  %p15007_p2 = scmp.eq.s32.totalorder %s12531_s11, 0 }
 0x183   : > { %12216 = dma.done.wait (%p15007_p2), [#allocation5], 16   ;;  %p15008_p4 = pmov %p15007_p2 }
 0x184   : > { %p15009_p0 = pmov %p15007_p2 }
 0x185   : > { %12218 = vsyncadd (%p15008_p4), [#allocation5], 4294967280 }
 0x186   : > { %12220 = dma.done.wait (%p15009_p0), [#allocation8], 528   ;;  %p15010_p1 = pmov %p15009_p0 }
 0x187   : > { %p15011_p13 = pmov %p15009_p0 }
 0x188   : > { %12222 = vsyncadd (%p15010_p1), [#allocation8], 4294966768 }
 0x189   : > { %12224 = dma.done.wait (%p15011_p13), [#allocation11], 32784   ;;  %p15012_p3 = pmov %p15009_p0 }
 0x18a   : > { %p15013_p5 = pmov %p15009_p0 }
 0x18b   : > { %12226 = vsyncadd (%p15012_p3), [#allocation11], 4294934512 }
 0x18c   : > { %12228 = dma.done.wait (%p15013_p5), [#allocation14], 2080   ;;  %p15014_p7 = pmov %p15009_p0 }
 0x18d   : > { %p15015_p9 = pmov %p15009_p0 }
 0x18e   : > { %12230 = vsyncadd (%p15014_p7), [#allocation14], 4294965216 }
 0x18f   : > { %12232 = dma.done.wait (%p15015_p9), [#allocation17], 48   ;;  %p15016_p11 = pmov %p15009_p0 }
 0x190   : > { %p15017_p10 = pmov %p15009_p0 }
 0x191   : > { %12234 = vsyncadd (%p15016_p11), [#allocation17], 4294967248 }
 0x192   : > { %12236 = dma.done.wait (%p15017_p10), [#allocation20], 528   ;;  %p15018_p6 = pmov %p15009_p0 }
 0x193   : > { %p15019_p12 = pmov %p15009_p0 }
 0x194   : > { %12238 = vsyncadd (%p15018_p6), [#allocation20], 4294966768 }
 0x195   : > { %12240 = dma.done.wait (%p15019_p12), [#allocation23], 32   ;;  %p15020_p8 = pmov %p15009_p0 }
 0x196   : > { %p15021_p2 = pmov %p15009_p0 }
 0x197   : > { %12242 = vsyncadd (%p15020_p8), [#allocation23], 4294967264 }
 0x198   : > { %12244 = dma.done.wait (%p15021_p2), [#allocation26], 528   ;;  %p15022_p4 = pmov %p15009_p0 }
 0x19a   : > { %12246 = vsyncadd (%p15022_p4), [#allocation26], 4294966768 }
 0x19b   : > { %12248 = dma.done.wait (%p15009_p0), [#allocation29], 1040   ;;  %p15023_p1 = pmov %p15009_p0 }
 0x19c   : > { %p15024_p13 = pmov %p15009_p0 }
 0x19d   : > { %12250 = vsyncadd (%p15023_p1), [#allocation29], 4294966256 }
 0x19e   : > { %12252 = dma.done.wait (%p15024_p13), [#allocation32], 32   ;;  %p15025_p3 = pmov %p15009_p0 }
 0x19f   : > { %v14937_v0 = vmov 0.0   ;;  %vm12329_vm0 = vmmov 0   ;;  %v1369_v1 = vld [vmem:[%s12771_s26] sm:$0xff]  ;;  %s12330_s7 = smov 64   ;;  %s15026_s28 = sld [smem:[#allocation67_spill]]  ;;  %v10516_v3 = vld [vmem:[#allocation30 + $0x30] sm:$0xff]  }
 0x1a0   : > { %12254 = vsyncadd (%p15025_p3), [#allocation32], 4294967264  ;;  %10107 = vmatprep.subr.bf16.mxu0 %v14937_v0  ;;  %10123 = vmatprep.mubr.msk.bf16.mxu0 %vm12329_vm0, %v14937_v0  ;;  %v10515_v2 = vld [vmem:[#allocation30 + $0x38] sm:$0xff]   ;;  %v10517_v4 = vld [vmem:[#allocation30 + $0x28] sm:$0xff]   ;;  %s15028_s16 = sld [smem:[#allocation52_spill]]  ;;  %vm1374_vm1 = vcmask 523264  }
 0x1a1   : > { %10127 = vmatprep.subr.bf16.mxu1 %v14937_v0  ;;  %10143 = vmatprep.mubr.msk.bf16.mxu1 %vm12329_vm0, %v14937_v0  ;;  %v10518_v5 = vld [vmem:[#allocation30 + $0x20] sm:$0xff]   ;;  %v10519_v6 = vld [vmem:[#allocation30 + $0x18] sm:$0xff]   ;;  %v10520_v7 = vld [vmem:[#allocation30 + $0x10] sm:$0xff]   ;;  %s15029_s4 = sld [smem:[#allocation46_spill]]  ;;  %s9381_s0 = sshll.u32 %s12531_s11, 3  ;;  %vm3564_vm2 = vcmask 784896  }
 0x1a2   : > { %1371 = vrot.lane.b32.xlu0 %v1369_v1, %s12330_s7  ;;  %10108 = vmatpush3.bf16.msra.mxu0 %v10515_v2  ;;  %v10521_v8 = vld [vmem:[#allocation30 + $0x8] sm:$0xff]   ;;  %v10522_v10 = vld [vmem:[#allocation30] sm:$0xff]   ;;  %p1344_p5 = scmp.lt.s32.totalorder %s9381_s0, 15  ;;  %s12331_s10 = smov 96   ;;  %vm3749_vm3 = vcmask 258048   ;;  %vm4094_vm4 = vcmask 1041409  }
 0x1a3   : > { %10109 = vmatprep.subr.bf16.mxu0 %v14937_v0  ;;  %v1368_v18 = vld [vmem:[%s1154_s23] sm:$0xff]  ;;  %s12332_s9 = smov 32   ;;  %vm4096_vm5 = vcmask 1042434   ;;  %vm4098_vm6 = vcmask 1043459   ;;  %vm4100_vm7 = vcmask 1044484   ;;  %vm4102_vm8 = vcmask 1045509  }
 0x1a4   : > { %s15145_s0 = smov (!%p1344_p5, %s9381_s0), 15  ;;  %vm4104_vm9 = vcmask 1046534   ;;  %s15043_s12 = sld [smem:[#allocation54_spill]]  ;;  %vm4106_vm10 = vcmask 1047559   ;;  %vm14957_vm11 = vcmask 261120   ;;  %vm14956_vm12 = vcmask 785408  }
 0x1a5   : > { %s15027_s15 = smov %s15026_s28  ;;  %v10550_v9 = vld [vmem:[%s15026_s28 + $0x38] sm:$0xff]   ;;  %s10231_s18 = smul.u32 24, %s15145_s0 }
 0x1a6   : > { %10110 = vmatpush3.bf16.msra.mxu0 %v10516_v3  ;;  %10128 = vmatpush3.bf16.msra.mxu1 %v10550_v9  ;;  %v10554_v11 = vld [vmem:[%s15027_s15 + $0x30] sm:$0xff]   ;;  %v10558_v13 = vld [vmem:[%s15027_s15 + $0x28] sm:$0xff]   ;;  %v10562_v14 = vld [vmem:[%s15027_s15 + $0x20] sm:$0xff]   ;;  %s15057_s8 = sld [smem:[#allocation47_spill]]  ;;  %p1350_p7 = scmp.lt.s32.totalorder %s12531_s11, 1 }
 0x1a7   : > { %10111 = vmatprep.subr.bf16.mxu0 %v14937_v0  ;;  %10129 = vmatprep.subr.bf16.mxu1 %v14937_v0  ;;  %v10525_v12 = vld [vmem:[%s15028_s16 + $0xe4] ss:$16 sps:$4 sm:$0xff]   ;;  %v10566_v15 = vld [vmem:[%s15027_s15 + $0x18] sm:$0xff]   ;;  %v10574_v17 = vld [vmem:[%s15027_s15 + $0x8] sm:$0xff]   ;;  %s12884_s6 = scalar_lea.vmem %s15029_s4, %s10231_s18  ;;  %s15128_s4 = sld [smem:[#allocation50_spill]] }
 0x1a8   : > { %v10570_v16 = vld [vmem:[%s15027_s15 + $0x10] sm:$0xff]   ;;  %v10578_v53 = vld [vmem:[%s15027_s15] sm:$0xff]   ;;  %s15147_s11 = smov (!%p1350_p7, %s12531_s11), 1  ;;  %s12335_s18 = smov 126  }
 0x1a9   : > { %v10523_v19 = vld [vmem:[%s15028_s16 + $0xe0] ss:$16 sps:$4 sm:$0xff]   ;;  %v10528_v21 = vld [vmem:[%s15028_s16 + $0xc4] ss:$16 sps:$4 sm:$0xff]  }
 0x1aa   : > { %10112 = vmatpush3.bf16.msra.mxu0 %v10517_v4  ;;  %10130 = vmatpush3.bf16.msra.mxu1 %v10554_v11  ;;  %v10526_v24 = vld [vmem:[%s15028_s16 + $0xc0] ss:$16 sps:$4 sm:$0xff]   ;;  %v10531_v25 = vld [vmem:[%s15028_s16 + $0xa4] ss:$16 sps:$4 sm:$0xff]  }
 0x1ab   : > { %10113 = vmatprep.subr.bf16.mxu0 %v14937_v0  ;;  %10131 = vmatprep.subr.bf16.mxu1 %v14937_v0  ;;  %v10529_v26 = vld [vmem:[%s15028_s16 + $0xa0] ss:$16 sps:$4 sm:$0xff]   ;;  %v10534_v27 = vld [vmem:[%s15028_s16 + $0x84] ss:$16 sps:$4 sm:$0xff]  }
 0x1ac   : > { %v10532_v28 = vld [vmem:[%s15028_s16 + $0x80] ss:$16 sps:$4 sm:$0xff]   ;;  %v10537_v29 = vld [vmem:[%s15028_s16 + $0x64] ss:$16 sps:$4 sm:$0xff]  }
 0x1ad   : > { %v10535_v30 = vld [vmem:[%s15028_s16 + $0x60] ss:$16 sps:$4 sm:$0xff]   ;;  %v10540_v31 = vld [vmem:[%s15028_s16 + $0x44] ss:$16 sps:$4 sm:$0xff]  }
 0x1ae   : > { %10114 = vmatpush3.bf16.msra.mxu0 %v10518_v5  ;;  %10132 = vmatpush3.bf16.msra.mxu1 %v10558_v13  ;;  %v10538_v32 = vld [vmem:[%s15028_s16 + $0x40] ss:$16 sps:$4 sm:$0xff]   ;;  %v10543_v33 = vld [vmem:[%s15028_s16 + $0x24] ss:$16 sps:$4 sm:$0xff]  }
 0x1af   : > { %10115 = vmatprep.subr.bf16.mxu0 %v14937_v0  ;;  %10133 = vmatprep.subr.bf16.mxu1 %v14937_v0  ;;  %v10541_v34 = vld [vmem:[%s15028_s16 + $0x20] ss:$16 sps:$4 sm:$0xff]   ;;  %v10546_v35 = vld [vmem:[%s15028_s16 + $0x4] ss:$16 sps:$4 sm:$0xff]  }
 0x1b0   : > { %v10544_v36 = vld [vmem:[%s15028_s16] ss:$16 sps:$4 sm:$0xff]   ;;  %v10549_v37 = vld [vmem:[%s15028_s16 + $0x1e4] ss:$16 sps:$4 sm:$0xff]  }
 0x1b1   : > { %v10547_v38 = vld [vmem:[%s15028_s16 + $0x1e0] ss:$16 sps:$4 sm:$0xff]   ;;  %v10553_v39 = vld [vmem:[%s15028_s16 + $0x1c4] ss:$16 sps:$4 sm:$0xff]  }
 0x1b2   : > { %10116 = vmatpush3.bf16.msra.mxu0 %v10519_v6  ;;  %10134 = vmatpush3.bf16.msra.mxu1 %v10562_v14  ;;  %v10551_v40 = vld [vmem:[%s15028_s16 + $0x1c0] ss:$16 sps:$4 sm:$0xff]   ;;  %v10557_v41 = vld [vmem:[%s15028_s16 + $0x1a4] ss:$16 sps:$4 sm:$0xff]  }
 0x1b3   : > { %10117 = vmatprep.subr.bf16.mxu0 %v14937_v0  ;;  %10135 = vmatprep.subr.bf16.mxu1 %v14937_v0  ;;  %v10555_v42 = vld [vmem:[%s15028_s16 + $0x1a0] ss:$16 sps:$4 sm:$0xff]   ;;  %v10561_v43 = vld [vmem:[%s15028_s16 + $0x184] ss:$16 sps:$4 sm:$0xff]  }
 0x1b4   : > { %v10559_v44 = vld [vmem:[%s15028_s16 + $0x180] ss:$16 sps:$4 sm:$0xff]   ;;  %v10565_v45 = vld [vmem:[%s15028_s16 + $0x164] ss:$16 sps:$4 sm:$0xff]  }
 0x1b5   : > { %v10563_v46 = vld [vmem:[%s15028_s16 + $0x160] ss:$16 sps:$4 sm:$0xff]   ;;  %v10569_v47 = vld [vmem:[%s15028_s16 + $0x144] ss:$16 sps:$4 sm:$0xff]  }
 0x1b6   : > { %10118 = vmatpush3.bf16.msra.mxu0 %v10520_v7  ;;  %10136 = vmatpush3.bf16.msra.mxu1 %v10566_v15  ;;  %v10567_v48 = vld [vmem:[%s15028_s16 + $0x140] ss:$16 sps:$4 sm:$0xff]   ;;  %v10573_v49 = vld [vmem:[%s15028_s16 + $0x124] ss:$16 sps:$4 sm:$0xff]  }
 0x1b7   : > { %10119 = vmatprep.subr.bf16.mxu0 %v14937_v0  ;;  %10137 = vmatprep.subr.bf16.mxu1 %v14937_v0  ;;  %v10571_v50 = vld [vmem:[%s15028_s16 + $0x120] ss:$16 sps:$4 sm:$0xff]   ;;  %v10577_v51 = vld [vmem:[%s15028_s16 + $0x104] ss:$16 sps:$4 sm:$0xff]  }
 0x1b8   : > { %v10575_v52 = vld [vmem:[%s15028_s16 + $0x100] ss:$16 sps:$4 sm:$0xff]   ;;  %v12887_v54 = vld [vmem:[%s12884_s6 + $0x4] ss:$24 sps:$4 sm:$0xff]   ;;  %v12916_v14 = vld [vmem:[%s12884_s6 + $0x34] ss:$24 sps:$4 sm:$0xff]  }
 0x1b9   : > { %v12890_v55 = vld [vmem:[%s12884_s6] ss:$24 sps:$4 sm:$0xff]   ;;  %v10584_v56 = vld [vmem:[%s15028_s16 + $0x2e4] ss:$16 sps:$4 sm:$0xff]  }
 0x1ba   : > { %10120 = vmatpush3.bf16.msra.mxu0 %v10521_v8  ;;  %10138 = vmatpush3.bf16.msra.mxu1 %v10570_v16  ;;  %v10585_v57 = vld [vmem:[%s15028_s16 + $0x4e0] ss:$16 sps:$4 sm:$0xff]   ;;  %v10587_v58 = vld [vmem:[%s15028_s16 + $0x4e4] ss:$16 sps:$4 sm:$0xff]  }
 0x1bb   : > { %10121 = vmatprep.subr.bf16.mxu0 %v14937_v0  ;;  %10139 = vmatprep.subr.bf16.mxu1 %v14937_v0  ;;  %v10591_v59 = vld [vmem:[%s15028_s16 + $0x4c0] ss:$16 sps:$4 sm:$0xff]   ;;  %v10593_v60 = vld [vmem:[%s15028_s16 + $0x4c4] ss:$16 sps:$4 sm:$0xff]  }
 0x1bc   : > { %v10597_v61 = vld [vmem:[%s15028_s16 + $0x4a0] ss:$16 sps:$4 sm:$0xff]   ;;  %v10599_v62 = vld [vmem:[%s15028_s16 + $0x4a4] ss:$16 sps:$4 sm:$0xff]  }
 0x1bd   : > { %v10603_v63 = vld [vmem:[%s15028_s16 + $0x480] ss:$16 sps:$4 sm:$0xff]   ;;  %v10605_v1 = vld [vmem:[%s15028_s16 + $0x484] ss:$16 sps:$4 sm:$0xff]  }
 0x1be   : > { %10122 = vmatpush3.bf16.msra.mxu0 %v10522_v10  ;;  %10140 = vmatpush3.bf16.msra.mxu1 %v10574_v17  ;;  %v10609_v2 = vld [vmem:[%s15028_s16 + $0x460] ss:$16 sps:$4 sm:$0xff]   ;;  %v10611_v3 = vld [vmem:[%s15028_s16 + $0x464] ss:$16 sps:$4 sm:$0xff]  }
 0x1bf   : > { %3021 = vmatprep.subr.bf16.mxu0 %v10525_v12  ;;  %10141 = vmatprep.subr.bf16.mxu1 %v14937_v0  ;;  %v10615_v4 = vld [vmem:[%s15028_s16 + $0x440] ss:$16 sps:$4 sm:$0xff]   ;;  %v10617_v5 = vld [vmem:[%s15028_s16 + $0x444] ss:$16 sps:$4 sm:$0xff]  }
 0x1c0   : > { %v10621_v6 = vld [vmem:[%s15028_s16 + $0x420] ss:$16 sps:$4 sm:$0xff]   ;;  %v10623_v7 = vld [vmem:[%s15028_s16 + $0x424] ss:$16 sps:$4 sm:$0xff]  }
 0x1c1   : > { %v10627_v8 = vld [vmem:[%s15028_s16 + $0x400] ss:$16 sps:$4 sm:$0xff]   ;;  %v10629_v9 = vld [vmem:[%s15028_s16 + $0x404] ss:$16 sps:$4 sm:$0xff]  }
 0x1c2   : > { %10142 = vmatpush3.bf16.msra.mxu1 %v10578_v53  ;;  %v10633_v10 = vld [vmem:[%s15028_s16 + $0x5e0] ss:$16 sps:$4 sm:$0xff]   ;;  %v10635_v11 = vld [vmem:[%s15028_s16 + $0x5e4] ss:$16 sps:$4 sm:$0xff]  }
 0x1c3   : > { %3094 = vmatprep.subr.bf16.mxu1 %v10584_v56  ;;  %v10639_v12 = vld [vmem:[%s15028_s16 + $0x5c0] ss:$16 sps:$4 sm:$0xff]   ;;  %v10641_v13 = vld [vmem:[%s15028_s16 + $0x5c4] ss:$16 sps:$4 sm:$0xff]  }
 0x1c4   : > { %v10647_v15 = vld [vmem:[%s15028_s16 + $0x5a0] ss:$16 sps:$4 sm:$0xff]   ;;  %v10649_v16 = vld [vmem:[%s15028_s16 + $0x5a4] ss:$16 sps:$4 sm:$0xff]  }
 0x1c5   : > { %v12921_v17 = vld [vmem:[%s12884_s6 + $0x30] ss:$24 sps:$4 sm:$0xff]   ;;  %v12993_v53 = vld [vmem:[%s12884_s6 + $0xa0] ss:$24 sps:$4 sm:$0xff]   ;;  %v10689_v56 = vld [vmem:[%s12884_s6 + $0xc] ss:$24 sps:$4 sm:$0xff]  }
 0x214   : > { %v1372_v20 = vpop.permute.xlu0 %1371 }
 0x215   : > { %v1375_v22 = vsel %vm1374_vm1, %v1368_v18, %v1372_v20  ;;  %v10654_v18 = vld [vmem:[%s15028_s16 + $0x580] ss:$16 sps:$4 sm:$0xff]   ;;  %v12928_v20 = vld [vmem:[%s12884_s6 + $0x64] ss:$24 sps:$4 sm:$0xff]  }
 0x216   : > { %v1376_v23 = vpack.c.bf16 %v1375_v22, %v1375_v22  ;;  %v10664_v22 = vld [vmem:[%s15028_s16 + $0x564] ss:$16 sps:$4 sm:$0xff]  }
 0x218   : > { %10124 = vmatmul.mubr.bf16.vlgmr.msra.gmra.mxu0 %v1376_v23  ;;  %v12933_v23 = vld [vmem:[%s12884_s6 + $0x60] ss:$24 sps:$4 sm:$0xff]  }
 0x219   : > { %3022 = vmatpush1.bf16.msra.mxu0 %v10523_v19  ;;  %3053 = vmatprep.mubr.bf16.mxu0 %v12887_v54  ;;  %v10656_v19 = vld [vmem:[%s15028_s16 + $0x584] ss:$16 sps:$4 sm:$0xff]  }
 0x21a   : > { %3023 = vmatprep.subr.bf16.mxu0 %v10528_v21  ;;  %v10662_v21 = vld [vmem:[%s15028_s16 + $0x560] ss:$16 sps:$4 sm:$0xff]  }
 0x21d   : > { %3024 = vmatpush1.bf16.msra.mxu0 %v10526_v24  ;;  %v10669_v24 = vld [vmem:[%s15028_s16 + $0x540] ss:$16 sps:$4 sm:$0xff]  }
 0x21e   : > { %3025 = vmatprep.subr.bf16.mxu0 %v10531_v25  ;;  %v10671_v25 = vld [vmem:[%s15028_s16 + $0x544] ss:$16 sps:$4 sm:$0xff]  }
 0x221   : > { %3026 = vmatpush1.bf16.msra.mxu0 %v10529_v26  ;;  %v12940_v26 = vld [vmem:[%s12884_s6 + $0x94] ss:$24 sps:$4 sm:$0xff]  }
 0x222   : > { %3027 = vmatprep.subr.bf16.mxu0 %v10534_v27  ;;  %v10677_v27 = vld [vmem:[%s15028_s16 + $0x520] ss:$16 sps:$4 sm:$0xff]  }
 0x225   : > { %3028 = vmatpush1.bf16.msra.mxu0 %v10532_v28  ;;  %v10679_v28 = vld [vmem:[%s15028_s16 + $0x524] ss:$16 sps:$4 sm:$0xff]  }
 0x226   : > { %3029 = vmatprep.subr.bf16.mxu0 %v10537_v29  ;;  %v12945_v29 = vld [vmem:[%s12884_s6 + $0x90] ss:$24 sps:$4 sm:$0xff]  }
 0x229   : > { %3030 = vmatpush1.bf16.msra.mxu0 %v10535_v30  ;;  %v10684_v30 = vld [vmem:[%s15028_s16 + $0x500] ss:$16 sps:$4 sm:$0xff]  }
 0x22a   : > { %3031 = vmatprep.subr.bf16.mxu0 %v10540_v31  ;;  %v10686_v31 = vld [vmem:[%s15028_s16 + $0x504] ss:$16 sps:$4 sm:$0xff]  }
 0x22d   : > { %3032 = vmatpush1.bf16.msra.mxu0 %v10538_v32  ;;  %v12952_v32 = vld [vmem:[%s12884_s6 + $0x14] ss:$24 sps:$4 sm:$0xff]  }
 0x22e   : > { %3033 = vmatprep.subr.bf16.mxu0 %v10543_v33  ;;  %v10698_v33 = vld [vmem:[%s15028_s16 + $0x2ec] ss:$16 sps:$4 sm:$0xff]  }
 0x231   : > { %3034 = vmatpush1.bf16.msra.mxu0 %v10541_v34  ;;  %v12956_v34 = vld [vmem:[%s12884_s6 + $0x10] ss:$24 sps:$4 sm:$0xff]  }
 0x232   : > { %3035 = vmatprep.subr.bf16.mxu0 %v10546_v35  ;;  %v10696_v35 = vld [vmem:[%s15028_s16 + $0x2e8] ss:$16 sps:$4 sm:$0xff]  }
 0x235   : > { %3036 = vmatpush1.bf16.msra.mxu0 %v10544_v36  ;;  %v10702_v36 = vld [vmem:[%s15028_s16 + $0x2c8] ss:$16 sps:$4 sm:$0xff]  }
 0x236   : > { %3037 = vmatprep.subr.bf16.mxu0 %v10549_v37  ;;  %v10704_v37 = vld [vmem:[%s15028_s16 + $0x2cc] ss:$16 sps:$4 sm:$0xff]  }
 0x239   : > { %3038 = vmatpush2.bf16.msra.mxu0 %v10547_v38  ;;  %v10713_v38 = vld [vmem:[%s15028_s16 + $0x2ac] ss:$16 sps:$4 sm:$0xff]  }
 0x23a   : > { %3039 = vmatprep.subr.bf16.mxu0 %v10553_v39  ;;  %v10711_v39 = vld [vmem:[%s15028_s16 + $0x2a8] ss:$16 sps:$4 sm:$0xff]  }
 0x23d   : > { %3040 = vmatpush2.bf16.msra.mxu0 %v10551_v40  ;;  %v12966_v40 = vld [vmem:[%s12884_s6 + $0x44] ss:$24 sps:$4 sm:$0xff]  }
 0x23e   : > { %3041 = vmatprep.subr.bf16.mxu0 %v10557_v41  ;;  %v12969_v41 = vld [vmem:[%s12884_s6 + $0x40] ss:$24 sps:$4 sm:$0xff]  }
 0x241   : > { %3042 = vmatpush2.bf16.msra.mxu0 %v10555_v42  ;;  %v10720_v42 = vld [vmem:[%s15028_s16 + $0x288] ss:$16 sps:$4 sm:$0xff]  }
 0x242   : > { %3043 = vmatprep.subr.bf16.mxu0 %v10561_v43  ;;  %v10722_v43 = vld [vmem:[%s15028_s16 + $0x28c] ss:$16 sps:$4 sm:$0xff]  }
 0x245   : > { %3044 = vmatpush2.bf16.msra.mxu0 %v10559_v44  ;;  %v10731_v44 = vld [vmem:[%s15028_s16 + $0x26c] ss:$16 sps:$4 sm:$0xff]  }
 0x246   : > { %3045 = vmatprep.subr.bf16.mxu0 %v10565_v45  ;;  %v10729_v45 = vld [vmem:[%s15028_s16 + $0x268] ss:$16 sps:$4 sm:$0xff]  }
 0x249   : > { %3046 = vmatpush2.bf16.msra.mxu0 %v10563_v46  ;;  %v12978_v46 = vld [vmem:[%s12884_s6 + $0x74] ss:$24 sps:$4 sm:$0xff]  }
 0x24a   : > { %3047 = vmatprep.subr.bf16.mxu0 %v10569_v47  ;;  %v12981_v47 = vld [vmem:[%s12884_s6 + $0x70] ss:$24 sps:$4 sm:$0xff]  }
 0x24d   : > { %3048 = vmatpush2.bf16.msra.mxu0 %v10567_v48  ;;  %v10738_v48 = vld [vmem:[%s15028_s16 + $0x248] ss:$16 sps:$4 sm:$0xff]  }
 0x24e   : > { %3049 = vmatprep.subr.bf16.mxu0 %v10573_v49  ;;  %v10740_v49 = vld [vmem:[%s15028_s16 + $0x24c] ss:$16 sps:$4 sm:$0xff]  }
 0x251   : > { %3050 = vmatpush2.bf16.msra.mxu0 %v10571_v50  ;;  %v10749_v50 = vld [vmem:[%s15028_s16 + $0x22c] ss:$16 sps:$4 sm:$0xff]  }
 0x252   : > { %3051 = vmatprep.subr.bf16.mxu0 %v10577_v51  ;;  %v10747_v51 = vld [vmem:[%s15028_s16 + $0x228] ss:$16 sps:$4 sm:$0xff]  }
 0x255   : > { %3052 = vmatpush2.bf16.msra.mxu0 %v10575_v52  ;;  %v12990_v52 = vld [vmem:[%s12884_s6 + $0xa4] ss:$24 sps:$4 sm:$0xff]  }
 0x256   : > { %3167 = vmatprep.subr.bf16.mxu0 %v10587_v58  ;;  %v10758_v58 = vld [vmem:[%s15028_s16 + $0x20c] ss:$16 sps:$4 sm:$0xff]  }
 0x258   : > { %3054 = vmatmul.mubr.bf16.vlgmr.msra.gmra.mxu0 %v12890_v55 }
 0x259   : > { %3168 = vmatpush1.bf16.msra.mxu0 %v10585_v57  ;;  %3063 = vmatprep.mubr.bf16.mxu0 %v12916_v14  ;;  %v10756_v57 = vld [vmem:[%s15028_s16 + $0x208] ss:$16 sps:$4 sm:$0xff]  }
 0x25a   : > { %3169 = vmatprep.subr.bf16.mxu0 %v10593_v60  ;;  %v10764_v60 = vld [vmem:[%s15028_s16 + $0x3ec] ss:$16 sps:$4 sm:$0xff]  }
 0x25d   : > { %3170 = vmatpush1.bf16.msra.mxu0 %v10591_v59  ;;  %v10762_v59 = vld [vmem:[%s15028_s16 + $0x3e8] ss:$16 sps:$4 sm:$0xff]  }
 0x25e   : > { %3171 = vmatprep.subr.bf16.mxu0 %v10599_v62  ;;  %v10770_v62 = vld [vmem:[%s15028_s16 + $0x3cc] ss:$16 sps:$4 sm:$0xff]  }
 0x260   : > { %3064 = vmatmul.mubr.bf16.gmra.mxu0 %v12921_v17 }
 0x261   : > { %3172 = vmatpush1.bf16.msra.mxu0 %v10597_v61  ;;  %3073 = vmatprep.mubr.bf16.mxu0 %v12928_v20  ;;  %v10768_v61 = vld [vmem:[%s15028_s16 + $0x3c8] ss:$16 sps:$4 sm:$0xff]  }
 0x262   : > { %3173 = vmatprep.subr.bf16.mxu0 %v10605_v1  ;;  %v10776_v1 = vld [vmem:[%s15028_s16 + $0x3ac] ss:$16 sps:$4 sm:$0xff]  }
 0x265   : > { %3174 = vmatpush1.bf16.msra.mxu0 %v10603_v63  ;;  %v10774_v63 = vld [vmem:[%s15028_s16 + $0x3a8] ss:$16 sps:$4 sm:$0xff]  }
 0x266   : > { %3175 = vmatprep.subr.bf16.mxu0 %v10611_v3  ;;  %v10782_v3 = vld [vmem:[%s15028_s16 + $0x38c] ss:$16 sps:$4 sm:$0xff]  }
 0x268   : > { %3074 = vmatmul.mubr.bf16.gmra.mxu0 %v12933_v23 }
 0x269   : > { %3176 = vmatpush1.bf16.msra.mxu0 %v10609_v2  ;;  %3083 = vmatprep.mubr.bf16.mxu0 %v12940_v26  ;;  %v10780_v2 = vld [vmem:[%s15028_s16 + $0x388] ss:$16 sps:$4 sm:$0xff]  }
 0x26a   : > { %3177 = vmatprep.subr.bf16.mxu0 %v10617_v5  ;;  %v10788_v5 = vld [vmem:[%s15028_s16 + $0x36c] ss:$16 sps:$4 sm:$0xff]  }
 0x26d   : > { %3178 = vmatpush1.bf16.msra.mxu0 %v10615_v4  ;;  %v10786_v4 = vld [vmem:[%s15028_s16 + $0x368] ss:$16 sps:$4 sm:$0xff]  }
 0x26e   : > { %3179 = vmatprep.subr.bf16.mxu0 %v10623_v7  ;;  %v10794_v7 = vld [vmem:[%s15028_s16 + $0x34c] ss:$16 sps:$4 sm:$0xff]  }
 0x270   : > { %3084 = vmatmul.mubr.bf16.gmra.mxu0 %v12945_v29 }
 0x271   : > { %3180 = vmatpush1.bf16.msra.mxu0 %v10621_v6  ;;  %3199 = vmatprep.mubr.bf16.mxu0 %v12952_v32  ;;  %v10792_v6 = vld [vmem:[%s15028_s16 + $0x348] ss:$16 sps:$4 sm:$0xff]  }
 0x272   : > { %3181 = vmatprep.subr.bf16.mxu0 %v10629_v9  ;;  %v10800_v9 = vld [vmem:[%s15028_s16 + $0x32c] ss:$16 sps:$4 sm:$0xff]  }
 0x275   : > { %3182 = vmatpush1.bf16.msra.mxu0 %v10627_v8  ;;  %v10798_v8 = vld [vmem:[%s15028_s16 + $0x328] ss:$16 sps:$4 sm:$0xff]  }
 0x276   : > { %3183 = vmatprep.subr.bf16.mxu0 %v10635_v11 }
 0x279   : > { %3184 = vmatpush2.bf16.msra.mxu0 %v10633_v10  ;;  %v9388_v10 = vld [vmem:[#allocation31] ss:$0 sm:$0xff] }
 0x27a   : > { %3185 = vmatprep.subr.bf16.mxu0 %v10641_v13  ;;  %v10804_v13 = vld [vmem:[%s15028_s16 + $0x308] ss:$16 sps:$4 sm:$0xff]  }
 0x27d   : > { %3186 = vmatpush2.bf16.msra.mxu0 %v10639_v12 }
 0x27e   : > { %3187 = vmatprep.subr.bf16.mxu0 %v10649_v16 }
 0x281   : > { %3188 = vmatpush2.bf16.msra.mxu0 %v10647_v15  ;;  %v10806_v15 = vld [vmem:[%s15028_s16 + $0x30c] ss:$16 sps:$4 sm:$0xff]  }
 0x282   : > { %3189 = vmatprep.subr.bf16.mxu0 %v10656_v19 }
 0x285   : > { %3190 = vmatpush2.bf16.msra.mxu0 %v10654_v18 }
 0x286   : > { %3191 = vmatprep.subr.bf16.mxu0 %v10664_v22 }
 0x289   : > { %3192 = vmatpush2.bf16.msra.mxu0 %v10662_v21  ;;  %v10582_v21 = vld [vmem:[%s15028_s16 + $0x2e0] ss:$16 sps:$4 sm:$0xff]  }
 0x28a   : > { %3193 = vmatprep.subr.bf16.mxu0 %v10671_v25 }
 0x28d   : > { %3194 = vmatpush2.bf16.msra.mxu0 %v10669_v24  ;;  %v10590_v24 = vld [vmem:[%s15028_s16 + $0x2c4] ss:$16 sps:$4 sm:$0xff]  }
 0x28e   : > { %3195 = vmatprep.subr.bf16.mxu0 %v10679_v28  ;;  %v10588_v28 = vld [vmem:[%s15028_s16 + $0x2c0] ss:$16 sps:$4 sm:$0xff]  }
 0x291   : > { %3196 = vmatpush2.bf16.msra.mxu0 %v10677_v27  ;;  %v13020_v27 = vld [vmem:[%s12884_s6 + $0x8] ss:$24 sps:$4 sm:$0xff]  }
 0x292   : > { %3197 = vmatprep.subr.bf16.mxu0 %v10686_v31  ;;  %v10596_v31 = vld [vmem:[%s15028_s16 + $0x2a4] ss:$16 sps:$4 sm:$0xff]  }
 0x295   : > { %3198 = vmatpush2.bf16.msra.mxu0 %v10684_v30  ;;  %v13024_v30 = vld [vmem:[%s12884_s6 + $0x3c] ss:$24 sps:$4 sm:$0xff]  }
 0x296   : > { %3313 = vmatprep.subr.bf16.mxu0 %v10698_v33  ;;  %v10594_v33 = vld [vmem:[%s15028_s16 + $0x2a0] ss:$16 sps:$4 sm:$0xff]  }
 0x298   : > { %3200 = vmatmul.mubr.bf16.vlgmr.msra.gmra.mxu0 %v12956_v34 }
 0x299   : > { %3314 = vmatpush1.bf16.msra.mxu0 %v10696_v35  ;;  %3209 = vmatprep.mubr.bf16.mxu0 %v12966_v40  ;;  %v10602_v35 = vld [vmem:[%s15028_s16 + $0x284] ss:$16 sps:$4 sm:$0xff]  }
 0x29a   : > { %3315 = vmatprep.subr.bf16.mxu0 %v10704_v37  ;;  %v10600_v37 = vld [vmem:[%s15028_s16 + $0x280] ss:$16 sps:$4 sm:$0xff]  }
 0x29d   : > { %3316 = vmatpush1.bf16.msra.mxu0 %v10702_v36  ;;  %v13032_v36 = vld [vmem:[%s12884_s6 + $0x38] ss:$24 sps:$4 sm:$0xff]  }
 0x29e   : > { %3317 = vmatprep.subr.bf16.mxu0 %v10713_v38  ;;  %v13036_v38 = vld [vmem:[%s12884_s6 + $0x6c] ss:$24 sps:$4 sm:$0xff]  }
 0x2a0   : > { %3210 = vmatmul.mubr.bf16.gmra.mxu0 %v12969_v41 }
 0x2a1   : > { %3318 = vmatpush1.bf16.msra.mxu0 %v10711_v39  ;;  %3219 = vmatprep.mubr.bf16.mxu0 %v12978_v46  ;;  %v10608_v39 = vld [vmem:[%s15028_s16 + $0x264] ss:$16 sps:$4 sm:$0xff]  }
 0x2a2   : > { %3319 = vmatprep.subr.bf16.mxu0 %v10722_v43  ;;  %v10614_v43 = vld [vmem:[%s15028_s16 + $0x244] ss:$16 sps:$4 sm:$0xff]  }
 0x2a5   : > { %3320 = vmatpush1.bf16.msra.mxu0 %v10720_v42  ;;  %v10606_v42 = vld [vmem:[%s15028_s16 + $0x260] ss:$16 sps:$4 sm:$0xff]  }
 0x2a6   : > { %3321 = vmatprep.subr.bf16.mxu0 %v10731_v44  ;;  %v13044_v44 = vld [vmem:[%s12884_s6 + $0x68] ss:$24 sps:$4 sm:$0xff]  }
 0x2a8   : > { %3220 = vmatmul.mubr.bf16.gmra.mxu0 %v12981_v47 }
 0x2a9   : > { %3322 = vmatpush1.bf16.msra.mxu0 %v10729_v45  ;;  %3229 = vmatprep.mubr.bf16.mxu0 %v12990_v52  ;;  %v10612_v45 = vld [vmem:[%s15028_s16 + $0x240] ss:$16 sps:$4 sm:$0xff]  }
 0x2aa   : > { %3323 = vmatprep.subr.bf16.mxu0 %v10740_v49  ;;  %v10620_v49 = vld [vmem:[%s15028_s16 + $0x224] ss:$16 sps:$4 sm:$0xff]  }
 0x2ad   : > { %3324 = vmatpush1.bf16.msra.mxu0 %v10738_v48  ;;  %v13048_v48 = vld [vmem:[%s12884_s6 + $0x9c] ss:$24 sps:$4 sm:$0xff]  }
 0x2ae   : > { %3325 = vmatprep.subr.bf16.mxu0 %v10749_v50  ;;  %v10618_v50 = vld [vmem:[%s15028_s16 + $0x220] ss:$16 sps:$4 sm:$0xff]  }
 0x2b0   : > { %3230 = vmatmul.mubr.bf16.gmra.mxu0 %v12993_v53 }
 0x2b1   : > { %3326 = vmatpush1.bf16.msra.mxu0 %v10747_v51  ;;  %3345 = vmatprep.mubr.bf16.mxu0 %v10689_v56  ;;  %v10626_v51 = vld [vmem:[%s15028_s16 + $0x204] ss:$16 sps:$4 sm:$0xff]  }
 0x2b2   : > { %3327 = vmatprep.subr.bf16.mxu0 %v10758_v58  ;;  %v10632_v58 = vld [vmem:[%s15028_s16 + $0x3e4] ss:$16 sps:$4 sm:$0xff]  }
 0x2b5   : > { %3328 = vmatpush1.bf16.msra.mxu0 %v10756_v57  ;;  %v10624_v57 = vld [vmem:[%s15028_s16 + $0x200] ss:$16 sps:$4 sm:$0xff]  }
 0x2b6   : > { %3329 = vmatprep.subr.bf16.mxu0 %v10764_v60  ;;  %v10638_v60 = vld [vmem:[%s15028_s16 + $0x3c4] ss:$16 sps:$4 sm:$0xff]  }
 0x2b9   : > { %3330 = vmatpush2.bf16.msra.mxu0 %v10762_v59  ;;  %v10630_v59 = vld [vmem:[%s15028_s16 + $0x3e0] ss:$16 sps:$4 sm:$0xff]  }
 0x2ba   : > { %3331 = vmatprep.subr.bf16.mxu0 %v10770_v62  ;;  %v10646_v62 = vld [vmem:[%s15028_s16 + $0x3a4] ss:$16 sps:$4 sm:$0xff]  }
 0x2bd   : > { %3332 = vmatpush2.bf16.msra.mxu0 %v10768_v61  ;;  %v10636_v61 = vld [vmem:[%s15028_s16 + $0x3c0] ss:$16 sps:$4 sm:$0xff]  }
 0x2be   : > { %3333 = vmatprep.subr.bf16.mxu0 %v10776_v1  ;;  %v10653_v1 = vld [vmem:[%s15028_s16 + $0x384] ss:$16 sps:$4 sm:$0xff]  }
 0x2c1   : > { %3334 = vmatpush2.bf16.msra.mxu0 %v10774_v63  ;;  %v10644_v63 = vld [vmem:[%s15028_s16 + $0x3a0] ss:$16 sps:$4 sm:$0xff]  }
 0x2c2   : > { %3335 = vmatprep.subr.bf16.mxu0 %v10782_v3  ;;  %v10661_v3 = vld [vmem:[%s15028_s16 + $0x364] ss:$16 sps:$4 sm:$0xff]  }
 0x2c5   : > { %3336 = vmatpush2.bf16.msra.mxu0 %v10780_v2  ;;  %v10651_v2 = vld [vmem:[%s15028_s16 + $0x380] ss:$16 sps:$4 sm:$0xff]  }
 0x2c6   : > { %3337 = vmatprep.subr.bf16.mxu0 %v10788_v5  ;;  %v10668_v5 = vld [vmem:[%s15028_s16 + $0x344] ss:$16 sps:$4 sm:$0xff]  }
 0x2c9   : > { %3338 = vmatpush2.bf16.msra.mxu0 %v10786_v4  ;;  %v10659_v4 = vld [vmem:[%s15028_s16 + $0x360] ss:$16 sps:$4 sm:$0xff]  }
 0x2ca   : > { %3339 = vmatprep.subr.bf16.mxu0 %v10794_v7  ;;  %v10676_v7 = vld [vmem:[%s15028_s16 + $0x324] ss:$16 sps:$4 sm:$0xff]  }
 0x2cd   : > { %3340 = vmatpush2.bf16.msra.mxu0 %v10792_v6  ;;  %v10666_v6 = vld [vmem:[%s15028_s16 + $0x340] ss:$16 sps:$4 sm:$0xff]  }
 0x2ce   : > { %3341 = vmatprep.subr.bf16.mxu0 %v10800_v9  ;;  %v10683_v9 = vld [vmem:[%s15028_s16 + $0x304] ss:$16 sps:$4 sm:$0xff]  }
 0x2d1   : > { %3342 = vmatpush2.bf16.msra.mxu0 %v10798_v8  ;;  %v10674_v8 = vld [vmem:[%s15028_s16 + $0x320] ss:$16 sps:$4 sm:$0xff]  }
 0x2d2   : > { %3343 = vmatprep.subr.bf16.mxu0 %v10806_v15  ;;  %v10699_v15 = vld [vmem:[%s15028_s16 + $0xc8] ss:$16 sps:$4 sm:$0xff]  }
 0x2d5   : > { %3344 = vmatpush2.bf16.msra.mxu0 %v10804_v13  ;;  %v10701_v13 = vld [vmem:[%s15028_s16 + $0xcc] ss:$16 sps:$4 sm:$0xff]  }
 0x2d6   : > { %10147 = vmatprep.subr.bf16.mxu0 %v14937_v0 }
 0x2d8   : > { %v1482_v11 = vpop.f32.mrf.mxu0  ;;  %3346 = vmatmul.mubr.bf16.vlgmr.msra.gmra.mxu0 %v13020_v27 }
 0x2d9   : > { %v1483_v12 = vadd.f32 %v9388_v10, %v1482_v11  ;;  %3355 = vmatprep.mubr.bf16.mxu0 %v13024_v30  ;;  %v10681_v10 = vld [vmem:[%s15028_s16 + $0x300] ss:$16 sps:$4 sm:$0xff]   ;;  %v10695_v11 = vld [vmem:[%s15028_s16 + $0xec] ss:$16 sps:$4 sm:$0xff]  }
 0x2da   : > { %v10125_v16 = vpop.f32.mrf.mxu0 }
 0x2db   : > { %v1488_v18 = vmax.f32 %v1483_v12, 0.0  ;;  %v10693_v12 = vld [vmem:[%s15028_s16 + $0xe8] ss:$16 sps:$4 sm:$0xff]   ;;  %v10710_v16 = vld [vmem:[%s15028_s16 + $0xac] ss:$16 sps:$4 sm:$0xff]  }
 0x2dc   : > { %v1485_v19 = vpop.f32.mrf.mxu0 }
 0x2dd   : > { %v1489_v22 = vpack.c.bf16 %v1488_v18, %v1488_v18  ;;  %v10708_v18 = vld [vmem:[%s15028_s16 + $0xa8] ss:$16 sps:$4 sm:$0xff]   ;;  %v10719_v19 = vld [vmem:[%s15028_s16 + $0x8c] ss:$16 sps:$4 sm:$0xff]  }
 0x2de   : > { %v10126_v25 = vpop.f32.mrf.mxu0 }
 0x2df   : > { %10144 = vmatmul.mubr.bf16.vlgmr.msra.gmra.mxu1 %v1489_v22  ;;  %v10728_v22 = vld [vmem:[%s15028_s16 + $0x6c] ss:$16 sps:$4 sm:$0xff]  }
 0x2e0   : > { %3095 = vmatpush1.bf16.msra.mxu1 %v10582_v21  ;;  %3126 = vmatprep.mubr.bf16.mxu1 %v10689_v56  ;;  %v13056_v56 = vld [vmem:[%s12884_s6 + $0x98] ss:$24 sps:$4 sm:$0xff]   ;;  %v10737_v25 = vld [vmem:[%s15028_s16 + $0x4c] ss:$16 sps:$4 sm:$0xff]   ;;  %s12336_s6 = smov 2  }
 0x2e1   : > { %3096 = vmatprep.subr.bf16.mxu1 %v10590_v24  ;;  %3356 = vmatmul.mubr.bf16.gmra.mxu0 %v13032_v36  ;;  %v10717_v21 = vld [vmem:[%s15028_s16 + $0x88] ss:$16 sps:$4 sm:$0xff]  }
 0x2e2   : > { %3365 = vmatprep.mubr.bf16.mxu0 %v13036_v38  ;;  %v10726_v24 = vld [vmem:[%s15028_s16 + $0x68] ss:$16 sps:$4 sm:$0xff]  }
 0x2e4   : > { %3097 = vmatpush1.bf16.msra.mxu1 %v10588_v28  ;;  %v10746_v28 = vld [vmem:[%s15028_s16 + $0x2c] ss:$16 sps:$4 sm:$0xff]  }
 0x2e5   : > { %3098 = vmatprep.subr.bf16.mxu1 %v10596_v31  ;;  %v10755_v31 = vld [vmem:[%s15028_s16 + $0xc] ss:$16 sps:$4 sm:$0xff]  }
 0x2e8   : > { %3099 = vmatpush1.bf16.msra.mxu1 %v10594_v33  ;;  %v10753_v33 = vld [vmem:[%s15028_s16 + $0x8] ss:$16 sps:$4 sm:$0xff]  }
 0x2e9   : > { %3100 = vmatprep.subr.bf16.mxu1 %v10602_v35  ;;  %3366 = vmatmul.mubr.bf16.gmra.mxu0 %v13044_v44  ;;  %v10761_v35 = vld [vmem:[%s15028_s16 + $0x1ec] ss:$16 sps:$4 sm:$0xff]  }
 0x2ea   : > { %3375 = vmatprep.mubr.bf16.mxu0 %v13048_v48 }
 0x2ec   : > { %3101 = vmatpush1.bf16.msra.mxu1 %v10600_v37  ;;  %v10767_v37 = vld [vmem:[%s15028_s16 + $0x1cc] ss:$16 sps:$4 sm:$0xff]  }
 0x2ed   : > { %3102 = vmatprep.subr.bf16.mxu1 %v10608_v39  ;;  %v10773_v39 = vld [vmem:[%s15028_s16 + $0x1ac] ss:$16 sps:$4 sm:$0xff]  }
 0x2f0   : > { %3103 = vmatpush1.bf16.msra.mxu1 %v10606_v42  ;;  %v10771_v42 = vld [vmem:[%s15028_s16 + $0x1a8] ss:$16 sps:$4 sm:$0xff]  }
 0x2f1   : > { %3104 = vmatprep.subr.bf16.mxu1 %v10614_v43  ;;  %3376 = vmatmul.mubr.bf16.gmra.mxu0 %v13056_v56  ;;  %v10777_v43 = vld [vmem:[%s15028_s16 + $0x188] ss:$16 sps:$4 sm:$0xff]  }
 0x2f2   : > { %10163 = vmatprep.mubr.msk.bf16.mxu0 %vm12329_vm0, %v14937_v0 }
 0x2f4   : > { %3105 = vmatpush1.bf16.msra.mxu1 %v10612_v45  ;;  %v10783_v45 = vld [vmem:[%s15028_s16 + $0x168] ss:$16 sps:$4 sm:$0xff]  }
 0x2f5   : > { %3106 = vmatprep.subr.bf16.mxu1 %v10620_v49  ;;  %v10789_v49 = vld [vmem:[%s15028_s16 + $0x148] ss:$16 sps:$4 sm:$0xff]  }
 0x2f8   : > { %3107 = vmatpush1.bf16.msra.mxu1 %v10618_v50  ;;  %v10797_v50 = vld [vmem:[%s15028_s16 + $0x12c] ss:$16 sps:$4 sm:$0xff]  }
 0x2f9   : > { %3108 = vmatprep.subr.bf16.mxu1 %v10626_v51  ;;  %v10795_v51 = vld [vmem:[%s15028_s16 + $0x128] ss:$16 sps:$4 sm:$0xff]  }
 0x2fc   : > { %3109 = vmatpush1.bf16.msra.mxu1 %v10624_v57  ;;  %v10801_v57 = vld [vmem:[%s15028_s16 + $0x108] ss:$16 sps:$4 sm:$0xff]  }
 0x2fd   : > { %3110 = vmatprep.subr.bf16.mxu1 %v10632_v58  ;;  %v10809_v58 = vld [vmem:[%s15028_s16 + $0x4ec] ss:$16 sps:$4 sm:$0xff]  }
 0x300   : > { %3111 = vmatpush2.bf16.msra.mxu1 %v10630_v59  ;;  %v10807_v59 = vld [vmem:[%s15028_s16 + $0x4e8] ss:$16 sps:$4 sm:$0xff]  }
 0x301   : > { %3112 = vmatprep.subr.bf16.mxu1 %v10638_v60  ;;  %v10812_v60 = vld [vmem:[%s15028_s16 + $0x4cc] ss:$16 sps:$4 sm:$0xff]  }
 0x304   : > { %3113 = vmatpush2.bf16.msra.mxu1 %v10636_v61  ;;  %v10810_v61 = vld [vmem:[%s15028_s16 + $0x4c8] ss:$16 sps:$4 sm:$0xff]  }
 0x305   : > { %3114 = vmatprep.subr.bf16.mxu1 %v10646_v62  ;;  %v10815_v62 = vld [vmem:[%s15028_s16 + $0x4ac] ss:$16 sps:$4 sm:$0xff]  }
 0x308   : > { %3115 = vmatpush2.bf16.msra.mxu1 %v10644_v63  ;;  %v10813_v63 = vld [vmem:[%s15028_s16 + $0x4a8] ss:$16 sps:$4 sm:$0xff]  }
 0x309   : > { %3116 = vmatprep.subr.bf16.mxu1 %v10653_v1  ;;  %v10818_v1 = vld [vmem:[%s15028_s16 + $0x48c] ss:$16 sps:$4 sm:$0xff]  }
 0x30c   : > { %3117 = vmatpush2.bf16.msra.mxu1 %v10651_v2  ;;  %v10816_v2 = vld [vmem:[%s15028_s16 + $0x488] ss:$16 sps:$4 sm:$0xff]  }
 0x30d   : > { %3118 = vmatprep.subr.bf16.mxu1 %v10661_v3  ;;  %v10824_v3 = vld [vmem:[%s15028_s16 + $0x44c] ss:$16 sps:$4 sm:$0xff]  }
 0x310   : > { %3119 = vmatpush2.bf16.msra.mxu1 %v10659_v4  ;;  %v10822_v4 = vld [vmem:[%s15028_s16 + $0x448] ss:$16 sps:$4 sm:$0xff]  }
 0x311   : > { %3120 = vmatprep.subr.bf16.mxu1 %v10668_v5  ;;  %v10830_v5 = vld [vmem:[%s15028_s16 + $0x40c] ss:$16 sps:$4 sm:$0xff]  }
 0x314   : > { %3121 = vmatpush2.bf16.msra.mxu1 %v10666_v6  ;;  %v10831_v6 = vld [vmem:[%s15028_s16 + $0x5e8] ss:$16 sps:$4 sm:$0xff]  }
 0x315   : > { %3122 = vmatprep.subr.bf16.mxu1 %v10676_v7  ;;  %v10836_v7 = vld [vmem:[%s15028_s16 + $0x5cc] ss:$16 sps:$4 sm:$0xff]  }
 0x318   : > { %3123 = vmatpush2.bf16.msra.mxu1 %v10674_v8  ;;  %v10834_v8 = vld [vmem:[%s15028_s16 + $0x5c8] ss:$16 sps:$4 sm:$0xff]  }
 0x319   : > { %3124 = vmatprep.subr.bf16.mxu1 %v10683_v9  ;;  %v10837_v9 = vld [vmem:[%s15028_s16 + $0x5a8] ss:$16 sps:$4 sm:$0xff]  }
 0x31c   : > { %3125 = vmatpush2.bf16.msra.mxu1 %v10681_v10  ;;  %v10840_v10 = vld [vmem:[%s15028_s16 + $0x588] ss:$16 sps:$4 sm:$0xff]  }
 0x31d   : > { %3240 = vmatprep.subr.bf16.mxu1 %v10695_v11  ;;  %v10845_v11 = vld [vmem:[%s15028_s16 + $0x56c] ss:$16 sps:$4 sm:$0xff]  }
 0x31f   : > { %3127 = vmatmul.mubr.bf16.vlgmr.msra.gmra.mxu1 %v13020_v27  ;;  %v10735_v27 = vld [vmem:[%s15028_s16 + $0x48] ss:$16 sps:$4 sm:$0xff]  }
 0x320   : > { %3241 = vmatpush1.bf16.msra.mxu1 %v10693_v12  ;;  %3136 = vmatprep.mubr.bf16.mxu1 %v13024_v30  ;;  %v10744_v30 = vld [vmem:[%s15028_s16 + $0x28] ss:$16 sps:$4 sm:$0xff]  }
 0x321   : > { %3242 = vmatprep.subr.bf16.mxu1 %v10701_v13  ;;  %v10843_v12 = vld [vmem:[%s15028_s16 + $0x568] ss:$16 sps:$4 sm:$0xff]   ;;  %v10848_v13 = vld [vmem:[%s15028_s16 + $0x54c] ss:$16 sps:$4 sm:$0xff]  }
 0x324   : > { %3243 = vmatpush1.bf16.msra.mxu1 %v10699_v15  ;;  %v10846_v15 = vld [vmem:[%s15028_s16 + $0x548] ss:$16 sps:$4 sm:$0xff]  }
 0x325   : > { %3244 = vmatprep.subr.bf16.mxu1 %v10710_v16  ;;  %v10851_v16 = vld [vmem:[%s15028_s16 + $0x52c] ss:$16 sps:$4 sm:$0xff]  }
 0x327   : > { %3137 = vmatmul.mubr.bf16.gmra.mxu1 %v13032_v36  ;;  %v10759_v36 = vld [vmem:[%s15028_s16 + $0x1e8] ss:$16 sps:$4 sm:$0xff]  }
 0x328   : > { %3245 = vmatpush1.bf16.msra.mxu1 %v10708_v18  ;;  %3146 = vmatprep.mubr.bf16.mxu1 %v13036_v38  ;;  %v10765_v38 = vld [vmem:[%s15028_s16 + $0x1c8] ss:$16 sps:$4 sm:$0xff]   ;;  %v3055_v18 = vpop.f32.mrf.mxu0 }
 0x329   : > { %3246 = vmatprep.subr.bf16.mxu1 %v10719_v19  ;;  %v10849_v19 = vld [vmem:[%s15028_s16 + $0x528] ss:$16 sps:$4 sm:$0xff]  }
 0x32c   : > { %3247 = vmatpush1.bf16.msra.mxu1 %v10717_v21  ;;  %v10854_v21 = vld [vmem:[%s15028_s16 + $0x50c] ss:$16 sps:$4 sm:$0xff]  }
 0x32d   : > { %3248 = vmatprep.subr.bf16.mxu1 %v10728_v22  ;;  %v3057_v22 = vpop.f32.mrf.mxu0 }
 0x32f   : > { %3147 = vmatmul.mubr.bf16.gmra.mxu1 %v13044_v44  ;;  %v10785_v44 = vld [vmem:[%s15028_s16 + $0x16c] ss:$16 sps:$4 sm:$0xff]  }
 0x330   : > { %3249 = vmatpush1.bf16.msra.mxu1 %v10726_v24  ;;  %3156 = vmatprep.mubr.bf16.mxu1 %v13048_v48  ;;  %v10791_v48 = vld [vmem:[%s15028_s16 + $0x14c] ss:$16 sps:$4 sm:$0xff]   ;;  %v10852_v24 = vld [vmem:[%s15028_s16 + $0x508] ss:$16 sps:$4 sm:$0xff]  }
 0x331   : > { %3250 = vmatprep.subr.bf16.mxu1 %v10737_v25  ;;  %v3059_v25 = vpop.f32.mrf.mxu0 }
 0x334   : > { %3251 = vmatpush1.bf16.msra.mxu1 %v10735_v27 }
 0x335   : > { %3252 = vmatprep.subr.bf16.mxu1 %v10746_v28  ;;  %v3061_v28 = vpop.f32.mrf.mxu0 }
 0x337   : > { %3157 = vmatmul.mubr.bf16.gmra.mxu1 %v13056_v56  ;;  %v10803_v56 = vld [vmem:[%s15028_s16 + $0x10c] ss:$16 sps:$4 sm:$0xff]  }
 0x338   : > { %3253 = vmatpush1.bf16.msra.mxu1 %v10744_v30  ;;  %3272 = vmatprep.mubr.bf16.mxu1 %v12887_v54  ;;  %v10779_v54 = vld [vmem:[%s15028_s16 + $0x18c] ss:$16 sps:$4 sm:$0xff]  }
 0x339   : > { %3254 = vmatprep.subr.bf16.mxu1 %v10755_v31 }
 0x33c   : > { %3255 = vmatpush1.bf16.msra.mxu1 %v10753_v33  ;;  %v3065_v33 = vpop.f32.mrf.mxu0 }
 0x33d   : > { %3256 = vmatprep.subr.bf16.mxu1 %v10761_v35 }
 0x340   : > { %3257 = vmatpush2.bf16.msra.mxu1 %v10759_v36  ;;  %v3067_v36 = vpop.f32.mrf.mxu0 }
 0x341   : > { %3258 = vmatprep.subr.bf16.mxu1 %v10767_v37 }
 0x342   : > { %v13165_v37 = vpop.f32.mrf.mxu0 }
 0x344   : > { %3259 = vmatpush2.bf16.msra.mxu1 %v10765_v38  ;;  %v3071_v38 = vpop.f32.mrf.mxu0 }
 0x345   : > { %3260 = vmatprep.subr.bf16.mxu1 %v10773_v39 }
 0x348   : > { %3261 = vmatpush2.bf16.msra.mxu1 %v10771_v42 }
 0x349   : > { %3262 = vmatprep.subr.bf16.mxu1 %v10779_v54 }
 0x34c   : > { %3263 = vmatpush2.bf16.msra.mxu1 %v10777_v43 }
 0x34d   : > { %3264 = vmatprep.subr.bf16.mxu1 %v10785_v44 }
 0x350   : > { %3265 = vmatpush2.bf16.msra.mxu1 %v10783_v45 }
 0x351   : > { %3266 = vmatprep.subr.bf16.mxu1 %v10791_v48 }
 0x354   : > { %3267 = vmatpush2.bf16.msra.mxu1 %v10789_v49 }
 0x355   : > { %3268 = vmatprep.subr.bf16.mxu1 %v10797_v50 }
 0x358   : > { %3269 = vmatpush2.bf16.msra.mxu1 %v10795_v51 }
 0x359   : > { %3270 = vmatprep.subr.bf16.mxu1 %v10803_v56 }
 0x35c   : > { %3271 = vmatpush2.bf16.msra.mxu1 %v10801_v57 }
 0x35d   : > { %3386 = vmatprep.subr.bf16.mxu1 %v10809_v58 }
 0x35f   : > { %3273 = vmatmul.mubr.bf16.vlgmr.msra.gmra.mxu1 %v12890_v55  ;;  %v10821_v55 = vld [vmem:[%s15028_s16 + $0x46c] ss:$16 sps:$4 sm:$0xff]  }
 0x360   : > { %3387 = vmatpush1.bf16.msra.mxu1 %v10807_v59  ;;  %3282 = vmatprep.mubr.bf16.mxu1 %v12916_v14  ;;  %v10819_v14 = vld [vmem:[%s15028_s16 + $0x468] ss:$16 sps:$4 sm:$0xff]  }
 0x361   : > { %3388 = vmatprep.subr.bf16.mxu1 %v10812_v60 }
 0x364   : > { %3389 = vmatpush1.bf16.msra.mxu1 %v10810_v61 }
 0x365   : > { %3390 = vmatprep.subr.bf16.mxu1 %v10815_v62 }
 0x367   : > { %3283 = vmatmul.mubr.bf16.gmra.mxu1 %v12921_v17  ;;  %v10827_v17 = vld [vmem:[%s15028_s16 + $0x42c] ss:$16 sps:$4 sm:$0xff]  }
 0x368   : > { %3391 = vmatpush1.bf16.msra.mxu1 %v10813_v63  ;;  %3292 = vmatprep.mubr.bf16.mxu1 %v12928_v20  ;;  %v10825_v20 = vld [vmem:[%s15028_s16 + $0x428] ss:$16 sps:$4 sm:$0xff]  }
 0x369   : > { %3392 = vmatprep.subr.bf16.mxu1 %v10818_v1 }
 0x36c   : > { %3393 = vmatpush1.bf16.msra.mxu1 %v10816_v2 }
 0x36d   : > { %3394 = vmatprep.subr.bf16.mxu1 %v10821_v55 }
 0x36f   : > { %3293 = vmatmul.mubr.bf16.gmra.mxu1 %v12933_v23  ;;  %v10828_v23 = vld [vmem:[%s15028_s16 + $0x408] ss:$16 sps:$4 sm:$0xff]  }
 0x370   : > { %3395 = vmatpush1.bf16.msra.mxu1 %v10819_v14  ;;  %3302 = vmatprep.mubr.bf16.mxu1 %v12940_v26  ;;  %v10833_v26 = vld [vmem:[%s15028_s16 + $0x5ec] ss:$16 sps:$4 sm:$0xff]  }
 0x371   : > { %3396 = vmatprep.subr.bf16.mxu1 %v10824_v3 }
 0x374   : > { %3397 = vmatpush1.bf16.msra.mxu1 %v10822_v4 }
 0x375   : > { %3398 = vmatprep.subr.bf16.mxu1 %v10827_v17 }
 0x377   : > { %3303 = vmatmul.mubr.bf16.gmra.mxu1 %v12945_v29  ;;  %v10839_v29 = vld [vmem:[%s15028_s16 + $0x5ac] ss:$16 sps:$4 sm:$0xff]  }
 0x378   : > { %3399 = vmatpush1.bf16.msra.mxu1 %v10825_v20  ;;  %3418 = vmatprep.mubr.bf16.mxu1 %v12952_v32  ;;  %v10842_v32 = vld [vmem:[%s15028_s16 + $0x58c] ss:$16 sps:$4 sm:$0xff]  }
 0x379   : > { %3400 = vmatprep.subr.bf16.mxu1 %v10830_v5 }
 0x37c   : > { %3401 = vmatpush1.bf16.msra.mxu1 %v10828_v23 }
 0x37d   : > { %3402 = vmatprep.subr.bf16.mxu1 %v10833_v26 }
 0x380   : > { %3403 = vmatpush2.bf16.msra.mxu1 %v10831_v6 }
 0x381   : > { %3404 = vmatprep.subr.bf16.mxu1 %v10836_v7 }
 0x384   : > { %3405 = vmatpush2.bf16.msra.mxu1 %v10834_v8 }
 0x385   : > { %3406 = vmatprep.subr.bf16.mxu1 %v10839_v29 }
 0x388   : > { %3407 = vmatpush2.bf16.msra.mxu1 %v10837_v9 }
 0x389   : > { %3408 = vmatprep.subr.bf16.mxu1 %v10842_v32 }
 0x38c   : > { %3409 = vmatpush2.bf16.msra.mxu1 %v10840_v10 }
 0x38d   : > { %3410 = vmatprep.subr.bf16.mxu1 %v10845_v11 }
 0x390   : > { %3411 = vmatpush2.bf16.msra.mxu1 %v10843_v12 }
 0x391   : > { %3412 = vmatprep.subr.bf16.mxu1 %v10848_v13 }
 0x394   : > { %3413 = vmatpush2.bf16.msra.mxu1 %v10846_v15 }
 0x395   : > { %3414 = vmatprep.subr.bf16.mxu1 %v10851_v16 }
 0x398   : > { %3415 = vmatpush2.bf16.msra.mxu1 %v10849_v19 }
 0x399   : > { %3416 = vmatprep.subr.bf16.mxu1 %v10854_v21 }
 0x39c   : > { %3417 = vmatpush2.bf16.msra.mxu1 %v10852_v24 }
 0x39d   : > { %10167 = vmatprep.subr.bf16.mxu1 %v14937_v0 }
 0x39f   : > { %3419 = vmatmul.mubr.bf16.vlgmr.msra.gmra.mxu1 %v12956_v34  ;;  %v13160_v27 = vpop.f32.mrf.mxu1  ;;  %v13169_v34 = vpop.f32.mrf.mxu0 }
 0x3a0   : > { %15030 = vst [vmem:[#allocation71_spill] sm:$0xff] %v13160_v27  ;;  %3428 = vmatprep.mubr.bf16.mxu1 %v12966_v40 }
 0x3a1   : > { %v10145_v30 = vpop.f32.mrf.mxu1  ;;  %v13172_v40 = vpop.f32.mrf.mxu0 }
 0x3a3   : > { %v1598_v31 = vpop.f32.mrf.mxu1 }
 0x3a5   : > { %v10146_v35 = vpop.f32.mrf.mxu1 }
 0x3a7   : > { %3429 = vmatmul.mubr.bf16.gmra.mxu1 %v12969_v41  ;;  %v13176_v41 = vpop.f32.mrf.mxu0 }
 0x3a8   : > { %3438 = vmatprep.mubr.bf16.mxu1 %v12978_v46 }
 0x3a9   : > { %v13178_v39 = vpop.f32.mrf.mxu0 }
 0x3ab   : > { %v13180_v46 = vpop.f32.mrf.mxu0 }
 0x3ad   : > { %v13182_v42 = vpop.f32.mrf.mxu0 }
 0x3af   : > { %3439 = vmatmul.mubr.bf16.gmra.mxu1 %v12981_v47  ;;  %v13184_v47 = vpop.f32.mrf.mxu0 }
 0x3b0   : > { %3448 = vmatprep.mubr.bf16.mxu1 %v12990_v52 }
 0x3b1   : > { %v13186_v52 = vpop.f32.mrf.mxu0 }
 0x3b3   : > { %v3201_v54 = vpop.f32.mrf.mxu0 }
 0x3b5   : > { %v3203_v43 = vpop.f32.mrf.mxu0 }
 0x3b7   : > { %3449 = vmatmul.mubr.bf16.gmra.mxu1 %v12993_v53  ;;  %v3205_v53 = vpop.f32.mrf.mxu0 }
 0x3b8   : > { %10175 = vmatprep.mubr.msk.bf16.mxu1 %vm12329_vm0, %v14937_v0 }
 0x3b9   : > { %v3207_v45 = vpop.f32.mrf.mxu0 }
 0x3bb   : > { %v3211_v57 = vpop.f32.mrf.mxu0 }
 0x3bd   : > { %v3213_v2 = vpop.f32.mrf.mxu0 }
 0x3bf   : > { %v3215_v5 = vpop.f32.mrf.mxu0 }
 0x3c1   : > { %v3217_v9 = vpop.f32.mrf.mxu0 }
 0x3c3   : > { %v3221_v16 = vpop.f32.mrf.mxu0 }
 0x3df   : > { %v3128_v44 = vpop.f32.mrf.mxu1 }
 0x3e0   : > { %v3129_v48 = vadd.f32 %v3128_v44, %v3055_v18 }
 0x3e1   : > { %v3130_v49 = vpop.f32.mrf.mxu1 }
 0x3e2   : > { %v3131_v50 = vadd.f32 %v3130_v49, %v3057_v22  ;;  %v13188_v51 = vadd.f32 %v3201_v54, %v3129_v48 }
 0x3e3   : > { %v3132_v56 = vpop.f32.mrf.mxu1 }
 0x3e4   : > { %15031 = vst [vmem:[#allocation72_spill] sm:$0xff] %v13188_v51  ;;  %v13190_v58 = vadd.f32 %v3203_v43, %v3131_v50  ;;  %v3524_v59 = vrot.slane %v13188_v51, 1  ;;  %v3133_v61 = vadd.f32 %v3132_v56, %v3059_v25  ;;  %v3223_v25 = vpop.f32.mrf.mxu0 }
 0x3e5   : > { %v3134_v60 = vpop.f32.mrf.mxu1 }
 0x3e6   : > { %v3135_v62 = vadd.f32 %v3134_v60, %v3061_v28  ;;  %3532 = vrot.lane.b32.xlu1 %v3524_v59, %s12331_s10  ;;  %v3629_v63 = vrot.slane %v13190_v58, 1  ;;  %v3669_v14 = vrot.slane %v13190_v58, 2  ;;  %v13199_v4 = vadd.f32 %v3205_v53, %v3133_v61 }
 0x3e7   : > { %v3138_v1 = vpop.f32.mrf.mxu1  ;;  %v3709_v17 = vrot.slane %v13190_v58, 3 }
 0x3e8   : > { %v13195_v55 = vadd.f32 %v3207_v45, %v3135_v62  ;;  %3637 = vrot.lane.b32.xlu0 %v3629_v63, %s12331_s10  ;;  %15032 = vst [vmem:[#allocation73_spill] sm:$0xff] %v13199_v4  ;;  %v3139_v23 = vadd.f32 %v3138_v1, %v3065_v33  ;;  %v3525_v8 = vrot.slane %v13199_v4, 1 }
 0x3e9   : > { %v3140_v3 = vpop.f32.mrf.mxu1 }
 0x3ea   : > { %3677 = vrot.lane.b32.xlu1 %v3669_v14, %s12330_s7  ;;  %v3141_v26 = vadd.f32 %v3140_v3, %v3067_v36  ;;  %v3630_v6 = vrot.slane %v13195_v55, 1  ;;  %v13207_v32 = vadd.f32 %v3211_v57, %v3139_v23  ;;  %v3710_v11 = vrot.slane %v13195_v55, 3 }
 0x3eb   : > { %v3142_v20 = vpop.f32.mrf.mxu1  ;;  %v3670_v12 = vrot.slane %v13195_v55, 2 }
 0x3ec   : > { %3717 = vrot.lane.b32.xlu0 %v3709_v17, %s12332_s9  ;;  %v13209_v10 = vadd.f32 %v3213_v2, %v3141_v26  ;;  %v3526_v13 = vrot.slane %v13207_v32, 1  ;;  %v3143_v18 = vadd.f32 %v3142_v20, %v13165_v37  ;;  %v3225_v37 = vpop.f32.mrf.mxu0 }
 0x3ed   : > { %v3144_v7 = vpop.f32.mrf.mxu1 }
 0x3ee   : > { %3639 = vrot.lane.b32.xlu1 %v3630_v6, %s12331_s10  ;;  %v3145_v19 = vadd.f32 %v3144_v7, %v3071_v38  ;;  %v3671_v21 = vrot.slane %v13209_v10, 2  ;;  %v3631_v22 = vrot.slane %v13209_v10, 1  ;;  %v13221_v28 = vadd.f32 %v3215_v5, %v3143_v18  ;;  %v3227_v44 = vpop.f32.mrf.mxu0 }
 0x3ef   : > { %v3148_v29 = vpop.f32.mrf.mxu1  ;;  %v3711_v31 = vrot.slane %v13209_v10, 3 }
 0x3f0   : > { %3534 = vrot.lane.b32.xlu0 %v3525_v8, %s12331_s10  ;;  %v13223_v30 = vadd.f32 %v3217_v9, %v3145_v19  ;;  %v3149_v33 = vadd.f32 %v3148_v29, %v13169_v34  ;;  %v3527_v35 = vrot.slane %v13221_v28, 1  ;;  %v3231_v60 = vpop.f32.mrf.mxu0 }
 0x3f1   : > { %v3150_v15 = vpop.f32.mrf.mxu1 }
 0x3f2   : > { %3719 = vrot.lane.b32.xlu1 %v3710_v11, %s12332_s9  ;;  %v3632_v54 = vrot.slane %v13223_v30, 1  ;;  %v3151_v43 = vadd.f32 %v3150_v15, %v13172_v40  ;;  %v13234_v53 = vadd.f32 %v3221_v16, %v3149_v33  ;;  %v3672_v34 = vrot.slane %v13223_v30, 2  ;;  %v3233_v3 = vpop.f32.mrf.mxu0 }
 0x3f3   : > { %v3152_v24 = vpop.f32.mrf.mxu1  ;;  %v3712_v49 = vrot.slane %v13223_v30, 3 }
 0x3f4   : > { %3679 = vrot.lane.b32.xlu0 %v3670_v12, %s12330_s7  ;;  %v3528_v48 = vrot.slane %v13234_v53, 1  ;;  %v3153_v63 = vadd.f32 %v3152_v24, %v13176_v41  ;;  %v3235_v26 = vpop.f32.mrf.mxu0 }
 0x3f5   : > { %v3154_v36 = vpop.f32.mrf.mxu1 }
 0x3f6   : > { %3536 = vrot.lane.b32.xlu1 %v3526_v13, %s12331_s10  ;;  %v3155_v38 = vadd.f32 %v3154_v36, %v13178_v39  ;;  %v13242_v39 = vadd.f32 %v3223_v25, %v3151_v43  ;;  %v13263_v5 = vadd.f32 %v3225_v37, %v3153_v63  ;;  %v3237_v8 = vpop.f32.mrf.mxu0 }
 0x3f7   : > { %v3158_v50 = vpop.f32.mrf.mxu1 }
 0x3f8   : > { %3681 = vrot.lane.b32.xlu0 %v3671_v21, %s12330_s7  ;;  %v13238_v45 = vadd.f32 %v3227_v44, %v3155_v38  ;;  %v3633_v56 = vrot.slane %v13242_v39, 1  ;;  %v3159_v61 = vadd.f32 %v3158_v50, %v13180_v46  ;;  %v3673_v62 = vrot.slane %v13242_v39, 2  ;;  %v3347_v44 = vpop.f32.mrf.mxu0 }
 0x3f9   : > { %v3160_v59 = vpop.f32.mrf.mxu1  ;;  %v3713_v46 = vrot.slane %v13242_v39, 3  ;;  %v3529_v7 = vrot.slane %v13263_v5, 1 }
 0x3fa   : > { %3641 = vrot.lane.b32.xlu1 %v3631_v22, %s12331_s10  ;;  %v3634_v40 = vrot.slane %v13238_v45, 1  ;;  %v3674_v57 = vrot.slane %v13238_v45, 2  ;;  %v3161_v1 = vadd.f32 %v3160_v59, %v13182_v42  ;;  %v3714_v2 = vrot.slane %v13238_v45, 3  ;;  %v3349_v50 = vpop.f32.mrf.mxu0 }
 0x3fb   : > { %v3162_v14 = vpop.f32.mrf.mxu1  ;;  %v13259_v17 = vadd.f32 %v3231_v60, %v3159_v61 }
 0x3fc   : > { %3721 = vrot.lane.b32.xlu0 %v3711_v31, %s12332_s9  ;;  %v3163_v23 = vadd.f32 %v3162_v14, %v13184_v47  ;;  %v13266_v41 = vadd.f32 %v3233_v3, %v3161_v1  ;;  %v3351_v1 = vpop.f32.mrf.mxu0 }
 0x3fd   : > { %v3164_v20 = vpop.f32.mrf.mxu1  ;;  %v3530_v42 = vrot.slane %v13259_v17, 1 }
 0x3fe   : > { %3538 = vrot.lane.b32.xlu1 %v3527_v35, %s12331_s10  ;;  %v3165_v6 = vadd.f32 %v3164_v20, %v13186_v52  ;;  %v13273_v29 = vadd.f32 %v3235_v26, %v3163_v23  ;;  %v3635_v47 = vrot.slane %v13266_v41, 1  ;;  %v3675_v12 = vrot.slane %v13266_v41, 2 }
 0x3ff   : > { %v3715_v13 = vrot.slane %v13266_v41, 3 }
 0x400   : > { %3643 = vrot.lane.b32.xlu0 %v3632_v54, %s12331_s10  ;;  %v13278_v9 = vadd.f32 %v3237_v8, %v3165_v6  ;;  %v3531_v11 = vrot.slane %v13273_v29, 1 }
 0x402   : > { %3683 = vrot.lane.b32.xlu1 %v3672_v34, %s12330_s7  ;;  %v3636_v52 = vrot.slane %v13278_v9, 1  ;;  %v3676_v15 = vrot.slane %v13278_v9, 2  ;;  %v3716_v16 = vrot.slane %v13278_v9, 3 }
 0x404   : > { %3540 = vrot.lane.b32.xlu0 %v3528_v48, %s12331_s10 }
 0x406   : > { %3723 = vrot.lane.b32.xlu1 %v3712_v49, %s12332_s9 }
 0x408   : > { %3647 = vrot.lane.b32.xlu0 %v3634_v40, %s12331_s10 }
 0x40a   : > { %3645 = vrot.lane.b32.xlu1 %v3633_v56, %s12331_s10 }
 0x40c   : > { %3687 = vrot.lane.b32.xlu0 %v3674_v57, %s12330_s7 }
 0x40e   : > { %3685 = vrot.lane.b32.xlu1 %v3673_v62, %s12330_s7 }
 0x410   : > { %3727 = vrot.lane.b32.xlu0 %v3714_v2, %s12332_s9 }
 0x412   : > { %3725 = vrot.lane.b32.xlu1 %v3713_v46, %s12332_s9 }
 0x414   : > { %3544 = vrot.lane.b32.xlu0 %v3530_v42, %s12331_s10 }
 0x416   : > { %3542 = vrot.lane.b32.xlu1 %v3529_v7, %s12331_s10 }
 0x418   : > { %3649 = vrot.lane.b32.xlu0 %v3635_v47, %s12331_s10  ;;  %v3353_v47 = vpop.f32.mrf.mxu0 }
 0x41a   : > { %3546 = vrot.lane.b32.xlu1 %v3531_v11, %s12331_s10 }
 0x41c   : > { %3689 = vrot.lane.b32.xlu0 %v3675_v12, %s12330_s7 }
 0x41e   : > { %3651 = vrot.lane.b32.xlu1 %v3636_v52, %s12331_s10 }
 0x41f   : > { %v3274_v18 = vpop.f32.mrf.mxu1 }
 0x420   : > { %3729 = vrot.lane.b32.xlu0 %v3715_v13, %s12332_s9  ;;  %v3348_v57 = vadd.f32 %v3347_v44, %v3274_v18  ;;  %v3357_v13 = vpop.f32.mrf.mxu0 }
 0x421   : > { %v3276_v19 = vpop.f32.mrf.mxu1 }
 0x422   : > { %3691 = vrot.lane.b32.xlu1 %v3676_v15, %s12330_s7  ;;  %v3350_v63 = vadd.f32 %v3349_v50, %v3276_v19  ;;  %v3359_v50 = vpop.f32.mrf.mxu0 }
 0x423   : > { %v3278_v21 = vpop.f32.mrf.mxu1 }
 0x424   : > { %3731 = vrot.lane.b32.xlu0 %v3716_v16, %s12332_s9  ;;  %v3352_v42 = vadd.f32 %v3351_v1, %v3278_v21 }
 0x425   : > { %v3280_v22 = vpop.f32.mrf.mxu1 }
 0x426   : > { %v3354_v44 = vadd.f32 %v3353_v47, %v3280_v22 }
 0x427   : > { %v13293_v24 = vpop.f32.mrf.mxu1 }
 0x429   : > { %v3286_v25 = vpop.f32.mrf.mxu1 }
 0x42b   : > { %v13295_v31 = vpop.f32.mrf.mxu1 }
 0x42d   : > { %v13297_v33 = vpop.f32.mrf.mxu1 }
 0x42f   : > { %v13299_v35 = vpop.f32.mrf.mxu1 }
 0x431   : > { %v13301_v36 = vpop.f32.mrf.mxu1 }
 0x433   : > { %v13303_v37 = vpop.f32.mrf.mxu1 }
 0x435   : > { %v13305_v38 = vpop.f32.mrf.mxu1 }
 0x437   : > { %v13307_v54 = vpop.f32.mrf.mxu1 }
 0x439   : > { %v13309_v43 = vpop.f32.mrf.mxu1 }
 0x43b   : > { %v13313_v48 = vpop.f32.mrf.mxu1 }
 0x43d   : > { %v13319_v56 = vpop.f32.mrf.mxu1 }
 0x458   : > { %v13311_v34 = vpop.permute.xlu1 %3532 }
 0x45a   : > { %v13315_v49 = vpop.permute.xlu0 %3637 }
 0x45c   : > { %v13317_v40 = vpop.permute.xlu1 %3677 }
 0x45e   : > { %v13321_v59 = vpop.permute.xlu0 %3717 }
 0x45f   : > { %v3420_v60 = vpop.f32.mrf.mxu1 }
 0x460   : > { %v13323_v61 = vadd.f32 %v3420_v60, %v3348_v57  ;;  %v13325_v62 = vpop.permute.xlu1 %3639 }
 0x461   : > { %v3422_v2 = vpop.f32.mrf.mxu1 }
 0x462   : > { %15033 = vst [vmem:[#allocation74_spill] sm:$0xff] %v13323_v61  ;;  %v13327_v14 = vpop.permute.xlu0 %3534  ;;  %v3814_v3 = vrot.slane %v13323_v61, 1  ;;  %v13330_v46 = vadd.f32 %v3422_v2, %v3350_v63  ;;  %v3894_v23 = vrot.slane %v13323_v61, 3  ;;  %v3854_v8 = vrot.slane %v13323_v61, 2 }
 0x463   : > { %v3424_v20 = vpop.f32.mrf.mxu1 }
 0x464   : > { %15034 = vst [vmem:[#allocation75_spill] sm:$0xff] %v13330_v46  ;;  %v13333_v26 = vpop.permute.xlu1 %3719  ;;  %3822 = vrot.lane.b32.xlu0 %v3814_v3, %s12331_s10  ;;  %3902 = vrot.lane.b32.xlu1 %v3894_v23, %s12332_s9  ;;  %v13337_v6 = vadd.f32 %v3424_v20, %v3352_v42  ;;  %v3966_v12 = vrot.slane %v13330_v46, 5  ;;  %v4006_v19 = vrot.slane %v13330_v46, 6  ;;  %v4046_v2 = vrot.slane %v13330_v46, 7  ;;  %v3361_v23 = vpop.f32.mrf.mxu0 }
 0x465   : > { %v3426_v11 = vpop.f32.mrf.mxu1  ;;  %v3360_v3 = vadd.f32 %v3359_v50, %v3286_v25 }
 0x466   : > { %15035 = vst [vmem:[#allocation76_spill] sm:$0xff] %v13337_v6  ;;  %v13339_v7 = vpop.permute.xlu0 %3679  ;;  %v3815_v16 = vrot.slane %v13337_v6, 1  ;;  %v3855_v60 = vrot.slane %v13337_v6, 2  ;;  %v13358_v63 = vadd.f32 %v3426_v11, %v3354_v44  ;;  %v3363_v25 = vpop.f32.mrf.mxu0 }
 0x467   : > { %v3430_v18 = vpop.f32.mrf.mxu1 }
 0x468   : > { %v13343_v52 = vpop.permute.xlu1 %3536  ;;  %3862 = vrot.lane.b32.xlu0 %v3854_v8, %s12330_s7  ;;  %3974 = vrot.lane.b32.xlu1 %v3966_v12, %s12331_s10  ;;  %15036 = vst [vmem:[#allocation77_spill] sm:$0xff] %v13358_v63  ;;  %v3895_v8 = vrot.slane %v13337_v6, 3  ;;  %v3967_v11 = vrot.slane %v13358_v63, 5  ;;  %v3362_v12 = vadd.f32 %v3361_v23, %v13295_v31  ;;  %v3358_v31 = vadd.f32 %v3357_v13, %v13293_v24 }
 0x469   : > { %v3432_v1 = vpop.f32.mrf.mxu1  ;;  %v3661_v23 = vadd.f32 %v13315_v49, %v13190_v58 }
 0x46a   : > { %v13347_v15 = vpop.permute.xlu0 %3681  ;;  %v13365_v22 = vadd.f32 %v3432_v1, %v3360_v3  ;;  %v4007_v1 = vrot.slane %v13358_v63, 6 }
 0x46b   : > { %v3434_v47 = vpop.f32.mrf.mxu1  ;;  %v3701_v24 = vadd.f32 %v13317_v40, %v3661_v23 }
 0x46c   : > { %v13351_v21 = vpop.permute.xlu1 %3641  ;;  %3824 = vrot.lane.b32.xlu0 %v3815_v16, %s12331_s10  ;;  %4014 = vrot.lane.b32.xlu1 %v4006_v19, %s12330_s7  ;;  %15037 = vst [vmem:[#allocation78_spill] sm:$0xff] %v13365_v22  ;;  %v13376_v19 = vadd.f32 %v3434_v47, %v3362_v12  ;;  %v4048_v50 = vrot.slane %v13365_v22, 7  ;;  %v13395_v12 = vadd.f32 %v3430_v18, %v3358_v31 }
 0x46d   : > { %v3556_v18 = vadd.f32 %v13311_v34, %v13188_v51 }
 0x46e   : > { %v13355_v57 = vpop.permute.xlu0 %3721  ;;  %15039 = vst [vmem:[#allocation80_spill] sm:$0xff] %v13395_v12  ;;  %v3816_v13 = vrot.slane %v13395_v12, 1  ;;  %v3856_v23 = vrot.slane %v13395_v12, 2  ;;  %v3896_v51 = vrot.slane %v13395_v12, 3 }
 0x470   : > { %v13361_v20 = vpop.permute.xlu1 %3538  ;;  %3864 = vrot.lane.b32.xlu0 %v3855_v60, %s12330_s7  ;;  %4054 = vrot.lane.b32.xlu1 %v4046_v2, %s12332_s9  ;;  %v3436_v60 = vpop.f32.mrf.mxu1  ;;  %v3364_v2 = vadd.f32 %v3363_v25, %v13297_v33  ;;  %v4047_v33 = vrot.slane %v13358_v63, 7 }
 0x471   : > { %v3367_v25 = vpop.f32.mrf.mxu0 }
 0x472   : > { %v13367_v42 = vpop.permute.xlu0 %3643 }
 0x474   : > { %v13372_v16 = vpop.permute.xlu1 %3683  ;;  %3904 = vrot.lane.b32.xlu0 %v3895_v8, %s12332_s9  ;;  %3976 = vrot.lane.b32.xlu1 %v3967_v11, %s12331_s10  ;;  %v13390_v8 = vadd.f32 %v3436_v60, %v3364_v2  ;;  %v3897_v11 = vrot.slane %v13376_v19, 3  ;;  %v3440_v2 = vpop.f32.mrf.mxu1 }
 0x476   : > { %v13378_v44 = vpop.permute.xlu0 %3540  ;;  %15038 = vst [vmem:[#allocation79_spill] sm:$0xff] %v13390_v8  ;;  %v3969_v49 = vrot.slane %v13390_v8, 5  ;;  %v4009_v40 = vrot.slane %v13390_v8, 6 }
 0x478   : > { %v13383_v3 = vpop.permute.xlu1 %3723  ;;  %4058 = vrot.lane.b32.xlu0 %v4048_v50, %s12332_s9  ;;  %4016 = vrot.lane.b32.xlu1 %v4007_v1, %s12330_s7  ;;  %v3369_v50 = vpop.f32.mrf.mxu0  ;;  %v3741_v1 = vadd.f32 %v13321_v59, %v3701_v24 }
 0x47a   : > { %v13392_v47 = vpop.permute.xlu0 %3647  ;;  %v3371_v34 = vpop.f32.mrf.mxu0  ;;  %v3750_v59 = vsel %vm3749_vm3, %v3741_v1, -inf  ;;  %v3968_v1 = vrot.slane %v13365_v22, 5 }
 0x47c   : > { %v13398_v0 = vpop.permute.xlu1 %3645  ;;  %3908 = vrot.lane.b32.xlu0 %v3897_v11, %s12332_s9  ;;  %4056 = vrot.lane.b32.xlu1 %v4047_v33, %s12332_s9  ;;  %v3368_v11 = vadd.f32 %v3367_v25, %v13299_v35  ;;  %v3565_v33 = vsel %vm3564_vm2, %v3556_v18, -inf  ;;  %v3373_v63 = vpop.f32.mrf.mxu0  ;;  %v3751_v35 = vrot.slane %v3750_v59, 4 }
 0x47d   : > { %v3566_v27 = vrot.slane %v3565_v33, 4 }
 0x47e   : > { %v13403_v58 = vpop.permute.xlu0 %3687  ;;  %v13425_v24 = vadd.f32 %v3440_v2, %v3368_v11  ;;  %v3377_v2 = vpop.f32.mrf.mxu0  ;;  %v3752_v11 = vmax.f32 %v3750_v59, %v3751_v35 }
 0x480   : > { %v13409_v60 = vpop.permute.xlu1 %3685  ;;  %3980 = vrot.lane.b32.xlu0 %v3969_v49, %s12331_s10  ;;  %3826 = vrot.lane.b32.xlu1 %v3816_v13, %s12331_s10  ;;  %15040 = vst [vmem:[#allocation81_spill] sm:$0xff] %v13425_v24  ;;  %v4049_v13 = vrot.slane %v13390_v8, 7  ;;  %v3818_v18 = vrot.slane %v13425_v24, 1  ;;  %v3557_v8 = vadd.f32 %v13327_v14, %v13199_v4  ;;  %v3379_v6 = vpop.f32.mrf.mxu0  ;;  %v3753_v59 = vrot.slane %v3752_v11, 2 }
 0x482   : > { %v13415_v31 = vpop.permute.xlu0 %3727  ;;  %v3572_v14 = vsel %vm3564_vm2, %v3557_v8, -inf  ;;  %v3381_v61 = vpop.f32.mrf.mxu0  ;;  %v3754_v8 = vmax.f32 %v3752_v11, %v3753_v59  ;;  %v13477_v11 = vadd.f32 %v3379_v6, %v13309_v43 }
 0x484   : > { %4020 = vrot.lane.b32.xlu0 %v4009_v40, %s12330_s7  ;;  %v13421_v49 = vpop.permute.xlu1 %3725  ;;  %3866 = vrot.lane.b32.xlu1 %v3856_v23, %s12330_s7  ;;  %v3567_v40 = vmax.f32 %v3565_v33, %v3566_v27  ;;  %v4008_v27 = vrot.slane %v13365_v22, 6  ;;  %v3370_v33 = vadd.f32 %v3369_v50, %v13301_v36  ;;  %v3898_v22 = vrot.slane %v13425_v24, 3 }
 0x485   : > { %v3817_v50 = vrot.slane %v13376_v19, 1  ;;  %v3755_v59 = vrot.slane %v3754_v8, 1 }
 0x486   : > { %v13430_v25 = vpop.permute.xlu0 %3544  ;;  %v3568_v12 = vrot.slane %v3567_v40, 2 }
 0x487   : > { %15041 = vst [vmem:[#allocation82_spill] sm:$0xff] %v13430_v25 }
 0x488   : > { %4060 = vrot.lane.b32.xlu0 %v4049_v13, %s12332_s9  ;;  %3906 = vrot.lane.b32.xlu1 %v3896_v51, %s12332_s9  ;;  %v13434_v23 = vpop.permute.xlu1 %3542  ;;  %v3858_v13 = vrot.slane %v13425_v24, 2  ;;  %v3442_v51 = vpop.f32.mrf.mxu1  ;;  %v3569_v36 = vmax.f32 %v3567_v40, %v3568_v12  ;;  %v3372_v12 = vadd.f32 %v3371_v34, %v13303_v37  ;;  %v3374_v37 = vadd.f32 %v3373_v63, %v13305_v38 }
 0x489   : > { %v13454_v4 = vadd.f32 %v3442_v51, %v3370_v33  ;;  %v3857_v33 = vrot.slane %v13376_v19, 2  ;;  %v3378_v34 = vadd.f32 %v3377_v2, %v13307_v54  ;;  %v3665_v54 = vadd.f32 %v13398_v0, %v13242_v39 }
 0x48a   : > { %v13442_v46 = vpop.permute.xlu0 %3649  ;;  %v3570_v40 = vrot.slane %v3569_v36, 1  ;;  %v3559_v0 = vadd.f32 %v13361_v20, %v13221_v28 }
 0x48b   : > { %v3970_v51 = vrot.slane %v13454_v4, 5  ;;  %v4010_v6 = vrot.slane %v13454_v4, 6  ;;  %v3705_v39 = vadd.f32 %v13409_v60, %v3665_v54  ;;  %v3667_v20 = vadd.f32 %v13442_v46, %v13266_v41 }
 0x48c   : > { %3830 = vrot.lane.b32.xlu0 %v3818_v18, %s12331_s10  ;;  %3978 = vrot.lane.b32.xlu1 %v3968_v1, %s12331_s10  ;;  %v3662_v18 = vadd.f32 %v13325_v62, %v13195_v55  ;;  %v13450_v35 = vpop.permute.xlu1 %3546  ;;  %v3573_v55 = vrot.slane %v3572_v14, 4  ;;  %v3663_v62 = vadd.f32 %v13351_v21, %v13209_v10  ;;  %v3558_v10 = vadd.f32 %v13343_v52, %v13207_v32 }
 0x48d   : > { %v13481_v52 = vadd.f32 %v3381_v61, %v13313_v48  ;;  %v13490_v38 = vmax.f32 %v3569_v36, %v3570_v40 }
 0x48e   : > { %v3702_v1 = vadd.f32 %v13339_v7, %v3662_v18  ;;  %v3690_v25 = vpop.permute.xlu0 %3689  ;;  %v3383_v18 = vpop.f32.mrf.mxu0  ;;  %v13466_v24 = vmax.f32 %v3572_v14, %v3573_v55  ;;  %v3703_v21 = vadd.f32 %v13347_v15, %v3663_v62  ;;  %v3579_v61 = vsel %vm3564_vm2, %v3558_v10, -inf }
 0x48f   : > { %v3560_v55 = vadd.f32 %v13378_v44, %v13234_v53  ;;  %v3666_v44 = vadd.f32 %v13392_v47, %v13238_v45  ;;  %v3707_v40 = vadd.f32 %v3690_v25, %v3667_v20 }
 0x490   : > { %3870 = vrot.lane.b32.xlu0 %v3858_v13, %s12330_s7  ;;  %4018 = vrot.lane.b32.xlu1 %v4008_v27, %s12330_s7  ;;  %v3444_v13 = vpop.f32.mrf.mxu1  ;;  %v3742_v7 = vadd.f32 %v13333_v26, %v3702_v1  ;;  %v3652_v27 = vpop.permute.xlu1 %3651  ;;  %v3575_v48 = vrot.slane %v13466_v24, 2  ;;  %v3743_v63 = vadd.f32 %v13355_v57, %v3703_v21 }
 0x491   : > { %v13484_v14 = vadd.f32 %v3444_v13, %v3372_v12  ;;  %v3593_v46 = vsel %vm3564_vm2, %v3560_v55, -inf  ;;  %v3706_v45 = vadd.f32 %v13403_v58, %v3666_v44 }
 0x492   : > { %v3446_v26 = vpop.f32.mrf.mxu1  ;;  %v3757_v15 = vsel %vm3749_vm3, %v3742_v7, -inf  ;;  %v3730_v43 = vpop.permute.xlu0 %3729  ;;  %v3580_v7 = vrot.slane %v3579_v61, 4 }
 0x493   : > { %v3758_v36 = vrot.slane %v3757_v15, 4  ;;  %v3859_v62 = vrot.slane %v13484_v14, 2  ;;  %v3819_v60 = vrot.slane %v13484_v14, 1  ;;  %v13522_v12 = vadd.f32 %v3446_v26, %v3374_v37 }
 0x494   : > { %3910 = vrot.lane.b32.xlu0 %v3898_v22, %s12332_s9  ;;  %3828 = vrot.lane.b32.xlu1 %v3817_v50, %s12331_s10  ;;  %v3664_v22 = vadd.f32 %v13367_v42, %v13223_v30  ;;  %v4050_v30 = vrot.slane %v13454_v4, 7  ;;  %v13488_v42 = vadd.f32 %v3383_v18, %v13319_v56  ;;  %v3450_v1 = vpop.f32.mrf.mxu1  ;;  %v13500_v56 = vmax.f32 %v3754_v8, %v3755_v59  ;;  %v3692_v50 = vpop.permute.xlu1 %3691 }
 0x495   : > { %v13511_v13 = vadd.f32 %v3450_v1, %v3378_v34  ;;  %v3745_v8 = vadd.f32 %v13421_v49, %v3705_v39  ;;  %v3561_v49 = vadd.f32 %v13434_v23, %v13263_v5  ;;  %v3899_v47 = vrot.slane %v13484_v14, 3 }
 0x496   : > { %v3704_v2 = vadd.f32 %v13372_v16, %v3664_v22  ;;  %v3668_v16 = vadd.f32 %v3652_v27, %v13278_v9  ;;  %v3586_v9 = vsel %vm3564_vm2, %v3559_v0, -inf  ;;  %v3732_v41 = vpop.permute.xlu0 %3731  ;;  %v3747_v10 = vadd.f32 %v3730_v43, %v3707_v40  ;;  %v3452_v25 = vpop.f32.mrf.mxu1  ;;  %v15042_v43 = vld [vmem:[#allocation82_spill] sm:$0xff] }
 0x497   : > { %v3778_v18 = vsel %vm3749_vm3, %v3745_v8, -inf  ;;  %v3820_v21 = vrot.slane %v13511_v13, 1  ;;  %v3587_v23 = vrot.slane %v3586_v9, 4  ;;  %v3746_v26 = vadd.f32 %v13415_v31, %v3706_v45 }
 0x498   : > { %3982 = vrot.lane.b32.xlu0 %v3970_v51, %s12331_s10  ;;  %3868 = vrot.lane.b32.xlu1 %v3857_v33, %s12330_s7  ;;  %v3744_v57 = vadd.f32 %v13383_v3, %v3704_v2  ;;  %v3764_v51 = vsel %vm3749_vm3, %v3743_v63, -inf  ;;  %v3708_v3 = vadd.f32 %v3692_v50, %v3668_v16  ;;  %v3759_v33 = vmax.f32 %v3757_v15, %v3758_v36  ;;  %v3454_v39 = vpop.f32.mrf.mxu1 }
 0x499   : > { %v3765_v22 = vrot.slane %v3764_v51, 4  ;;  %v3594_v34 = vrot.slane %v3593_v46, 4  ;;  %v3600_v58 = vsel %vm3564_vm2, %v3561_v49, -inf  ;;  %v3563_v15 = vadd.f32 %v13450_v35, %v13273_v29 }
 0x49a   : > { %v3771_v27 = vsel %vm3749_vm3, %v3744_v57, -inf  ;;  %v3748_v37 = vadd.f32 %v3732_v41, %v3708_v3  ;;  %v3779_v54 = vrot.slane %v3778_v18, 4  ;;  %v3971_v63 = vrot.slane %v13522_v12, 5 }
 0x49b   : > { %v3772_v59 = vrot.slane %v3771_v27, 4  ;;  %v3760_v31 = vrot.slane %v3759_v33, 2  ;;  %v13543_v2 = vadd.f32 %v3452_v25, %v13477_v11  ;;  %v3792_v1 = vsel %vm3749_vm3, %v3747_v10, -inf }
 0x49c   : > { %4062 = vrot.lane.b32.xlu0 %v4050_v30, %s12332_s9  ;;  %4022 = vrot.lane.b32.xlu1 %v4010_v6, %s12330_s7  ;;  %v3581_v30 = vmax.f32 %v3579_v61, %v3580_v7  ;;  %v3562_v6 = vadd.f32 %v15042_v43, %v13259_v17  ;;  %v3860_v36 = vrot.slane %v13511_v13, 2  ;;  %v3766_v0 = vmax.f32 %v3764_v51, %v3765_v22 }
 0x49d   : > { %v3785_v35 = vsel %vm3749_vm3, %v3746_v26, -inf  ;;  %v3601_v50 = vrot.slane %v3600_v58, 4  ;;  %v3799_v61 = vsel %vm3749_vm3, %v3748_v37, -inf  ;;  %v3588_v55 = vmax.f32 %v3586_v9, %v3587_v23  ;;  %v3456_v23 = vpop.f32.mrf.mxu1 }
 0x49e   : > { %v3595_v57 = vmax.f32 %v3593_v46, %v3594_v34  ;;  %v3773_v16 = vmax.f32 %v3771_v27, %v3772_v59  ;;  %v3780_v11 = vmax.f32 %v3778_v18, %v3779_v54  ;;  %v3607_v8 = vsel %vm3564_vm2, %v3562_v6, -inf }
 0x49f   : > { %v3793_v20 = vrot.slane %v3792_v1, 4  ;;  %v13555_v7 = vadd.f32 %v3454_v39, %v13481_v52  ;;  %v3786_v51 = vrot.slane %v3785_v35, 4  ;;  %v3800_v44 = vrot.slane %v3799_v61, 4 }
 0x4a0   : > { %3872 = vrot.lane.b32.xlu0 %v3859_v62, %s12330_s7  ;;  %3832 = vrot.lane.b32.xlu1 %v3819_v60, %s12331_s10  ;;  %v3614_v62 = vsel %vm3564_vm2, %v3563_v15, -inf  ;;  %v4011_v60 = vrot.slane %v13522_v12, 6  ;;  %v4012_v3 = vrot.slane %v13543_v2, 6  ;;  %v3582_v9 = vrot.slane %v3581_v30, 2 }
 0x4a1   : > { %v3767_v49 = vrot.slane %v3766_v0, 2  ;;  %v3602_v40 = vmax.f32 %v3600_v58, %v3601_v50  ;;  %v3615_v41 = vrot.slane %v3614_v62, 4  ;;  %v3761_v46 = vmax.f32 %v3759_v33, %v3760_v31 }
 0x4a2   : > { %v3589_v27 = vrot.slane %v3588_v55, 2  ;;  %v3774_v45 = vrot.slane %v3773_v16, 2  ;;  %v3576_v52 = vmax.f32 %v13466_v24, %v3575_v48  ;;  %v3781_v18 = vrot.slane %v3780_v11, 2 }
 0x4a3   : > { %v3794_v10 = vmax.f32 %v3792_v1, %v3793_v20  ;;  %v3596_v22 = vrot.slane %v3595_v57, 2  ;;  %v3787_v25 = vmax.f32 %v3785_v35, %v3786_v51  ;;  %v3801_v26 = vmax.f32 %v3799_v61, %v3800_v44 }
 0x4a4   : > { %3912 = vrot.lane.b32.xlu0 %v3899_v47, %s12332_s9  ;;  %3834 = vrot.lane.b32.xlu1 %v3820_v21, %s12331_s10  ;;  %v3608_v47 = vrot.slane %v3607_v8, 4  ;;  %v3900_v21 = vrot.slane %v13511_v13, 3  ;;  %v3821_v37 = vrot.slane %v13555_v7, 1  ;;  %v3583_v33 = vmax.f32 %v3581_v30, %v3582_v9 }
 0x4a5   : > { %v3768_v34 = vmax.f32 %v3766_v0, %v3767_v49  ;;  %v3603_v59 = vrot.slane %v3602_v40, 2  ;;  %v3616_v58 = vmax.f32 %v3614_v62, %v3615_v41  ;;  %v3762_v15 = vrot.slane %v3761_v46, 1 }
 0x4a6   : > { %v3590_v54 = vmax.f32 %v3588_v55, %v3589_v27  ;;  %v3775_v43 = vmax.f32 %v3773_v16, %v3774_v45  ;;  %v3609_v24 = vmax.f32 %v3607_v8, %v3608_v47  ;;  %v13568_v48 = vadd.f32 %v3456_v23, %v13488_v42 }
 0x4a7   : > { %v3782_v6 = vmax.f32 %v3780_v11, %v3781_v18  ;;  %v3972_v31 = vrot.slane %v13543_v2, 5  ;;  %v3597_v30 = vmax.f32 %v3595_v57, %v3596_v22  ;;  %v3788_v1 = vrot.slane %v3787_v25, 2 }
 0x4a8   : > { %3984 = vrot.lane.b32.xlu0 %v3971_v63, %s12331_s10  ;;  %3874 = vrot.lane.b32.xlu1 %v3860_v36, %s12330_s7  ;;  %v3795_v63 = vrot.slane %v3794_v10, 2  ;;  %v3802_v36 = vrot.slane %v3801_v26, 2  ;;  %v3861_v0 = vrot.slane %v13555_v7, 2  ;;  %v3577_v39 = vrot.slane %v3576_v52, 1 }
 0x4a9   : > { %v3769_v35 = vrot.slane %v3768_v34, 1  ;;  %v3604_v50 = vmax.f32 %v3602_v40, %v3603_v59  ;;  %v3617_v61 = vrot.slane %v3616_v58, 2  ;;  %v3584_v55 = vrot.slane %v3583_v33, 1 }
 0x4aa   : > { %v3591_v42 = vrot.slane %v3590_v54, 1  ;;  %v3776_v16 = vrot.slane %v3775_v43, 1  ;;  %v3610_v62 = vrot.slane %v3609_v24, 2  ;;  %v3763_v11 = vmax.f32 %v3761_v46, %v3762_v15 }
 0x4ab   : > { %v3783_v57 = vrot.slane %v3782_v6, 1  ;;  %v3796_v8 = vmax.f32 %v3794_v10, %v3795_v63  ;;  %v3901_v20 = vrot.slane %v13555_v7, 3  ;;  %v3789_v51 = vmax.f32 %v3787_v25, %v3788_v1 }
 0x4ac   : > { %4024 = vrot.lane.b32.xlu0 %v4011_v60, %s12330_s7  ;;  %4026 = vrot.lane.b32.xlu1 %v4012_v3, %s12330_s7  ;;  %v3598_v60 = vrot.slane %v3597_v30, 1  ;;  %v3803_v44 = vmax.f32 %v3801_v26, %v3802_v36  ;;  %v3973_v3 = vrot.slane %v13568_v48, 5  ;;  %v3578_v9 = vmax.f32 %v3576_v52, %v3577_v39 }
 0x4ad   : > { %v3770_v49 = vmax.f32 %v3768_v34, %v3769_v35  ;;  %v3605_v40 = vrot.slane %v3604_v50, 1  ;;  %v3618_v41 = vmax.f32 %v3616_v58, %v3617_v61  ;;  %v3585_v27 = vmax.f32 %v3583_v33, %v3584_v55 }
 0x4ae   : > { %v3592_v45 = vmax.f32 %v3590_v54, %v3591_v42  ;;  %v3777_v47 = vmax.f32 %v3775_v43, %v3776_v16  ;;  %v3611_v18 = vmax.f32 %v3609_v24, %v3610_v62  ;;  %v3784_v46 = vmax.f32 %v3782_v6, %v3783_v57  ;;  %v15044_v57 = vld [vmem:[#allocation74_spill] sm:$0xff] }
 0x4af   : > { %v3797_v10 = vrot.slane %v3796_v8, 1  ;;  %v4013_v22 = vrot.slane %v13568_v48, 6  ;;  %v3599_v23 = vmax.f32 %v3597_v30, %v3598_v60  ;;  %v3790_v25 = vrot.slane %v3789_v51, 1 }
 0x4b0   : > { %3914 = vrot.lane.b32.xlu0 %v3900_v21, %s12332_s9  ;;  %3836 = vrot.lane.b32.xlu1 %v3821_v37, %s12331_s10  ;;  %v4051_v21 = vrot.slane %v13522_v12, 7  ;;  %v3804_v52 = vrot.slane %v3803_v44, 1  ;;  %v4135_v26 = vsel %vm4094_vm4, %v3763_v11, %v13500_v56  ;;  %v4117_v37 = vsel %vm4094_vm4, %v3578_v9, %v13490_v38 }
 0x4b1   : > { %v3606_v33 = vmax.f32 %v3604_v50, %v3605_v40  ;;  %v3619_v34 = vrot.slane %v3618_v41, 1  ;;  %v4136_v59 = vsel %vm4096_vm5, %v3770_v49, %v4135_v26  ;;  %v3612_v58 = vrot.slane %v3611_v18, 1  ;;  %v10856_v49 = vld [vmem:[%s15043_s12 + $0x30] sm:$0xff]  }
 0x4b2   : > { %v4118_v15 = vsel %vm4096_vm5, %v3585_v27, %v4117_v37  ;;  %v4137_v54 = vsel %vm4098_vm6, %v3777_v47, %v4136_v59  ;;  %v4053_v43 = vrot.slane %v13568_v48, 7  ;;  %v3798_v24 = vmax.f32 %v3796_v8, %v3797_v10  ;;  %v15048_v26 = vld [vmem:[#allocation77_spill] sm:$0xff] }
 0x4b3   : > { %v4119_v56 = vsel %vm4098_vm6, %v3592_v45, %v4118_v15  ;;  %v4138_v38 = vsel %vm4100_vm7, %v3784_v46, %v4137_v54  ;;  %v3791_v6 = vmax.f32 %v3789_v51, %v3790_v25  ;;  %v4052_v63 = vrot.slane %v13543_v2, 7  ;;  %v10855_v51 = vld [vmem:[%s15043_s12 + $0x38] sm:$0xff]   ;;  %v15046_v45 = vld [vmem:[#allocation76_spill] sm:$0xff] }
 0x4b4   : > { %3986 = vrot.lane.b32.xlu0 %v3972_v31, %s12331_s10  ;;  %3876 = vrot.lane.b32.xlu1 %v3861_v0, %s12330_s7  ;;  %v4120_v31 = vsel %vm4100_vm7, %v3599_v23, %v4119_v56  ;;  %v3805_v30 = vmax.f32 %v3803_v44, %v3804_v52  ;;  %v3620_v1 = vmax.f32 %v3618_v41, %v3619_v34  ;;  %v15045_v40 = vmov 0.0   ;;  %v15047_v46 = vld [vmem:[#allocation75_spill] sm:$0xff] }
 0x4b5   : > { %v4121_v36 = vsel %vm4102_vm8, %v3606_v33, %v4120_v31  ;;  %v3613_v0 = vmax.f32 %v3611_v18, %v3612_v58  ;;  %v4139_v39 = vsel %vm4102_vm8, %v3791_v6, %v4138_v38  ;;  %10148 = vmatpush3.bf16.msra.mxu0 %v10855_v51  ;;  %v3942_v10 = vrot.slane %v15047_v46, 4  ;;  %v10858_v34 = vld [vmem:[%s15043_s12 + $0x20] sm:$0xff]   ;;  %v10859_v56 = vld [vmem:[%s15043_s12 + $0x18] sm:$0xff]  }
 0x4b6   : > { %v4140_v35 = vsel %vm4104_vm9, %v3798_v24, %v4139_v39  ;;  %10149 = vmatprep.subr.bf16.mxu0 %v15045_v40  ;;  %v3943_v37 = vrot.slane %v15048_v26, 4  ;;  %vm8316_vm2 = vcmask 130112   ;;  %vm8323_vm3 = vcmask 195712  }
 0x4b7   : > { %v4122_v50 = vsel %vm4104_vm9, %v3613_v0, %v4121_v36  ;;  %v4141_v61 = vsel %vm4106_vm10, %v3805_v30, %v4140_v35  ;;  %v10860_v30 = vld [vmem:[%s15043_s12 + $0x10] sm:$0xff]  }
 0x4b8   : > { %3916 = vrot.lane.b32.xlu0 %v3901_v20, %s12332_s9  ;;  %3988 = vrot.lane.b32.xlu1 %v3973_v3, %s12331_s10  ;;  %v4123_v55 = vsel %vm4106_vm10, %v3620_v1, %v4122_v50  ;;  %v13607_v3 = vld [vmem:[%s12771_s26] sm:$0xff]  ;;  %v10861_v50 = vld [vmem:[%s15043_s12 + $0x8] sm:$0xff]  }
 0x4b9   : > { %v6928_v9 = vsel %vm1374_vm1, %v13607_v3, -inf  ;;  %10150 = vmatpush3.bf16.msra.mxu0 %v10856_v49 }
 0x4ba   : > { %10151 = vmatprep.subr.bf16.mxu0 %v15045_v40 }
 0x4bc   : > { %4064 = vrot.lane.b32.xlu0 %v4051_v21, %s12332_s9  ;;  %4028 = vrot.lane.b32.xlu1 %v4013_v22, %s12330_s7  ;;  %v10857_v21 = vld [vmem:[%s15043_s12 + $0x28] sm:$0xff]  }
 0x4bd   : > { %10152 = vmatpush3.bf16.msra.mxu0 %v10857_v21 }
 0x4be   : > { %10153 = vmatprep.subr.bf16.mxu0 %v15045_v40 }
 0x4c0   : > { %4068 = vrot.lane.b32.xlu0 %v4053_v43, %s12332_s9  ;;  %4066 = vrot.lane.b32.xlu1 %v4052_v63, %s12332_s9 }
 0x4c1   : > { %10154 = vmatpush3.bf16.msra.mxu0 %v10858_v34 }
 0x4c2   : > { %10155 = vmatprep.subr.bf16.mxu0 %v15045_v40 }
 0x4c4   : > { %4142 = vrot.lane.b32.xlu0 %v4141_v61, %s12330_s7  ;;  %4124 = vrot.lane.b32.xlu1 %v4123_v55, %s12331_s10  ;;  %s14241_s7 = sshll.u32 %s15147_s11, 3 }
 0x4c5   : > { %10156 = vmatpush3.bf16.msra.mxu0 %v10859_v56  ;;  %s1358_s0 = scalar_lea.vmem %s15128_s4, %s14241_s7  ;;  %s15136_s4 = sld [smem:[#allocation65_spill]] }
 0x4c6   : > { %10157 = vmatprep.subr.bf16.mxu0 %v15045_v40 }
 0x4c9   : > { %10158 = vmatpush3.bf16.msra.mxu0 %v10860_v30 }
 0x4ca   : > { %10159 = vmatprep.subr.bf16.mxu0 %v15045_v40 }
 0x4cd   : > { %10160 = vmatpush3.bf16.msra.mxu0 %v10861_v50 }
 0x4ce   : > { %10161 = vmatprep.subr.bf16.mxu0 %v15045_v40 }
 0x4d6   : > { %v3823_v42 = vpop.permute.xlu0 %3822  ;;  %v3903_v16 = vpop.permute.xlu1 %3902 }
 0x4d7   : > { %v3846_v8 = vadd.f32 %v3823_v42, %v15044_v57  ;;  %v15049_v42 = vld [vmem:[#allocation80_spill] sm:$0xff] }
 0x4da   : > { %v3863_v62 = vpop.permute.xlu0 %3862  ;;  %v3975_v11 = vpop.permute.xlu1 %3974 }
 0x4db   : > { %v3886_v20 = vadd.f32 %v3863_v62, %v3846_v8 }
 0x4dd   : > { %v3926_v41 = vadd.f32 %v3903_v16, %v3886_v20  ;;  %v15050_v20 = vld [vmem:[#allocation78_spill] sm:$0xff] }
 0x4de   : > { %v3825_v60 = vpop.permute.xlu0 %3824  ;;  %v4015_v44 = vpop.permute.xlu1 %4014 }
 0x4df   : > { %v3847_v47 = vadd.f32 %v3825_v60, %v15046_v45  ;;  %v3958_v23 = vadd.f32 %v3942_v10, %v3926_v41  ;;  %v3944_v60 = vrot.slane %v15050_v20, 4 }
 0x4e1   : > { %v3998_v58 = vadd.f32 %v3975_v11, %v3958_v23 }
 0x4e2   : > { %v3865_v27 = vpop.permute.xlu0 %3864  ;;  %v4055_v18 = vpop.permute.xlu1 %4054 }
 0x4e3   : > { %6929 = vmax.xlane.f32.xlu0 %v6928_v9  ;;  %v3887_v22 = vadd.f32 %v3865_v27, %v3847_v47  ;;  %v4038_v38 = vadd.f32 %v4015_v44, %v3998_v58  ;;  %v15051_v27 = vld [vmem:[#allocation81_spill] sm:$0xff] }
 0x4e5   : > { %v4078_v1 = vadd.f32 %v4055_v18, %v4038_v38 }
 0x4e6   : > { %v3905_v25 = vpop.permute.xlu0 %3904  ;;  %v3977_v33 = vpop.permute.xlu1 %3976 }
 0x4e7   : > { %v3927_v52 = vadd.f32 %v3905_v25, %v3887_v22 }
 0x4e9   : > { %v3959_v59 = vadd.f32 %v3943_v37, %v3927_v52  ;;  %v3946_v52 = vrot.slane %v13454_v4, 4 }
 0x4ea   : > { %v4059_v15 = vpop.permute.xlu0 %4058  ;;  %v4017_v43 = vpop.permute.xlu1 %4016 }
 0x4eb   : > { %v3999_v54 = vadd.f32 %v3977_v33, %v3959_v59 }
 0x4ed   : > { %v4039_v24 = vadd.f32 %v4017_v43, %v3999_v54  ;;  %v15052_v54 = vld [vmem:[#allocation79_spill] sm:$0xff] }
 0x4ee   : > { %v3909_v6 = vpop.permute.xlu0 %3908  ;;  %v4057_v63 = vpop.permute.xlu1 %4056  ;;  %v3945_v43 = vrot.slane %v15052_v54, 4 }
 0x4ef   : > { %v4079_v31 = vadd.f32 %v4057_v63, %v4039_v24 }
 0x4f1   : > { %v4153_v36 = vrot.slane %v4079_v31, 7 }
 0x4f2   : > { %v3981_v0 = vpop.permute.xlu0 %3980  ;;  %v3827_v39 = vpop.permute.xlu1 %3826 }
 0x4f3   : > { %v4154_v35 = vsel %vm4094_vm4, %v4153_v36, %v4078_v1  ;;  %v3848_v16 = vadd.f32 %v3827_v39, %v15049_v42 }
 0x4f6   : > { %v4021_v61 = vpop.permute.xlu0 %4020  ;;  %v3867_v55 = vpop.permute.xlu1 %3866 }
 0x4f7   : > { %v3888_v62 = vadd.f32 %v3867_v55, %v3848_v16 }
 0x4fa   : > { %v4061_v11 = vpop.permute.xlu0 %4060  ;;  %v3907_v57 = vpop.permute.xlu1 %3906 }
 0x4fb   : > { %v3928_v8 = vadd.f32 %v3907_v57, %v3888_v62 }
 0x4fd   : > { %v3960_v44 = vadd.f32 %v3944_v60, %v3928_v8 }
 0x4fe   : > { %v3831_v51 = vpop.permute.xlu0 %3830  ;;  %v3979_v9 = vpop.permute.xlu1 %3978 }
 0x4ff   : > { %v4000_v49 = vadd.f32 %v3979_v9, %v3960_v44  ;;  %v3850_v45 = vadd.f32 %v3831_v51, %v15051_v27 }
 0x502   : > { %v3871_v41 = vpop.permute.xlu0 %3870  ;;  %v4019_v47 = vpop.permute.xlu1 %4018 }
 0x503   : > { %v4040_v18 = vadd.f32 %v4019_v47, %v4000_v49  ;;  %v3890_v46 = vadd.f32 %v3871_v41, %v3850_v45  ;;  %v3947_v49 = vrot.slane %v13522_v12, 4 }
 0x505   : > { %v4080_v10 = vadd.f32 %v4059_v15, %v4040_v18  ;;  %v3948_v18 = vrot.slane %v13543_v2, 4 }
 0x506   : > { %v3911_v21 = vpop.permute.xlu0 %3910  ;;  %v3829_v23 = vpop.permute.xlu1 %3828 }
 0x507   : > { %v3930_v22 = vadd.f32 %v3911_v21, %v3890_v46  ;;  %v4155_v25 = vrot.slane %v4080_v10, 6  ;;  %v3849_v37 = vadd.f32 %v3829_v23, %v13376_v19  ;;  %v3949_v23 = vrot.slane %v13568_v48, 4 }
 0x508   : > { %v14949_v48 = vlaneseq }
 0x509   : > { %v4156_v26 = vsel %vm4096_vm5, %v4155_v25, %v4154_v35  ;;  %v3962_v34 = vadd.f32 %v3946_v52, %v3930_v22 }
 0x50a   : > { %v3983_v33 = vpop.permute.xlu0 %3982  ;;  %v3869_v59 = vpop.permute.xlu1 %3868 }
 0x50b   : > { %v3889_v58 = vadd.f32 %v3869_v59, %v3849_v37  ;;  %v4002_v38 = vadd.f32 %v3983_v33, %v3962_v34 }
 0x50d   : > { %v3929_v56 = vadd.f32 %v3909_v6, %v3889_v58 }
 0x50e   : > { %v4063_v24 = vpop.permute.xlu0 %4062  ;;  %v4023_v15 = vpop.permute.xlu1 %4022 }
 0x50f   : > { %v3961_v63 = vadd.f32 %v3945_v43, %v3929_v56  ;;  %v4042_v31 = vadd.f32 %v4023_v15, %v4002_v38  ;;  %v10862_v43 = vld [vmem:[%s15043_s12] sm:$0xff]  }
 0x510   : > { %10162 = vmatpush3.bf16.msra.mxu0 %v10862_v43 }
 0x511   : > { %v4001_v30 = vadd.f32 %v3981_v0, %v3961_v63  ;;  %v4082_v39 = vadd.f32 %v4063_v24, %v4042_v31  ;;  %v11639_v31 = vld [vmem:[%s1154_s23] sm:$0xff]  ;;  %s10008_s23 = sshll.u32 %s15147_s11, 6  ;;  %s12334_s11 = smov 6  }
 0x512   : > { %v3873_v1 = vpop.permute.xlu0 %3872  ;;  %v3833_v36 = vpop.permute.xlu1 %3832  ;;  %s13762_s13 = scalar_lea.vmem %s15057_s8, %s10008_s23  ;;  %s12338_s8 = smov 122  }
 0x513   : > { %v4041_v4 = vadd.f32 %v4021_v61, %v4001_v30  ;;  %v4159_v42 = vrot.slane %v4082_v39, 4  ;;  %v3851_v6 = vadd.f32 %v3833_v36, %v13484_v14  ;;  %v13647_v30 = vmul.f32 0.125, %v11639_v31  ;;  %s12339_s23 = smov 124  }
 0x514   : > { %v13650_v36 = vshrl.u32 %v14949_v48, 7 }
 0x515   : > { %v4081_v35 = vadd.f32 %v4061_v11, %v4041_v4  ;;  %v3891_v60 = vadd.f32 %v3873_v1, %v3851_v6  ;;  %vm6934_vm13 = vcmp.ge.f32.partialorder %v13647_v30, 0.0 }
 0x516   : > { %v3913_v50 = vpop.permute.xlu0 %3912  ;;  %v3835_v19 = vpop.permute.xlu1 %3834  ;;  %15053 = vst [vmem:[#allocation82_spill] sm:$0xff] %v13650_v36  ;;  %v13654_v39 = vsub.s32 0, %v13650_v36  ;;  %v7044_v6 = vsub.s32 3, %v13650_v36 }
 0x517   : > { %v4157_v55 = vrot.slane %v4081_v35, 5  ;;  %v3852_v51 = vadd.f32 %v3835_v19, %v13511_v13  ;;  %v3931_v44 = vadd.f32 %v3913_v50, %v3891_v60  ;;  %v13657_v35 = vsub.s32 1, %v13650_v36  ;;  %v15056_v60 = vld [vmem:[#allocation72_spill] sm:$0xff] }
 0x518   : > { %v13663_v19 = vrot.slane %v13647_v30, %v13654_v39 }
 0x519   : > { %v4158_v62 = vsel %vm4098_vm6, %v4157_v55, %v4156_v26  ;;  %v3963_v45 = vadd.f32 %v3947_v49, %v3931_v44  ;;  %15054 = vst [vmem:[#allocation74_spill] sm:$0xff] %v13657_v35  ;;  %v13668_v55 = vrot.slane %v13647_v30, %v13657_v35  ;;  %v3488_v44 = vsel %vm14957_vm11, %v13234_v53, -inf }
 0x51a   : > { %v3985_v16 = vpop.permute.xlu0 %3984  ;;  %v3875_v57 = vpop.permute.xlu1 %3874  ;;  %v4160_v8 = vsel %vm4100_vm7, %v4159_v42, %v4158_v62  ;;  %6942 = vbcast.lane.b32.xlu0 %v13663_v19, 256  ;;  %v7009_v42 = vsub.s32 2, %v13650_v36  ;;  %v6931_v62 = vsel %vm1374_vm1, %v13607_v3, inf  ;;  %v15055_v3 = vld [vmem:[#allocation73_spill] sm:$0xff] }
 0x51b   : > { %v3892_v9 = vadd.f32 %v3875_v57, %v3852_v51  ;;  %v4003_v22 = vadd.f32 %v3985_v16, %v3963_v45  ;;  %v13687_v57 = vrot.slane %v13647_v30, %v7044_v6  ;;  %v3481_v51 = vsel %vm14957_vm11, %v13221_v28, -inf }
 0x51c   : > { %v13677_v16 = vrot.slane %v13647_v30, %v7009_v42  ;;  %v3509_v45 = vsel %vm14957_vm11, %v13273_v29, -inf }
 0x51d   : > { %v3510_v53 = vrot.slane %v3509_v45, 4 }
 0x51e   : > { %v4025_v20 = vpop.permute.xlu0 %4024  ;;  %v4027_v0 = vpop.permute.xlu1 %4026  ;;  %6977 = vbcast.lane.b32.xlu0 %v13668_v55, 256 }
 0x51f   : > { %v4043_v52 = vadd.f32 %v4025_v20, %v4003_v22  ;;  %v3474_v20 = vsel %vm14957_vm11, %v13207_v32, -inf  ;;  %v3489_v32 = vrot.slane %v3488_v44, 4 }
 0x522   : > { %v3915_v61 = vpop.permute.xlu0 %3914  ;;  %v3837_v11 = vpop.permute.xlu1 %3836  ;;  %6950 = vbcast.lane.b32.xlu0 %v13663_v19, 272 }
 0x523   : > { %v3932_v41 = vadd.f32 %v3915_v61, %v3892_v9  ;;  %v3853_v47 = vadd.f32 %v3837_v11, %v13555_v7  ;;  %v3475_v11 = vrot.slane %v3474_v20, 4  ;;  %v3495_v9 = vsel %vm14957_vm11, %v13263_v5, -inf }
 0x525   : > { %v3964_v10 = vadd.f32 %v3948_v18, %v3932_v41  ;;  %v3482_v41 = vrot.slane %v3481_v51, 4  ;;  %v3476_v28 = vmax.f32 %v3474_v20, %v3475_v11 }
 0x526   : > { %v3987_v27 = vpop.permute.xlu0 %3986  ;;  %v3877_v14 = vpop.permute.xlu1 %3876  ;;  %6985 = vbcast.lane.b32.xlu0 %v13668_v55, 272 }
 0x527   : > { %v3893_v46 = vadd.f32 %v3877_v14, %v3853_v47  ;;  %v4004_v12 = vadd.f32 %v3987_v27, %v3964_v10  ;;  %v3502_v27 = vsel %vm14957_vm11, %v13259_v17, -inf  ;;  %v3496_v14 = vrot.slane %v3495_v9, 4 }
 0x528   : > { %v3503_v18 = vrot.slane %v3502_v27, 4  ;;  %v3483_v10 = vmax.f32 %v3481_v51, %v3482_v41  ;;  %v3477_v5 = vrot.slane %v3476_v28, 2 }
 0x529   : > { %v4044_v54 = vadd.f32 %v4027_v0, %v4004_v12  ;;  %v3460_v0 = vsel %vm14957_vm11, %v15056_v60, -inf }
 0x52a   : > { %v3917_v21 = vpop.permute.xlu0 %3916  ;;  %v3989_v25 = vpop.permute.xlu1 %3988  ;;  %7012 = vbcast.lane.b32.xlu0 %v13677_v16, 256  ;;  %v3461_v49 = vrot.slane %v3460_v0, 4 }
 0x52b   : > { %v3933_v13 = vadd.f32 %v3917_v21, %v3893_v46  ;;  %v3490_v21 = vmax.f32 %v3488_v44, %v3489_v32 }
 0x52c   : > { %v3462_v46 = vmax.f32 %v3460_v0, %v3461_v49 }
 0x52d   : > { %v3965_v26 = vadd.f32 %v3949_v23, %v3933_v13  ;;  %v3497_v13 = vmax.f32 %v3495_v9, %v3496_v14  ;;  %v3504_v23 = vmax.f32 %v3502_v27, %v3503_v18  ;;  %v3491_v17 = vrot.slane %v3490_v21, 2  ;;  %v9626_v14 = vld [vmem:[#allocation6] ss:$0 sm:$0xff] }
 0x52e   : > { %v4065_v37 = vpop.permute.xlu0 %4064  ;;  %v4029_v7 = vpop.permute.xlu1 %4028  ;;  %7020 = vbcast.lane.b32.xlu0 %v13677_v16, 272 }
 0x52f   : > { %v4005_v33 = vadd.f32 %v3989_v25, %v3965_v26  ;;  %v4083_v34 = vadd.f32 %v4065_v37, %v4043_v52  ;;  %v3463_v25 = vrot.slane %v3462_v46, 2  ;;  %v3484_v52 = vrot.slane %v3483_v10, 2 }
 0x530   : > { %v3511_v26 = vmax.f32 %v3509_v45, %v3510_v53  ;;  %v3498_v37 = vrot.slane %v3497_v13, 2  ;;  %v3505_v29 = vrot.slane %v3504_v23, 2 }
 0x531   : > { %v4161_v59 = vrot.slane %v4083_v34, 3  ;;  %v4045_v58 = vadd.f32 %v4029_v7, %v4005_v33  ;;  %v3478_v33 = vmax.f32 %v3476_v28, %v3477_v5  ;;  %v3464_v34 = vmax.f32 %v3462_v46, %v3463_v25  ;;  %v10866_v5 = vld [vmem:[#allocation12 + $0x60] ss:$8 sps:$4 sm:$0xff]   ;;  %v10869_v25 = vld [vmem:[#allocation12 + $0x50] ss:$8 sps:$4 sm:$0xff]  }
 0x532   : > { %v4069_v2 = vpop.permute.xlu0 %4068  ;;  %v4067_v24 = vpop.permute.xlu1 %4066  ;;  %7047 = vbcast.lane.b32.xlu0 %v13687_v57, 256  ;;  %v3485_v7 = vmax.f32 %v3483_v10, %v3484_v52  ;;  %v10871_v52 = vld [vmem:[#allocation12 + $0x54] ss:$8 sps:$4 sm:$0xff]  }
 0x533   : > { %v4085_v56 = vadd.f32 %v4069_v2, %v4045_v58  ;;  %v4162_v38 = vsel %vm4102_vm8, %v4161_v59, %v4160_v8  ;;  %v4084_v15 = vadd.f32 %v4067_v24, %v4044_v54  ;;  %v3467_v8 = vsel %vm14957_vm11, %v15055_v3, -inf }
 0x534   : > { %v3468_v61 = vrot.slane %v3467_v8, 4  ;;  %v3512_v59 = vrot.slane %v3511_v26, 2  ;;  %v3492_v58 = vmax.f32 %v3490_v21, %v3491_v17  ;;  %v3499_v54 = vmax.f32 %v3497_v13, %v3498_v37  ;;  %v10865_v13 = vld [vmem:[#allocation12 + $0x74] ss:$8 sps:$4 sm:$0xff]   ;;  %v10874_v17 = vld [vmem:[#allocation12 + $0x44] ss:$8 sps:$4 sm:$0xff]  }
 0x535   : > { %v4165_v63 = vrot.slane %v4085_v56, 1  ;;  %v4163_v1 = vrot.slane %v4084_v15, 2  ;;  %v3479_v43 = vrot.slane %v3478_v33, 1  ;;  %v3506_v56 = vmax.f32 %v3504_v23, %v3505_v29  ;;  %5992 = vmatprep.subr.bf16.mxu0 %v10865_v13  ;;  %v10868_v23 = vld [vmem:[#allocation12 + $0x64] ss:$8 sps:$4 sm:$0xff]  }
 0x536   : > { %v3469_v47 = vmax.f32 %v3467_v8, %v3468_v61  ;;  %v3465_v24 = vrot.slane %v3464_v34, 1  ;;  %v3513_v15 = vmax.f32 %v3511_v26, %v3512_v59  ;;  %v4125_v41 = vpop.permute.xlu1 %4124  ;;  %v4143_v45 = vpop.permute.xlu0 %4142  ;;  %v10872_v26 = vld [vmem:[#allocation12 + $0x40] ss:$8 sps:$4 sm:$0xff]   ;;  %v10877_v37 = vld [vmem:[#allocation12 + $0x34] ss:$8 sps:$4 sm:$0xff]  }
 0x537   : > { %v4164_v4 = vsel %vm4104_vm9, %v4163_v1, %v4162_v38  ;;  %v3486_v38 = vrot.slane %v3485_v7, 1  ;;  %v3500_v1 = vrot.slane %v3499_v54, 1  ;;  %v10880_v29 = vld [vmem:[#allocation12 + $0x24] ss:$8 sps:$4 sm:$0xff]   ;;  %v10884_v59 = vld [vmem:[#allocation12] ss:$8 sps:$4 sm:$0xff]  }
 0x538   : > { %v4166_v50 = vsel %vm4106_vm10, %v4165_v63, %v4164_v4  ;;  %v3470_v22 = vrot.slane %v3469_v47, 2  ;;  %v3493_v63 = vrot.slane %v3492_v58, 1  ;;  %v3480_v4 = vmax.f32 %v3478_v33, %v3479_v43  ;;  %v10878_v33 = vld [vmem:[#allocation12 + $0x20] ss:$8 sps:$4 sm:$0xff]   ;;  %v10890_v43 = vld [vmem:[#allocation12 + $0xf4] ss:$8 sps:$4 sm:$0xff]  }
 0x539   : > { %4167 = vrot.lane.b32.xlu1 %v4166_v50, %s12331_s10  ;;  %v3507_v50 = vrot.slane %v3506_v56, 1  ;;  %v3487_v3 = vmax.f32 %v3485_v7, %v3486_v38  ;;  %v3514_v8 = vrot.slane %v3513_v15, 1  ;;  %v3501_v0 = vmax.f32 %v3499_v54, %v3500_v1  ;;  %v10883_v7 = vld [vmem:[#allocation12 + $0x14] ss:$8 sps:$4 sm:$0xff]   ;;  %v10888_v54 = vld [vmem:[#allocation12 + $0xf0] ss:$8 sps:$4 sm:$0xff]  }
 0x53a   : > { %v3471_v12 = vmax.f32 %v3469_v47, %v3470_v22  ;;  %v3494_v20 = vmax.f32 %v3492_v58, %v3493_v63  ;;  %v10863_v22 = vld [vmem:[#allocation12 + $0x70] ss:$8 sps:$4 sm:$0xff]   ;;  %v10886_v58 = vld [vmem:[#allocation12 + $0x4] ss:$8 sps:$4 sm:$0xff]   ;;  %v10897_v63 = vld [vmem:[#allocation12 + $0xd4] ss:$8 sps:$4 sm:$0xff]  }
 0x53b   : > { %v3508_v61 = vmax.f32 %v3506_v56, %v3507_v50  ;;  %v3515_v44 = vmax.f32 %v3513_v15, %v3514_v8  ;;  %v10891_v56 = vld [vmem:[#allocation12 + $0xe0] ss:$8 sps:$4 sm:$0xff]   ;;  %v10894_v38 = vld [vmem:[#allocation9 + $0x10] sm:$0xff]   ;;  %s12337_s10 = smov 4  }
 0x53c   : > { %v3472_v2 = vrot.slane %v3471_v12, 1  ;;  %v10895_v15 = vld [vmem:[#allocation12 + $0xd0] ss:$8 sps:$4 sm:$0xff]   ;;  %v10898_v1 = vld [vmem:[#allocation12 + $0xc0] ss:$8 sps:$4 sm:$0xff]  }
 0x53d   : > { %v10901_v8 = vld [vmem:[#allocation9 + $0x8] sm:$0xff]   ;;  %v10934_v13 = vld [vmem:[#allocation12 + $0x254] ss:$8 sps:$4 sm:$0xff]  }
 0x53e   : > { %v3473_v31 = vmax.f32 %v3471_v12, %v3472_v2  ;;  %v10875_v12 = vld [vmem:[#allocation12 + $0x30] ss:$8 sps:$4 sm:$0xff]  }
 0x53f   : > { %v10887_v2 = vld [vmem:[#allocation9 + $0x18] sm:$0xff]  }
 0x540   : > { %10168 = vmatpush3.bf16.msra.mxu1 %v10887_v2  ;;  %v10968_v2 = vld [vmem:[#allocation12 + $0x2f0] ss:$8 sps:$4 sm:$0xff]  }
 0x541   : > { %10169 = vmatprep.subr.bf16.mxu1 %v15045_v40 }
 0x544   : > { %10170 = vmatpush3.bf16.msra.mxu1 %v10894_v38  ;;  %v10987_v38 = vld [vmem:[#allocation12 + $0x2c0] ss:$8 sps:$4 sm:$0xff]  }
 0x545   : > { %10171 = vmatprep.subr.bf16.mxu1 %v15045_v40 }
 0x548   : > { %10172 = vmatpush3.bf16.msra.mxu1 %v10901_v8 }
 0x549   : > { %10173 = vmatprep.subr.bf16.mxu1 %v15045_v40  ;;  %v10959_v40 = vld [vmem:[#allocation12 + $0x100] ss:$8 sps:$4 sm:$0xff]  }
 0x55d   : > { %6932 = vmin.xlane.f32.xlu1 %v6931_v62  ;;  %v3466_v62 = vmax.f32 %v3464_v34, %v3465_v24  ;;  %v10881_v34 = vld [vmem:[#allocation12 + $0x10] ss:$8 sps:$4 sm:$0xff]   ;;  %v10893_v24 = vld [vmem:[#allocation12 + $0xe4] ss:$8 sps:$4 sm:$0xff]  }
 0x55f   : > { %v4095_v60 = vsel %vm4094_vm4, %v3473_v31, %v3466_v62 }
 0x560   : > { %v4097_v51 = vsel %vm4096_vm5, %v3480_v4, %v4095_v60  ;;  %v10900_v4 = vld [vmem:[#allocation12 + $0xc4] ss:$8 sps:$4 sm:$0xff]   ;;  %v10902_v60 = vld [vmem:[#allocation12 + $0xb0] ss:$8 sps:$4 sm:$0xff]  }
 0x561   : > { %v4099_v11 = vsel %vm4098_vm6, %v3487_v3, %v4097_v51 }
 0x562   : > { %v4101_v9 = vsel %vm4100_vm7, %v3494_v20, %v4099_v11  ;;  %v10904_v20 = vld [vmem:[#allocation12 + $0xb4] ss:$8 sps:$4 sm:$0xff]  }
 0x563   : > { %v4103_v49 = vsel %vm4102_vm8, %v3501_v0, %v4101_v9  ;;  %v10908_v11 = vld [vmem:[#allocation9] sm:$0xff]   ;;  %v7079_v9 = vsub.s32 4, %v13650_v36 }
 0x564   : > { %v4105_v27 = vsel %vm4104_vm9, %v3508_v61, %v4103_v49  ;;  %v10907_v61 = vld [vmem:[#allocation12 + $0xa4] ss:$8 sps:$4 sm:$0xff]   ;;  %10174 = vmatpush3.bf16.msra.mxu1 %v10908_v11  ;;  %v10909_v49 = vld [vmem:[#allocation12 + $0x90] ss:$8 sps:$4 sm:$0xff]  }
 0x565   : > { %v4107_v32 = vsel %vm4106_vm10, %v3515_v44, %v4105_v27  ;;  %v10905_v44 = vld [vmem:[#allocation12 + $0xa0] ss:$8 sps:$4 sm:$0xff]   ;;  %v10914_v27 = vld [vmem:[#allocation12 + $0x84] ss:$8 sps:$4 sm:$0xff]  }
 0x566   : > { %v4170_v47 = vsel %vm14957_vm11, %v4107_v32, %v4125_v41  ;;  %v10911_v41 = vld [vmem:[#allocation12 + $0x94] ss:$8 sps:$4 sm:$0xff]   ;;  %v11013_v11 = vld [vmem:[#allocation12 + $0x284] ss:$8 sps:$4 sm:$0xff]   ;;  %vm8358_vm11 = vcmask 523712  }
 0x567   : > { %v4171_v28 = vsel %vm1374_vm1, %v4170_v47, %v4143_v45  ;;  %v10917_v32 = vld [vmem:[#allocation12 + $0x174] ss:$8 sps:$4 sm:$0xff]   ;;  %v10912_v45 = vld [vmem:[#allocation12 + $0x80] ss:$8 sps:$4 sm:$0xff]   ;;  %v13753_v47 = vrot.slane %v13647_v30, %v7079_v9 }
 0x568   : > { %6033 = vmatprep.subr.bf16.mxu1 %v10917_v32 }
 0x56c   : > { %v6930_v31 = vpop.xlane.xlu0 %6929 }
 0x56e   : > { %6946 = vbcast.lane.b32.xlu1 %v13663_v19, 264 }
 0x572   : > { %6981 = vbcast.lane.b32.xlu1 %v13668_v55, 264 }
 0x576   : > { %6954 = vbcast.lane.b32.xlu1 %v13663_v19, 280 }
 0x57a   : > { %6989 = vbcast.lane.b32.xlu1 %v13668_v55, 280 }
 0x57e   : > { %7016 = vbcast.lane.b32.xlu1 %v13677_v16, 264 }
 0x582   : > { %7024 = vbcast.lane.b32.xlu1 %v13677_v16, 280 }
 0x586   : > { %7051 = vbcast.lane.b32.xlu1 %v13687_v57, 264 }
 0x5ab   : > { %v4168_v18 = vpop.permute.xlu1 %4167 }
 0x5ac   : > { %v4173_v46 = vsel %vm14956_vm12, %v4171_v28, %v4168_v18  ;;  %v4380_v28 = vld [vmem:[%s13762_s13] sm:$0xff]  ;;  %vm8351_vm12 = vcmask 458112  }
 0x5ad   : > { %v4181_v10 = vadd.f32 %v9626_v14, %v4173_v46  ;;  %v10922_v14 = vld [vmem:[#allocation12 + $0x274] ss:$8 sps:$4 sm:$0xff]   ;;  %v9642_v18 = vcombine.low %v4380_v28, %v4380_v28  ;;  %v9643_v46 = vcombine.high %v4380_v28, %v4380_v28  ;;  %v11021_v28 = vld [vmem:[#allocation12 + $0x470] ss:$8 sps:$4 sm:$0xff]  }
 0x5af   : > { %v4182_v53 = vmax.f32 %v4181_v10, 0.0  ;;  %v10920_v10 = vld [vmem:[#allocation12 + $0x270] ss:$8 sps:$4 sm:$0xff]  }
 0x5b1   : > { %v4183_v21 = vpack.c.bf16 %v4182_v53, %v4182_v53  ;;  %v10928_v53 = vld [vmem:[#allocation12 + $0x264] ss:$8 sps:$4 sm:$0xff]  }
 0x5b3   : > { %10164 = vmatmul.mubr.bf16.vlgmr.msra.gmra.mxu0 %v4183_v21  ;;  %v10926_v21 = vld [vmem:[#allocation12 + $0x260] ss:$8 sps:$4 sm:$0xff]  }
 0x5b4   : > { %5993 = vmatpush1.bf16.msra.mxu0 %v10863_v22  ;;  %6024 = vmatprep.mubr.bf16.mxu0 %v9643_v46 }
 0x5b5   : > { %5994 = vmatprep.subr.bf16.mxu0 %v10868_v23  ;;  %v10940_v23 = vld [vmem:[#allocation12 + $0x244] ss:$8 sps:$4 sm:$0xff]  }
 0x5b8   : > { %5995 = vmatpush1.bf16.msra.mxu0 %v10866_v5  ;;  %v10932_v5 = vld [vmem:[#allocation12 + $0x250] ss:$8 sps:$4 sm:$0xff]  }
 0x5b9   : > { %5996 = vmatprep.subr.bf16.mxu0 %v10871_v52  ;;  %v7114_v52 = vsub.s32 5, %v13650_v36 }
 0x5bc   : > { %5997 = vmatpush1.bf16.msra.mxu0 %v10869_v25  ;;  %v10938_v25 = vld [vmem:[#allocation12 + $0x240] ss:$8 sps:$4 sm:$0xff]  }
 0x5bd   : > { %5998 = vmatprep.subr.bf16.mxu0 %v10874_v17  ;;  %v13784_v17 = vrot.slane %v13647_v30, %v7114_v52 }
 0x5c0   : > { %5999 = vmatpush1.bf16.msra.mxu0 %v10872_v26  ;;  %v10944_v26 = vld [vmem:[#allocation12 + $0x230] ss:$8 sps:$4 sm:$0xff]  }
 0x5c1   : > { %6000 = vmatprep.subr.bf16.mxu0 %v10877_v37  ;;  %v10950_v37 = vld [vmem:[#allocation12 + $0x220] ss:$8 sps:$4 sm:$0xff]  }
 0x5c4   : > { %6001 = vmatpush1.bf16.msra.mxu0 %v10875_v12  ;;  %v10952_v12 = vld [vmem:[#allocation12 + $0x224] ss:$8 sps:$4 sm:$0xff]  }
 0x5c5   : > { %6002 = vmatprep.subr.bf16.mxu0 %v10880_v29  ;;  %v10956_v29 = vld [vmem:[#allocation12 + $0x210] ss:$8 sps:$4 sm:$0xff]  }
 0x5c8   : > { %6003 = vmatpush1.bf16.msra.mxu0 %v10878_v33  ;;  %v10958_v33 = vld [vmem:[#allocation12 + $0x214] ss:$8 sps:$4 sm:$0xff]  }
 0x5c9   : > { %6004 = vmatprep.subr.bf16.mxu0 %v10883_v7  ;;  %v10964_v7 = vld [vmem:[#allocation12 + $0x204] ss:$8 sps:$4 sm:$0xff]  }
 0x5cc   : > { %6005 = vmatpush1.bf16.msra.mxu0 %v10881_v34 }
 0x5cd   : > { %6006 = vmatprep.subr.bf16.mxu0 %v10886_v58  ;;  %v10970_v58 = vld [vmem:[#allocation12 + $0x2f4] ss:$8 sps:$4 sm:$0xff]  }
 0x5d0   : > { %6007 = vmatpush1.bf16.msra.mxu0 %v10884_v59  ;;  %v10962_v59 = vld [vmem:[#allocation12 + $0x200] ss:$8 sps:$4 sm:$0xff]  }
 0x5d1   : > { %6008 = vmatprep.subr.bf16.mxu0 %v10890_v43  ;;  %v10983_v43 = vld [vmem:[#allocation12 + $0x2d4] ss:$8 sps:$4 sm:$0xff]  }
 0x5d4   : > { %6009 = vmatpush2.bf16.msra.mxu0 %v10888_v54  ;;  %v10976_v54 = vld [vmem:[#allocation12 + $0x2e4] ss:$8 sps:$4 sm:$0xff]  }
 0x5d5   : > { %6010 = vmatprep.subr.bf16.mxu0 %v10893_v24  ;;  %v7149_v24 = vsub.s32 6, %v13650_v36 }
 0x5d8   : > { %6011 = vmatpush2.bf16.msra.mxu0 %v10891_v56  ;;  %v10981_v56 = vld [vmem:[#allocation12 + $0x2d0] ss:$8 sps:$4 sm:$0xff]  }
 0x5d9   : > { %6012 = vmatprep.subr.bf16.mxu0 %v10897_v63  ;;  %v10993_v63 = vld [vmem:[#allocation12 + $0x2b0] ss:$8 sps:$4 sm:$0xff]  }
 0x5dc   : > { %6013 = vmatpush2.bf16.msra.mxu0 %v10895_v15  ;;  %v10995_v15 = vld [vmem:[#allocation12 + $0x2b4] ss:$8 sps:$4 sm:$0xff]  }
 0x5dd   : > { %6014 = vmatprep.subr.bf16.mxu0 %v10900_v4  ;;  %v11001_v4 = vld [vmem:[#allocation12 + $0x2a4] ss:$8 sps:$4 sm:$0xff]  }
 0x5e0   : > { %6015 = vmatpush2.bf16.msra.mxu0 %v10898_v1 }
 0x5e1   : > { %6016 = vmatprep.subr.bf16.mxu0 %v10904_v20 }
 0x5e4   : > { %6017 = vmatpush2.bf16.msra.mxu0 %v10902_v60  ;;  %v4382_v60 = vld [vmem:[%s13762_s13 + $0x10] sm:$0xff] }
 0x5e5   : > { %6018 = vmatprep.subr.bf16.mxu0 %v10907_v61  ;;  %v11005_v61 = vld [vmem:[#allocation12 + $0x290] ss:$8 sps:$4 sm:$0xff]  }
 0x5e6   : > { %v6933_v50 = vpop.xlane.xlu1 %6932 }
 0x5e7   : > { %v6935_v62 = vsel %vm6934_vm13, %v6930_v31, %v6933_v50  ;;  %v13813_v31 = vpop.permute.xlu0 %6942  ;;  %v10999_v50 = vld [vmem:[#allocation12 + $0x2a0] ss:$8 sps:$4 sm:$0xff]   ;;  %vm8330_vm13 = vcmask 261312  }
 0x5e8   : > { %v13727_v3 = vmul.f32 %v6935_v62, %v13647_v30  ;;  %6019 = vmatpush2.bf16.msra.mxu0 %v10905_v44  ;;  %v11007_v62 = vld [vmem:[#allocation12 + $0x294] ss:$8 sps:$4 sm:$0xff]   ;;  %v9647_v44 = vcombine.high %v4382_v60, %v4382_v60 }
 0x5e9   : > { %6020 = vmatprep.subr.bf16.mxu0 %v10911_v41 }
 0x5ea   : > { %v13731_v0 = vrot.slane %v13727_v3, %v13654_v39  ;;  %v13738_v51 = vrot.slane %v13727_v3, %v13657_v35  ;;  %v13772_v22 = vrot.slane %v13727_v3, %v7009_v42  ;;  %v10946_v42 = vld [vmem:[#allocation12 + $0x234] ss:$8 sps:$4 sm:$0xff]   ;;  %v13793_v34 = vrot.slane %v13727_v3, %v7044_v6  ;;  %v10974_v6 = vld [vmem:[#allocation12 + $0x2e0] ss:$8 sps:$4 sm:$0xff]   ;;  %v13815_v1 = vpop.permute.xlu1 %6946 }
 0x5eb   : > { %v13819_v8 = vpop.permute.xlu0 %6977  ;;  %v13831_v41 = vrot.slane %v13727_v3, %v7079_v9  ;;  %v11027_v9 = vld [vmem:[#allocation12 + $0x460] ss:$8 sps:$4 sm:$0xff]  }
 0x5ec   : > { %7379 = vbcast.lane.b32.xlu1 %v13731_v0, 264  ;;  %7375 = vbcast.lane.b32.xlu0 %v13731_v0, 256 }
 0x5ed   : > { %6021 = vmatpush2.bf16.msra.mxu0 %v10909_v49  ;;  %v11011_v49 = vld [vmem:[#allocation12 + $0x280] ss:$8 sps:$4 sm:$0xff]  }
 0x5ee   : > { %6022 = vmatprep.subr.bf16.mxu0 %v10914_v27  ;;  %v13821_v20 = vpop.permute.xlu1 %6981 }
 0x5ef   : > { %v13833_v27 = vpop.permute.xlu0 %6950 }
 0x5f0   : > { %7414 = vbcast.lane.b32.xlu1 %v13738_v51, 264  ;;  %7410 = vbcast.lane.b32.xlu0 %v13738_v51, 256 }
 0x5f1   : > { %6023 = vmatpush2.bf16.msra.mxu0 %v10912_v45  ;;  %v11023_v45 = vld [vmem:[#allocation12 + $0x474] ss:$8 sps:$4 sm:$0xff]  }
 0x5f2   : > { %6074 = vmatprep.subr.bf16.mxu0 %v10922_v14  ;;  %v13835_v32 = vpop.permute.xlu1 %6954  ;;  %v9646_v14 = vcombine.low %v4382_v60, %v4382_v60  ;;  %v11075_v60 = vld [vmem:[#allocation12 + $0x4e0] ss:$8 sps:$4 sm:$0xff]  }
 0x5f3   : > { %v13839_v46 = vpop.permute.xlu0 %6985 }
 0x5f4   : > { %6962 = vbcast.lane.b32.xlu1 %v13663_v19, 296  ;;  %6958 = vbcast.lane.b32.xlu0 %v13663_v19, 288 }
 0x5f5   : > { %6025 = vmatmul.mubr.bf16.vlgmr.msra.gmra.mxu0 %v9642_v18  ;;  %v11029_v18 = vld [vmem:[#allocation12 + $0x464] ss:$8 sps:$4 sm:$0xff]  }
 0x5f6   : > { %6075 = vmatpush1.bf16.msra.mxu0 %v10920_v10  ;;  %6106 = vmatprep.mubr.bf16.mxu0 %v9647_v44  ;;  %v13841_v10 = vpop.permute.xlu1 %6989 }
 0x5f7   : > { %6076 = vmatprep.subr.bf16.mxu0 %v10928_v53  ;;  %v11035_v53 = vld [vmem:[#allocation12 + $0x454] ss:$8 sps:$4 sm:$0xff]  }
 0x5f8   : > { %6997 = vbcast.lane.b32.xlu1 %v13668_v55, 296  ;;  %6993 = vbcast.lane.b32.xlu0 %v13668_v55, 288 }
 0x5fa   : > { %6077 = vmatpush1.bf16.msra.mxu0 %v10926_v21  ;;  %v11033_v21 = vld [vmem:[#allocation12 + $0x450] ss:$8 sps:$4 sm:$0xff]  }
 0x5fb   : > { %6078 = vmatprep.subr.bf16.mxu0 %v10934_v13  ;;  %v14950_v13 = vsub.s32 7, %v13650_v36 }
 0x5fc   : > { %7059 = vbcast.lane.b32.xlu1 %v13687_v57, 280  ;;  %7055 = vbcast.lane.b32.xlu0 %v13687_v57, 272 }
 0x5fe   : > { %6079 = vmatpush1.bf16.msra.mxu0 %v10932_v5  ;;  %v13848_v5 = vpop.permute.xlu0 %7012 }
 0x5ff   : > { %6080 = vmatprep.subr.bf16.mxu0 %v10940_v23  ;;  %v13850_v23 = vpop.permute.xlu1 %7016 }
 0x600   : > { %7086 = vbcast.lane.b32.xlu1 %v13753_v47, 264  ;;  %7082 = vbcast.lane.b32.xlu0 %v13753_v47, 256 }
 0x602   : > { %6081 = vmatpush1.bf16.msra.mxu0 %v10938_v25  ;;  %v11041_v25 = vld [vmem:[#allocation12 + $0x444] ss:$8 sps:$4 sm:$0xff]  }
 0x603   : > { %6082 = vmatprep.subr.bf16.mxu0 %v10946_v42  ;;  %v11039_v42 = vld [vmem:[#allocation12 + $0x440] ss:$8 sps:$4 sm:$0xff]  }
 0x604   : > { %7387 = vbcast.lane.b32.xlu1 %v13731_v0, 280  ;;  %7383 = vbcast.lane.b32.xlu0 %v13731_v0, 272 }
 0x606   : > { %6083 = vmatpush1.bf16.msra.mxu0 %v10944_v26  ;;  %v11047_v26 = vld [vmem:[#allocation12 + $0x434] ss:$8 sps:$4 sm:$0xff]  }
 0x607   : > { %6084 = vmatprep.subr.bf16.mxu0 %v10952_v12  ;;  %v13859_v12 = vpop.permute.xlu0 %7020 }
 0x608   : > { %7422 = vbcast.lane.b32.xlu1 %v13738_v51, 280  ;;  %7418 = vbcast.lane.b32.xlu0 %v13738_v51, 272 }
 0x60a   : > { %6085 = vmatpush1.bf16.msra.mxu0 %v10950_v37  ;;  %v13861_v37 = vpop.permute.xlu1 %7024 }
 0x60b   : > { %6086 = vmatprep.subr.bf16.mxu0 %v10958_v33  ;;  %v11045_v33 = vld [vmem:[#allocation12 + $0x430] ss:$8 sps:$4 sm:$0xff]  }
 0x60c   : > { %7449 = vbcast.lane.b32.xlu1 %v13772_v22, 264  ;;  %7445 = vbcast.lane.b32.xlu0 %v13772_v22, 256 }
 0x60e   : > { %6087 = vmatpush1.bf16.msra.mxu0 %v10956_v29  ;;  %v11053_v29 = vld [vmem:[#allocation12 + $0x424] ss:$8 sps:$4 sm:$0xff]  }
 0x60f   : > { %6088 = vmatprep.subr.bf16.mxu0 %v10964_v7  ;;  %v11051_v7 = vld [vmem:[#allocation12 + $0x420] ss:$8 sps:$4 sm:$0xff]  }
 0x610   : > { %7032 = vbcast.lane.b32.xlu1 %v13677_v16, 296  ;;  %7028 = vbcast.lane.b32.xlu0 %v13677_v16, 288 }
 0x612   : > { %6089 = vmatpush1.bf16.msra.mxu0 %v10962_v59  ;;  %v13869_v59 = vpop.permute.xlu1 %7051 }
 0x613   : > { %6090 = vmatprep.subr.bf16.mxu0 %v10970_v58  ;;  %v11059_v58 = vld [vmem:[#allocation12 + $0x414] ss:$8 sps:$4 sm:$0xff]  }
 0x614   : > { %7094 = vbcast.lane.b32.xlu1 %v13753_v47, 280  ;;  %7090 = vbcast.lane.b32.xlu0 %v13753_v47, 272 }
 0x616   : > { %6091 = vmatpush2.bf16.msra.mxu0 %v10968_v2  ;;  %v11057_v2 = vld [vmem:[#allocation12 + $0x410] ss:$8 sps:$4 sm:$0xff]  }
 0x617   : > { %6092 = vmatprep.subr.bf16.mxu0 %v10976_v54  ;;  %v13876_v54 = vrot.slane %v13727_v3, %v7114_v52  ;;  %v11069_v52 = vld [vmem:[#allocation12 + $0x4f0] ss:$8 sps:$4 sm:$0xff]  }
 0x618   : > { %7121 = vbcast.lane.b32.xlu1 %v13784_v17, 264  ;;  %7117 = vbcast.lane.b32.xlu0 %v13784_v17, 256 }
 0x61a   : > { %6093 = vmatpush2.bf16.msra.mxu0 %v10974_v6  ;;  %v11065_v6 = vld [vmem:[#allocation12 + $0x404] ss:$8 sps:$4 sm:$0xff]  }
 0x61b   : > { %6094 = vmatprep.subr.bf16.mxu0 %v10983_v43 }
 0x61c   : > { %7457 = vbcast.lane.b32.xlu1 %v13772_v22, 280  ;;  %7453 = vbcast.lane.b32.xlu0 %v13772_v22, 272 }
 0x61e   : > { %6095 = vmatpush2.bf16.msra.mxu0 %v10981_v56 }
 0x620   : > { %7484 = vbcast.lane.b32.xlu1 %v13793_v34, 264  ;;  %7480 = vbcast.lane.b32.xlu0 %v13793_v34, 256 }
 0x624   : > { %6970 = vbcast.lane.b32.xlu1 %v13663_v19, 312  ;;  %6966 = vbcast.lane.b32.xlu0 %v13663_v19, 304  ;;  %v10989_v19 = vld [vmem:[#allocation12 + $0x2c4] ss:$8 sps:$4 sm:$0xff]  }
 0x625   : > { %6096 = vmatprep.subr.bf16.mxu0 %v10989_v19  ;;  %v11063_v19 = vld [vmem:[#allocation12 + $0x400] ss:$8 sps:$4 sm:$0xff]  }
 0x626   : > { %6097 = vmatpush2.bf16.msra.mxu0 %v10987_v38  ;;  %v11071_v38 = vld [vmem:[#allocation12 + $0x4f4] ss:$8 sps:$4 sm:$0xff]  }
 0x627   : > { %6098 = vmatprep.subr.bf16.mxu0 %v10995_v15 }
 0x628   : > { %7005 = vbcast.lane.b32.xlu1 %v13668_v55, 312  ;;  %7001 = vbcast.lane.b32.xlu0 %v13668_v55, 304  ;;  %v13809_v55 = vrot.slane %v13647_v30, %v7149_v24 }
 0x62a   : > { %6099 = vmatpush2.bf16.msra.mxu0 %v10993_v63 }
 0x62b   : > { %6100 = vmatprep.subr.bf16.mxu0 %v11001_v4  ;;  %v11077_v4 = vld [vmem:[#allocation12 + $0x4e4] ss:$8 sps:$4 sm:$0xff]  }
 0x62c   : > { %7067 = vbcast.lane.b32.xlu1 %v13687_v57, 296  ;;  %7063 = vbcast.lane.b32.xlu0 %v13687_v57, 288 }
 0x62e   : > { %6101 = vmatpush2.bf16.msra.mxu0 %v10999_v50 }
 0x62f   : > { %6102 = vmatprep.subr.bf16.mxu0 %v11007_v62 }
 0x630   : > { %7129 = vbcast.lane.b32.xlu1 %v13784_v17, 280  ;;  %7125 = vbcast.lane.b32.xlu0 %v13784_v17, 272 }
 0x632   : > { %6103 = vmatpush2.bf16.msra.mxu0 %v11005_v61  ;;  %v11083_v61 = vld [vmem:[#allocation12 + $0x4d4] ss:$8 sps:$4 sm:$0xff]  }
 0x633   : > { %6104 = vmatprep.subr.bf16.mxu0 %v11013_v11 }
 0x634   : > { %7156 = vbcast.lane.b32.xlu1 %v13809_v55, 264  ;;  %7152 = vbcast.lane.b32.xlu0 %v13809_v55, 256 }
 0x636   : > { %6105 = vmatpush2.bf16.msra.mxu0 %v11011_v49  ;;  %v11089_v49 = vld [vmem:[#allocation12 + $0x4c4] ss:$8 sps:$4 sm:$0xff]  }
 0x637   : > { %6156 = vmatprep.subr.bf16.mxu0 %v11023_v45 }
 0x638   : > { %7395 = vbcast.lane.b32.xlu1 %v13731_v0, 296  ;;  %7391 = vbcast.lane.b32.xlu0 %v13731_v0, 288 }
 0x639   : > { %6107 = vmatmul.mubr.bf16.vlgmr.msra.gmra.mxu0 %v9646_v14 }
 0x63a   : > { %6157 = vmatpush1.bf16.msra.mxu0 %v11021_v28  ;;  %v11087_v28 = vld [vmem:[#allocation12 + $0x4c0] ss:$8 sps:$4 sm:$0xff]  }
 0x63b   : > { %6158 = vmatprep.subr.bf16.mxu0 %v11029_v18  ;;  %v9627_v18 = vld [vmem:[#allocation7] ss:$0 sm:$0xff] }
 0x63c   : > { %7430 = vbcast.lane.b32.xlu1 %v13738_v51, 296  ;;  %7426 = vbcast.lane.b32.xlu0 %v13738_v51, 288 }
 0x63e   : > { %6159 = vmatpush1.bf16.msra.mxu0 %v11027_v9  ;;  %v11095_v9 = vld [vmem:[#allocation12 + $0x4b4] ss:$8 sps:$4 sm:$0xff]  }
 0x63f   : > { %6160 = vmatprep.subr.bf16.mxu0 %v11035_v53 }
 0x640   : > { %7492 = vbcast.lane.b32.xlu1 %v13793_v34, 280  ;;  %7488 = vbcast.lane.b32.xlu0 %v13793_v34, 272 }
 0x642   : > { %6161 = vmatpush1.bf16.msra.mxu0 %v11033_v21 }
 0x643   : > { %6162 = vmatprep.subr.bf16.mxu0 %v11041_v25 }
 0x644   : > { %7519 = vbcast.lane.b32.xlu1 %v13831_v41, 264  ;;  %7515 = vbcast.lane.b32.xlu0 %v13831_v41, 256 }
 0x646   : > { %6163 = vmatpush1.bf16.msra.mxu0 %v11039_v42  ;;  %v11093_v42 = vld [vmem:[#allocation12 + $0x4b0] ss:$8 sps:$4 sm:$0xff]  }
 0x647   : > { %6164 = vmatprep.subr.bf16.mxu0 %v11047_v26 }
 0x648   : > { %7040 = vbcast.lane.b32.xlu1 %v13677_v16, 312  ;;  %7036 = vbcast.lane.b32.xlu0 %v13677_v16, 304  ;;  %v13857_v16 = vrot.slane %v13647_v30, %v14950_v13  ;;  %v13867_v30 = vpop.permute.xlu0 %7047  ;;  %v10953_v13 = vld [vmem:[#allocation12 + $0x110] ss:$8 sps:$4 sm:$0xff]  }
 0x64a   : > { %6165 = vmatpush1.bf16.msra.mxu0 %v11045_v33  ;;  %v13915_v33 = vld [vmem:[%s13762_s13 + $0x8] sm:$0xff] }
 0x64b   : > { %6166 = vmatprep.subr.bf16.mxu0 %v11053_v29 }
 0x64c   : > { %7102 = vbcast.lane.b32.xlu1 %v13753_v47, 296  ;;  %7098 = vbcast.lane.b32.xlu0 %v13753_v47, 288 }
 0x64e   : > { %6167 = vmatpush1.bf16.msra.mxu0 %v11051_v7 }
 0x64f   : > { %6168 = vmatprep.subr.bf16.mxu0 %v11059_v58 }
 0x650   : > { %7164 = vbcast.lane.b32.xlu1 %v13809_v55, 280  ;;  %7160 = vbcast.lane.b32.xlu0 %v13809_v55, 272 }
 0x652   : > { %6169 = vmatpush1.bf16.msra.mxu0 %v11057_v2 }
 0x653   : > { %6170 = vmatprep.subr.bf16.mxu0 %v11065_v6 }
 0x654   : > { %7191 = vbcast.lane.b32.xlu1 %v13857_v16, 264  ;;  %7187 = vbcast.lane.b32.xlu0 %v13857_v16, 256 }
 0x656   : > { %6171 = vmatpush1.bf16.msra.mxu0 %v11063_v19  ;;  %v10915_v19 = vld [vmem:[#allocation12 + $0x170] ss:$8 sps:$4 sm:$0xff]  }
 0x657   : > { %6172 = vmatprep.subr.bf16.mxu0 %v11071_v38  ;;  %v9645_v38 = vcombine.high %v13915_v33, %v13915_v33 }
 0x658   : > { %7465 = vbcast.lane.b32.xlu1 %v13772_v22, 296  ;;  %7461 = vbcast.lane.b32.xlu0 %v13772_v22, 288 }
 0x65a   : > { %6173 = vmatpush2.bf16.msra.mxu0 %v11069_v52 }
 0x65b   : > { %6174 = vmatprep.subr.bf16.mxu0 %v11077_v4  ;;  %v10925_v4 = vld [vmem:[#allocation12 + $0x164] ss:$8 sps:$4 sm:$0xff]  }
 0x65c   : > { %7527 = vbcast.lane.b32.xlu1 %v13831_v41, 280  ;;  %7523 = vbcast.lane.b32.xlu0 %v13831_v41, 272 }
 0x65e   : > { %v13878_v43 = vpop.permute.xlu0 %7375  ;;  %v13880_v56 = vpop.permute.xlu1 %7379  ;;  %6175 = vmatpush2.bf16.msra.mxu0 %v11075_v60  ;;  %v11099_v60 = vld [vmem:[#allocation12 + $0x4a0] ss:$8 sps:$4 sm:$0xff]  }
 0x65f   : > { %6176 = vmatprep.subr.bf16.mxu0 %v11083_v61 }
 0x660   : > { %7554 = vbcast.lane.b32.xlu1 %v13876_v54, 264  ;;  %7550 = vbcast.lane.b32.xlu0 %v13876_v54, 256 }
 0x662   : > { %v13884_v15 = vpop.permute.xlu0 %7410  ;;  %v13886_v63 = vpop.permute.xlu1 %7414 }
 0x664   : > { %7075 = vbcast.lane.b32.xlu1 %v13687_v57, 312  ;;  %7071 = vbcast.lane.b32.xlu0 %v13687_v57, 304  ;;  %v11081_v57 = vld [vmem:[#allocation12 + $0x4d0] ss:$8 sps:$4 sm:$0xff]  }
 0x665   : > { %6177 = vmatpush2.bf16.msra.mxu0 %v11081_v57 }
 0x666   : > { %v13890_v50 = vpop.permute.xlu0 %6958  ;;  %v13892_v62 = vpop.permute.xlu1 %6962  ;;  %6178 = vmatprep.subr.bf16.mxu0 %v11089_v49  ;;  %v11107_v49 = vld [vmem:[#allocation12 + $0x494] ss:$8 sps:$4 sm:$0xff]  }
 0x667   : > { %15058 = vst [vmem:[#allocation76_spill] sm:$0xff] %v13890_v50 }
 0x668   : > { %7137 = vbcast.lane.b32.xlu1 %v13784_v17, 296  ;;  %7133 = vbcast.lane.b32.xlu0 %v13784_v17, 288 }
 0x669   : > { %6179 = vmatpush2.bf16.msra.mxu0 %v11087_v28  ;;  %v4384_v28 = vld [vmem:[%s13762_s13 + $0x20] sm:$0xff] }
 0x66a   : > { %v13896_v44 = vpop.permute.xlu0 %6993  ;;  %v13898_v11 = vpop.permute.xlu1 %6997  ;;  %6180 = vmatprep.subr.bf16.mxu0 %v11095_v9  ;;  %v13936_v9 = vrot.slane %v13727_v3, %v7149_v24  ;;  %v10937_v24 = vld [vmem:[#allocation12 + $0x144] ss:$8 sps:$4 sm:$0xff]  }
 0x66c   : > { %7199 = vbcast.lane.b32.xlu1 %v13857_v16, 280  ;;  %7195 = vbcast.lane.b32.xlu0 %v13857_v16, 272 }
 0x66d   : > { %6181 = vmatpush2.bf16.msra.mxu0 %v11093_v42  ;;  %v10931_v42 = vld [vmem:[#allocation12 + $0x154] ss:$8 sps:$4 sm:$0xff]  }
 0x66e   : > { %v13902_v45 = vpop.permute.xlu0 %7055  ;;  %v13904_v14 = vpop.permute.xlu1 %7059 }
 0x670   : > { %7403 = vbcast.lane.b32.xlu1 %v13731_v0, 312  ;;  %7399 = vbcast.lane.b32.xlu0 %v13731_v0, 304  ;;  %v11101_v0 = vld [vmem:[#allocation12 + $0x4a4] ss:$8 sps:$4 sm:$0xff]  }
 0x671   : > { %6182 = vmatprep.subr.bf16.mxu0 %v11101_v0 }
 0x672   : > { %v13908_v53 = vpop.permute.xlu0 %7082  ;;  %v13910_v21 = vpop.permute.xlu1 %7086  ;;  %6183 = vmatpush2.bf16.msra.mxu0 %v11099_v60  ;;  %v10943_v60 = vld [vmem:[#allocation12 + $0x134] ss:$8 sps:$4 sm:$0xff]  }
 0x673   : > { %v4289_v25 = vpop.f32.mrf.mxu0  ;;  %6184 = vmatprep.subr.bf16.mxu0 %v11107_v49  ;;  %v9650_v49 = vcombine.low %v4384_v28, %v4384_v28 }
 0x674   : > { %v4290_v26 = vadd.f32 %v9627_v18, %v4289_v25  ;;  %7438 = vbcast.lane.b32.xlu1 %v13738_v51, 312  ;;  %7434 = vbcast.lane.b32.xlu0 %v13738_v51, 304  ;;  %v10923_v18 = vld [vmem:[#allocation12 + $0x160] ss:$8 sps:$4 sm:$0xff]   ;;  %v9651_v25 = vcombine.high %v4384_v28, %v4384_v28 }
 0x675   : > { %v10165_v29 = vpop.f32.mrf.mxu0  ;;  %v11127_v28 = vld [vmem:[#allocation12 + $0x660] ss:$8 sps:$4 sm:$0xff]  }
 0x676   : > { %v4295_v7 = vmax.f32 %v4290_v26, 0.0  ;;  %v13917_v58 = vpop.permute.xlu0 %7383  ;;  %v13919_v2 = vpop.permute.xlu1 %7387  ;;  %v11105_v26 = vld [vmem:[#allocation12 + $0x490] ss:$8 sps:$4 sm:$0xff]   ;;  %6188 = vmatprep.mubr.bf16.mxu0 %v9651_v25 }
 0x677   : > { %v4292_v6 = vpop.f32.mrf.mxu0  ;;  %6185 = vmatpush2.bf16.msra.mxu0 %v11105_v26  ;;  %v10941_v26 = vld [vmem:[#allocation12 + $0x130] ss:$8 sps:$4 sm:$0xff]  }
 0x678   : > { %v4296_v52 = vpack.c.bf16 %v4295_v7, %v4295_v7  ;;  %7500 = vbcast.lane.b32.xlu1 %v13793_v34, 296  ;;  %7496 = vbcast.lane.b32.xlu0 %v13793_v34, 288  ;;  %v11113_v7 = vld [vmem:[#allocation12 + $0x484] ss:$8 sps:$4 sm:$0xff]   ;;  %v10929_v6 = vld [vmem:[#allocation12 + $0x150] ss:$8 sps:$4 sm:$0xff]  }
 0x679   : > { %v10166_v51 = vpop.f32.mrf.mxu0  ;;  %6186 = vmatprep.subr.bf16.mxu0 %v11113_v7  ;;  %v11129_v7 = vld [vmem:[#allocation12 + $0x664] ss:$8 sps:$4 sm:$0xff]  }
 0x67a   : > { %10176 = vmatmul.mubr.msk.bf16.vlgmr.msra.gmra.mxu1 %vm1374_vm1, %v4296_v52  ;;  %v13926_v61 = vpop.permute.xlu0 %7418  ;;  %v13928_v57 = vpop.permute.xlu1 %7422  ;;  %v11123_v51 = vld [vmem:[#allocation12 + $0x674] ss:$8 sps:$4 sm:$0xff]  }
 0x67b   : > { %6034 = vmatpush1.bf16.msra.mxu1 %v10915_v19  ;;  %6065 = vmatprep.mubr.bf16.mxu1 %v9645_v38  ;;  %v11111_v19 = vld [vmem:[#allocation12 + $0x480] ss:$8 sps:$4 sm:$0xff]  }
 0x67c   : > { %7562 = vbcast.lane.b32.xlu1 %v13876_v54, 280  ;;  %7558 = vbcast.lane.b32.xlu0 %v13876_v54, 272 }
 0x67d   : > { %6035 = vmatprep.subr.bf16.mxu1 %v10925_v4  ;;  %v10935_v4 = vld [vmem:[#allocation12 + $0x140] ss:$8 sps:$4 sm:$0xff]   ;;  %6187 = vmatpush2.bf16.msra.mxu0 %v11111_v19 }
 0x67e   : > { %v13938_v29 = vpop.permute.xlu0 %7445  ;;  %v13940_v0 = vpop.permute.xlu1 %7449  ;;  %6238 = vmatprep.subr.bf16.mxu0 %v11123_v51  ;;  %v10947_v19 = vld [vmem:[#allocation12 + $0x120] ss:$8 sps:$4 sm:$0xff]   ;;  %v11135_v51 = vld [vmem:[#allocation12 + $0x654] ss:$8 sps:$4 sm:$0xff]  }
 0x67f   : > { %6036 = vmatpush1.bf16.msra.mxu1 %v10923_v18 }
 0x680   : > { %7589 = vbcast.lane.b32.xlu1 %v13936_v9, 264  ;;  %7585 = vbcast.lane.b32.xlu0 %v13936_v9, 256 }
 0x681   : > { %6037 = vmatprep.subr.bf16.mxu1 %v10931_v42  ;;  %v11121_v42 = vld [vmem:[#allocation12 + $0x670] ss:$8 sps:$4 sm:$0xff]   ;;  %6189 = vmatmul.mubr.bf16.vlgmr.msra.gmra.mxu0 %v9650_v49 }
 0x682   : > { %v13944_v38 = vpop.permute.xlu0 %7028  ;;  %v13946_v52 = vpop.permute.xlu1 %7032  ;;  %6239 = vmatpush1.bf16.msra.mxu0 %v11121_v42  ;;  %v11133_v49 = vld [vmem:[#allocation12 + $0x650] ss:$8 sps:$4 sm:$0xff]   ;;  %v11141_v42 = vld [vmem:[#allocation12 + $0x644] ss:$8 sps:$4 sm:$0xff]  }
 0x683   : > { %15059 = vst [vmem:[#allocation75_spill] sm:$0xff] %v13946_v52  ;;  %6038 = vmatpush1.bf16.msra.mxu1 %v10929_v6  ;;  %v10949_v6 = vld [vmem:[#allocation12 + $0x124] ss:$8 sps:$4 sm:$0xff]   ;;  %6240 = vmatprep.subr.bf16.mxu0 %v11129_v7 }
 0x684   : > { %7110 = vbcast.lane.b32.xlu1 %v13753_v47, 312  ;;  %7106 = vbcast.lane.b32.xlu0 %v13753_v47, 304 }
 0x685   : > { %6039 = vmatprep.subr.bf16.mxu1 %v10937_v24 }
 0x686   : > { %v13950_v18 = vpop.permute.xlu0 %7090  ;;  %v13952_v25 = vpop.permute.xlu1 %7094  ;;  %6241 = vmatpush1.bf16.msra.mxu0 %v11127_v28  ;;  %v11147_v28 = vld [vmem:[#allocation12 + $0x634] ss:$8 sps:$4 sm:$0xff]  }
 0x687   : > { %15060 = vst [vmem:[#allocation77_spill] sm:$0xff] %v13950_v18  ;;  %15061 = vst [vmem:[#allocation80_spill] sm:$0xff] %v13952_v25  ;;  %6040 = vmatpush1.bf16.msra.mxu1 %v10935_v4  ;;  %v10955_v4 = vld [vmem:[#allocation12 + $0x114] ss:$8 sps:$4 sm:$0xff]   ;;  %6242 = vmatprep.subr.bf16.mxu0 %v11135_v51  ;;  %v12333_v25 = vmov 1966171168  }
 0x688   : > { %7172 = vbcast.lane.b32.xlu1 %v13809_v55, 296  ;;  %7168 = vbcast.lane.b32.xlu0 %v13809_v55, 288 }
 0x689   : > { %6041 = vmatprep.subr.bf16.mxu1 %v10943_v60 }
 0x68a   : > { %v13956_v47 = vpop.permute.xlu0 %7117  ;;  %v13958_v24 = vpop.permute.xlu1 %7121  ;;  %6243 = vmatpush1.bf16.msra.mxu0 %v11133_v49  ;;  %v10965_v49 = vld [vmem:[#allocation12 + $0x1f0] ss:$8 sps:$4 sm:$0xff]  }
 0x68b   : > { %15062 = vst [vmem:[#allocation78_spill] sm:$0xff] %v13956_v47  ;;  %15063 = vst [vmem:[#allocation81_spill] sm:$0xff] %v13958_v24  ;;  %6042 = vmatpush1.bf16.msra.mxu1 %v10941_v26  ;;  %v10961_v26 = vld [vmem:[#allocation12 + $0x104] ss:$8 sps:$4 sm:$0xff]   ;;  %6244 = vmatprep.subr.bf16.mxu0 %v11141_v42 }
 0x68c   : > { %7473 = vbcast.lane.b32.xlu1 %v13772_v22, 312  ;;  %7469 = vbcast.lane.b32.xlu0 %v13772_v22, 304  ;;  %v11153_v42 = vld [vmem:[#allocation12 + $0x624] ss:$8 sps:$4 sm:$0xff]  }
 0x68d   : > { %6043 = vmatprep.subr.bf16.mxu1 %v10949_v6  ;;  %v11139_v6 = vld [vmem:[#allocation12 + $0x640] ss:$8 sps:$4 sm:$0xff]   ;;  %v10973_v47 = vld [vmem:[#allocation12 + $0x1e4] ss:$8 sps:$4 sm:$0xff]  }
 0x68e   : > { %v13962_v48 = vpop.permute.xlu0 %7453  ;;  %v13964_v60 = vpop.permute.xlu1 %7457  ;;  %6245 = vmatpush1.bf16.msra.mxu0 %v11139_v6  ;;  %v11159_v6 = vld [vmem:[#allocation12 + $0x614] ss:$8 sps:$4 sm:$0xff]  }
 0x68f   : > { %6044 = vmatpush1.bf16.msra.mxu1 %v10947_v19  ;;  %v15064_v19 = vsub.s32 7, %v13650_v36  ;;  %6246 = vmatprep.subr.bf16.mxu0 %v11147_v28 }
 0x690   : > { %7535 = vbcast.lane.b32.xlu1 %v13831_v41, 296  ;;  %7531 = vbcast.lane.b32.xlu0 %v13831_v41, 288 }
 0x691   : > { %6045 = vmatprep.subr.bf16.mxu1 %v10955_v4  ;;  %v13977_v51 = vrot.slane %v13727_v3, %v15064_v19  ;;  %v10967_v4 = vld [vmem:[#allocation12 + $0x1f4] ss:$8 sps:$4 sm:$0xff]   ;;  %v11151_v19 = vld [vmem:[#allocation12 + $0x620] ss:$8 sps:$4 sm:$0xff]  }
 0x692   : > { %v13968_v7 = vpop.permute.xlu0 %7480  ;;  %v13970_v22 = vpop.permute.xlu1 %7484 }
 0x693   : > { %6046 = vmatpush1.bf16.msra.mxu1 %v10953_v13  ;;  %v11145_v13 = vld [vmem:[#allocation12 + $0x630] ss:$8 sps:$4 sm:$0xff]  }
 0x694   : > { %7593 = vbcast.lane.b32.xlu0 %v13936_v9, 272  ;;  %7597 = vbcast.lane.b32.xlu1 %v13936_v9, 280 }
 0x695   : > { %6047 = vmatprep.subr.bf16.mxu1 %v10961_v26  ;;  %6247 = vmatpush1.bf16.msra.mxu0 %v11145_v13  ;;  %v11165_v13 = vld [vmem:[#allocation12 + $0x604] ss:$8 sps:$4 sm:$0xff]  }
 0x696   : > { %v13979_v35 = vpop.permute.xlu0 %6966  ;;  %v13981_v24 = vpop.permute.xlu1 %6970  ;;  %6248 = vmatprep.subr.bf16.mxu0 %v11153_v42 }
 0x697   : > { %15065 = vst [vmem:[#allocation79_spill] sm:$0xff] %v13979_v35  ;;  %15066 = vst [vmem:[#allocation73_spill] sm:$0xff] %v13981_v24  ;;  %6048 = vmatpush1.bf16.msra.mxu1 %v10959_v40  ;;  %v10971_v24 = vld [vmem:[#allocation12 + $0x1e0] ss:$8 sps:$4 sm:$0xff]   ;;  %v10979_v40 = vld [vmem:[#allocation12 + $0x1d4] ss:$8 sps:$4 sm:$0xff]  }
 0x698   : > { %7620 = vbcast.lane.b32.xlu0 %v13977_v51, 256  ;;  %7624 = vbcast.lane.b32.xlu1 %v13977_v51, 264  ;;  %v11187_v35 = vld [vmem:[#allocation12 + $0x6c0] ss:$8 sps:$4 sm:$0xff]  }
 0x699   : > { %6049 = vmatprep.subr.bf16.mxu1 %v10967_v4  ;;  %6249 = vmatpush1.bf16.msra.mxu0 %v11151_v19  ;;  %v11171_v19 = vld [vmem:[#allocation12 + $0x6f4] ss:$8 sps:$4 sm:$0xff]  }
 0x69a   : > { %v13985_v3 = vpop.permute.xlu0 %7001  ;;  %v13987_v26 = vpop.permute.xlu1 %7005  ;;  %6250 = vmatprep.subr.bf16.mxu0 %v11159_v6 }
 0x69b   : > { %15067 = vst [vmem:[#allocation72_spill] sm:$0xff] %v13985_v3  ;;  %15068 = vst [vmem:[#allocation83_spill] sm:$0xff] %v13987_v26  ;;  %6050 = vmatpush2.bf16.msra.mxu1 %v10965_v49  ;;  %v11157_v3 = vld [vmem:[#allocation12 + $0x610] ss:$8 sps:$4 sm:$0xff]   ;;  %v10986_v49 = vld [vmem:[#allocation12 + $0x1c4] ss:$8 sps:$4 sm:$0xff]  }
 0x69c   : > { %7141 = vbcast.lane.b32.xlu0 %v13784_v17, 304  ;;  %7145 = vbcast.lane.b32.xlu1 %v13784_v17, 312  ;;  %v10977_v26 = vld [vmem:[#allocation12 + $0x1d0] ss:$8 sps:$4 sm:$0xff]  }
 0x69d   : > { %6051 = vmatprep.subr.bf16.mxu1 %v10973_v47  ;;  %6251 = vmatpush1.bf16.msra.mxu0 %v11157_v3  ;;  %v11163_v47 = vld [vmem:[#allocation12 + $0x600] ss:$8 sps:$4 sm:$0xff]   ;;  %v11177_v3 = vld [vmem:[#allocation12 + $0x6e4] ss:$8 sps:$4 sm:$0xff]  }
 0x69e   : > { %v13991_v28 = vpop.permute.xlu0 %7063  ;;  %v13993_v4 = vpop.permute.xlu1 %7067  ;;  %6252 = vmatprep.subr.bf16.mxu0 %v11165_v13 }
 0x69f   : > { %15069 = vst [vmem:[#allocation84_spill] sm:$0xff] %v13991_v28  ;;  %15070 = vst [vmem:[#allocation85_spill] sm:$0xff] %v13993_v4  ;;  %6052 = vmatpush2.bf16.msra.mxu1 %v10971_v24  ;;  %v10984_v4 = vld [vmem:[#allocation12 + $0x1c0] ss:$8 sps:$4 sm:$0xff]   ;;  %v10992_v24 = vld [vmem:[#allocation12 + $0x1b4] ss:$8 sps:$4 sm:$0xff]  }
 0x6a0   : > { %7203 = vbcast.lane.b32.xlu0 %v13857_v16, 288  ;;  %7207 = vbcast.lane.b32.xlu1 %v13857_v16, 296  ;;  %v11002_v28 = vld [vmem:[#allocation12 + $0x190] ss:$8 sps:$4 sm:$0xff]  }
 0x6a1   : > { %6053 = vmatprep.subr.bf16.mxu1 %v10979_v40  ;;  %6253 = vmatpush1.bf16.msra.mxu0 %v11163_v47  ;;  %v11183_v47 = vld [vmem:[#allocation12 + $0x6d4] ss:$8 sps:$4 sm:$0xff]  }
 0x6a2   : > { %v13997_v42 = vpop.permute.xlu0 %7125  ;;  %v13999_v17 = vpop.permute.xlu1 %7129  ;;  %6254 = vmatprep.subr.bf16.mxu0 %v11171_v19 }
 0x6a3   : > { %15071 = vst [vmem:[#allocation86_spill] sm:$0xff] %v13997_v42  ;;  %15072 = vst [vmem:[#allocation87_spill] sm:$0xff] %v13999_v17  ;;  %6054 = vmatpush2.bf16.msra.mxu1 %v10977_v26  ;;  %v11169_v42 = vld [vmem:[#allocation12 + $0x6f0] ss:$8 sps:$4 sm:$0xff]   ;;  %v10998_v26 = vld [vmem:[#allocation12 + $0x1a4] ss:$8 sps:$4 sm:$0xff]  }
 0x6a4   : > { %7504 = vbcast.lane.b32.xlu0 %v13793_v34, 304  ;;  %7508 = vbcast.lane.b32.xlu1 %v13793_v34, 312  ;;  %v10990_v17 = vld [vmem:[#allocation12 + $0x1b0] ss:$8 sps:$4 sm:$0xff]  }
 0x6a5   : > { %6055 = vmatprep.subr.bf16.mxu1 %v10986_v49  ;;  %6255 = vmatpush2.bf16.msra.mxu0 %v11169_v42  ;;  %v11175_v49 = vld [vmem:[#allocation12 + $0x6e0] ss:$8 sps:$4 sm:$0xff]   ;;  %v11189_v42 = vld [vmem:[#allocation12 + $0x6c4] ss:$8 sps:$4 sm:$0xff]  }
 0x6a6   : > { %v14003_v6 = vpop.permute.xlu0 %7152  ;;  %v14005_v40 = vpop.permute.xlu1 %7156  ;;  %6256 = vmatprep.subr.bf16.mxu0 %v11177_v3 }
 0x6a7   : > { %15073 = vst [vmem:[#allocation88_spill] sm:$0xff] %v14003_v6  ;;  %15074 = vst [vmem:[#allocation89_spill] sm:$0xff] %v14005_v40  ;;  %6056 = vmatpush2.bf16.msra.mxu1 %v10984_v4  ;;  %v10996_v40 = vld [vmem:[#allocation12 + $0x1a0] ss:$8 sps:$4 sm:$0xff]   ;;  %v11004_v4 = vld [vmem:[#allocation12 + $0x194] ss:$8 sps:$4 sm:$0xff]  }
 0x6a8   : > { %7566 = vbcast.lane.b32.xlu0 %v13876_v54, 288  ;;  %7570 = vbcast.lane.b32.xlu1 %v13876_v54, 296  ;;  %v11181_v6 = vld [vmem:[#allocation12 + $0x6d0] ss:$8 sps:$4 sm:$0xff]  }
 0x6a9   : > { %6057 = vmatprep.subr.bf16.mxu1 %v10992_v24  ;;  %6257 = vmatpush2.bf16.msra.mxu0 %v11175_v49  ;;  %v11008_v49 = vld [vmem:[#allocation12 + $0x180] ss:$8 sps:$4 sm:$0xff]  }
 0x6aa   : > { %v14009_v13 = vpop.permute.xlu0 %7391  ;;  %v14011_v34 = vpop.permute.xlu1 %7395  ;;  %6258 = vmatprep.subr.bf16.mxu0 %v11183_v47  ;;  %v7219_v47 = vunpack.c.l.s4 %v12333_v25 }
 0x6ab   : > { %15075 = vst [vmem:[#allocation90_spill] sm:$0xff] %v14009_v13  ;;  %6058 = vmatpush2.bf16.msra.mxu1 %v10990_v17  ;;  %v11010_v17 = vld [vmem:[#allocation12 + $0x184] ss:$8 sps:$4 sm:$0xff]   ;;  %v14028_v13 = vld [vmem:[%s13762_s13 + $0x18] sm:$0xff] }
 0x6ac   : > { %7628 = vbcast.lane.b32.xlu0 %v13977_v51, 272  ;;  %7632 = vbcast.lane.b32.xlu1 %v13977_v51, 280  ;;  %v9649_v25 = vcombine.high %v14028_v13, %v14028_v13 }
 0x6ad   : > { %6059 = vmatprep.subr.bf16.mxu1 %v10998_v26  ;;  %6259 = vmatpush2.bf16.msra.mxu0 %v11181_v6 }
 0x6ae   : > { %v14015_v19 = vpop.permute.xlu0 %7426  ;;  %v14017_v24 = vpop.permute.xlu1 %7430  ;;  %6260 = vmatprep.subr.bf16.mxu0 %v11189_v42  ;;  %v11016_v42 = vld [vmem:[#allocation12 + $0x370] ss:$8 sps:$4 sm:$0xff]  }
 0x6af   : > { %6060 = vmatpush2.bf16.msra.mxu1 %v10996_v40  ;;  %v11195_v40 = vld [vmem:[#allocation12 + $0x6b4] ss:$8 sps:$4 sm:$0xff]  }
 0x6b0   : > { %7176 = vbcast.lane.b32.xlu0 %v13809_v55, 304  ;;  %7180 = vbcast.lane.b32.xlu1 %v13809_v55, 312  ;;  %v11018_v55 = vld [vmem:[#allocation12 + $0x374] ss:$8 sps:$4 sm:$0xff]  }
 0x6b1   : > { %6061 = vmatprep.subr.bf16.mxu1 %v11004_v4  ;;  %v9644_v4 = vcombine.low %v13915_v33, %v13915_v33  ;;  %6261 = vmatpush2.bf16.msra.mxu0 %v11187_v35  ;;  %v11201_v33 = vld [vmem:[#allocation12 + $0x6a4] ss:$8 sps:$4 sm:$0xff]   ;;  %v11199_v35 = vld [vmem:[#allocation12 + $0x6a0] ss:$8 sps:$4 sm:$0xff]  }
 0x6b2   : > { %v14021_v3 = vpop.permute.xlu0 %7488  ;;  %v14023_v26 = vpop.permute.xlu1 %7492  ;;  %6262 = vmatprep.subr.bf16.mxu0 %v11195_v40  ;;  %v11207_v40 = vld [vmem:[#allocation12 + $0x694] ss:$8 sps:$4 sm:$0xff]  }
 0x6b3   : > { %6062 = vmatpush2.bf16.msra.mxu1 %v11002_v28  ;;  %v11193_v28 = vld [vmem:[#allocation12 + $0x6b0] ss:$8 sps:$4 sm:$0xff]  }
 0x6b4   : > { %7539 = vbcast.lane.b32.xlu0 %v13831_v41, 304  ;;  %7543 = vbcast.lane.b32.xlu1 %v13831_v41, 312  ;;  %v7220_v41 = vunpack.c.0.s8 %v7219_v47 }
 0x6b5   : > { %6063 = vmatprep.subr.bf16.mxu1 %v11010_v17  ;;  %v11026_v17 = vld [vmem:[#allocation12 + $0x364] ss:$8 sps:$4 sm:$0xff]   ;;  %6263 = vmatpush2.bf16.msra.mxu0 %v11193_v28 }
 0x6b6   : > { %v14032_v18 = vpop.permute.xlu0 %7515  ;;  %v14034_v6 = vpop.permute.xlu1 %7519  ;;  %v14045_v47 = vsub.s32 %v7220_v41, %v13650_v36  ;;  %6264 = vmatprep.subr.bf16.mxu0 %v11201_v33  ;;  %v14055_v41 = vld [vmem:[%s12771_s26] sm:$0xff]  ;;  %s15090_s26 = sld [smem:[#allocation51_spill]] }
 0x6b7   : > { %15076 = vst [vmem:[#allocation91_spill] sm:$0xff] %v14034_v6  ;;  %6064 = vmatpush2.bf16.msra.mxu1 %v11008_v49  ;;  %v11024_v49 = vld [vmem:[#allocation12 + $0x360] ss:$8 sps:$4 sm:$0xff]  }
 0x6b8   : > { %7601 = vbcast.lane.b32.xlu0 %v13936_v9, 288  ;;  %7605 = vbcast.lane.b32.xlu1 %v13936_v9, 296  ;;  %v7224_v36 = vrot.slane %v14055_v41, %v14045_v47 }
 0x6b9   : > { %6115 = vmatprep.subr.bf16.mxu1 %v11018_v55  ;;  %v11032_v55 = vld [vmem:[#allocation12 + $0x354] ss:$8 sps:$4 sm:$0xff]   ;;  %6265 = vmatpush2.bf16.msra.mxu0 %v11199_v35 }
 0x6ba   : > { %6066 = vmatmul.mubr.bf16.vlgmr.msra.gmra.mxu1 %v9644_v4  ;;  %v14040_v52 = vpop.permute.xlu0 %7036  ;;  %v14042_v50 = vpop.permute.xlu1 %7040  ;;  %6266 = vmatprep.subr.bf16.mxu0 %v11207_v40  ;;  %v11036_v40 = vld [vmem:[#allocation12 + $0x340] ss:$8 sps:$4 sm:$0xff]  }
 0x6bb   : > { %15077 = vst [vmem:[#allocation92_spill] sm:$0xff] %v14040_v52  ;;  %15078 = vst [vmem:[#allocation93_spill] sm:$0xff] %v14042_v50  ;;  %6116 = vmatpush1.bf16.msra.mxu1 %v11016_v42  ;;  %6147 = vmatprep.mubr.bf16.mxu1 %v9649_v25  ;;  %v11205_v42 = vld [vmem:[#allocation12 + $0x690] ss:$8 sps:$4 sm:$0xff]   ;;  %v11213_v50 = vld [vmem:[#allocation12 + $0x684] ss:$8 sps:$4 sm:$0xff]  }
 0x6bc   : > { %7211 = vbcast.lane.b32.xlu0 %v13857_v16, 304  ;;  %7215 = vbcast.lane.b32.xlu1 %v13857_v16, 312  ;;  %v11030_v25 = vld [vmem:[#allocation12 + $0x350] ss:$8 sps:$4 sm:$0xff]   ;;  %s1362_s28 = scalar_lea.vmem %s15090_s26, %s14241_s7  ;;  %s15132_s26 = sld [smem:[#allocation59_spill]] }
 0x6bd   : > { %6117 = vmatprep.subr.bf16.mxu1 %v11026_v17  ;;  %v4386_v52 = vld [vmem:[%s13762_s13 + $0x30] sm:$0xff]  ;;  %6267 = vmatpush2.bf16.msra.mxu0 %v11205_v42 }
 0x6be   : > { %v14049_v4 = vpop.permute.xlu0 %7098  ;;  %v14051_v28 = vpop.permute.xlu1 %7102  ;;  %v9655_v16 = vcombine.high %v4386_v52, %v4386_v52  ;;  %v11038_v17 = vld [vmem:[#allocation12 + $0x344] ss:$8 sps:$4 sm:$0xff]   ;;  %6268 = vmatprep.subr.bf16.mxu0 %v11213_v50  ;;  %v11042_v42 = vld [vmem:[#allocation12 + $0x330] ss:$8 sps:$4 sm:$0xff]  }
 0x6bf   : > { %15079 = vst [vmem:[#allocation94_spill] sm:$0xff] %v14049_v4  ;;  %15080 = vst [vmem:[#allocation95_spill] sm:$0xff] %v14051_v28  ;;  %6118 = vmatpush1.bf16.msra.mxu1 %v11024_v49  ;;  %v11211_v49 = vld [vmem:[#allocation12 + $0x680] ss:$8 sps:$4 sm:$0xff]   ;;  %v7240_v28 = vrot.slane %v7224_v36, %v14045_v47  ;;  %v7232_v4 = vcombine.high %v7224_v36, %v7224_v36  ;;  %v11050_v36 = vld [vmem:[#allocation12 + $0x324] ss:$8 sps:$4 sm:$0xff]  }
 0x6c0   : > { %7574 = vbcast.lane.b32.xlu0 %v13876_v54, 304  ;;  %7578 = vbcast.lane.b32.xlu1 %v13876_v54, 312  ;;  %v11044_v54 = vld [vmem:[#allocation12 + $0x334] ss:$8 sps:$4 sm:$0xff]  }
 0x6c1   : > { %6119 = vmatprep.subr.bf16.mxu1 %v11032_v55  ;;  %6270 = vmatprep.mubr.bf16.mxu0 %v9655_v16  ;;  %v9654_v55 = vcombine.low %v4386_v52, %v4386_v52  ;;  %v14076_v50 = vrot.slane %v7232_v4, %v14045_v47 }
 0x6c2   : > { %v14061_v33 = vpop.permute.xlu0 %7160  ;;  %v14063_v35 = vpop.permute.xlu1 %7164  ;;  %6269 = vmatpush2.bf16.msra.mxu0 %v11211_v49 }
 0x6c3   : > { %15081 = vst [vmem:[#allocation96_spill] sm:$0xff] %v14061_v33  ;;  %15082 = vst [vmem:[#allocation97_spill] sm:$0xff] %v14063_v35  ;;  %6120 = vmatpush1.bf16.msra.mxu1 %v11030_v25  ;;  %v14073_v25 = vrot.slane %v7240_v28, %v13654_v39  ;;  %v14088_v4 = vrot.slane %v14076_v50, %v13654_v39 }
 0x6c4   : > { %7636 = vbcast.lane.b32.xlu0 %v13977_v51, 288  ;;  %7640 = vbcast.lane.b32.xlu1 %v13977_v51, 296 }
 0x6c5   : > { %6121 = vmatprep.subr.bf16.mxu1 %v11038_v17  ;;  %6271 = vmatmul.mubr.bf16.vlgmr.msra.gmra.mxu0 %v9654_v55  ;;  %v11048_v17 = vld [vmem:[#allocation12 + $0x320] ss:$8 sps:$4 sm:$0xff]   ;;  %v7306_v49 = vmul.f32 %v14073_v25, %v13813_v31  ;;  %v11054_v55 = vld [vmem:[#allocation12 + $0x310] ss:$8 sps:$4 sm:$0xff]  }
 0x6c6   : > { %v14068_v6 = vpop.permute.xlu0 %7187  ;;  %v14070_v33 = vpop.permute.xlu1 %7191 }
 0x6c7   : > { %15083 = vst [vmem:[#allocation98_spill] sm:$0xff] %v14068_v6  ;;  %15084 = vst [vmem:[#allocation99_spill] sm:$0xff] %v14070_v33  ;;  %6122 = vmatpush1.bf16.msra.mxu1 %v11036_v40  ;;  %v7650_v31 = vsub.f32 %v7306_v49, %v13878_v43  ;;  %v11062_v33 = vld [vmem:[#allocation12 + $0x304] ss:$8 sps:$4 sm:$0xff]   ;;  %v7307_v6 = vmul.f32 %v14073_v25, %v13815_v1  ;;  %v7308_v43 = vmul.f32 %v14073_v25, %v13833_v27 }
 0x6c8   : > { %7609 = vbcast.lane.b32.xlu0 %v13936_v9, 304  ;;  %7613 = vbcast.lane.b32.xlu1 %v13936_v9, 312  ;;  %v11056_v9 = vld [vmem:[#allocation12 + $0x314] ss:$8 sps:$4 sm:$0xff]   ;;  %v7262_v49 = vcombine.high %v7240_v28, %v7240_v28  ;;  %v7316_v27 = vmul.f32 %v14088_v4, %v13839_v46 }
 0x6c9   : > { %6123 = vmatprep.subr.bf16.mxu1 %v11044_v54  ;;  %v7651_v1 = vsub.f32 %v7307_v6, %v13880_v56  ;;  %v7652_v28 = vsub.f32 %v7308_v43, %v13917_v58  ;;  %v11080_v46 = vld [vmem:[#allocation12 + $0x3d4] ss:$8 sps:$4 sm:$0xff]  }
 0x6ca   : > { %v14080_v52 = vpop.permute.xlu0 %7461  ;;  %v14082_v16 = vpop.permute.xlu1 %7465  ;;  %v14121_v56 = vrot.slane %v7262_v49, %v13654_v39 }
 0x6cb   : > { %6124 = vmatpush1.bf16.msra.mxu1 %v11042_v42  ;;  %v7314_v42 = vmul.f32 %v14088_v4, %v13819_v8  ;;  %v11068_v8 = vld [vmem:[#allocation12 + $0x3f4] ss:$8 sps:$4 sm:$0xff]   ;;  %v7716_v6 = vmul.f32 1.442695, %v7651_v1  ;;  %v7718_v58 = vmul.f32 1.442695, %v7652_v28 }
 0x6cc   : > { %7644 = vbcast.lane.b32.xlu0 %v13977_v51, 304  ;;  %7648 = vbcast.lane.b32.xlu1 %v13977_v51, 312  ;;  %v11078_v1 = vld [vmem:[#allocation12 + $0x3d0] ss:$8 sps:$4 sm:$0xff]   ;;  %v11092_v28 = vld [vmem:[#allocation12 + $0x3b4] ss:$8 sps:$4 sm:$0xff]  }
 0x6cd   : > { %6125 = vmatprep.subr.bf16.mxu1 %v11050_v36  ;;  %v11060_v36 = vld [vmem:[#allocation12 + $0x300] ss:$8 sps:$4 sm:$0xff]  }
 0x6ce   : > { %v14092_v40 = vpop.permute.xlu0 %7523  ;;  %v14094_v54 = vpop.permute.xlu1 %7527 }
 0x6cf   : > { %15085 = vst [vmem:[#allocation100_spill] sm:$0xff] %v14092_v40  ;;  %15086 = vst [vmem:[#allocation101_spill] sm:$0xff] %v14094_v54  ;;  %6126 = vmatpush1.bf16.msra.mxu1 %v11048_v17  ;;  %v7315_v17 = vmul.f32 %v14088_v4, %v13821_v20  ;;  %v7714_v54 = vmul.f32 1.442695, %v7650_v31  ;;  %v7658_v40 = vsub.f32 %v7314_v42, %v13884_v15 }
 0x6d0   : > { %6127 = vmatprep.subr.bf16.mxu1 %v11056_v9  ;;  %v7309_v20 = vmul.f32 %v14073_v25, %v13835_v32  ;;  %v11072_v32 = vld [vmem:[#allocation12 + $0x3e0] ss:$8 sps:$4 sm:$0xff]  }
 0x6d1   : > { %11366 = vpow2.f32 %v7714_v54  ;;  %v7730_v31 = vmul.f32 1.442695, %v7658_v40  ;;  %v7659_v15 = vsub.f32 %v7315_v17, %v13886_v63  ;;  %v7317_v63 = vmul.f32 %v14088_v4, %v13841_v10 }
 0x6d2   : > { %v14101_v35 = vpop.permute.xlu0 %7550  ;;  %v14103_v51 = vpop.permute.xlu1 %7554  ;;  %v7653_v54 = vsub.f32 %v7309_v20, %v13919_v2  ;;  %v7322_v17 = vmul.f32 %v14121_v56, %v13848_v5  ;;  %v7323_v10 = vmul.f32 %v14121_v56, %v13850_v23  ;;  %v11086_v20 = vld [vmem:[#allocation12 + $0x3c4] ss:$8 sps:$4 sm:$0xff]   ;;  %v7324_v23 = vmul.f32 %v14121_v56, %v13859_v12  ;;  %v11090_v12 = vld [vmem:[#allocation12 + $0x3b0] ss:$8 sps:$4 sm:$0xff]  }
 0x6d3   : > { %15087 = vst [vmem:[#allocation102_spill] sm:$0xff] %v14101_v35  ;;  %6128 = vmatpush1.bf16.msra.mxu1 %v11054_v55  ;;  %v11066_v55 = vld [vmem:[#allocation12 + $0x3f0] ss:$8 sps:$4 sm:$0xff]   ;;  %11368 = vpow2.f32 %v7730_v31  ;;  %v7732_v40 = vmul.f32 1.442695, %v7659_v15 }
 0x6d4   : > { %6129 = vmatprep.subr.bf16.mxu1 %v11062_v33  ;;  %v11074_v33 = vld [vmem:[#allocation12 + $0x3e4] ss:$8 sps:$4 sm:$0xff]   ;;  %11370 = vpow2.f32 %v7716_v6  ;;  %v7720_v2 = vmul.f32 1.442695, %v7653_v54  ;;  %v7666_v31 = vsub.f32 %v7322_v17, %v13938_v29  ;;  %v7667_v6 = vsub.f32 %v7323_v10, %v13940_v0 }
 0x6d5   : > { %11372 = vpow2.f32 %v7732_v40  ;;  %v7668_v0 = vsub.f32 %v7324_v23, %v13962_v48 }
 0x6d6   : > { %v14111_v9 = vpop.permute.xlu0 %7071  ;;  %v14113_v35 = vpop.permute.xlu1 %7075  ;;  %11374 = vpow2.f32 %v7718_v58  ;;  %v7746_v29 = vmul.f32 1.442695, %v7666_v31  ;;  %v11098_v58 = vld [vmem:[#allocation12 + $0x3a4] ss:$8 sps:$4 sm:$0xff]   ;;  %v11104_v31 = vld [vmem:[#allocation12 + $0x394] ss:$8 sps:$4 sm:$0xff]  }
 0x6d7   : > { %6130 = vmatpush1.bf16.msra.mxu1 %v11060_v36  ;;  %11376 = vpow2.f32 %v7720_v2 }
 0x6d8   : > { %6131 = vmatprep.subr.bf16.mxu1 %v11068_v8  ;;  %v7660_v8 = vsub.f32 %v7316_v27, %v13926_v61  ;;  %v11084_v27 = vld [vmem:[#allocation12 + $0x3c0] ss:$8 sps:$4 sm:$0xff]  }
 0x6da   : > { %v14124_v42 = vpop.permute.xlu0 %7133  ;;  %v14126_v36 = vpop.permute.xlu1 %7137  ;;  %v7734_v5 = vmul.f32 1.442695, %v7660_v8 }
 0x6db   : > { %6132 = vmatpush2.bf16.msra.mxu1 %v11066_v55  ;;  %v7661_v55 = vsub.f32 %v7317_v63, %v13928_v57 }
 0x6dc   : > { %6133 = vmatprep.subr.bf16.mxu1 %v11074_v33  ;;  %v7264_v33 = vcombine.high %v14076_v50, %v14076_v50  ;;  %11378 = vpow2.f32 %v7734_v5  ;;  %v7325_v50 = vmul.f32 %v14121_v56, %v13861_v37 }
 0x6dd   : > { %v7736_v57 = vmul.f32 1.442695, %v7661_v55  ;;  %v11096_v55 = vld [vmem:[#allocation12 + $0x3a0] ss:$8 sps:$4 sm:$0xff]  }
 0x6de   : > { %v14134_v43 = vpop.permute.xlu0 %7195  ;;  %v14136_v49 = vpop.permute.xlu1 %7199  ;;  %v14158_v54 = vrot.slane %v7264_v33, %v13654_v39  ;;  %v7669_v48 = vsub.f32 %v7325_v50, %v13964_v60  ;;  %v11110_v50 = vld [vmem:[#allocation12 + $0x384] ss:$8 sps:$4 sm:$0xff]  }
 0x6df   : > { %6134 = vmatpush2.bf16.msra.mxu1 %v11072_v32  ;;  %v11367_v32 = vpop.eup %11366  ;;  %11380 = vpow2.f32 %v7736_v57 }
 0x6e0   : > { %6135 = vmatprep.subr.bf16.mxu1 %v11080_v46  ;;  %v7748_v46 = vmul.f32 1.442695, %v7667_v6  ;;  %v7842_v17 = vsel %vm1374_vm1, %v11367_v32, 0.0  ;;  %v11369_v8 = vpop.eup %11368  ;;  %11382 = vpow2.f32 %v7746_v29  ;;  %v7330_v37 = vmul.f32 %v14158_v54, %v13867_v30 }
 0x6e1   : > { %v7866_v5 = vsel %vm1374_vm1, %v11369_v8, 0.0  ;;  %v7331_v30 = vmul.f32 %v14158_v54, %v13869_v59  ;;  %v7752_v60 = vmul.f32 1.442695, %v7669_v48  ;;  %v7311_v59 = vmul.f32 %v14073_v25, %v13892_v62  ;;  %v11118_v48 = vld [vmem:[#allocation12 + $0x574] ss:$8 sps:$4 sm:$0xff]  }
 0x6e2   : > { %v14142_v61 = vpop.permute.xlu0 %7399  ;;  %v14144_v15 = vpop.permute.xlu1 %7403  ;;  %11384 = vpow2.f32 %v7748_v46  ;;  %v7674_v32 = vsub.f32 %v7330_v37, %v13968_v7  ;;  %v11108_v7 = vld [vmem:[#allocation12 + $0x380] ss:$8 sps:$4 sm:$0xff]  }
 0x6e3   : > { %6136 = vmatpush2.bf16.msra.mxu1 %v11078_v1  ;;  %v11371_v1 = vpop.eup %11370 }
 0x6e4   : > { %6137 = vmatprep.subr.bf16.mxu1 %v11086_v20  ;;  %v7750_v20 = vmul.f32 1.442695, %v7668_v0  ;;  %v11373_v33 = vpop.eup %11372  ;;  %v14180_v0 = vpop.f32.mrf.mxu0  ;;  %v7762_v37 = vmul.f32 1.442695, %v7674_v32 }
 0x6e5   : > { %v11375_v23 = vpop.eup %11374  ;;  %v7869_v29 = vsel %vm1374_vm1, %v11373_v33, 0.0  ;;  %15088 = vst [vmem:[#allocation103_spill] sm:$0xff] %v14180_v0 }
 0x6e6   : > { %v14151_v63 = vpop.permute.xlu0 %7434  ;;  %v14153_v40 = vpop.permute.xlu1 %7438  ;;  %11386 = vpow2.f32 %v7750_v20  ;;  %v7848_v46 = vsel %vm1374_vm1, %v11375_v23, 0.0  ;;  %v14196_v23 = vld [vmem:[%s13762_s13 + $0x28] sm:$0xff] }
 0x6e7   : > { %6138 = vmatpush2.bf16.msra.mxu1 %v11084_v27  ;;  %v7845_v27 = vsel %vm1374_vm1, %v11371_v1, 0.0  ;;  %v14188_v1 = vpop.f32.mrf.mxu0  ;;  %11388 = vpow2.f32 %v7752_v60 }
 0x6e8   : > { %6139 = vmatprep.subr.bf16.mxu1 %v11092_v28  ;;  %v11102_v28 = vld [vmem:[#allocation12 + $0x390] ss:$8 sps:$4 sm:$0xff]   ;;  %15089 = vst [vmem:[#allocation104_spill] sm:$0xff] %v14188_v1  ;;  %11390 = vpow2.f32 %v7762_v37 }
 0x6ea   : > { %v14162_v10 = vpop.permute.xlu0 %7496  ;;  %v14164_v2 = vpop.permute.xlu1 %7500 }
 0x6eb   : > { %6140 = vmatpush2.bf16.msra.mxu1 %v11090_v12  ;;  %7843 = vadd.xlane.f32.xlu0 %v7842_v17  ;;  %v11377_v12 = vpop.eup %11376 }
 0x6ec   : > { %6141 = vmatprep.subr.bf16.mxu1 %v11098_v58  ;;  %v11379_v17 = vpop.eup %11378  ;;  %v7851_v20 = vsel %vm1374_vm1, %v11377_v12, 0.0  ;;  %v11126_v12 = vld [vmem:[#allocation12 + $0x564] ss:$8 sps:$4 sm:$0xff]  }
 0x6ed   : > { %v7872_v62 = vsel %vm1374_vm1, %v11379_v17, 0.0 }
 0x6ee   : > { %v14171_v57 = vpop.permute.xlu0 %7558  ;;  %v14173_v6 = vpop.permute.xlu1 %7562 }
 0x6ef   : > { %6142 = vmatpush2.bf16.msra.mxu1 %v11096_v55  ;;  %7867 = vadd.xlane.f32.xlu0 %v7866_v5  ;;  %v7675_v55 = vsub.f32 %v7331_v30, %v13970_v22  ;;  %v11381_v5 = vpop.eup %11380  ;;  %v7217_v22 = vcombine.high %v14055_v41, %v14055_v41  ;;  %v11116_v30 = vld [vmem:[#allocation12 + $0x570] ss:$8 sps:$4 sm:$0xff]   ;;  %v9653_v41 = vcombine.high %v14196_v23, %v14196_v23 }
 0x6f0   : > { %7846 = vadd.xlane.f32.xlu1 %v7845_v27  ;;  %6143 = vmatprep.subr.bf16.mxu1 %v11104_v31  ;;  %v6030_v31 = vpop.f32.mrf.mxu0  ;;  %v11383_v33 = vpop.eup %11382  ;;  %v9648_v27 = vcombine.low %v14028_v13, %v14028_v13  ;;  %v7875_v13 = vsel %vm1374_vm1, %v11381_v5, 0.0 }
 0x6f1   : > { %v14214_v37 = vrot.slane %v7217_v22, %v14045_v47 }
 0x6f2   : > { %v14182_v58 = vpop.permute.xlu0 %7585  ;;  %v14186_v8 = vpop.permute.xlu1 %7589 }
 0x6f3   : > { %6144 = vmatpush2.bf16.msra.mxu1 %v11102_v28  ;;  %7870 = vadd.xlane.f32.xlu0 %v7869_v29  ;;  %v7318_v28 = vmul.f32 %v14088_v4, %v13896_v44  ;;  %v6031_v32 = vpop.f32.mrf.mxu0  ;;  %v7764_v29 = vmul.f32 1.442695, %v7675_v55  ;;  %v7890_v44 = vsel %vm1374_vm1, %v11383_v33, 0.0  ;;  %v14224_v31 = vrot.slane %v14214_v37, %v14045_v47  ;;  %v11130_v33 = vld [vmem:[#allocation12 + $0x550] ss:$8 sps:$4 sm:$0xff]  }
 0x6f4   : > { %7849 = vadd.xlane.f32.xlu1 %v7848_v46  ;;  %6145 = vmatprep.subr.bf16.mxu1 %v11110_v50  ;;  %v7655_v50 = vsub.f32 %v7311_v59, %v14011_v34  ;;  %v11385_v46 = vpop.eup %11384  ;;  %v11124_v34 = vld [vmem:[#allocation12 + $0x560] ss:$8 sps:$4 sm:$0xff]  }
 0x6f5   : > { %11392 = vpow2.f32 %v7764_v29  ;;  %v7662_v55 = vsub.f32 %v7318_v28, %v14015_v19  ;;  %v11387_v5 = vpop.eup %11386  ;;  %v14234_v29 = vrot.slane %v14224_v31, %v13654_v39 }
 0x6f6   : > { %v14202_v60 = vpop.permute.xlu0 %7106  ;;  %v14207_v17 = vpop.permute.xlu1 %7110  ;;  %v7724_v59 = vmul.f32 1.442695, %v7655_v50  ;;  %v7896_v22 = vsel %vm1374_vm1, %v11387_v5, 0.0  ;;  %v11136_v50 = vld [vmem:[#allocation12 + $0x540] ss:$8 sps:$4 sm:$0xff]  }
 0x6f7   : > { %6146 = vmatpush2.bf16.msra.mxu1 %v11108_v7  ;;  %7852 = vadd.xlane.f32.xlu0 %v7851_v20  ;;  %v7319_v7 = vmul.f32 %v14088_v4, %v13898_v11  ;;  %v7893_v20 = vsel %vm1374_vm1, %v11385_v46, 0.0  ;;  %v7332_v11 = vmul.f32 %v14158_v54, %v13902_v45  ;;  %v11389_v32 = vpop.eup %11388  ;;  %v7333_v45 = vmul.f32 %v14158_v54, %v13904_v14 }
 0x6f8   : > { %7873 = vadd.xlane.f32.xlu1 %v7872_v62  ;;  %6197 = vmatprep.subr.bf16.mxu1 %v11118_v48  ;;  %v11132_v48 = vld [vmem:[#allocation12 + $0x554] ss:$8 sps:$4 sm:$0xff]   ;;  %11394 = vpow2.f32 %v7724_v59  ;;  %v7899_v46 = vsel %vm1374_vm1, %v11389_v32, 0.0  ;;  %v11391_v14 = vpop.eup %11390 }
 0x6f9   : > { %v7663_v28 = vsub.f32 %v7319_v7, %v14017_v24  ;;  %v7338_v7 = vmul.f32 %v14234_v29, %v13908_v53  ;;  %v11148_v53 = vld [vmem:[#allocation12 + $0x520] ss:$8 sps:$4 sm:$0xff]  }
 0x6fa   : > { %6148 = vmatmul.mubr.bf16.vlgmr.msra.gmra.mxu1 %v9648_v27  ;;  %v14218_v62 = vpop.permute.xlu0 %7168  ;;  %v14226_v19 = vpop.permute.xlu1 %7172  ;;  %v7738_v27 = vmul.f32 1.442695, %v7662_v55  ;;  %v7914_v55 = vsel %vm1374_vm1, %v11391_v14, 0.0 }
 0x6fb   : > { %6198 = vmatpush1.bf16.msra.mxu1 %v11116_v30  ;;  %7876 = vadd.xlane.f32.xlu0 %v7875_v13  ;;  %v11138_v30 = vld [vmem:[#allocation12 + $0x544] ss:$8 sps:$4 sm:$0xff]   ;;  %v7740_v24 = vmul.f32 1.442695, %v7663_v28 }
 0x6fc   : > { %7891 = vadd.xlane.f32.xlu1 %v7890_v44  ;;  %6199 = vmatprep.subr.bf16.mxu1 %v11126_v12  ;;  %11396 = vpow2.f32 %v7738_v27  ;;  %v7676_v12 = vsub.f32 %v7332_v11, %v14021_v3  ;;  %v11144_v44 = vld [vmem:[#allocation12 + $0x534] ss:$8 sps:$4 sm:$0xff]   ;;  %v7677_v3 = vsub.f32 %v7333_v45, %v14023_v26  ;;  %v7682_v26 = vsub.f32 %v7338_v7, %v14032_v18  ;;  %v11162_v7 = vld [vmem:[#allocation12 + $0x504] ss:$8 sps:$4 sm:$0xff]  }
 0x6fd   : > { %6229 = vmatprep.mubr.bf16.mxu1 %v9653_v41  ;;  %11398 = vpow2.f32 %v7740_v24  ;;  %v1627_v11 = vld [vmem:[%s1362_s28] sm:$0xff]  ;;  %v7233_v45 = vcombine.high %v14214_v37, %v14214_v37  ;;  %s15134_s28 = sld [smem:[#allocation61_spill]] }
 0x6fe   : > { %v14236_v13 = vpop.permute.xlu0 %7469  ;;  %v14243_v41 = vpop.permute.xlu1 %7473  ;;  %v7766_v59 = vmul.f32 1.442695, %v7676_v12  ;;  %v7768_v28 = vmul.f32 1.442695, %v7677_v3  ;;  %v7778_v18 = vmul.f32 1.442695, %v7682_v26 }
 0x6ff   : > { %6200 = vmatpush1.bf16.msra.mxu1 %v11124_v34  ;;  %7894 = vadd.xlane.f32.xlu0 %v7893_v20  ;;  %v11142_v34 = vld [vmem:[#allocation12 + $0x530] ss:$8 sps:$4 sm:$0xff]   ;;  %v11150_v20 = vld [vmem:[#allocation12 + $0x524] ss:$8 sps:$4 sm:$0xff]   ;;  %v14265_v12 = vpop.f32.mrf.mxu0 }
 0x700   : > { %6201 = vmatprep.subr.bf16.mxu1 %v11132_v48  ;;  %11400 = vpow2.f32 %v7766_v59  ;;  %15091 = vst [vmem:[#allocation105_spill] sm:$0xff] %v14265_v12  ;;  %v11180_v12 = vld [vmem:[#allocation12 + $0x5d4] ss:$8 sps:$4 sm:$0xff]  }
 0x701   : > { %11402 = vpow2.f32 %v7768_v28  ;;  %v14271_v59 = vpop.f32.mrf.mxu0 }
 0x702   : > { %v11393_v48 = vpop.eup %11392  ;;  %v14251_v5 = vpop.permute.xlu0 %7531  ;;  %11404 = vpow2.f32 %v7778_v18 }
 0x703   : > { %6202 = vmatpush1.bf16.msra.mxu1 %v11130_v33  ;;  %7897 = vadd.xlane.f32.xlu0 %v7896_v22  ;;  %v7339_v33 = vmul.f32 %v14234_v29, %v13910_v21  ;;  %v14255_v27 = vpop.permute.xlu1 %7535  ;;  %v7917_v22 = vsel %vm1374_vm1, %v11393_v48, 0.0  ;;  %v7326_v21 = vmul.f32 %v14121_v56, %v13944_v38  ;;  %v15094_v38 = vld [vmem:[#allocation76_spill] sm:$0xff] }
 0x704   : > { %6203 = vmatprep.subr.bf16.mxu1 %v11138_v30  ;;  %v11156_v30 = vld [vmem:[#allocation12 + $0x514] ss:$8 sps:$4 sm:$0xff]   ;;  %v7310_v3 = vmul.f32 %v14073_v25, %v15094_v38 }
 0x705   : > { %v11395_v32 = vpop.eup %11394  ;;  %v7670_v28 = vsub.f32 %v7326_v21, %v14080_v52  ;;  %v11166_v21 = vld [vmem:[#allocation12 + $0x5f0] ss:$8 sps:$4 sm:$0xff]  }
 0x706   : > { %v14263_v24 = vpop.permute.xlu0 %7593  ;;  %v7857_v14 = vsel %vm1374_vm1, %v11395_v32, 0.0 }
 0x707   : > { %6204 = vmatpush1.bf16.msra.mxu1 %v11136_v50  ;;  %7900 = vadd.xlane.f32.xlu0 %v7899_v46  ;;  %v11154_v50 = vld [vmem:[#allocation12 + $0x510] ss:$8 sps:$4 sm:$0xff]   ;;  %v14269_v37 = vpop.permute.xlu1 %7597 }
 0x708   : > { %6205 = vmatprep.subr.bf16.mxu1 %v11144_v44  ;;  %v15092_v46 = vld [vmem:[#allocation91_spill] sm:$0xff] }
 0x709   : > { %v7683_v44 = vsub.f32 %v7339_v33, %v15092_v46  ;;  %15093 = vst [vmem:[#allocation91_spill] sm:$0xff] %v14271_v59  ;;  %v6112_v33 = vpop.f32.mrf.mxu0  ;;  %v15100_v59 = vld [vmem:[#allocation100_spill] sm:$0xff] }
 0x70a   : > { %v14282_v32 = vpop.permute.xlu0 %7620  ;;  %v11174_v33 = vld [vmem:[#allocation12 + $0x5e4] ss:$8 sps:$4 sm:$0xff]  }
 0x70b   : > { %6206 = vmatpush1.bf16.msra.mxu1 %v11142_v34  ;;  %7915 = vadd.xlane.f32.xlu0 %v7914_v55  ;;  %v11397_v34 = vpop.eup %11396  ;;  %v14276_v55 = vrot.slane %v7233_v45, %v14045_v47  ;;  %v6113_v47 = vpop.f32.mrf.mxu0  ;;  %v15096_v45 = vld [vmem:[#allocation77_spill] sm:$0xff] }
 0x70c   : > { %6207 = vmatprep.subr.bf16.mxu1 %v11150_v20  ;;  %v15095_v20 = vld [vmem:[#allocation75_spill] sm:$0xff]  ;;  %v7878_v26 = vsel %vm1374_vm1, %v11397_v34, 0.0  ;;  %v7340_v46 = vmul.f32 %v14234_v29, %v15096_v45  ;;  %v7754_v34 = vmul.f32 1.442695, %v7670_v28  ;;  %v15099_v45 = vld [vmem:[#allocation78_spill] sm:$0xff] }
 0x70d   : > { %1629 = vrot.lane.b32.xlu1 %v1627_v11, %s12334_s11  ;;  %v7327_v48 = vmul.f32 %v14121_v56, %v15095_v20  ;;  %v11160_v11 = vld [vmem:[#allocation12 + $0x500] ss:$8 sps:$4 sm:$0xff]   ;;  %s15135_s11 = smov %s15134_s28 }
 0x70e   : > { %v14302_v28 = vpop.permute.xlu0 %7141 }
 0x70f   : > { %6208 = vmatpush1.bf16.msra.mxu1 %v11148_v53  ;;  %7918 = vadd.xlane.f32.xlu0 %v7917_v22  ;;  %v7780_v53 = vmul.f32 1.442695, %v7683_v44  ;;  %v11168_v22 = vld [vmem:[#allocation12 + $0x5f4] ss:$8 sps:$4 sm:$0xff]   ;;  %v7671_v38 = vsub.f32 %v7327_v48, %v14082_v16  ;;  %v15102_v48 = vld [vmem:[#allocation101_spill] sm:$0xff] }
 0x710   : > { %6209 = vmatprep.subr.bf16.mxu1 %v11156_v30  ;;  %v11399_v30 = vpop.eup %11398  ;;  %v15098_v44 = vld [vmem:[#allocation80_spill] sm:$0xff] }
 0x711   : > { %v7341_v52 = vmul.f32 %v14234_v29, %v15098_v44  ;;  %11406 = vpow2.f32 %v7780_v53  ;;  %v7881_v20 = vsel %vm1374_vm1, %v11399_v30, 0.0  ;;  %v11401_v47 = vpop.eup %11400  ;;  %v7684_v44 = vsub.f32 %v7340_v46, %v15100_v59  ;;  %v11172_v53 = vld [vmem:[#allocation12 + $0x5e0] ss:$8 sps:$4 sm:$0xff]   ;;  %v15103_v59 = vld [vmem:[#allocation79_spill] sm:$0xff] }
 0x712   : > { %11408 = vpow2.f32 %v7754_v34  ;;  %v7756_v16 = vmul.f32 1.442695, %v7671_v38  ;;  %v7920_v30 = vsel %vm1374_vm1, %v11401_v47, 0.0  ;;  %v7312_v46 = vmul.f32 %v14073_v25, %v15103_v59  ;;  %v11178_v34 = vld [vmem:[#allocation12 + $0x5d0] ss:$8 sps:$4 sm:$0xff]   ;;  %v14315_v59 = vpop.permute.xlu0 %7203 }
 0x713   : > { %6210 = vmatpush1.bf16.msra.mxu1 %v11154_v50  ;;  %7858 = vadd.xlane.f32.xlu0 %v7857_v14  ;;  %v14288_v50 = vrot.slane %v14276_v55, %v13654_v39  ;;  %v15097_v14 = vld [vmem:[#allocation90_spill] sm:$0xff] }
 0x714   : > { %6211 = vmatprep.subr.bf16.mxu1 %v11162_v7  ;;  %v7654_v18 = vsub.f32 %v7310_v3, %v15097_v14  ;;  %v14293_v7 = vpop.permute.xlu1 %7624 }
 0x715   : > { %v7346_v3 = vmul.f32 %v14288_v50, %v15099_v45  ;;  %v11403_v45 = vpop.eup %11402 }
 0x716   : > { %v7722_v14 = vmul.f32 1.442695, %v7654_v18  ;;  %v7923_v47 = vsel %vm1374_vm1, %v11403_v45, 0.0  ;;  %v11405_v0 = vpop.eup %11404  ;;  %v11192_v45 = vld [vmem:[#allocation12 + $0x5b4] ss:$8 sps:$4 sm:$0xff]  }
 0x717   : > { %6212 = vmatpush1.bf16.msra.mxu1 %v11160_v11  ;;  %7879 = vadd.xlane.f32.xlu0 %v7878_v26  ;;  %v15101_v11 = vld [vmem:[#allocation81_spill] sm:$0xff] }
 0x718   : > { %6213 = vmatprep.subr.bf16.mxu1 %v11168_v22  ;;  %v7347_v26 = vmul.f32 %v14288_v50, %v15101_v11  ;;  %v7685_v22 = vsub.f32 %v7341_v52, %v15102_v48  ;;  %v14306_v18 = vpop.permute.xlu1 %7145  ;;  %11410 = vpow2.f32 %v7722_v14  ;;  %v15105_v52 = vld [vmem:[#allocation73_spill] sm:$0xff]  ;;  %v15106_v14 = vld [vmem:[#allocation72_spill] sm:$0xff] }
 0x719   : > { %v7313_v38 = vmul.f32 %v14073_v25, %v15105_v52  ;;  %11412 = vpow2.f32 %v7756_v16  ;;  %v11186_v48 = vld [vmem:[#allocation12 + $0x5c4] ss:$8 sps:$4 sm:$0xff]   ;;  %v11184_v25 = vld [vmem:[#allocation12 + $0x5c0] ss:$8 sps:$4 sm:$0xff]  }
 0x71a   : > { %v7691_v1 = vsub.f32 %v7347_v26, %v14103_v51 }
 0x71b   : > { %6214 = vmatpush2.bf16.msra.mxu1 %v11166_v21  ;;  %7882 = vadd.xlane.f32.xlu0 %v7881_v20  ;;  %v7782_v21 = vmul.f32 1.442695, %v7684_v44  ;;  %v15104_v20 = vld [vmem:[#allocation102_spill] sm:$0xff]  ;;  %v7656_v44 = vsub.f32 %v7312_v46, %v14142_v61  ;;  %v7263_v61 = vcombine.high %v14224_v31, %v14224_v31 }
 0x71c   : > { %6215 = vmatprep.subr.bf16.mxu1 %v11174_v33  ;;  %v7690_v11 = vsub.f32 %v7346_v3, %v15104_v20  ;;  %v7784_v33 = vmul.f32 1.442695, %v7685_v22  ;;  %v7320_v3 = vmul.f32 %v14088_v4, %v15106_v14  ;;  %v7796_v26 = vmul.f32 1.442695, %v7691_v1  ;;  %v15108_v1 = vld [vmem:[#allocation84_spill] sm:$0xff]  ;;  %v15110_v14 = vld [vmem:[#allocation86_spill] sm:$0xff] }
 0x71d   : > { %11414 = vpow2.f32 %v7782_v21  ;;  %v7657_v22 = vsub.f32 %v7313_v38, %v14144_v15  ;;  %v7334_v46 = vmul.f32 %v14158_v54, %v15108_v1  ;;  %v7726_v20 = vmul.f32 1.442695, %v7656_v44  ;;  %v14331_v15 = vpop.permute.xlu0 %7504 }
 0x71e   : > { %v7794_v51 = vmul.f32 1.442695, %v7690_v11  ;;  %11416 = vpow2.f32 %v7784_v33  ;;  %v11407_v21 = vpop.eup %11406  ;;  %v7664_v11 = vsub.f32 %v7320_v3, %v14151_v63  ;;  %v11198_v33 = vld [vmem:[#allocation12 + $0x5a4] ss:$8 sps:$4 sm:$0xff]   ;;  %v7348_v3 = vmul.f32 %v14288_v50, %v15110_v14  ;;  %v15114_v14 = vld [vmem:[#allocation92_spill] sm:$0xff] }
 0x71f   : > { %6216 = vmatpush2.bf16.msra.mxu1 %v11172_v53  ;;  %7921 = vadd.xlane.f32.xlu0 %v7920_v30  ;;  %v14320_v53 = vpop.permute.xlu1 %7207  ;;  %v7938_v30 = vsel %vm1374_vm1, %v11405_v0, 0.0  ;;  %v7728_v52 = vmul.f32 1.442695, %v7657_v22  ;;  %v7941_v31 = vsel %vm1374_vm1, %v11407_v21, 0.0  ;;  %v7678_v44 = vsub.f32 %v7334_v46, %v14162_v10 }
 0x720   : > { %6217 = vmatprep.subr.bf16.mxu1 %v11180_v12  ;;  %v15107_v12 = vld [vmem:[#allocation83_spill] sm:$0xff]  ;;  %11418 = vpow2.f32 %v7794_v51  ;;  %v7742_v51 = vmul.f32 1.442695, %v7664_v11 }
 0x721   : > { %v7321_v16 = vmul.f32 %v14088_v4, %v15107_v12  ;;  %11420 = vpow2.f32 %v7796_v26  ;;  %v11190_v4 = vld [vmem:[#allocation12 + $0x5b0] ss:$8 sps:$4 sm:$0xff]   ;;  %v11196_v12 = vld [vmem:[#allocation12 + $0x5a0] ss:$8 sps:$4 sm:$0xff]   ;;  %v14351_v10 = vpop.permute.xlu0 %7566  ;;  %v7770_v46 = vmul.f32 1.442695, %v7678_v44 }
 0x722   : > { %11422 = vpow2.f32 %v7726_v20  ;;  %v7692_v20 = vsub.f32 %v7348_v3, %v14171_v57  ;;  %v7328_v3 = vmul.f32 %v14121_v56, %v15114_v14  ;;  %v15118_v14 = vld [vmem:[#allocation96_spill] sm:$0xff] }
 0x723   : > { %6218 = vmatpush2.bf16.msra.mxu1 %v11178_v34  ;;  %7924 = vadd.xlane.f32.xlu0 %v7923_v47  ;;  %v15109_v34 = vld [vmem:[#allocation85_spill] sm:$0xff]  ;;  %v7665_v38 = vsub.f32 %v7321_v16, %v14153_v40  ;;  %v11409_v47 = vpop.eup %11408  ;;  %v14340_v63 = vpop.permute.xlu1 %7508  ;;  %11424 = vpow2.f32 %v7728_v52 }
 0x724   : > { %6219 = vmatprep.subr.bf16.mxu1 %v11186_v48  ;;  %v7335_v0 = vmul.f32 %v14158_v54, %v15109_v34  ;;  %v14338_v48 = vrot.slane %v7263_v61, %v13654_v39  ;;  %v15112_v61 = vld [vmem:[#allocation88_spill] sm:$0xff]  ;;  %11426 = vpow2.f32 %v7742_v51  ;;  %v15113_v34 = vld [vmem:[#allocation89_spill] sm:$0xff]  ;;  %v7798_v51 = vmul.f32 1.442695, %v7692_v20 }
 0x725   : > { %v11411_v26 = vpop.eup %11410  ;;  %v7744_v16 = vmul.f32 1.442695, %v7665_v38 }
 0x726   : > { %v7679_v22 = vsub.f32 %v7335_v0, %v14164_v2  ;;  %v11413_v21 = vpop.eup %11412  ;;  %v7354_v1 = vmul.f32 %v14338_v48, %v15112_v61  ;;  %v7854_v11 = vsel %vm1374_vm1, %v11411_v26, 0.0  ;;  %v7355_v2 = vmul.f32 %v14338_v48, %v15113_v34  ;;  %v11202_v0 = vld [vmem:[#allocation12 + $0x590] ss:$8 sps:$4 sm:$0xff]  }
 0x727   : > { %6220 = vmatpush2.bf16.msra.mxu1 %v11184_v25  ;;  %7939 = vadd.xlane.f32.xlu0 %v7938_v30  ;;  %v15111_v25 = vld [vmem:[#allocation87_spill] sm:$0xff]  ;;  %v7902_v30 = vsel %vm1374_vm1, %v11409_v47, 0.0  ;;  %v14357_v52 = vpop.permute.xlu1 %7570  ;;  %11428 = vpow2.f32 %v7744_v16  ;;  %v11210_v47 = vld [vmem:[#allocation12 + $0x584] ss:$8 sps:$4 sm:$0xff]  }
 0x728   : > { %6221 = vmatprep.subr.bf16.mxu1 %v11192_v45  ;;  %v7349_v40 = vmul.f32 %v14288_v50, %v15111_v25  ;;  %v11204_v45 = vld [vmem:[#allocation12 + $0x594] ss:$8 sps:$4 sm:$0xff]   ;;  %v7772_v38 = vmul.f32 1.442695, %v7679_v22  ;;  %11430 = vpow2.f32 %v7770_v46  ;;  %v7698_v44 = vsub.f32 %v7354_v1, %v14182_v58  ;;  %v15116_v61 = vld [vmem:[#allocation94_spill] sm:$0xff] }
 0x729   : > { %v7342_v1 = vmul.f32 %v14234_v29, %v15116_v61  ;;  %v9652_v46 = vcombine.low %v14196_v23, %v14196_v23 }
 0x72a   : > { %11432 = vpow2.f32 %v7772_v38 }
 0x72b   : > { %6222 = vmatpush2.bf16.msra.mxu1 %v11190_v4  ;;  %7942 = vadd.xlane.f32.xlu0 %v7941_v31  ;;  %v11415_v4 = vpop.eup %11414  ;;  %v7693_v31 = vsub.f32 %v7349_v40, %v14173_v6  ;;  %v11208_v6 = vld [vmem:[#allocation12 + $0x580] ss:$8 sps:$4 sm:$0xff]   ;;  %v14367_v40 = vpop.permute.xlu0 %7628  ;;  %11434 = vpow2.f32 %v7798_v51 }
 0x72c   : > { %6223 = vmatprep.subr.bf16.mxu1 %v11198_v33  ;;  %v7905_v33 = vsel %vm1374_vm1, %v11413_v21, 0.0  ;;  %v11417_v57 = vpop.eup %11416  ;;  %v7944_v26 = vsel %vm1374_vm1, %v11415_v4, 0.0  ;;  %v11218_v21 = vld [vmem:[#allocation12 + $0x774] ss:$8 sps:$4 sm:$0xff]   ;;  %v14377_v20 = vpop.permute.xlu1 %7632  ;;  %v7672_v4 = vsub.f32 %v7328_v3, %v14236_v13  ;;  %v7356_v3 = vmul.f32 %v14338_v48, %v15118_v14 }
 0x72d   : > { %v11419_v25 = vpop.eup %11418  ;;  %v7947_v58 = vsel %vm1374_vm1, %v11417_v57, 0.0 }
 0x72e   : > { %v11421_v22 = vpop.eup %11420  ;;  %v7962_v34 = vsel %vm1374_vm1, %v11419_v25, 0.0  ;;  %v7686_v25 = vsub.f32 %v7342_v1, %v14251_v5  ;;  %v11226_v1 = vld [vmem:[#allocation12 + $0x754] ss:$8 sps:$4 sm:$0xff]  }
 0x72f   : > { %6224 = vmatpush2.bf16.msra.mxu1 %v11196_v12  ;;  %7903 = vadd.xlane.f32.xlu0 %v7902_v30  ;;  %v15115_v12 = vld [vmem:[#allocation93_spill] sm:$0xff]  ;;  %v7800_v30 = vmul.f32 1.442695, %v7693_v31  ;;  %v7965_v31 = vsel %vm1374_vm1, %v11421_v22, 0.0 }
 0x730   : > { %6225 = vmatprep.subr.bf16.mxu1 %v11204_v45  ;;  %v7329_v16 = vmul.f32 %v14121_v56, %v15115_v12  ;;  %v7699_v45 = vsub.f32 %v7355_v2, %v14186_v8  ;;  %v7265_v56 = vcombine.high %v14276_v55, %v14276_v55  ;;  %v7810_v8 = vmul.f32 1.442695, %v7698_v44  ;;  %v11423_v2 = vpop.eup %11422  ;;  %v11216_v55 = vld [vmem:[#allocation12 + $0x770] ss:$8 sps:$4 sm:$0xff]   ;;  %v14395_v44 = vpop.permute.xlu0 %7176 }
 0x731   : > { %7855 = vadd.xlane.f32.xlu1 %v7854_v11  ;;  %v14380_v11 = vld [vmem:[%s13762_s13 + $0x38] sm:$0xff]  ;;  %11436 = vpow2.f32 %v7800_v30  ;;  %v11425_v57 = vpop.eup %11424  ;;  %v7860_v12 = vsel %vm1374_vm1, %v11423_v2, 0.0  ;;  %v11221_v30 = vld [vmem:[#allocation12 + $0x760] ss:$8 sps:$4 sm:$0xff]   ;;  %s15131_s13 = sld [smem:[#allocation57_spill]] }
 0x732   : > { %v7812_v23 = vmul.f32 1.442695, %v7699_v45  ;;  %v9657_v13 = vcombine.high %v14380_v11, %v14380_v11  ;;  %v14393_v51 = vrot.slane %v7265_v56, %v13654_v39  ;;  %11438 = vpow2.f32 %v7810_v8  ;;  %v14403_v45 = vpop.permute.xlu1 %7180 }
 0x733   : > { %6226 = vmatpush2.bf16.msra.mxu1 %v11202_v0  ;;  %7906 = vadd.xlane.f32.xlu0 %v7905_v33  ;;  %v15117_v0 = vld [vmem:[#allocation95_spill] sm:$0xff]  ;;  %v7673_v33 = vsub.f32 %v7329_v16, %v14243_v41  ;;  %v11427_v16 = vpop.eup %11426  ;;  %v7863_v5 = vsel %vm1374_vm1, %v11425_v57, 0.0  ;;  %v11229_v57 = vld [vmem:[#allocation12 + $0x744] ss:$8 sps:$4 sm:$0xff]  }
 0x734   : > { %6227 = vmatprep.subr.bf16.mxu1 %v11210_v47  ;;  %v7343_v38 = vmul.f32 %v14234_v29, %v15117_v0  ;;  %v11223_v47 = vld [vmem:[#allocation12 + $0x764] ss:$8 sps:$4 sm:$0xff]   ;;  %11440 = vpow2.f32 %v7812_v23  ;;  %v11429_v56 = vpop.eup %11428  ;;  %v7884_v0 = vsel %vm1374_vm1, %v11427_v16, 0.0  ;;  %v14413_v23 = vpop.permute.xlu0 %7539 }
 0x735   : > { %7945 = vadd.xlane.f32.xlu1 %v7944_v26  ;;  %v7758_v26 = vmul.f32 1.442695, %v7672_v4  ;;  %v7786_v4 = vmul.f32 1.442695, %v7686_v25 }
 0x737   : > { %6228 = vmatpush2.bf16.msra.mxu1 %v11208_v6  ;;  %7948 = vadd.xlane.f32.xlu0 %v7947_v58  ;;  %v15119_v6 = vld [vmem:[#allocation97_spill] sm:$0xff]  ;;  %v7760_v58 = vmul.f32 1.442695, %v7673_v33  ;;  %11442 = vpow2.f32 %v7758_v26  ;;  %v14419_v26 = vpop.permute.xlu1 %7543 }
 0x738   : > { %6279 = vmatprep.subr.bf16.mxu1 %v11218_v21  ;;  %v7357_v22 = vmul.f32 %v14338_v48, %v15119_v6  ;;  %v7687_v21 = vsub.f32 %v7343_v38, %v14255_v27  ;;  %v15121_v27 = vld [vmem:[#allocation99_spill] sm:$0xff] }
 0x739   : > { %7963 = vadd.xlane.f32.xlu1 %v7962_v34  ;;  %v7700_v34 = vsub.f32 %v7356_v3, %v14263_v24  ;;  %v7363_v38 = vmul.f32 %v14393_v51, %v15121_v27  ;;  %11444 = vpow2.f32 %v7760_v58  ;;  %v7887_v24 = vsel %vm1374_vm1, %v11429_v56, 0.0 }
 0x73a   : > { %6230 = vmatmul.mubr.bf16.vlgmr.msra.gmra.mxu1 %v9652_v46  ;;  %v14398_v41 = vpop.f32.mrf.mxu1  ;;  %v15120_v46 = vld [vmem:[#allocation98_spill] sm:$0xff]  ;;  %v7788_v33 = vmul.f32 1.442695, %v7687_v21  ;;  %v7336_v3 = vmul.f32 %v14158_v54, %v14111_v9  ;;  %11446 = vpow2.f32 %v7786_v4  ;;  %v11232_v21 = vld [vmem:[#allocation12 + $0x734] ss:$8 sps:$4 sm:$0xff]  }
 0x73b   : > { %6280 = vmatpush1.bf16.msra.mxu1 %v11216_v55  ;;  %7966 = vadd.xlane.f32.xlu0 %v7965_v31  ;;  %v7362_v8 = vmul.f32 %v14393_v51, %v15120_v46  ;;  %v11431_v55 = vpop.eup %11430  ;;  %v11224_v31 = vld [vmem:[#allocation12 + $0x750] ss:$8 sps:$4 sm:$0xff]   ;;  %v7814_v25 = vmul.f32 1.442695, %v7700_v34  ;;  %v7707_v9 = vsub.f32 %v7363_v38, %v14293_v7  ;;  %v7351_v7 = vmul.f32 %v14288_v50, %v14126_v36 }
 0x73c   : > { %v10177_v61 = vpop.f32.mrf.mxu1  ;;  %6281 = vmatprep.subr.bf16.mxu1 %v11223_v47  ;;  %6311 = vmatprep.mubr.bf16.mxu1 %v9657_v13  ;;  %v7701_v47 = vsub.f32 %v7357_v22, %v14269_v37  ;;  %v11433_v14 = vpop.eup %11432  ;;  %v7926_v16 = vsel %vm1374_vm1, %v11431_v55, 0.0  ;;  %v7337_v37 = vmul.f32 %v14158_v54, %v14113_v35  ;;  %v11227_v22 = vld [vmem:[#allocation12 + $0x740] ss:$8 sps:$4 sm:$0xff]   ;;  %11448 = vpow2.f32 %v7788_v33  ;;  %v11230_v46 = vld [vmem:[#allocation12 + $0x730] ss:$8 sps:$4 sm:$0xff]  }
 0x73d   : > { %7861 = vadd.xlane.f32.xlu1 %v7860_v12  ;;  %v7706_v12 = vsub.f32 %v7362_v8, %v14282_v32  ;;  %v11435_v6 = vpop.eup %11434  ;;  %v7929_v58 = vsel %vm1374_vm1, %v11433_v14, 0.0  ;;  %v7350_v32 = vmul.f32 %v14288_v50, %v14124_v42  ;;  %11450 = vpow2.f32 %v7814_v25  ;;  %v14435_v8 = vpop.permute.xlu1 %7605  ;;  %v9397_v55 = vld [vmem:[#allocation33] ss:$0 sm:$0xff]  ;;  %v11233_v33 = vld [vmem:[#allocation12 + $0x720] ss:$8 sps:$4 sm:$0xff]   ;;  %v15122_v14 = vld [vmem:[#allocation71_spill] sm:$0xff] }
 0x73e   : > { %v4376_v2 = vpop.f32.mrf.mxu1  ;;  %v11437_v61 = vpop.eup %11436  ;;  %v7680_v54 = vsub.f32 %v7336_v3, %v14331_v15  ;;  %v7828_v42 = vmul.f32 1.442695, %v7707_v9  ;;  %v7681_v4 = vsub.f32 %v7337_v37, %v14340_v63  ;;  %v7364_v36 = vmul.f32 %v14393_v51, %v14134_v43 }
 0x73f   : > { %6282 = vmatpush1.bf16.msra.mxu1 %v11221_v30  ;;  %7864 = vadd.xlane.f32.xlu0 %v7863_v5  ;;  %v7816_v30 = vmul.f32 1.442695, %v7701_v47  ;;  %v14429_v5 = vpop.permute.xlu0 %7601  ;;  %v7826_v35 = vmul.f32 1.442695, %v7706_v12  ;;  %v11439_v56 = vpop.eup %11438  ;;  %v7971_v34 = vsel %vm1374_vm1, %v11437_v61, 0.0  ;;  %v7695_v63 = vsub.f32 %v7351_v7, %v14357_v52 }
 0x740   : > { %v10178_v13 = vpop.f32.mrf.mxu1  ;;  %6283 = vmatprep.subr.bf16.mxu1 %v11226_v1  ;;  %v7968_v1 = vsel %vm1374_vm1, %v11435_v6, 0.0  ;;  %v11235_v2 = vld [vmem:[#allocation12 + $0x724] ss:$8 sps:$4 sm:$0xff]   ;;  %v7774_v27 = vmul.f32 1.442695, %v7680_v54  ;;  %v7986_v38 = vsel %vm1374_vm1, %v11439_v56, 0.0  ;;  %v14450_v3 = vadd.f32 %v9397_v55, %v15122_v14 }
 0x741   : > { %7885 = vadd.xlane.f32.xlu1 %v7884_v0  ;;  %11452 = vpow2.f32 %v7816_v30  ;;  %v11441_v15 = vpop.eup %11440  ;;  %v7694_v0 = vsub.f32 %v7350_v32, %v14351_v10  ;;  %v7365_v10 = vmul.f32 %v14393_v51, %v14136_v49  ;;  %v7776_v13 = vmul.f32 1.442695, %v7681_v4  ;;  %v14452_v12 = vpop.permute.xlu1 %7215  ;;  %v11244_v4 = vld [vmem:[#allocation12 + $0x7f4] ss:$8 sps:$4 sm:$0xff]  }
 0x742   : > { %11454 = vpow2.f32 %v7826_v35  ;;  %v7989_v43 = vsel %vm1374_vm1, %v11441_v15, 0.0  ;;  %v7344_v52 = vmul.f32 %v14234_v29, %v14202_v60  ;;  %v7708_v49 = vsub.f32 %v7364_v36, %v14367_v40  ;;  %v11241_v60 = vld [vmem:[#allocation12 + $0x704] ss:$8 sps:$4 sm:$0xff]  }
 0x743   : > { %6284 = vmatpush1.bf16.msra.mxu1 %v11224_v31  ;;  %7888 = vadd.xlane.f32.xlu0 %v7887_v24  ;;  %v14444_v47 = vpop.permute.xlu0 %7211  ;;  %11456 = vpow2.f32 %v7828_v42  ;;  %v11238_v24 = vld [vmem:[#allocation12 + $0x714] ss:$8 sps:$4 sm:$0xff]   ;;  %v7802_v25 = vmul.f32 1.442695, %v7694_v0  ;;  %v7804_v37 = vmul.f32 1.442695, %v7695_v63  ;;  %v7345_v30 = vmul.f32 %v14234_v29, %v14207_v17 }
 0x744   : > { %6285 = vmatprep.subr.bf16.mxu1 %v11229_v57  ;;  %v11443_v31 = vpop.eup %11442  ;;  %11458 = vpow2.f32 %v7774_v27  ;;  %v7709_v9 = vsub.f32 %v7365_v10, %v14377_v20  ;;  %v1602_v61 = vmin.f32 %v14450_v3, 20.0  ;;  %v7358_v35 = vmul.f32 %v14338_v48, %v14218_v62 }
 0x745   : > { %7927 = vadd.xlane.f32.xlu1 %v7926_v16  ;;  %v7908_v16 = vsel %vm1374_vm1, %v11443_v31, 0.0  ;;  %11460 = vpow2.f32 %v7776_v13  ;;  %v7830_v17 = vmul.f32 1.442695, %v7708_v49  ;;  %v7688_v29 = vsub.f32 %v7344_v52, %v14413_v23  ;;  %v14471_v56 = vpop.permute.xlu1 %7578  ;;  %v11247_v13 = vld [vmem:[#allocation12 + $0x7e4] ss:$8 sps:$4 sm:$0xff]  }
 0x746   : > { %v11445_v57 = vpop.eup %11444  ;;  %11462 = vpow2.f32 %v7802_v25  ;;  %v7832_v42 = vmul.f32 1.442695, %v7709_v9  ;;  %v7689_v23 = vsub.f32 %v7345_v30, %v14419_v26  ;;  %v7352_v15 = vmul.f32 %v14288_v50, %v14302_v28  ;;  %v11242_v26 = vld [vmem:[#allocation12 + $0x7f0] ss:$8 sps:$4 sm:$0xff]   ;;  %v11250_v49 = vld [vmem:[#allocation12 + $0x7d4] ss:$8 sps:$4 sm:$0xff]  }
 0x747   : > { %6286 = vmatpush1.bf16.msra.mxu1 %v11227_v22  ;;  %7930 = vadd.xlane.f32.xlu0 %v7929_v58  ;;  %v11447_v6 = vpop.eup %11446  ;;  %v11236_v22 = vld [vmem:[#allocation12 + $0x710] ss:$8 sps:$4 sm:$0xff]   ;;  %v7911_v58 = vsel %vm1374_vm1, %v11445_v57, 0.0  ;;  %v14465_v32 = vpop.permute.xlu0 %7574  ;;  %11464 = vpow2.f32 %v7804_v37  ;;  %v7790_v55 = vmul.f32 1.442695, %v7688_v29  ;;  %v7702_v36 = vsub.f32 %v7358_v35, %v14429_v5 }
 0x748   : > { %6287 = vmatprep.subr.bf16.mxu1 %v11232_v21  ;;  %v14462_v21 = vpop.f32.mrf.mxu0  ;;  %v7950_v20 = vsel %vm1374_vm1, %v11447_v6, 0.0  ;;  %11466 = vpow2.f32 %v7830_v17  ;;  %v7696_v57 = vsub.f32 %v7352_v15, %v14465_v32  ;;  %v7367_v25 = vmul.f32 %v14393_v51, %v14320_v53  ;;  %v11253_v17 = vld [vmem:[#allocation12 + $0x7c4] ss:$8 sps:$4 sm:$0xff]  }
 0x749   : > { %7969 = vadd.xlane.f32.xlu1 %v7968_v1  ;;  %v11449_v40 = vpop.eup %11448  ;;  %v11239_v1 = vld [vmem:[#allocation12 + $0x700] ss:$8 sps:$4 sm:$0xff]   ;;  %11468 = vpow2.f32 %v7832_v42  ;;  %v7360_v37 = vmul.f32 %v14338_v48, %v14395_v44  ;;  %vm1601_vm15 = vcmp.gt.f32.partialorder %v14450_v3, 20.0 }
 0x74a   : > { %v11451_v54 = vpop.eup %11450  ;;  %v14473_v7 = vpop.f32.mrf.mxu0  ;;  %v7953_v62 = vsel %vm1374_vm1, %v11449_v40, 0.0  ;;  %v7806_v53 = vmul.f32 1.442695, %v7696_v57  ;;  %v11248_v40 = vld [vmem:[#allocation12 + $0x7d0] ss:$8 sps:$4 sm:$0xff]  }
 0x74b   : > { %6288 = vmatpush1.bf16.msra.mxu1 %v11230_v46  ;;  %7972 = vadd.xlane.f32.xlu0 %v7971_v34  ;;  %v7359_v46 = vmul.f32 %v14338_v48, %v14226_v19  ;;  %v7992_v19 = vsel %vm1374_vm1, %v11451_v54, 0.0  ;;  %v7637_v31 = vpop.permute.xlu0 %7636  ;;  %v7368_v54 = vmul.f32 %v14393_v51, %v14444_v47 }
 0x74c   : > { %6289 = vmatprep.subr.bf16.mxu1 %v11235_v2  ;;  %v1603_v2 = vmul.f32 1.442695, %v1602_v61  ;;  %v6194_v0 = vpop.f32.mrf.mxu0 }
 0x74d   : > { %7987 = vadd.xlane.f32.xlu1 %v7986_v38  ;;  %v7353_v38 = vmul.f32 %v14288_v50, %v14306_v18  ;;  %v7703_v10 = vsub.f32 %v7359_v46, %v14435_v8  ;;  %v7641_v50 = vpop.permute.xlu1 %7640  ;;  %v7818_v18 = vmul.f32 1.442695, %v7702_v36  ;;  %v11245_v8 = vld [vmem:[#allocation12 + $0x7e0] ss:$8 sps:$4 sm:$0xff]  }
 0x74e   : > { %v11453_v34 = vpop.eup %11452  ;;  %v6195_v63 = vpop.f32.mrf.mxu0  ;;  %11470 = vpow2.f32 %v1603_v2  ;;  %v7711_v29 = vsub.f32 %v7367_v25, %v7641_v50  ;;  %v11262_v50 = vld [vmem:[#allocation12 + $0x794] ss:$8 sps:$4 sm:$0xff]   ;;  %v4644_v25 = vld [vmem:[#allocation13] sm:$0x3] }
 0x74f   : > { %6290 = vmatpush1.bf16.msra.mxu1 %v11233_v33  ;;  %7990 = vadd.xlane.f32.xlu0 %v7989_v43  ;;  %v11455_v27 = vpop.eup %11454  ;;  %v7792_v33 = vmul.f32 1.442695, %v7689_v23  ;;  %v7995_v28 = vsel %vm1374_vm1, %v11453_v34, 0.0  ;;  %v7366_v43 = vmul.f32 %v14393_v51, %v14315_v59  ;;  %11472 = vpow2.f32 %v7790_v55 }
 0x750   : > { %6291 = vmatprep.subr.bf16.mxu1 %v11238_v24  ;;  %v11457_v5 = vpop.eup %11456  ;;  %v8010_v24 = vsel %vm1374_vm1, %v11455_v27, 0.0  ;;  %v7820_v52 = vmul.f32 1.442695, %v7703_v10  ;;  %v7836_v23 = vmul.f32 1.442695, %v7711_v29 }
 0x751   : > { %7909 = vadd.xlane.f32.xlu1 %v7908_v16  ;;  %v11459_v14 = vpop.eup %11458  ;;  %11474 = vpow2.f32 %v7792_v33  ;;  %v8013_v59 = vsel %vm1374_vm1, %v11457_v5, 0.0  ;;  %v7697_v16 = vsub.f32 %v7353_v38, %v14471_v56  ;;  %v7614_v61 = vpop.permute.xlu1 %7613  ;;  %v11251_v56 = vld [vmem:[#allocation12 + $0x7c0] ss:$8 sps:$4 sm:$0xff]   ;;  %v11254_v27 = vld [vmem:[#allocation12 + $0x7b0] ss:$8 sps:$4 sm:$0xff]  }
 0x752   : > { %v11461_v6 = vpop.eup %11460  ;;  %11476 = vpow2.f32 %v7818_v18  ;;  %v7932_v9 = vsel %vm1374_vm1, %v11459_v14, 0.0  ;;  %v11259_v38 = vld [vmem:[#allocation12 + $0x7a4] ss:$8 sps:$4 sm:$0xff]   ;;  %v11260_v14 = vld [vmem:[#allocation12 + $0x790] ss:$8 sps:$4 sm:$0xff]  }
 0x753   : > { %6292 = vmatpush1.bf16.msra.mxu1 %v11236_v22  ;;  %7912 = vadd.xlane.f32.xlu0 %v7911_v58  ;;  %v7610_v22 = vpop.permute.xlu0 %7609  ;;  %v11463_v30 = vpop.eup %11462  ;;  %v7710_v58 = vsub.f32 %v7366_v43, %v7637_v31  ;;  %11478 = vpow2.f32 %v7820_v52  ;;  %v7935_v44 = vsel %vm1374_vm1, %v11461_v6, 0.0  ;;  %v7808_v35 = vmul.f32 1.442695, %v7697_v16  ;;  %v11265_v52 = vld [vmem:[#allocation12 + $0x784] ss:$8 sps:$4 sm:$0xff]  }
 0x754   : > { %6293 = vmatprep.subr.bf16.mxu1 %v11241_v60  ;;  %v7361_v60 = vmul.f32 %v14338_v48, %v14403_v45  ;;  %v11465_v32 = vpop.eup %11464  ;;  %11480 = vpow2.f32 %v7806_v53  ;;  %v7704_v45 = vsub.f32 %v7360_v37, %v7610_v22  ;;  %v4649_v6 = vrot.slane %v4644_v25, %v13654_v39  ;;  %v11263_v37 = vld [vmem:[#allocation12 + $0x780] ss:$8 sps:$4 sm:$0xff]  }
 0x755   : > { %7951 = vadd.xlane.f32.xlu1 %v7950_v20  ;;  %v7974_v20 = vsel %vm1374_vm1, %v11463_v30, 0.0  ;;  %v7834_v48 = vmul.f32 1.442695, %v7710_v58  ;;  %v7977_v46 = vsel %vm1374_vm1, %v11465_v32, 0.0  ;;  %11482 = vpow2.f32 %v7808_v35  ;;  %v7649_v47 = vpop.permute.xlu1 %7648  ;;  %v15124_v32 = vld [vmem:[#allocation103_spill] sm:$0xff] }
 0x756   : > { %v7705_v34 = vsub.f32 %v7361_v60, %v7614_v61  ;;  %v7822_v0 = vmul.f32 1.442695, %v7704_v45  ;;  %v9656_v60 = vcombine.low %v14380_v11, %v14380_v11 }
 0x757   : > { %6294 = vmatpush1.bf16.msra.mxu1 %v11239_v1  ;;  %7954 = vadd.xlane.f32.xlu0 %v7953_v62  ;;  %v11467_v1 = vpop.eup %11466  ;;  %v7645_v42 = vpop.permute.xlu0 %7644  ;;  %v7369_v62 = vmul.f32 %v14393_v51, %v14452_v12  ;;  %11484 = vpow2.f32 %v7834_v48 }
 0x758   : > { %6295 = vmatprep.subr.bf16.mxu1 %v11244_v4  ;;  %v11256_v4 = vld [vmem:[#allocation12 + $0x7b4] ss:$8 sps:$4 sm:$0xff]   ;;  %v11469_v2 = vpop.eup %11468  ;;  %v8016_v55 = vsel %vm1374_vm1, %v11467_v1, 0.0  ;;  %v7712_v36 = vsub.f32 %v7368_v54, %v7645_v42  ;;  %11486 = vpow2.f32 %v7836_v23  ;;  %v7824_v12 = vmul.f32 1.442695, %v7705_v34 }
 0x759   : > { %7993 = vadd.xlane.f32.xlu1 %v7992_v19  ;;  %v8019_v51 = vsel %vm1374_vm1, %v11469_v2, 0.0  ;;  %11488 = vpow2.f32 %v7822_v0  ;;  %v15125_v54 = vld [vmem:[#allocation104_spill] sm:$0xff] }
 0x75a   : > { %v7838_v33 = vmul.f32 1.442695, %v7712_v36  ;;  %11490 = vpow2.f32 %v7824_v12 }
 0x75b   : > { %6296 = vmatpush2.bf16.msra.mxu1 %v11242_v26  ;;  %7996 = vadd.xlane.f32.xlu0 %v7995_v28  ;;  %v14507_v15 = vpop.eup %11470  ;;  %v7713_v26 = vsub.f32 %v7369_v62, %v7649_v47 }
 0x75c   : > { %6297 = vmatprep.subr.bf16.mxu1 %v11247_v13  ;;  %v11473_v19 = vpop.eup %11472  ;;  %v1605_v63 = vadd.f32 1.0, %v14507_v15  ;;  %v11257_v13 = vld [vmem:[#allocation12 + $0x7a0] ss:$8 sps:$4 sm:$0xff]   ;;  %v1608_v29 = vmul.f32 -0.5, %v14507_v15 }
 0x75d   : > { %8011 = vadd.xlane.f32.xlu1 %v8010_v24  ;;  %v7956_v28 = vsel %vm1374_vm1, %v11473_v19, 0.0  ;;  %v7840_v43 = vmul.f32 1.442695, %v7713_v26 }
 0x75e   : > { %v11475_v31 = vpop.eup %11474  ;;  %11492 = vlog2.f32 %v1605_v63  ;;  %v1609_v34 = vadd.f32 1.0, %v1608_v29  ;;  %v15126_v63 = vlaneseq }
 0x75f   : > { %6298 = vmatpush2.bf16.msra.mxu1 %v11245_v8  ;;  %8014 = vadd.xlane.f32.xlu0 %v8013_v59  ;;  %v11477_v10 = vpop.eup %11476  ;;  %v7959_v5 = vsel %vm1374_vm1, %v11475_v31, 0.0  ;;  %11494 = vpow2.f32 %v7838_v33 }
 0x760   : > { %6299 = vmatprep.subr.bf16.mxu1 %v11250_v49  ;;  %v11479_v18 = vpop.eup %11478  ;;  %v7998_v24 = vsel %vm1374_vm1, %v11477_v10, 0.0  ;;  %11496 = vpow2.f32 %v7840_v43  ;;  %v1610_v26 = vmul.f32 %v14507_v15, %v1609_v34  ;;  %v14538_v33 = vand.u32 127, %v15126_v63 }
 0x761   : > { %7933 = vadd.xlane.f32.xlu1 %v7932_v9  ;;  %v11481_v57 = vpop.eup %11480  ;;  %v8001_v8 = vsel %vm1374_vm1, %v11479_v18, 0.0  ;;  %v15123_v9 = vld [vmem:[#allocation74_spill] sm:$0xff] }
 0x762   : > { %v11483_v59 = vpop.eup %11482  ;;  %v7980_v49 = vsel %vm1374_vm1, %v11481_v57, 0.0  ;;  %v4653_v58 = vrot.slane %v4644_v25, %v15123_v9  ;;  %v8311_v43 = vadd.s32 4294967288, %v14538_v33 }
 0x763   : > { %6300 = vmatpush2.bf16.msra.mxu1 %v11248_v40  ;;  %7936 = vadd.xlane.f32.xlu0 %v7935_v44  ;;  %v7983_v30 = vsel %vm1374_vm1, %v11483_v59, 0.0  ;;  %v6027_v44 = vadd.f32 %v15124_v32, %v4649_v6 }
 0x764   : > { %6301 = vmatprep.subr.bf16.mxu1 %v11253_v17  ;;  %v11485_v16 = vpop.eup %11484  ;;  %v6029_v48 = vadd.f32 %v15125_v54, %v4653_v58 }
 0x765   : > { %7975 = vadd.xlane.f32.xlu1 %v7974_v20  ;;  %v11487_v53 = vpop.eup %11486  ;;  %v8022_v40 = vsel %vm1374_vm1, %v11485_v16, 0.0 }
 0x766   : > { %v11489_v61 = vpop.eup %11488  ;;  %v8025_v17 = vsel %vm1374_vm1, %v11487_v53, 0.0 }
 0x767   : > { %6302 = vmatpush2.bf16.msra.mxu1 %v11251_v56  ;;  %7978 = vadd.xlane.f32.xlu0 %v7977_v46  ;;  %v11491_v20 = vpop.eup %11490  ;;  %v8004_v56 = vsel %vm1374_vm1, %v11489_v61, 0.0 }
 0x768   : > { %6303 = vmatprep.subr.bf16.mxu1 %v11256_v4  ;;  %v8007_v4 = vsel %vm1374_vm1, %v11491_v20, 0.0 }
 0x769   : > { %8017 = vadd.xlane.f32.xlu1 %v8016_v55  ;;  %v1611_v55 = vand.u32 2147483647, %v14507_v15 }
 0x76b   : > { %6304 = vmatpush2.bf16.msra.mxu1 %v11254_v27  ;;  %8020 = vadd.xlane.f32.xlu0 %v8019_v51  ;;  %v11493_v1 = vpop.eup %11492  ;;  %vm1612_vm14 = vcmp.lt.f32.partialorder %v1611_v55, 0.0004427343 }
 0x76c   : > { %6305 = vmatprep.subr.bf16.mxu1 %v11259_v38  ;;  %v11495_v46 = vpop.eup %11494  ;;  %v1607_v27 = vmul.f32 0.6931472, %v11493_v1 }
 0x76d   : > { %7957 = vadd.xlane.f32.xlu1 %v7956_v28  ;;  %v11497_v2 = vpop.eup %11496  ;;  %v8028_v19 = vsel %vm1374_vm1, %v11495_v46, 0.0 }
 0x76e   : > { %v8031_v38 = vsel %vm1374_vm1, %v11497_v2, 0.0  ;;  %v1613_v28 = vsel %vm1612_vm14, %v1610_v26, %v1607_v27  ;;  %v1616_v2 = vld [vmem:[%s1358_s0] sm:$0xff]  ;;  %vm8337_vm14 = vcmask 326912  }
 0x76f   : > { %6306 = vmatpush2.bf16.msra.mxu1 %v11257_v13  ;;  %7960 = vadd.xlane.f32.xlu0 %v7959_v5  ;;  %v1614_v5 = vsel %vm1601_vm15, %v14450_v3, %v1613_v28  ;;  %vm8344_vm15 = vcmask 392512  }
 0x770   : > { %6307 = vmatprep.subr.bf16.mxu1 %v11262_v50 }
 0x771   : > { %7999 = vadd.xlane.f32.xlu1 %v7998_v24 }
 0x773   : > { %6308 = vmatpush2.bf16.msra.mxu1 %v11260_v14  ;;  %8002 = vadd.xlane.f32.xlu0 %v8001_v8  ;;  %v14543_v14 = vadd.f32 1e-07, %v1614_v5  ;;  %v15127_v8 = vld [vmem:[#allocation82_spill] sm:$0xff] }
 0x774   : > { %v7844_v22 = vpop.xlane.xlu0 %7843  ;;  %6309 = vmatprep.subr.bf16.mxu1 %v11265_v52  ;;  %v14547_v52 = vsub.s32 %v14538_v33, %v15127_v8  ;;  %v14550_v59 = vsub.s32 %v8311_v43, %v15127_v8 }
 0x775   : > { %7981 = vadd.xlane.f32.xlu1 %v7980_v49  ;;  %11498 = vrcp.f32 %v7844_v22  ;;  %v8325_v22 = vadd.s32 4294967272, %v14538_v33 }
 0x777   : > { %6310 = vmatpush2.bf16.msra.mxu1 %v11263_v37  ;;  %7984 = vadd.xlane.f32.xlu0 %v7983_v30  ;;  %v8318_v37 = vadd.s32 4294967280, %v14538_v33 }
 0x778   : > { %v7868_v35 = vpop.xlane.xlu0 %7867 }
 0x779   : > { %8023 = vadd.xlane.f32.xlu1 %v8022_v40  ;;  %v7847_v45 = vpop.xlane.xlu1 %7846 }
 0x77a   : > { %v6067_v11 = vpop.f32.mrf.mxu1  ;;  %6312 = vmatmul.mubr.bf16.vlgmr.msra.gmra.mxu1 %v9656_v60  ;;  %11500 = vrcp.f32 %v7847_v45 }
 0x77b   : > { %11502 = vrcp.f32 %v7868_v35  ;;  %v14528_v42 = vadd.f32 %v6067_v11, %v6027_v44  ;;  %8026 = vadd.xlane.f32.xlu0 %v8025_v17  ;;  %v14560_v35 = vsub.s32 %v8318_v37, %v15127_v8  ;;  %v14563_v17 = vsub.s32 %v8325_v22, %v15127_v8 }
 0x77c   : > { %v6069_v62 = vpop.f32.mrf.mxu1  ;;  %v7871_v23 = vpop.xlane.xlu0 %7870 }
 0x77d   : > { %v14531_v47 = vadd.f32 %v6069_v62, %v6029_v48  ;;  %11504 = vrcp.f32 %v7871_v23  ;;  %8005 = vadd.xlane.f32.xlu1 %v8004_v56  ;;  %v7850_v0 = vpop.xlane.xlu1 %7849 }
 0x77e   : > { %v6071_v36 = vpop.f32.mrf.mxu1  ;;  %11506 = vrcp.f32 %v7850_v0 }
 0x77f   : > { %8008 = vadd.xlane.f32.xlu0 %v8007_v4 }
 0x780   : > { %v6072_v51 = vpop.f32.mrf.mxu1  ;;  %v7853_v12 = vpop.xlane.xlu0 %7852 }
 0x781   : > { %11508 = vrcp.f32 %v7853_v12  ;;  %8029 = vadd.xlane.f32.xlu1 %v8028_v19  ;;  %v7874_v31 = vpop.xlane.xlu1 %7873 }
 0x782   : > { %11510 = vrcp.f32 %v7874_v31  ;;  %v11499_v13 = vpop.eup %11498 }
 0x783   : > { %8032 = vadd.xlane.f32.xlu0 %v8031_v38 }
 0x784   : > { %v7877_v10 = vpop.xlane.xlu0 %7876 }
 0x785   : > { %11512 = vrcp.f32 %v7877_v10  ;;  %v7892_v15 = vpop.xlane.xlu1 %7891  ;;  %v14557_v44 = vpop.f32.mrf.mxu0 }
 0x786   : > { %11514 = vrcp.f32 %v7892_v15 }
 0x787   : > { %v11501_v50 = vpop.eup %11500  ;;  %v14572_v62 = vpop.f32.mrf.mxu0 }
 0x788   : > { %v11503_v18 = vpop.eup %11502  ;;  %v8162_v24 = vpack.c.bf16 %v11501_v50, %v11499_v13  ;;  %v7895_v57 = vpop.xlane.xlu0 %7894 }
 0x789   : > { %11516 = vrcp.f32 %v7895_v57  ;;  %v6276_v36 = vpop.f32.mrf.mxu0  ;;  %v1630_v12 = vpop.permute.xlu1 %1629 }
 0x78a   : > { %v11505_v25 = vpop.eup %11504  ;;  %v8241_v49 = vunpack.c.l.b16 %v8162_v24  ;;  %v8242_v16 = vunpack.c.h.b16 %v8162_v24  ;;  %11518 = vlog2.f32 %v14543_v14  ;;  %v1632_v5 = vmul.f32 %v1630_v12, %v14543_v14 }
 0x78b   : > { %v8166_v6 = vpack.c.bf16 %v11505_v25, %v11503_v18  ;;  %v11507_v30 = vpop.eup %11506  ;;  %v6277_v63 = vpop.f32.mrf.mxu0  ;;  %v8339_v36 = vadd.s32 4294967256, %v14538_v33 }
 0x78c   : > { %v7898_v53 = vpop.xlane.xlu0 %7897  ;;  %v8310_v60 = vrot.slane %v8241_v49, %v14547_v52  ;;  %v8315_v40 = vrot.slane %v8242_v16, %v14550_v59 }
 0x78d   : > { %v8249_v61 = vunpack.c.l.b16 %v8166_v6  ;;  %v8250_v32 = vunpack.c.h.b16 %v8166_v6  ;;  %11520 = vrcp.f32 %v7898_v53  ;;  %v14617_v63 = vsub.s32 %v8339_v36, %v15127_v8 }
 0x78e   : > { %v11509_v58 = vpop.eup %11508  ;;  %v8317_v11 = vsel %vm8316_vm2, %v8315_v40, %v8310_v60 }
 0x78f   : > { %v8163_v29 = vpack.c.bf16 %v11509_v58, %v11507_v30  ;;  %v11511_v20 = vpop.eup %11510  ;;  %v8363_v56 = vrot.slane %v8249_v61, %v14547_v52  ;;  %v8367_v46 = vrot.slane %v8250_v32, %v14550_v59 }
 0x790   : > { %v7901_v54 = vpop.xlane.xlu0 %7900 }
 0x791   : > { %v8243_v48 = vunpack.c.l.b16 %v8163_v29  ;;  %v8244_v45 = vunpack.c.h.b16 %v8163_v29  ;;  %11522 = vrcp.f32 %v7901_v54  ;;  %v8368_v26 = vsel %vm8316_vm2, %v8367_v46, %v8363_v56  ;;  %v11269_v56 = vld [vmem:[#allocation15 + $0x38] sm:$0xff]   ;;  %v11270_v46 = vld [vmem:[#allocation15 + $0x70] sm:$0xff]  }
 0x792   : > { %v11513_v1 = vpop.eup %11512  ;;  %1640 = vrot.lane.b32.xlu1 %v14543_v14, %s12335_s18 }
 0x793   : > { %v8322_v23 = vrot.slane %v8243_v48, %v14560_v35  ;;  %v8329_v4 = vrot.slane %v8244_v45, %v14563_v17  ;;  %v8167_v34 = vpack.c.bf16 %v11513_v1, %v11511_v20  ;;  %v11515_v0 = vpop.eup %11514 }
 0x794   : > { %v7916_v55 = vpop.xlane.xlu0 %7915 }
 0x795   : > { %v8324_v19 = vsel %vm8323_vm3, %v8322_v23, %v8317_v11  ;;  %v8251_v27 = vunpack.c.l.b16 %v8167_v34  ;;  %v8252_v51 = vunpack.c.h.b16 %v8167_v34  ;;  %11524 = vrcp.f32 %v7916_v55  ;;  %v11268_v11 = vld [vmem:[#allocation15 + $0x78] sm:$0xff]   ;;  %v11272_v34 = vld [vmem:[#allocation15 + $0x68] sm:$0xff]  }
 0x796   : > { %v11517_v38 = vpop.eup %11516  ;;  %v14579_v31 = vsel %vm8330_vm13, %v8329_v4, %v8324_v19  ;;  %1618 = vrot.lane.b32.xlu1 %v1616_v2, %s12336_s6  ;;  %10041 = vmatprep.subr.bf16.mxu0 %v11268_v11  ;;  %v11271_v4 = vld [vmem:[#allocation15 + $0x30] sm:$0xff]   ;;  %v8332_v55 = vadd.s32 4294967264, %v14538_v33  ;;  %v11274_v19 = vld [vmem:[#allocation15 + $0x60] sm:$0xff]  }
 0x797   : > { %v8372_v28 = vrot.slane %v8251_v27, %v14560_v35  ;;  %v8377_v10 = vrot.slane %v8252_v51, %v14563_v17  ;;  %v8170_v13 = vpack.c.bf16 %v11517_v38, %v11515_v0  ;;  %v11519_v15 = vpop.eup %11518  ;;  %10042 = vmatpush3.bf16.msra.mxu0 %v11269_v56  ;;  %v11273_v0 = vld [vmem:[#allocation15 + $0x28] sm:$0xff]   ;;  %v11275_v38 = vld [vmem:[#allocation15 + $0x20] sm:$0xff]  }
 0x798   : > { %v7919_v43 = vpop.xlane.xlu0 %7918  ;;  %v14592_v16 = vmul.f32 0.6931472, %v11519_v15  ;;  %10043 = vmatprep.subr.bf16.mxu0 %v11270_v46 }
 0x799   : > { %v8373_v50 = vsel %vm8323_vm3, %v8372_v28, %v8368_v26  ;;  %11526 = vrcp.f32 %v7919_v43  ;;  %1697 = vrot.lane.b32.xlu0 %v14543_v14, %s12336_s6  ;;  %v8257_v24 = vunpack.c.l.b16 %v8170_v13  ;;  %v8258_v57 = vunpack.c.h.b16 %v8170_v13 }
 0x79a   : > { %v14587_v18 = vsel %vm8330_vm13, %v8377_v10, %v8373_v50  ;;  %1634 = vrot.lane.b32.xlu1 %v1632_v5, %s12335_s18  ;;  %v11521_v25 = vpop.eup %11520  ;;  %v14614_v26 = vsub.s32 %v8332_v55, %v15127_v8  ;;  %v11276_v10 = vld [vmem:[#allocation15 + $0x58] sm:$0xff]  }
 0x79b   : > { %v8402_v37 = vrot.slane %v8257_v24, %v14547_v52  ;;  %v8406_v22 = vrot.slane %v8258_v57, %v14550_v59  ;;  %10044 = vmatpush3.bf16.msra.mxu0 %v11271_v4  ;;  %v11277_v24 = vld [vmem:[#allocation15 + $0x18] sm:$0xff]  }
 0x79c   : > { %v14590_v49 = vpop.xlane.xlu0 %7858  ;;  %10045 = vmatprep.subr.bf16.mxu0 %v11272_v34 }
 0x79d   : > { %1693 = vrot.lane.b32.xlu0 %v14450_v3, %s12337_s10  ;;  %v8407_v40 = vsel %vm8316_vm2, %v8406_v22, %v8402_v37 }
 0x79e   : > { %v11523_v6 = vpop.eup %11522  ;;  %1650 = vrot.lane.b32.xlu1 %v14592_v16, %s12335_s18 }
 0x79f   : > { %v8171_v30 = vpack.c.bf16 %v11523_v6, %v11521_v25  ;;  %10046 = vmatpush3.bf16.msra.mxu0 %v11273_v0  ;;  %v11278_v6 = vld [vmem:[#allocation15 + $0x50] sm:$0xff]  }
 0x7a0   : > { %v7880_v53 = vpop.xlane.xlu0 %7879  ;;  %10047 = vmatprep.subr.bf16.mxu0 %v11274_v19 }
 0x7a1   : > { %v8259_v58 = vunpack.c.l.b16 %v8171_v30  ;;  %v8260_v60 = vunpack.c.h.b16 %v8171_v30  ;;  %1704 = vrot.lane.b32.xlu0 %v14592_v16, %s12336_s6  ;;  %11528 = vrcp.f32 %v7880_v53  ;;  %v15129_v30 = vld [vmem:[#allocation105_spill] sm:$0xff] }
 0x7a2   : > { %1664 = vrot.lane.b32.xlu1 %v14543_v14, %s12338_s8  ;;  %v11525_v29 = vpop.eup %11524  ;;  %v6109_v53 = vadd.f32 %v15129_v30, %v14528_v42 }
 0x7a3   : > { %v8411_v61 = vrot.slane %v8259_v58, %v14560_v35  ;;  %v8416_v32 = vrot.slane %v8260_v60, %v14563_v17  ;;  %10048 = vmatpush3.bf16.msra.mxu0 %v11275_v38  ;;  %v11282_v38 = vld [vmem:[#allocation15 + $0x40] sm:$0xff]  }
 0x7a4   : > { %v7883_v20 = vpop.xlane.xlu0 %7882  ;;  %10049 = vmatprep.subr.bf16.mxu0 %v11276_v10 }
 0x7a5   : > { %v8412_v54 = vsel %vm8323_vm3, %v8411_v61, %v8407_v40  ;;  %11530 = vrcp.f32 %v7883_v20 }
 0x7a6   : > { %v11527_v48 = vpop.eup %11526  ;;  %v14607_v45 = vsel %vm8330_vm13, %v8416_v32, %v8412_v54  ;;  %1660 = vrot.lane.b32.xlu1 %v14450_v3, %s12339_s23  ;;  %v11279_v54 = vld [vmem:[#allocation15 + $0x10] sm:$0xff]  }
 0x7a7   : > { %v8174_v1 = vpack.c.bf16 %v11527_v48, %v11525_v29  ;;  %10050 = vmatpush3.bf16.msra.mxu0 %v11277_v24  ;;  %v15130_v48 = vld [vmem:[#allocation91_spill] sm:$0xff] }
 0x7a8   : > { %v7922_v23 = vpop.xlane.xlu0 %7921  ;;  %v6111_v42 = vadd.f32 %v15130_v48, %v14531_v47  ;;  %10051 = vmatprep.subr.bf16.mxu0 %v11278_v6 }
 0x7a9   : > { %11532 = vrcp.f32 %v7922_v23  ;;  %v8265_v15 = vunpack.c.l.b16 %v8174_v1  ;;  %v8266_v50 = vunpack.c.h.b16 %v8174_v1 }
 0x7ab   : > { %v8441_v40 = vrot.slane %v8265_v15, %v14547_v52  ;;  %v8445_v61 = vrot.slane %v8266_v50, %v14550_v59  ;;  %10052 = vmatpush3.bf16.msra.mxu0 %v11279_v54  ;;  %v11283_v15 = vld [vmem:[#allocation15] sm:$0xff]  }
 0x7ac   : > { %v7925_v2 = vpop.xlane.xlu0 %7924 }
 0x7ad   : > { %11534 = vrcp.f32 %v7925_v2  ;;  %v8446_v4 = vsel %vm8316_vm2, %v8445_v61, %v8441_v40 }
 0x7ae   : > { %v11529_v27 = vpop.eup %11528 }
 0x7b0   : > { %v7940_v51 = vpop.xlane.xlu0 %7939 }
 0x7b1   : > { %11536 = vrcp.f32 %v7940_v51  ;;  %v11280_v51 = vld [vmem:[#allocation15 + $0x48] sm:$0xff]  }
 0x7b2   : > { %v11531_v12 = vpop.eup %11530  ;;  %10053 = vmatprep.subr.bf16.mxu0 %v11280_v51 }
 0x7b3   : > { %v8168_v28 = vpack.c.bf16 %v11531_v12, %v11529_v27  ;;  %v11281_v12 = vld [vmem:[#allocation15 + $0x8] sm:$0xff]  }
 0x7b4   : > { %v7943_v13 = vpop.xlane.xlu0 %7942  ;;  %10054 = vmatpush3.bf16.msra.mxu0 %v11281_v12 }
 0x7b5   : > { %v8253_v5 = vunpack.c.l.b16 %v8168_v28  ;;  %v8254_v43 = vunpack.c.h.b16 %v8168_v28  ;;  %11538 = vrcp.f32 %v7943_v13  ;;  %10055 = vmatprep.subr.bf16.mxu0 %v11282_v38 }
 0x7b6   : > { %v11533_v37 = vpop.eup %11532  ;;  %11540 = vrcp.f32 %v14590_v49 }
 0x7b7   : > { %v8382_v57 = vrot.slane %v8253_v5, %v14614_v26  ;;  %v8387_v25 = vrot.slane %v8254_v43, %v14617_v63 }
 0x7b8   : > { %v7904_v22 = vpop.xlane.xlu0 %7903  ;;  %10056 = vmatpush3.bf16.msra.mxu0 %v11283_v15 }
 0x7b9   : > { %v8383_v58 = vsel %vm8337_vm14, %v8382_v57, %v14587_v18 }
 0x7ba   : > { %v11535_v60 = vpop.eup %11534  ;;  %v14629_v32 = vsel %vm8344_vm15, %v8387_v25, %v8383_v58  ;;  %v6149_v29 = vpop.f32.mrf.mxu1 }
 0x7bb   : > { %v7856_v20 = vpop.xlane.xlu1 %7855  ;;  %v8175_v1 = vpack.c.bf16 %v11535_v60, %v11533_v37  ;;  %v14633_v49 = vadd.f32 %v6149_v29, %v6109_v53 }
 0x7bc   : > { %11542 = vrcp.f32 %v7856_v20  ;;  %v6151_v18 = vpop.f32.mrf.mxu1  ;;  %v7907_v11 = vpop.xlane.xlu0 %7906 }
 0x7bd   : > { %11544 = vrcp.f32 %v7904_v22  ;;  %v8267_v56 = vunpack.c.l.b16 %v8175_v1  ;;  %v8268_v46 = vunpack.c.h.b16 %v8175_v1  ;;  %v14635_v23 = vadd.f32 %v6151_v18, %v6111_v42 }
 0x7be   : > { %11546 = vrcp.f32 %v7907_v11  ;;  %v6153_v34 = vpop.f32.mrf.mxu1  ;;  %v11537_v55 = vpop.eup %11536 }
 0x7bf   : > { %v7946_v2 = vpop.xlane.xlu1 %7945  ;;  %v8450_v47 = vrot.slane %v8267_v56, %v14560_v35  ;;  %v8455_v0 = vrot.slane %v8268_v46, %v14563_v17 }
 0x7c0   : > { %11548 = vrcp.f32 %v7946_v2  ;;  %v6154_v36 = vpop.f32.mrf.mxu1  ;;  %v7949_v19 = vpop.xlane.xlu0 %7948 }
 0x7c1   : > { %v8451_v27 = vsel %vm8323_vm3, %v8450_v47, %v8446_v4  ;;  %11550 = vrcp.f32 %v7949_v19 }
 0x7c2   : > { %v11539_v28 = vpop.eup %11538  ;;  %v14642_v10 = vsel %vm8330_vm13, %v8455_v0, %v8451_v27 }
 0x7c3   : > { %v7964_v13 = vpop.xlane.xlu1 %7963  ;;  %v8178_v5 = vpack.c.bf16 %v11539_v28, %v11537_v55  ;;  %v11541_v50 = vpop.eup %11540  ;;  %v8353_v28 = vadd.s32 4294967240, %v14538_v33 }
 0x7c4   : > { %11552 = vrcp.f32 %v7964_v13  ;;  %v7967_v43 = vpop.xlane.xlu0 %7966 }
 0x7c5   : > { %11554 = vrcp.f32 %v7967_v43  ;;  %v8273_v22 = vunpack.c.l.b16 %v8178_v5  ;;  %v8274_v30 = vunpack.c.h.b16 %v8178_v5 }
 0x7c7   : > { %v7862_v24 = vpop.xlane.xlu1 %7861  ;;  %v8480_v1 = vrot.slane %v8273_v22, %v14547_v52  ;;  %v8484_v18 = vrot.slane %v8274_v30, %v14550_v59  ;;  %v14671_v22 = vsub.s32 %v8353_v28, %v15127_v8 }
 0x7c8   : > { %11556 = vrcp.f32 %v7862_v24  ;;  %v7865_v25 = vpop.xlane.xlu0 %7864 }
 0x7c9   : > { %v11543_v57 = vpop.eup %11542  ;;  %11558 = vrcp.f32 %v7865_v25  ;;  %v8485_v12 = vsel %vm8316_vm2, %v8484_v18, %v8480_v1 }
 0x7ca   : > { %v11545_v6 = vpop.eup %11544  ;;  %v8164_v37 = vpack.c.bf16 %v11541_v50, %v11543_v57 }
 0x7cb   : > { %v7886_v53 = vpop.xlane.xlu1 %7885  ;;  %v11547_v58 = vpop.eup %11546 }
 0x7cc   : > { %v8245_v60 = vunpack.c.l.b16 %v8164_v37  ;;  %v8246_v40 = vunpack.c.h.b16 %v8164_v37  ;;  %11560 = vrcp.f32 %v7886_v53  ;;  %v8172_v29 = vpack.c.bf16 %v11547_v58, %v11545_v6  ;;  %v7889_v20 = vpop.xlane.xlu0 %7888 }
 0x7cd   : > { %v11549_v61 = vpop.eup %11548  ;;  %11562 = vrcp.f32 %v7889_v20 }
 0x7ce   : > { %v8336_v54 = vrot.slane %v8245_v60, %v14614_v26  ;;  %v8343_v48 = vrot.slane %v8246_v40, %v14617_v63  ;;  %v11551_v42 = vpop.eup %11550  ;;  %v8261_v11 = vunpack.c.l.b16 %v8172_v29  ;;  %v8262_v56 = vunpack.c.h.b16 %v8172_v29 }
 0x7cf   : > { %v7928_v46 = vpop.xlane.xlu1 %7927  ;;  %v8179_v34 = vpack.c.bf16 %v11551_v42, %v11549_v61 }
 0x7d0   : > { %v8338_v4 = vsel %vm8337_vm14, %v8336_v54, %v14579_v31  ;;  %11564 = vrcp.f32 %v7928_v46  ;;  %v8421_v0 = vrot.slane %v8261_v11, %v14614_v26  ;;  %v8426_v55 = vrot.slane %v8262_v56, %v14617_v63  ;;  %v7931_v36 = vpop.xlane.xlu0 %7930 }
 0x7d1   : > { %v11553_v2 = vpop.eup %11552  ;;  %v8345_v47 = vsel %vm8344_vm15, %v8343_v48, %v8338_v4  ;;  %v8275_v19 = vunpack.c.l.b16 %v8179_v34  ;;  %v8276_v27 = vunpack.c.h.b16 %v8179_v34  ;;  %11566 = vrcp.f32 %v7931_v36 }
 0x7d2   : > { %v11555_v51 = vpop.eup %11554  ;;  %v8422_v38 = vsel %vm8337_vm14, %v8421_v0, %v14607_v45  ;;  %v8346_v31 = vadd.s32 4294967248, %v14538_v33 }
 0x7d3   : > { %v7970_v13 = vpop.xlane.xlu1 %7969  ;;  %v14659_v5 = vsel %vm8344_vm15, %v8426_v55, %v8422_v38  ;;  %v8489_v43 = vrot.slane %v8275_v19, %v14560_v35  ;;  %v8494_v15 = vrot.slane %v8276_v27, %v14563_v17  ;;  %v8182_v50 = vpack.c.bf16 %v11555_v51, %v11553_v2 }
 0x7d4   : > { %11568 = vrcp.f32 %v7970_v13  ;;  %v7973_v57 = vpop.xlane.xlu0 %7972  ;;  %v14668_v37 = vsub.s32 %v8346_v31, %v15127_v8 }
 0x7d5   : > { %v11557_v24 = vpop.eup %11556  ;;  %v8490_v25 = vsel %vm8323_vm3, %v8489_v43, %v8485_v12  ;;  %11570 = vrcp.f32 %v7973_v57  ;;  %v8281_v46 = vunpack.c.l.b16 %v8182_v50  ;;  %v8282_v4 = vunpack.c.h.b16 %v8182_v50 }
 0x7d6   : > { %v11559_v45 = vpop.eup %11558  ;;  %v14665_v6 = vsel %vm8330_vm13, %v8494_v15, %v8490_v25 }
 0x7d7   : > { %v7988_v33 = vpop.xlane.xlu1 %7987  ;;  %v8165_v30 = vpack.c.bf16 %v11559_v45, %v11557_v24  ;;  %v8519_v31 = vrot.slane %v8281_v46, %v14547_v52  ;;  %v8523_v28 = vrot.slane %v8282_v4, %v14550_v59 }
 0x7d8   : > { %11572 = vrcp.f32 %v7988_v33  ;;  %v7991_v58 = vpop.xlane.xlu0 %7990 }
 0x7d9   : > { %v11561_v53 = vpop.eup %11560  ;;  %v8247_v60 = vunpack.c.l.b16 %v8165_v30  ;;  %v8248_v40 = vunpack.c.h.b16 %v8165_v30  ;;  %11574 = vrcp.f32 %v7991_v58  ;;  %v8524_v58 = vsel %vm8316_vm2, %v8523_v28, %v8519_v31 }
 0x7da   : > { %v11563_v61 = vpop.eup %11562 }
 0x7db   : > { %v7910_v29 = vpop.xlane.xlu1 %7909  ;;  %v8350_v20 = vrot.slane %v8247_v60, %v14668_v37  ;;  %v8357_v54 = vrot.slane %v8248_v40, %v14671_v22  ;;  %v8169_v48 = vpack.c.bf16 %v11563_v61, %v11561_v53 }
 0x7dc   : > { %11576 = vrcp.f32 %v7910_v29  ;;  %v7913_v8 = vpop.xlane.xlu0 %7912 }
 0x7dd   : > { %v11565_v42 = vpop.eup %11564  ;;  %v8352_v1 = vsel %vm8351_vm12, %v8350_v20, %v8345_v47  ;;  %v8255_v18 = vunpack.c.l.b16 %v8169_v48  ;;  %v8256_v11 = vunpack.c.h.b16 %v8169_v48  ;;  %11578 = vrcp.f32 %v7913_v8 }
 0x7de   : > { %v11567_v56 = vpop.eup %11566  ;;  %v8359_v34 = vsel %vm8358_vm11, %v8357_v54, %v8352_v1 }
 0x7df   : > { %v7952_v2 = vpop.xlane.xlu1 %7951  ;;  %v8392_v0 = vrot.slane %v8255_v18, %v14668_v37  ;;  %v8397_v55 = vrot.slane %v8256_v11, %v14671_v22  ;;  %v8176_v36 = vpack.c.bf16 %v11567_v56, %v11565_v42 }
 0x7e0   : > { %11580 = vrcp.f32 %v7952_v2  ;;  %v7955_v19 = vpop.xlane.xlu0 %7954 }
 0x7e1   : > { %v11569_v27 = vpop.eup %11568  ;;  %v8393_v47 = vsel %vm8351_vm12, %v8392_v0, %v14629_v32  ;;  %v8269_v51 = vunpack.c.l.b16 %v8176_v36  ;;  %v8270_v12 = vunpack.c.h.b16 %v8176_v36  ;;  %11582 = vrcp.f32 %v7955_v19 }
 0x7e2   : > { %v11571_v38 = vpop.eup %11570  ;;  %v8398_v13 = vsel %vm8358_vm11, %v8397_v55, %v8393_v47 }
 0x7e3   : > { %v7994_v43 = vpop.xlane.xlu1 %7993  ;;  %v14685_v15 = vsel %vm4094_vm4, %v8398_v13, %v8359_v34  ;;  %v8460_v50 = vrot.slane %v8269_v51, %v14614_v26  ;;  %v8465_v24 = vrot.slane %v8270_v12, %v14617_v63  ;;  %v8183_v57 = vpack.c.bf16 %v11571_v38, %v11569_v27 }
 0x7e4   : > { %11584 = vrcp.f32 %v7994_v43  ;;  %v7997_v25 = vpop.xlane.xlu0 %7996  ;;  %vm1655_vm4 = vcmask 15360  }
 0x7e5   : > { %v11573_v32 = vpop.eup %11572  ;;  %v8461_v45 = vsel %vm8337_vm14, %v8460_v50, %v14642_v10  ;;  %v8283_v33 = vunpack.c.l.b16 %v8183_v57  ;;  %v8284_v30 = vunpack.c.h.b16 %v8183_v57  ;;  %11586 = vrcp.f32 %v7997_v25 }
 0x7e6   : > { %v11575_v53 = vpop.eup %11574  ;;  %v14693_v60 = vsel %vm8344_vm15, %v8465_v24, %v8461_v45 }
 0x7e7   : > { %v8012_v40 = vpop.xlane.xlu1 %8011  ;;  %v8528_v61 = vrot.slane %v8283_v33, %v14560_v35  ;;  %v8533_v29 = vrot.slane %v8284_v30, %v14563_v17  ;;  %v8186_v20 = vpack.c.bf16 %v11575_v53, %v11573_v32 }
 0x7e8   : > { %11588 = vrcp.f32 %v8012_v40  ;;  %v8015_v48 = vpop.xlane.xlu0 %8014 }
 0x7e9   : > { %v11577_v54 = vpop.eup %11576  ;;  %v8529_v10 = vsel %vm8323_vm3, %v8528_v61, %v8524_v58  ;;  %11590 = vrcp.f32 %v8015_v48  ;;  %v8289_v2 = vunpack.c.l.b16 %v8186_v20  ;;  %v8290_v0 = vunpack.c.h.b16 %v8186_v20 }
 0x7ea   : > { %v11579_v42 = vpop.eup %11578  ;;  %v14699_v8 = vsel %vm8330_vm13, %v8533_v29, %v8529_v10 }
 0x7eb   : > { %v7934_v1 = vpop.xlane.xlu1 %7933  ;;  %v8173_v18 = vpack.c.bf16 %v11579_v42, %v11577_v54  ;;  %v8558_v13 = vrot.slane %v8289_v2, %v14547_v52  ;;  %v8562_v43 = vrot.slane %v8290_v0, %v14550_v59 }
 0x7ec   : > { %11592 = vrcp.f32 %v7934_v1  ;;  %v7937_v56 = vpop.xlane.xlu0 %7936 }
 0x7ed   : > { %v11581_v11 = vpop.eup %11580  ;;  %v8263_v46 = vunpack.c.l.b16 %v8173_v18  ;;  %v8264_v4 = vunpack.c.h.b16 %v8173_v18  ;;  %11594 = vrcp.f32 %v7937_v56  ;;  %v8563_v40 = vsel %vm8316_vm2, %v8562_v43, %v8558_v13 }
 0x7ee   : > { %v11583_v34 = vpop.eup %11582 }
 0x7ef   : > { %v7976_v55 = vpop.xlane.xlu1 %7975  ;;  %v8431_v36 = vrot.slane %v8263_v46, %v14668_v37  ;;  %v8436_v19 = vrot.slane %v8264_v4, %v14671_v22  ;;  %v8180_v27 = vpack.c.bf16 %v11583_v34, %v11581_v11 }
 0x7f0   : > { %11596 = vrcp.f32 %v7976_v55  ;;  %v7979_v47 = vpop.xlane.xlu0 %7978 }
 0x7f1   : > { %v11585_v51 = vpop.eup %11584  ;;  %v8432_v12 = vsel %vm8351_vm12, %v8431_v36, %v14659_v5  ;;  %v8277_v38 = vunpack.c.l.b16 %v8180_v27  ;;  %v8278_v31 = vunpack.c.h.b16 %v8180_v27  ;;  %11598 = vrcp.f32 %v7979_v47 }
 0x7f2   : > { %v11587_v28 = vpop.eup %11586  ;;  %v8437_v50 = vsel %vm8358_vm11, %v8436_v19, %v8432_v12 }
 0x7f3   : > { %v8018_v24 = vpop.xlane.xlu1 %8017  ;;  %v8499_v57 = vrot.slane %v8277_v38, %v14614_v26  ;;  %v8504_v32 = vrot.slane %v8278_v31, %v14617_v63  ;;  %v8187_v25 = vpack.c.bf16 %v11587_v28, %v11585_v51  ;;  %v8634_v46 = vsel %vm4096_vm5, %v8437_v50, %v14685_v15 }
 0x7f4   : > { %11600 = vrcp.f32 %v8018_v24  ;;  %v8021_v33 = vpop.xlane.xlu0 %8020  ;;  %vm15137_vm5 = vcmask 261120  }
 0x7f5   : > { %v11589_v45 = vpop.eup %11588  ;;  %v8500_v5 = vsel %vm8337_vm14, %v8499_v57, %v14665_v6  ;;  %v8291_v30 = vunpack.c.l.b16 %v8187_v25  ;;  %v8292_v53 = vunpack.c.h.b16 %v8187_v25  ;;  %11602 = vrcp.f32 %v8021_v33 }
 0x7f6   : > { %v11591_v58 = vpop.eup %11590  ;;  %v14714_v61 = vsel %vm8344_vm15, %v8504_v32, %v8500_v5 }
 0x7f7   : > { %v7958_v29 = vpop.xlane.xlu1 %7957  ;;  %v8567_v20 = vrot.slane %v8291_v30, %v14560_v35  ;;  %v8572_v54 = vrot.slane %v8292_v53, %v14563_v17  ;;  %v8190_v48 = vpack.c.bf16 %v11591_v58, %v11589_v45 }
 0x7f8   : > { %11604 = vrcp.f32 %v7958_v29  ;;  %v7961_v42 = vpop.xlane.xlu0 %7960 }
 0x7f9   : > { %v11593_v10 = vpop.eup %11592  ;;  %v8568_v6 = vsel %vm8323_vm3, %v8567_v20, %v8563_v40  ;;  %11606 = vrcp.f32 %v7961_v42  ;;  %v8297_v27 = vunpack.c.l.b16 %v8190_v48  ;;  %v8298_v47 = vunpack.c.h.b16 %v8190_v48 }
 0x7fa   : > { %v11595_v1 = vpop.eup %11594  ;;  %v14720_v18 = vsel %vm8330_vm13, %v8572_v54, %v8568_v6  ;;  %v14722_v11 = vpop.f32.mrf.mxu1 }
 0x7fb   : > { %v8000_v56 = vpop.xlane.xlu1 %7999  ;;  %v8177_v4 = vpack.c.bf16 %v11595_v1, %v11593_v10  ;;  %v8597_v25 = vrot.slane %v8297_v27, %v14547_v52  ;;  %v8601_v45 = vrot.slane %v8298_v47, %v14550_v59 }
 0x7fc   : > { %11608 = vrcp.f32 %v8000_v56  ;;  %v14726_v2 = vpop.f32.mrf.mxu1  ;;  %v8003_v0 = vpop.xlane.xlu0 %8002 }
 0x7fd   : > { %v11597_v34 = vpop.eup %11596  ;;  %v8271_v55 = vunpack.c.l.b16 %v8177_v4  ;;  %v8272_v36 = vunpack.c.h.b16 %v8177_v4  ;;  %11610 = vrcp.f32 %v8003_v0  ;;  %v8602_v48 = vsel %vm8316_vm2, %v8601_v45, %v8597_v25 }
 0x7fe   : > { %v11599_v19 = vpop.eup %11598  ;;  %v6235_v51 = vpop.f32.mrf.mxu1 }
 0x7ff   : > { %v7982_v12 = vpop.xlane.xlu1 %7981  ;;  %v8470_v38 = vrot.slane %v8271_v55, %v14668_v37  ;;  %v8475_v31 = vrot.slane %v8272_v36, %v14671_v22  ;;  %v8184_v28 = vpack.c.bf16 %v11599_v19, %v11597_v34 }
 0x800   : > { %11612 = vrcp.f32 %v7982_v12  ;;  %v6236_v13 = vpop.f32.mrf.mxu1  ;;  %v7985_v43 = vpop.xlane.xlu0 %7984 }
 0x801   : > { %v11601_v15 = vpop.eup %11600  ;;  %v8471_v50 = vsel %vm8351_vm12, %v8470_v38, %v14693_v60  ;;  %v8285_v24 = vunpack.c.l.b16 %v8184_v28  ;;  %v8286_v57 = vunpack.c.h.b16 %v8184_v28  ;;  %11614 = vrcp.f32 %v7985_v43 }
 0x802   : > { %v11603_v32 = vpop.eup %11602  ;;  %v8476_v33 = vsel %vm8358_vm11, %v8475_v31, %v8471_v50 }
 0x803   : > { %v8024_v5 = vpop.xlane.xlu1 %8023  ;;  %v8538_v30 = vrot.slane %v8285_v24, %v14614_v26  ;;  %v8543_v53 = vrot.slane %v8286_v57, %v14617_v63  ;;  %v8191_v58 = vpack.c.bf16 %v11603_v32, %v11601_v15  ;;  %v8635_v60 = vsel %vm4098_vm6, %v8476_v33, %v8634_v46 }
 0x804   : > { %11616 = vrcp.f32 %v8024_v5  ;;  %v8027_v29 = vpop.xlane.xlu0 %8026  ;;  %vm15138_vm6 = vcmask 785408  }
 0x805   : > { %v11605_v40 = vpop.eup %11604  ;;  %v8539_v20 = vsel %vm8337_vm14, %v8538_v30, %v14699_v8  ;;  %v8299_v54 = vunpack.c.l.b16 %v8191_v58  ;;  %v8300_v52 = vunpack.c.h.b16 %v8191_v58  ;;  %11618 = vrcp.f32 %v8027_v29 }
 0x806   : > { %v11607_v59 = vpop.eup %11606  ;;  %v8544_v10 = vsel %vm8344_vm15, %v8543_v53, %v8539_v20 }
 0x807   : > { %v8006_v42 = vpop.xlane.xlu1 %8005  ;;  %v8606_v6 = vrot.slane %v8299_v54, %v14560_v35  ;;  %v8611_v1 = vrot.slane %v8300_v52, %v14563_v17  ;;  %v8181_v56 = vpack.c.bf16 %v11607_v59, %v11605_v40 }
 0x808   : > { %11620 = vrcp.f32 %v8006_v42  ;;  %v8009_v4 = vpop.xlane.xlu0 %8008 }
 0x809   : > { %v11609_v46 = vpop.eup %11608  ;;  %v8607_v34 = vsel %vm8323_vm3, %v8606_v6, %v8602_v48  ;;  %v8279_v8 = vunpack.c.l.b16 %v8181_v56  ;;  %v8280_v0 = vunpack.c.h.b16 %v8181_v56  ;;  %11622 = vrcp.f32 %v8009_v4 }
 0x80a   : > { %v8612_v55 = vsel %vm8330_vm13, %v8611_v1, %v8607_v34  ;;  %v11611_v19 = vpop.eup %11610 }
 0x80b   : > { %v8030_v36 = vpop.xlane.xlu1 %8029  ;;  %v8509_v27 = vrot.slane %v8279_v8, %v14668_v37  ;;  %v8514_v47 = vrot.slane %v8280_v0, %v14671_v22  ;;  %v8188_v35 = vpack.c.bf16 %v11611_v19, %v11609_v46 }
 0x80c   : > { %11624 = vrcp.f32 %v8030_v36  ;;  %v8033_v17 = vpop.xlane.xlu0 %8032 }
 0x80d   : > { %v11613_v51 = vpop.eup %11612  ;;  %v8510_v12 = vsel %vm8351_vm12, %v8509_v27, %v14714_v61  ;;  %11626 = vrcp.f32 %v8033_v17  ;;  %v8293_v31 = vunpack.c.l.b16 %v8188_v35  ;;  %v8294_v28 = vunpack.c.h.b16 %v8188_v35 }
 0x80e   : > { %v11615_v38 = vpop.eup %11614  ;;  %v8515_v13 = vsel %vm8358_vm11, %v8514_v47, %v8510_v12 }
 0x80f   : > { %v1641_v15 = vpop.permute.xlu1 %1640  ;;  %v8185_v43 = vpack.c.bf16 %v11615_v38, %v11613_v51  ;;  %v8636_v50 = vsel %vm4100_vm7, %v8515_v13, %v8635_v60  ;;  %v8577_v57 = vrot.slane %v8293_v31, %v14614_v26  ;;  %v8582_v32 = vrot.slane %v8294_v28, %v14617_v63  ;;  %v11284_v38 = vld [vmem:[%s15131_s13 + $0x70] ss:$8 sps:$4 sm:$0xff]   ;;  %v11286_v31 = vld [vmem:[%s15131_s13 + $0x74] ss:$8 sps:$4 sm:$0xff]  }
 0x810   : > { %11628 = vrcp.f32 %v1641_v15  ;;  %v1698_v25 = vpop.permute.xlu0 %1697  ;;  %v11289_v15 = vld [vmem:[%s15131_s13 + $0x64] ss:$8 sps:$4 sm:$0xff]   ;;  %6706 = vmatprep.subr.bf16.mxu1 %v11286_v31  ;;  %v11322_v31 = vld [vmem:[%s15131_s13 + $0xb4] ss:$8 sps:$4 sm:$0xff]  }
 0x811   : > { %v11617_v24 = vpop.eup %11616  ;;  %v8287_v45 = vunpack.c.l.b16 %v8185_v43  ;;  %v8288_v33 = vunpack.c.h.b16 %v8185_v43  ;;  %11630 = vrcp.f32 %v1698_v25  ;;  %v8578_v5 = vsel %vm8337_vm14, %v8577_v57, %v14720_v18  ;;  %6707 = vmatpush1.bf16.msra.mxu1 %v11284_v38  ;;  %v11317_v38 = vld [vmem:[%s15131_s13 + $0xc0] ss:$8 sps:$4 sm:$0xff]  }
 0x812   : > { %v11619_v61 = vpop.eup %11618  ;;  %v8583_v20 = vsel %vm8344_vm15, %v8582_v32, %v8578_v5  ;;  %v11287_v32 = vld [vmem:[%s15131_s13 + $0x60] ss:$8 sps:$4 sm:$0xff]   ;;  %6708 = vmatprep.subr.bf16.mxu1 %v11289_v15 }
 0x813   : > { %v1619_v30 = vpop.permute.xlu1 %1618  ;;  %v8548_v53 = vrot.slane %v8287_v45, %v14668_v37  ;;  %v8553_v58 = vrot.slane %v8288_v33, %v14671_v22  ;;  %v8192_v40 = vpack.c.bf16 %v11619_v61, %v11617_v24  ;;  %v11292_v61 = vld [vmem:[%s15131_s13 + $0x54] ss:$8 sps:$4 sm:$0xff]   ;;  %v11323_v15 = vld [vmem:[%s15131_s13 + $0xa0] ss:$8 sps:$4 sm:$0xff]  }
 0x814   : > { %v1621_v29 = vmul.f32 %v1619_v30, %v14543_v14  ;;  %v1694_v27 = vpop.permute.xlu0 %1693 }
 0x815   : > { %v11621_v60 = vpop.eup %11620  ;;  %v8301_v54 = vunpack.c.l.b16 %v8192_v40  ;;  %v8302_v52 = vunpack.c.h.b16 %v8192_v40  ;;  %v8549_v59 = vsel %vm8351_vm12, %v8548_v53, %v8544_v10  ;;  %6709 = vmatpush1.bf16.msra.mxu1 %v11287_v32 }
 0x816   : > { %1623 = vrot.lane.b32.xlu0 %v1621_v29, %s12335_s18  ;;  %v11623_v48 = vpop.eup %11622  ;;  %v8554_v18 = vsel %vm8358_vm11, %v8553_v58, %v8549_v59  ;;  %v11290_v29 = vld [vmem:[%s15131_s13 + $0x50] ss:$8 sps:$4 sm:$0xff]   ;;  %6710 = vmatprep.subr.bf16.mxu1 %v11292_v61  ;;  %v11293_v59 = vld [vmem:[%s15131_s13 + $0x40] ss:$8 sps:$4 sm:$0xff]  }
 0x817   : > { %v1635_v42 = vpop.permute.xlu1 %1634  ;;  %v8616_v6 = vrot.slane %v8301_v54, %v14614_v26  ;;  %v8621_v1 = vrot.slane %v8302_v52, %v14617_v63  ;;  %v8189_v56 = vpack.c.bf16 %v11623_v48, %v11621_v60  ;;  %v8637_v46 = vsel %vm4102_vm8, %v8554_v18, %v8636_v50  ;;  %v11295_v54 = vld [vmem:[%s15131_s13 + $0x44] ss:$8 sps:$4 sm:$0xff]   ;;  %v11298_v48 = vld [vmem:[%s15131_s13 + $0x34] ss:$8 sps:$4 sm:$0xff]   ;;  %v11326_v61 = vld [vmem:[%s15131_s13 + $0x90] ss:$8 sps:$4 sm:$0xff]  }
 0x818   : > { %v1637_v14 = vadd.f32 %v1635_v42, %v14450_v3  ;;  %v1705_v40 = vpop.permute.xlu0 %1704  ;;  %v11296_v42 = vld [vmem:[%s15131_s13 + $0x30] ss:$8 sps:$4 sm:$0xff]   ;;  %v11301_v18 = vld [vmem:[%s15131_s13 + $0x24] ss:$8 sps:$4 sm:$0xff]  }
 0x819   : > { %v11625_v4 = vpop.eup %11624  ;;  %v8295_v34 = vunpack.c.l.b16 %v8189_v56  ;;  %v8296_v8 = vunpack.c.h.b16 %v8189_v56  ;;  %v8617_v26 = vsel %vm8337_vm14, %v8616_v6, %v8612_v55  ;;  %6711 = vmatpush1.bf16.msra.mxu1 %v11290_v29  ;;  %v11299_v6 = vld [vmem:[%s15131_s13 + $0x20] ss:$8 sps:$4 sm:$0xff]   ;;  %v6191_v56 = vadd.f32 %v14462_v21, %v14633_v49  ;;  %v11310_v21 = vld [vmem:[%s15131_s13 + $0xf4] ss:$8 sps:$4 sm:$0xff]  }
 0x81a   : > { %1671 = vrot.lane.b32.xlu0 %v14592_v16, %s12338_s8  ;;  %v11627_v10 = vpop.eup %11626  ;;  %v1680_v0 = vsub.f32 %v1637_v14, %v14450_v3  ;;  %v8622_v47 = vsel %vm8344_vm15, %v8621_v1, %v8617_v26  ;;  %v1696_v17 = vsub.f32 %v1637_v14, %v1694_v27  ;;  %6712 = vmatprep.subr.bf16.mxu1 %v11295_v54  ;;  %v11304_v1 = vld [vmem:[%s15131_s13 + $0x14] ss:$8 sps:$4 sm:$0xff]   ;;  %v11302_v14 = vld [vmem:[%s15131_s13 + $0x10] ss:$8 sps:$4 sm:$0xff]  }
 0x81b   : > { %v8587_v63 = vrot.slane %v8295_v34, %v14668_v37  ;;  %v8592_v36 = vrot.slane %v8296_v8, %v14671_v22  ;;  %v8193_v19 = vpack.c.bf16 %v11627_v10, %v11625_v4  ;;  %v14788_v30 = vpop.permute.xlu1 %1650  ;;  %v6193_v4 = vadd.f32 %v14473_v7, %v14635_v23  ;;  %v11307_v34 = vld [vmem:[%s15131_s13 + $0x4] ss:$8 sps:$4 sm:$0xff]   ;;  %v11305_v10 = vld [vmem:[%s15131_s13] ss:$8 sps:$4 sm:$0xff]   ;;  %v11308_v23 = vld [vmem:[%s15131_s13 + $0xf0] ss:$8 sps:$4 sm:$0xff]  }
 0x81d   : > { %v14774_v35 = vpop.eup %11628  ;;  %v8303_v51 = vunpack.c.l.b16 %v8193_v19  ;;  %v8304_v16 = vunpack.c.h.b16 %v8193_v19  ;;  %v8588_v55 = vsel %vm8351_vm12, %v8587_v63, %v8583_v20  ;;  %6713 = vmatpush1.bf16.msra.mxu1 %v11293_v59  ;;  %v6234_v8 = vadd.f32 %v14726_v2, %v6193_v4  ;;  %v11334_v4 = vld [vmem:[%s15132_s26 + $0x70] sm:$0xff]  }
 0x81e   : > { %v1681_v12 = vmul.f32 %v14774_v35, %v1680_v0  ;;  %v11631_v28 = vpop.eup %11630  ;;  %v8593_v13 = vsel %vm8358_vm11, %v8592_v36, %v8588_v55  ;;  %6714 = vmatprep.subr.bf16.mxu1 %v11298_v48  ;;  %v11313_v36 = vld [vmem:[%s15131_s13 + $0xe4] ss:$8 sps:$4 sm:$0xff]   ;;  %v11320_v55 = vld [vmem:[%s15131_s13 + $0xb0] ss:$8 sps:$4 sm:$0xff]   ;;  %v15133_v59 = vmov 0.0  }
 0x81f   : > { %v8626_v43 = vrot.slane %v8303_v51, %v14668_v37  ;;  %v8631_v50 = vrot.slane %v8304_v16, %v14671_v22  ;;  %v1701_v24 = vmul.f32 %v11631_v28, %v1696_v17  ;;  %v8638_v25 = vsel %vm4104_vm9, %v8593_v13, %v8637_v46  ;;  %v11316_v17 = vld [vmem:[%s15131_s13 + $0xd4] ss:$8 sps:$4 sm:$0xff]   ;;  %v11314_v16 = vld [vmem:[%s15131_s13 + $0xd0] ss:$8 sps:$4 sm:$0xff]   ;;  %v1665_v28 = vpop.permute.xlu1 %1664  ;;  %v11325_v13 = vld [vmem:[%s15131_s13 + $0xa4] ss:$8 sps:$4 sm:$0xff]  }
 0x820   : > { %v1682_v57 = vmul.f32 %v1681_v12, %v1681_v12  ;;  %v6232_v46 = vadd.f32 %v14722_v11, %v6191_v56  ;;  %v6275_v26 = vadd.f32 %v14572_v62, %v6234_v8  ;;  %v11319_v12 = vld [vmem:[%s15131_s13 + $0xc4] ss:$8 sps:$4 sm:$0xff]   ;;  %11632 = vrcp.f32 %v1665_v28  ;;  %v11332_v56 = vld [vmem:[%s15132_s26 + $0x78] sm:$0xff]  }
 0x821   : > { %v1702_v45 = vmul.f32 %v1701_v24, %v1701_v24  ;;  %v8627_v5 = vsel %vm8351_vm12, %v8626_v43, %v8622_v47  ;;  %6715 = vmatpush1.bf16.msra.mxu1 %v11296_v42  ;;  %v11311_v47 = vld [vmem:[%s15131_s13 + $0xe0] ss:$8 sps:$4 sm:$0xff]   ;;  %10063 = vmatprep.subr.bf16.mxu0 %v11332_v56 }
 0x822   : > { %v1683_v33 = vmul.f32 -0.5, %v1682_v57  ;;  %v8632_v37 = vsel %vm8358_vm11, %v8631_v50, %v8627_v5  ;;  %6716 = vmatprep.subr.bf16.mxu1 %v11301_v18  ;;  %v6273_v0 = vadd.f32 %v14557_v44, %v6232_v46  ;;  %v11328_v5 = vld [vmem:[%s15131_s13 + $0x94] ss:$8 sps:$4 sm:$0xff]   ;;  %v11337_v8 = vld [vmem:[%s15132_s26 + $0x28] sm:$0xff]  }
 0x823   : > { %v1703_v22 = vmul.f32 -0.5, %v1702_v45  ;;  %v14793_v58 = vsel %vm4106_vm10, %v8632_v37, %v8638_v25  ;;  %v1661_v24 = vpop.permute.xlu1 %1660  ;;  %v11335_v46 = vld [vmem:[%s15132_s26 + $0x30] sm:$0xff]  }
 0x824   : > { %v1684_v53 = vsub.f32 %v1683_v33, %v14788_v30 }
 0x825   : > { %v1707_v60 = vsub.f32 %v1703_v22, %v1705_v40  ;;  %6717 = vmatpush1.bf16.msra.mxu1 %v11299_v6 }
 0x826   : > { %v9408_v20 = vadd.f32 -0.9189385, %v1684_v53  ;;  %6718 = vmatprep.subr.bf16.mxu1 %v11304_v1  ;;  %v11331_v53 = vld [vmem:[%s15131_s13 + $0x84] ss:$8 sps:$4 sm:$0xff]  }
 0x827   : > { %v9409_v52 = vadd.f32 -0.9189385, %v1707_v60  ;;  %v11329_v60 = vld [vmem:[%s15131_s13 + $0x80] ss:$8 sps:$4 sm:$0xff]  }
 0x828   : > { %1687 = vrot.lane.b32.xlu1 %v9408_v20, %s12339_s23 }
 0x829   : > { %1710 = vrot.lane.b32.xlu0 %v9409_v52, %s12339_s23  ;;  %6719 = vmatpush1.bf16.msra.mxu1 %v11302_v14  ;;  %v11333_v14 = vld [vmem:[%s15132_s26 + $0x38] sm:$0xff]  }
 0x82a   : > { %6720 = vmatprep.subr.bf16.mxu1 %v11307_v34  ;;  %v11336_v34 = vld [vmem:[%s15132_s26 + $0x68] sm:$0xff]  }
 0x82d   : > { %6721 = vmatpush1.bf16.msra.mxu1 %v11305_v10  ;;  %v11633_v25 = vpop.eup %11632  ;;  %v11338_v10 = vld [vmem:[%s15132_s26 + $0x60] sm:$0xff]  }
 0x82e   : > { %6722 = vmatprep.subr.bf16.mxu1 %v11310_v21  ;;  %v11340_v21 = vld [vmem:[%s15132_s26 + $0x58] sm:$0xff]  }
 0x831   : > { %6723 = vmatpush2.bf16.msra.mxu1 %v11308_v23 }
 0x832   : > { %6724 = vmatprep.subr.bf16.mxu1 %v11313_v36  ;;  %v9914_v36 = vld [vmem:[#allocation16] ss:$0 sm:$0xff] }
 0x835   : > { %6725 = vmatpush2.bf16.msra.mxu1 %v11311_v47 }
 0x836   : > { %6726 = vmatprep.subr.bf16.mxu1 %v11316_v17 }
 0x839   : > { %6727 = vmatpush2.bf16.msra.mxu1 %v11314_v16 }
 0x83a   : > { %v6313_v49 = vpop.f32.mrf.mxu1  ;;  %6728 = vmatprep.subr.bf16.mxu1 %v11319_v12  ;;  %v11344_v12 = vld [vmem:[%s15132_s26 + $0x48] sm:$0xff]  }
 0x83b   : > { %v6314_v63 = vadd.f32 %v6313_v49, %v6273_v0  ;;  %v11339_v0 = vld [vmem:[%s15132_s26 + $0x20] sm:$0xff]   ;;  %v11341_v49 = vld [vmem:[%s15132_s26 + $0x18] sm:$0xff]  }
 0x83c   : > { %v6315_v7 = vpop.f32.mrf.mxu1 }
 0x83d   : > { %v6316_v11 = vadd.f32 %v6315_v7, %v6275_v26  ;;  %v6320_v2 = vmax.f32 %v6314_v63, 0.0  ;;  %6729 = vmatpush2.bf16.msra.mxu1 %v11317_v38  ;;  %v11342_v26 = vld [vmem:[%s15132_s26 + $0x50] sm:$0xff]   ;;  %v9636_v7 = vld [vmem:[#allocation10] ss:$0 sm:$0xff] }
 0x83e   : > { %v6317_v19 = vpop.f32.mrf.mxu1  ;;  %6730 = vmatprep.subr.bf16.mxu1 %v11322_v31  ;;  %v11343_v63 = vld [vmem:[%s15132_s26 + $0x10] sm:$0xff]   ;;  %v11346_v38 = vld [vmem:[%s15132_s26 + $0x40] sm:$0xff]  }
 0x83f   : > { %v6321_v44 = vmax.f32 %v6316_v11, 0.0  ;;  %v6322_v51 = vpack.c.bf16 %v6320_v2, %v6320_v2  ;;  %v4374_v11 = vadd.f32 %v9636_v7, %v14398_v41  ;;  %v11345_v41 = vld [vmem:[%s15132_s26 + $0x8] sm:$0xff]   ;;  %v11347_v31 = vld [vmem:[%s15132_s26] sm:$0xff]  }
 0x840   : > { %v6318_v27 = vpop.f32.mrf.mxu1 }
 0x841   : > { %v6323_v62 = vpack.c.bf16 %v6321_v44, %v6321_v44  ;;  %6731 = vmatpush2.bf16.msra.mxu1 %v11320_v55  ;;  %v4379_v47 = vmax.f32 %v4374_v11, 0.0  ;;  %v6534_v55 = vld [vmem:[#allocation18] sm:$0x3] }
 0x842   : > { %6732 = vmatprep.subr.bf16.mxu1 %v11325_v13  ;;  %v6539_v28 = vrot.slane %v6534_v55, %v13654_v39  ;;  %v11350_v39 = vld [vmem:[#allocation21 + $0x8] sm:$0xff]  }
 0x843   : > { %6491 = vmatprep.mubr.bf16.mxu0 %v6323_v62  ;;  %v6500_v16 = vpack.c.bf16 %v4379_v47, %v4379_v47 }
 0x844   : > { %6492 = vmatmul.mubr.bf16.vlgmr.msra.gmra.mxu0 %v6322_v51 }
 0x845   : > { %6733 = vmatpush2.bf16.msra.mxu1 %v11323_v15  ;;  %10064 = vmatpush3.bf16.msra.mxu0 %v11333_v14  ;;  %v6543_v15 = vrot.slane %v6534_v55, %v15123_v9  ;;  %v11351_v9 = vld [vmem:[#allocation21] sm:$0xff]  }
 0x846   : > { %6734 = vmatprep.subr.bf16.mxu1 %v11328_v5  ;;  %10065 = vmatprep.subr.bf16.mxu0 %v11334_v4  ;;  %v11363_v55 = vld [vmem:[%s15136_s4 + $0x10] sm:$0xff]  }
 0x849   : > { %6735 = vmatpush2.bf16.msra.mxu1 %v11326_v61  ;;  %10066 = vmatpush3.bf16.msra.mxu0 %v11335_v46  ;;  %v11348_v61 = vld [vmem:[#allocation21 + $0x18] sm:$0xff]  }
 0x84a   : > { %6736 = vmatprep.subr.bf16.mxu1 %v11331_v53  ;;  %10067 = vmatprep.subr.bf16.mxu0 %v11336_v34  ;;  %v11352_v53 = vld [vmem:[%s15134_s28 + $0x28] sm:$0xff]  }
 0x84d   : > { %6737 = vmatpush2.bf16.msra.mxu1 %v11329_v60  ;;  %10068 = vmatpush3.bf16.msra.mxu0 %v11337_v8  ;;  %v11355_v60 = vld [vmem:[%s15135_s11 + $0x10] sm:$0xff]  }
 0x84e   : > { %10191 = vmatprep.subr.bf16.mxu1 %v15133_v59  ;;  %10069 = vmatprep.subr.bf16.mxu0 %v11338_v10  ;;  %v11357_v10 = vld [vmem:[%s15135_s11] sm:$0xff]  }
 0x851   : > { %10070 = vmatpush3.bf16.msra.mxu0 %v11339_v0  ;;  %v11358_v0 = vld [vmem:[#allocation25 + $0x18] sm:$0xff]  }
 0x852   : > { %10071 = vmatprep.subr.bf16.mxu0 %v11340_v21  ;;  %v9980_v21 = vld [vmem:[#allocation22] ss:$0 sm:$0xff] }
 0x855   : > { %10072 = vmatpush3.bf16.msra.mxu0 %v11341_v49  ;;  %v11359_v49 = vld [vmem:[#allocation25 + $0x10] sm:$0xff]  }
 0x856   : > { %10073 = vmatprep.subr.bf16.mxu0 %v11342_v26 }
 0x859   : > { %10074 = vmatpush3.bf16.msra.mxu0 %v11343_v63 }
 0x85a   : > { %10075 = vmatprep.subr.bf16.mxu0 %v11344_v12 }
 0x85d   : > { %10076 = vmatpush3.bf16.msra.mxu0 %v11345_v41  ;;  %v11360_v41 = vld [vmem:[#allocation25 + $0x8] sm:$0xff]  }
 0x85e   : > { %10077 = vmatprep.subr.bf16.mxu0 %v11346_v38  ;;  %v11361_v38 = vld [vmem:[#allocation25] sm:$0xff]  }
 0x861   : > { %10078 = vmatpush3.bf16.msra.mxu0 %v11347_v31  ;;  %v11362_v31 = vld [vmem:[%s15136_s4 + $0x18] sm:$0xff]  }
 0x862   : > { %10179 = vmatprep.subr.bf16.mxu0 %v15133_v59 }
 0x888   : > { %v1624_v43 = vpop.permute.xlu0 %1623 }
 0x889   : > { %v1626_v50 = vadd.f32 %v1624_v43, %v14450_v3 }
 0x88b   : > { %v1638_v57 = vsub.f32 %v1626_v50, %v14450_v3  ;;  %v1663_v32 = vsub.f32 %v1626_v50, %v1661_v24 }
 0x88c   : > { %v1672_v20 = vpop.permute.xlu0 %1671 }
 0x88d   : > { %v1644_v45 = vmul.f32 %v14774_v35, %v1638_v57  ;;  %v1668_v33 = vmul.f32 %v11633_v25, %v1663_v32 }
 0x88f   : > { %v1645_v37 = vmul.f32 %v1644_v45, %v1644_v45  ;;  %v1669_v22 = vmul.f32 %v1668_v33, %v1668_v33 }
 0x891   : > { %v1646_v40 = vmul.f32 -0.5, %v1645_v37  ;;  %v1670_v29 = vmul.f32 -0.5, %v1669_v22  ;;  %v11349_v37 = vld [vmem:[#allocation21 + $0x10] sm:$0xff]   ;;  %v8640_v22 = vpack.c.b16 %v14793_v58, %v14793_v58  ;;  %v11356_v58 = vld [vmem:[%s15135_s11 + $0x8] sm:$0xff]  }
 0x893   : > { %v1674_v54 = vsub.f32 %v1670_v29, %v1672_v20  ;;  %v1653_v3 = vsub.f32 %v1646_v40, %v14788_v30  ;;  %v11353_v40 = vld [vmem:[%s15135_s11 + $0x20] sm:$0xff]   ;;  %v11354_v29 = vld [vmem:[%s15135_s11 + $0x18] sm:$0xff]  }
 0x895   : > { %v9407_v35 = vadd.f32 -0.9189385, %v1674_v54  ;;  %v9406_v52 = vadd.f32 -0.9189385, %v1653_v3 }
 0x897   : > { %v1656_v48 = vsel %vm1655_vm4, %v9406_v52, 0.0  ;;  %v1676_v42 = vsel %vm1655_vm4, %v9407_v35, 0.0 }
 0x898   : > { %1657 = vadd.xlane.f32.xlu1 %v1656_v48  ;;  %1677 = vadd.xlane.f32.xlu0 %v1676_v42 }
 0x89a   : > { %v1688_v18 = vpop.permute.xlu1 %1687 }
 0x89b   : > { %v1690_v30 = vsel %vm1655_vm4, %v1688_v18, 0.0  ;;  %v1711_v6 = vpop.permute.xlu0 %1710 }
 0x89c   : > { %1691 = vadd.xlane.f32.xlu0 %v1690_v30  ;;  %v1713_v1 = vsel %vm1655_vm4, %v1711_v6, 0.0 }
 0x89d   : > { %1714 = vadd.xlane.f32.xlu1 %v1713_v1 }
 0x904   : > { %v10057_v23 = vpop.f32.mrf.mxu0 }
 0x906   : > { %v10058_v2 = vpop.f32.mrf.mxu0 }
 0x907   : > { %v10059_v19 = vadd.f32 %v10058_v2, %v10057_v23 }
 0x908   : > { %v10060_v44 = vpop.f32.mrf.mxu0 }
 0x909   : > { %v6494_v27 = vadd.f32 %v10059_v19, %v9914_v36  ;;  %v9963_v44 = vld [vmem:[#allocation19] ss:$0 sm:$0xff] }
 0x90a   : > { %v10061_v62 = vpop.f32.mrf.mxu0 }
 0x90b   : > { %v6499_v17 = vmax.f32 %v6494_v27, 0.0 }
 0x90d   : > { %v6501_v51 = vpack.c.bf16 %v6499_v17, %v6499_v17 }
 0x90f   : > { %6738 = vmatprep.mubr.bf16.mxu1 %v6501_v51 }
 0x910   : > { %6739 = vmatmul.mubr.bf16.vlgmr.msra.gmra.mxu1 %v6500_v16 }
 0x911   : > { %10203 = vmatprep.mubr.msk.bf16.mxu1 %vm12329_vm0, %v15133_v59  ;;  %10192 = vmatpush3.bf16.msra.mxu1 %v11352_v53 }
 0x912   : > { %10193 = vmatprep.subr.bf16.mxu1 %v15133_v59 }
 0x915   : > { %10194 = vmatpush3.bf16.msra.mxu1 %v11353_v40  ;;  %v10000_v40 = vld [vmem:[#allocation28] ss:$0 sm:$0xff] }
 0x916   : > { %10195 = vmatprep.subr.bf16.mxu1 %v15133_v59 }
 0x919   : > { %10196 = vmatpush3.bf16.msra.mxu1 %v11354_v29 }
 0x91a   : > { %10197 = vmatprep.subr.bf16.mxu1 %v15133_v59 }
 0x91d   : > { %10198 = vmatpush3.bf16.msra.mxu1 %v11355_v60 }
 0x91e   : > { %10199 = vmatprep.subr.bf16.mxu1 %v15133_v59 }
 0x921   : > { %10200 = vmatpush3.bf16.msra.mxu1 %v11356_v58  ;;  %v1678_v20 = vpop.xlane.xlu0 %1677  ;;  %v1658_v54 = vpop.xlane.xlu1 %1657 }
 0x922   : > { %10201 = vmatprep.subr.bf16.mxu1 %v15133_v59  ;;  %v1679_v48 = vsub.f32 %v1658_v54, %v1678_v20 }
 0x925   : > { %v1692_v35 = vpop.xlane.xlu0 %1691  ;;  %10202 = vmatpush3.bf16.msra.mxu1 %v11357_v10 }
 0x926   : > { %v1715_v3 = vpop.xlane.xlu1 %1714  ;;  %10219 = vmatprep.subr.bf16.mxu1 %v15133_v59 }
 0x927   : > { %v1716_v52 = vsub.f32 %v1692_v35, %v1715_v3 }
 0x929   : > { %v1717_v42 = vadd.f32 %v1716_v52, %v1679_v48 }
 0x92b   : > { %v1718_v18 = vmul.f32 0.5, %v1717_v42 }
 0x92d   : > { %v1719_v30 = vsub.f32 0.0, %v1718_v18 }
 0x92f   : > { %v1720_v6 = vmul.f32 1.442695, %v1719_v30 }
 0x931   : > { %11634 = vpow2.f32 %v1720_v6 }
 0x93e   : > { %v11635_v1 = vpop.eup %11634 }
 0x93f   : > { %v1722_v4 = vadd.f32 1.0, %v11635_v1 }
 0x941   : > { %11636 = vrcp.f32 %v1722_v4 }
 0x94e   : > { %v11637_v11 = vpop.eup %11636 }
 0x94f   : > { %v8709_v62 = vsub.f32 1.0, %v11637_v11 }
 0x9d0   : > { %v6740_v13 = vpop.f32.mrf.mxu1 }
 0x9d1   : > { %v6741_v43 = vadd.f32 %v6740_v13, %v6539_v28  ;;  %v9986_v28 = vld [vmem:[#allocation24] ss:$0 sm:$0xff] }
 0x9d2   : > { %v6742_v50 = vpop.f32.mrf.mxu1 }
 0x9d3   : > { %v6743_v24 = vadd.f32 %v6742_v50, %v6543_v15  ;;  %v6747_v57 = vmax.f32 %v6741_v43, 0.0 }
 0x9d4   : > { %v6744_v32 = vpop.f32.mrf.mxu1 }
 0x9d5   : > { %v6748_v25 = vmax.f32 %v6743_v24, 0.0  ;;  %v6749_v5 = vpack.c.bf16 %v6747_v57, %v6747_v57 }
 0x9d6   : > { %v6745_v45 = vpop.f32.mrf.mxu1 }
 0x9d7   : > { %v6750_v33 = vpack.c.bf16 %v6748_v25, %v6748_v25  ;;  %v11364_v25 = vld [vmem:[%s15136_s4 + $0x8] sm:$0xff]   ;;  %v11365_v45 = vld [vmem:[%s15136_s4] sm:$0xff]  }
 0x9d9   : > { %6918 = vmatprep.mubr.bf16.mxu0 %v6750_v33  ;;  %v9994_v33 = vld [vmem:[#allocation27] ss:$0 sm:$0xff] }
 0x9da   : > { %6919 = vmatmul.mubr.bf16.vlgmr.msra.gmra.mxu0 %v6749_v5 }
 0x9db   : > { %10180 = vmatpush3.bf16.msra.mxu0 %v11348_v61  ;;  %10187 = vmatprep.mubr.msk.bf16.mxu0 %vm12329_vm0, %v15133_v59 }
 0x9dc   : > { %10181 = vmatprep.subr.bf16.mxu0 %v15133_v59 }
 0x9df   : > { %10182 = vmatpush3.bf16.msra.mxu0 %v11349_v37 }
 0x9e0   : > { %10183 = vmatprep.subr.bf16.mxu0 %v15133_v59 }
 0x9e3   : > { %10184 = vmatpush3.bf16.msra.mxu0 %v11350_v39 }
 0x9e4   : > { %10185 = vmatprep.subr.bf16.mxu0 %v15133_v59 }
 0x9e7   : > { %10186 = vmatpush3.bf16.msra.mxu0 %v11351_v9 }
 0x9e8   : > { %10207 = vmatprep.subr.bf16.mxu0 %v15133_v59 }
 0x9ea   : > { %10188 = vmatmul.mubr.msk.bf16.vlgmr.msra.gmra.mxu0 %vm1374_vm1, %v8640_v22 }
 0x9eb   : > { %10215 = vmatprep.mubr.msk.bf16.mxu0 %vm12329_vm0, %v15133_v59  ;;  %10208 = vmatpush3.bf16.msra.mxu0 %v11358_v0 }
 0x9ec   : > { %10209 = vmatprep.subr.bf16.mxu0 %v15133_v59 }
 0x9ef   : > { %10210 = vmatpush3.bf16.msra.mxu0 %v11359_v49 }
 0x9f0   : > { %10211 = vmatprep.subr.bf16.mxu0 %v15133_v59 }
 0x9f3   : > { %10212 = vmatpush3.bf16.msra.mxu0 %v11360_v41 }
 0x9f4   : > { %10213 = vmatprep.subr.bf16.mxu0 %v15133_v59 }
 0x9f7   : > { %10214 = vmatpush3.bf16.msra.mxu0 %v11361_v38 }
 0xa9a   : > { %v10079_v56 = vpop.f32.mrf.mxu0 }
 0xa9c   : > { %v10080_v14 = vpop.f32.mrf.mxu0 }
 0xa9d   : > { %v10081_v46 = vadd.f32 %v10080_v14, %v10079_v56 }
 0xa9e   : > { %v10082_v34 = vpop.f32.mrf.mxu0 }
 0xa9f   : > { %v6921_v27 = vadd.f32 %v10081_v46, %v9963_v44 }
 0xaa0   : > { %v10083_v8 = vpop.f32.mrf.mxu0 }
 0xaa1   : > { %v6926_v47 = vmax.f32 %v6921_v27, 0.0 }
 0xaa3   : > { %v8710_v17 = vmul.f32 %v8709_v62, %v6926_v47 }
 0xaaa   : > { %v8702_v26 = vpop.f32.mrf.mxu0 }
 0xaab   : > { %v8703_v63 = vadd.f32 %v9980_v21, %v8702_v26 }
 0xaac   : > { %v10189_v7 = vpop.f32.mrf.mxu0 }
 0xaad   : > { %v8708_v23 = vmax.f32 %v8703_v63, 0.0 }
 0xaae   : > { %v8705_v36 = vpop.f32.mrf.mxu0 }
 0xaaf   : > { %v8711_v2 = vmul.f32 %v11637_v11, %v8708_v23 }
 0xab0   : > { %v10190_v19 = vpop.f32.mrf.mxu0 }
 0xab1   : > { %8713 = vrot.lane.b32.xlu0 %v8711_v2, %s12332_s9  ;;  %s15139_s9 = sld [smem:[#allocation69_spill]] }
 0xab7   : > { %s1366_s0 = scalar_lea.vmem %s15139_s9, %s14241_s7 }
 0xb23   : > { %v8714_v51 = vpop.permute.xlu0 %8713 }
 0xb24   : > { %v8716_v16 = vsel %vm15137_vm5, %v8710_v17, %v8714_v51 }
 0xb25   : > { %v8717_v12 = vpack.c.bf16 %v8716_v16, %v8716_v16 }
 0xb27   : > { %10204 = vmatmul.mubr.msk.bf16.vlgmr.msra.gmra.mxu1 %vm15138_vm6, %v8717_v12 }
 0xb28   : > { %10227 = vmatprep.mubr.msk.bf16.mxu1 %vm12329_vm0, %v15133_v59  ;;  %10220 = vmatpush3.bf16.msra.mxu1 %v11362_v31 }
 0xb29   : > { %10221 = vmatprep.subr.bf16.mxu1 %v15133_v59 }
 0xb2c   : > { %10222 = vmatpush3.bf16.msra.mxu1 %v11363_v55 }
 0xb2d   : > { %10223 = vmatprep.subr.bf16.mxu1 %v15133_v59 }
 0xb30   : > { %10224 = vmatpush3.bf16.msra.mxu1 %v11364_v25 }
 0xb31   : > { %10225 = vmatprep.subr.bf16.mxu1 %v15133_v59 }
 0xb34   : > { %10226 = vmatpush3.bf16.msra.mxu1 %v11365_v45 }
 0xbe7   : > { %v8810_v15 = vpop.f32.mrf.mxu1 }
 0xbe8   : > { %v8811_v13 = vadd.f32 %v9986_v28, %v8810_v15 }
 0xbe9   : > { %v10205_v43 = vpop.f32.mrf.mxu1 }
 0xbea   : > { %v8816_v50 = vmax.f32 %v8811_v13, 0.0 }
 0xbeb   : > { %v8813_v24 = vpop.f32.mrf.mxu1 }
 0xbec   : > { %v8817_v57 = vpack.c.bf16 %v8816_v50, %v8816_v50 }
 0xbed   : > { %v10206_v32 = vpop.f32.mrf.mxu1 }
 0xbee   : > { %10216 = vmatmul.mubr.msk.bf16.vlgmr.msra.gmra.mxu0 %vm1374_vm1, %v8817_v57 }
 0xcae   : > { %v8894_v61 = vpop.f32.mrf.mxu0 }
 0xcaf   : > { %v8895_v5 = vadd.f32 %v9994_v33, %v8894_v61 }
 0xcb0   : > { %v10217_v37 = vpop.f32.mrf.mxu0 }
 0xcb1   : > { %v8900_v39 = vmax.f32 %v8895_v5, 0.0 }
 0xcb2   : > { %v8897_v9 = vpop.f32.mrf.mxu0 }
 0xcb3   : > { %v8901_v22 = vpack.c.bf16 %v8900_v39, %v8900_v39 }
 0xcb4   : > { %v10218_v53 = vpop.f32.mrf.mxu0 }
 0xcb5   : > { %10228 = vmatmul.mubr.msk.bf16.vlgmr.msra.gmra.mxu1 %vm1374_vm1, %v8901_v22 }
 0xd75   : > { %v8978_v29 = vpop.f32.mrf.mxu1 }
 0xd76   : > { %v8979_v60 = vadd.f32 %v10000_v40, %v8978_v29 }
 0xd77   : > { %v10229_v58 = vpop.f32.mrf.mxu1 }
 0xd78   : > { %8984 = vst.msk [vmem:[%s1366_s0] sm:$0xff] %vm1655_vm4, %v8979_v60 }
 0xd79   : > { %v8981_v20 = vpop.f32.mrf.mxu1 }
 0xd7b   : > { %v10230_v59 = vpop.f32.mrf.mxu1 }
 0xd7c PF: > { %p87_p9 = scmp.ge.s32.totalorder %s12684_s22, 4   ;;  %s15140_s28 = smov %s12261_s1 }
 0xd7d   : > { %s15141_s1 = smov %s12265_s2  ;;  %s15142_s2 = smov %s12695_s5 }
 0xd7e   : > { %s15143_s0 = smov %s12684_s22  ;;  %89 = sbr.rel (!%p87_p9) target bundleno = 78 (0x4e), region = 321 }
 0xd83   :  { %9004 = vsyncpa [#allocation3], 1 }
 0xd84   :  { %9006 = vsyncpa [#allocation3 + $0x1], 1 }
 0xd85   :  { %9007 = vsyncpa [#allocation5], 1 }
 0xd86   :  { %9009 = vsyncpa [#allocation5 + $0x1], 1 }
 0xd87   :  { %9010 = vsyncpa [#allocation8], 1 }
 0xd88   :  { %9011 = vsyncpa [#allocation11], 1 }
 0xd89   :  { %9012 = vsyncpa [#allocation14], 1 }
 0xd8a   :  { %9013 = vsyncpa [#allocation17], 1 }
 0xd8b   :  { %9014 = vsyncpa [#allocation20], 1 }
 0xd8c   :  { %9015 = vsyncpa [#allocation23], 1 }
 0xd8d   :  { %9016 = vsyncpa [#allocation26], 1 }
 0xd8e   :  { %9017 = vsyncpa [#allocation29], 1 }
 0xd8f   :  { %9018 = vsyncpa [#allocation32], 1 }

</bundles_post_ra>
